<compile_context>
chip_gen: v7x
topology: tpu7x:2x2x1
jax: 0.10.0
libtpu: 0.0.40
codegen_flags: <defaults>
</compile_context>

<pallas_src>
import functools

import jax
import jax.numpy as jnp
from jax.experimental import pallas as pl
from jax.experimental.pallas import tpu as pltpu


def _round_up(x, m):
    return ((x + m - 1) // m) * m


def _pick_tile(nc):
    for t in (512, 256, 128):
        if nc % t == 0:
            return t
    return 128


def _sub_loss_kernel(f1_ref, f2p_ref, f2n_ref, mp_ref, mn_ref,
                     loss_ref, pair_ref, lacc, pacc):
    """Grid = (call=4, row_tiles, pos_tiles, neg_tiles).

    f1_ref  : (1, TM, D)   rows of the "selected" features
    f2p_ref : (1, D, TP)   pre-transposed column features (positive tile)
    f2n_ref : (1, D, TN)   pre-transposed column features (negative tile)
    mp_ref  : (1, TM, TP)  mask * sel[:,None]         (positives, row-gated)
    mn_ref  : (1, TM, TN)  (1-mask) * sel[:,None]     (negatives, row-gated)
    loss_ref/pair_ref : (1, 1, 8, 128) per-(call,row_tile) partial outputs
    lacc/pacc : (1, 1) f32 VMEM scalar accumulators (persist over pos/neg axes)
    """
    p_idx = pl.program_id(2)
    n_idx = pl.program_id(3)

    @pl.when((p_idx == 0) & (n_idx == 0))
    def _():
        lacc[...] = jnp.zeros_like(lacc)
        pacc[...] = jnp.zeros_like(pacc)

    f1 = f1_ref[0]          # (TM, D)
    f2p = f2p_ref[0]        # (D, TP)
    f2n = f2n_ref[0]        # (D, TN)
    mp = mp_ref[0]          # (TM, TP)
    mn = mn_ref[0]          # (TM, TN)

    # Similarities on the MXU (standard (M,K)x(K,N) dots, f32 accumulate).
    sim_p = jnp.dot(f1, f2p, preferred_element_type=jnp.float32)   # (TM, TP)
    sim_n = jnp.dot(f1, f2n, preferred_element_type=jnp.float32)   # (TM, TN)

    # d[i,p,n] = sim[i,n] - sim[i,p];  -logsigmoid(sim_p - sim_n) = softplus(d)
    d = sim_n[:, None, :] - sim_p[:, :, None]                      # (TM, TP, TN)
    sp = jnp.maximum(d, 0.0) + jnp.log1p(jnp.exp(-jnp.abs(d)))     # stable softplus

    # Weighted double reduction without materializing a second full weight cube.
    t = jnp.sum(sp * mn[:, None, :], axis=-1)                      # (TM, TP)
    loss_part = jnp.sum(t * mp)

    rowp = jnp.sum(mp, axis=1, keepdims=True)                      # (TM, 1)
    rown = jnp.sum(mn, axis=1, keepdims=True)                      # (TM, 1)
    pair_part = jnp.sum(rowp * rown)

    lacc[...] = lacc[...] + loss_part
    pacc[...] = pacc[...] + pair_part

    @pl.when((p_idx == pl.num_programs(2) - 1) &
             (n_idx == pl.num_programs(3) - 1))
    def _():
        loss_ref[...] = jnp.full(loss_ref.shape, lacc[0, 0], jnp.float32)
        pair_ref[...] = jnp.full(pair_ref.shape, pacc[0, 0], jnp.float32)


@functools.partial(jax.jit, static_argnames=("sim_type",))
def sub_independent_loss(features1, features2, mask_cross, mask1, mask2,
                         mask_sents1, mask_sents2, sim_type="dot"):
    f32 = jnp.float32
    f1 = features1.astype(f32)
    f2 = features2.astype(f32)
    if sim_type == "cos":
        f1 = f1 / jnp.linalg.norm(f1, axis=-1, keepdims=True)
        f2 = f2 / jnp.linalg.norm(f2, axis=-1, keepdims=True)

    N1, D = f1.shape
    N2 = f2.shape[0]
    max_n = max(N1, N2)

    TM = 8                                  # row tile (sublane-aligned)
    NR = _round_up(max_n, TM)               # padded row count
    NC = _round_up(max_n, 128)              # padded column count (lane-aligned)
    TP = TN = _pick_tile(NC)                # pos / neg tiles (cube slab bounded)

    sel1 = mask_sents1.astype(f32)
    sel2 = mask_sents2.astype(f32)
    mc = mask_cross.astype(f32)
    m1 = mask1.astype(f32)
    m2 = mask2.astype(f32)

    def pad2(x, r, c):
        return jnp.pad(x, ((0, r - x.shape[0]), (0, c - x.shape[1])))

    # Stack the four (rows, cols) feature pairs: (f1,f2), (f2,f1), (f1,f1), (f2,f2)
    f1_rows = jnp.stack([pad2(f1, NR, D), pad2(f2, NR, D),
                         pad2(f1, NR, D), pad2(f2, NR, D)])            # (4, NR, D)
    f2_cols = jnp.stack([pad2(f2, NC, D).T, pad2(f1, NC, D).T,
                         pad2(f1, NC, D).T, pad2(f2, NC, D).T])        # (4, D, NC)

    def gated(mask, sel):
        return mask * sel[:, None], (1.0 - mask) * sel[:, None]

    mp1, mn1 = gated(mc, sel1)
    mp2, mn2 = gated(mc.T, sel2)
    mp3, mn3 = gated(m1, sel1)
    mp4, mn4 = gated(m2, sel2)
    mp = jnp.stack([pad2(x, NR, NC) for x in (mp1, mp2, mp3, mp4)])    # (4, NR, NC)
    mn = jnp.stack([pad2(x, NR, NC) for x in (mn1, mn2, mn3, mn4)])    # (4, NR, NC)

    R = NR // TM
    P = NC // TP
    Nn = NC // TN
    grid = (4, R, P, Nn)

    cube = 4 * NR * NC * NC
    cost = pl.CostEstimate(
        flops=2 * 4 * NR * NC * D * (P + Nn) + 6 * cube,
        transcendentals=2 * cube,
        bytes_accessed=4 * (f1_rows.size + 2 * f2_cols.size + mp.size + mn.size
                            + 2 * 4 * R * 8 * 128),
    )

    loss_parts, pair_parts = pl.pallas_call(
        _sub_loss_kernel,
        out_shape=(
            jax.ShapeDtypeStruct((4, R, 8, 128), f32),
            jax.ShapeDtypeStruct((4, R, 8, 128), f32),
        ),
        grid_spec=pltpu.PrefetchScalarGridSpec(
            num_scalar_prefetch=0,
            grid=grid,
            in_specs=[
                pl.BlockSpec((1, TM, D), lambda c, r, p, n: (c, r, 0)),
                pl.BlockSpec((1, D, TP), lambda c, r, p, n: (c, 0, p)),
                pl.BlockSpec((1, D, TN), lambda c, r, p, n: (c, 0, n)),
                pl.BlockSpec((1, TM, TP), lambda c, r, p, n: (c, r, p)),
                pl.BlockSpec((1, TM, TN), lambda c, r, p, n: (c, r, n)),
            ],
            out_specs=(
                pl.BlockSpec((1, 1, 8, 128), lambda c, r, p, n: (c, r, 0, 0)),
                pl.BlockSpec((1, 1, 8, 128), lambda c, r, p, n: (c, r, 0, 0)),
            ),
            scratch_shapes=[
                pltpu.VMEM((1, 1), f32),
                pltpu.VMEM((1, 1), f32),
            ],
        ),
        compiler_params=pltpu.CompilerParams(
            dimension_semantics=("parallel", "parallel", "arbitrary", "arbitrary"),
            vmem_limit_bytes=32 * 1024 * 1024,
        ),
        cost_estimate=cost,
    )(f1_rows, f2_cols, f2_cols, mp, mn)

    loss = jnp.sum(loss_parts[:, :, 0, 0])
    pair = jnp.sum(pair_parts[:, :, 0, 0])
    denom = jnp.where(pair > 0, pair, 1.0)     # safe divide: no inf/NaN if pair==0
    return jnp.where(pair > 0, loss / denom, loss)


# ---------------- pure-JAX reference (same gated-row math as PyTorch) ----------
def _ref_compute(f1, f2, mask, sel):
    sim = f1 @ f2.T
    s = sel.astype(jnp.float32)[:, None]
    mp = mask * s
    mn = (1.0 - mask) * s
    d = sim[:, None, :] - sim[:, :, None]
    sp = jnp.maximum(d, 0.0) + jnp.log1p(jnp.exp(-jnp.abs(d)))
    loss = jnp.sum(mp[:, :, None] * mn[:, None, :] * sp)
    pair = jnp.sum(jnp.sum(mp, 1) * jnp.sum(mn, 1))
    return loss, pair


def _ref_forward(f1, f2, mc, m1, m2, ms1, ms2):
    l1, p1 = _ref_compute(f1, f2, mc, ms1)
    l2, p2 = _ref_compute(f2, f1, mc.T, ms2)
    l3, p3 = _ref_compute(f1, f1, m1, ms1)
    l4, p4 = _ref_compute(f2, f2, m2, ms2)
    loss = l1 + l2 + l3 + l4
    pair = p1 + p2 + p3 + p4
    return jnp.where(pair > 0, loss / jnp.where(pair > 0, pair, 1.0), loss)


if __name__ == "__main__":
    key = jax.random.PRNGKey(0)
    k1, k2, k3, k4, k5 = jax.random.split(key, 5)

    N1, N2, D = 6, 8, 32
    features1 = jax.random.normal(k1, (N1, D), dtype=jnp.float32)
    features2 = jax.random.normal(k2, (N2, D), dtype=jnp.float32)

    mask_cross = (jax.random.uniform(k3, (N1, N2)) > 0.5).astype(jnp.float32)
    mask1 = (jax.random.uniform(k4, (N1, N1)) > 0.5).astype(jnp.float32)
    mask2 = (jax.random.uniform(k5, (N2, N2)) > 0.5).astype(jnp.float32)

    mask_sents1 = jnp.array([True, True, False, True, False, True])
    mask_sents2 = jnp.array([True, False, True, True, True, False, True, True])

    loss = sub_independent_loss(
        features1, features2, mask_cross, mask1, mask2, mask_sents1, mask_sents2
    )
    loss = jax.block_until_ready(loss)

    ref = _ref_forward(
        features1, features2, mask_cross, mask1, mask2, mask_sents1, mask_sents2
    )
    assert jnp.isfinite(loss), loss
    assert jnp.allclose(loss, ref, rtol=1e-5, atol=1e-4), (loss, ref)

    print("KERNEL_OK")
</pallas_src>

<mosaic_0001>
module attributes {stable_mosaic.version = 11 : i64} {
  func.func @_sub_loss_kernel(%arg0: i32, %arg1: i32, %arg2: i32, %arg3: i32, %arg4: memref<1x8x32xf32, #tpu.memory_space<vmem>>, %arg5: memref<1x32x128xf32, #tpu.memory_space<vmem>>, %arg6: memref<1x32x128xf32, #tpu.memory_space<vmem>>, %arg7: memref<1x8x128xf32, #tpu.memory_space<vmem>>, %arg8: memref<1x8x128xf32, #tpu.memory_space<vmem>>, %arg9: memref<1x1x8x128xf32, #tpu.memory_space<vmem>>, %arg10: memref<1x1x8x128xf32, #tpu.memory_space<vmem>>, %arg11: memref<1x1xf32, #tpu.memory_space<vmem>>, %arg12: memref<1x1xf32, #tpu.memory_space<vmem>>) attributes {dimension_semantics = [#tpu.dimension_semantics<parallel>, #tpu.dimension_semantics<parallel>, #tpu.dimension_semantics<arbitrary>, #tpu.dimension_semantics<arbitrary>], iteration_bounds = array<i64: 4, 1, 1, 1>, scalar_prefetch = 0 : i64, scratch_operands = 2 : i64, tpu.core_type = #tpu.core_type<tc>, window_params = [{transform_indices = @transform_0, window_bounds = array<i64: 1, 8, 32>}, {transform_indices = @transform_1, window_bounds = array<i64: 1, 32, 128>}, {transform_indices = @transform_2, window_bounds = array<i64: 1, 32, 128>}, {transform_indices = @transform_3, window_bounds = array<i64: 1, 8, 128>}, {transform_indices = @transform_4, window_bounds = array<i64: 1, 8, 128>}, {transform_indices = @transform_5, window_bounds = array<i64: 1, 1, 8, 128>}, {transform_indices = @transform_6, window_bounds = array<i64: 1, 1, 8, 128>}]} {
    %c0_i32 = arith.constant 0 : i32
    %0 = arith.cmpi eq, %arg2, %c0_i32 : i32
    %c0_i32_0 = arith.constant 0 : i32
    %1 = arith.cmpi eq, %arg3, %c0_i32_0 : i32
    %2 = arith.andi %0, %1 : i1
    %3 = arith.extui %2 : i1 to i32
    %c0_i32_1 = arith.constant 0 : i32
    %4 = arith.cmpi ne, %3, %c0_i32_1 : i32
    scf.if %4 {
      %cst_35 = arith.constant 0.000000e+00 : f32
      %61 = vector.broadcast %cst_35 : f32 to vector<1x1xf32>
      %c0_36 = arith.constant 0 : index
      %c0_37 = arith.constant 0 : index
      %62 = vector.load %arg11[%c0_36, %c0_37] : memref<1x1xf32, #tpu.memory_space<vmem>>, vector<1x1xf32>
      tpu.vector_store %arg11[%c0_36, %c0_37], %61 {strides = array<i32>} : memref<1x1xf32, #tpu.memory_space<vmem>>, vector<1x1xf32>,
      %cst_38 = arith.constant 0.000000e+00 : f32
      %63 = vector.broadcast %cst_38 : f32 to vector<1x1xf32>
      %c0_39 = arith.constant 0 : index
      %c0_40 = arith.constant 0 : index
      %64 = vector.load %arg12[%c0_39, %c0_40] : memref<1x1xf32, #tpu.memory_space<vmem>>, vector<1x1xf32>
      tpu.vector_store %arg12[%c0_39, %c0_40], %63 {strides = array<i32>} : memref<1x1xf32, #tpu.memory_space<vmem>>, vector<1x1xf32>,
    } else {
    }
    %c0 = arith.constant 0 : index
    %c0_2 = arith.constant 0 : index
    %c0_3 = arith.constant 0 : index
    %5 = vector.load %arg4[%c0, %c0_2, %c0_3] : memref<1x8x32xf32, #tpu.memory_space<vmem>>, vector<1x8x32xf32>
    %6 = vector.shape_cast %5 : vector<1x8x32xf32> to vector<8x32xf32>
    %c0_4 = arith.constant 0 : index
    %c0_5 = arith.constant 0 : index
    %c0_6 = arith.constant 0 : index
    %7 = vector.load %arg5[%c0_4, %c0_5, %c0_6] : memref<1x32x128xf32, #tpu.memory_space<vmem>>, vector<1x32x128xf32>
    %8 = vector.shape_cast %7 : vector<1x32x128xf32> to vector<32x128xf32>
    %c0_7 = arith.constant 0 : index
    %c0_8 = arith.constant 0 : index
    %c0_9 = arith.constant 0 : index
    %9 = vector.load %arg6[%c0_7, %c0_8, %c0_9] : memref<1x32x128xf32, #tpu.memory_space<vmem>>, vector<1x32x128xf32>
    %10 = vector.shape_cast %9 : vector<1x32x128xf32> to vector<32x128xf32>
    %c0_10 = arith.constant 0 : index
    %c0_11 = arith.constant 0 : index
    %c0_12 = arith.constant 0 : index
    %11 = vector.load %arg7[%c0_10, %c0_11, %c0_12] : memref<1x8x128xf32, #tpu.memory_space<vmem>>, vector<1x8x128xf32>
    %12 = vector.shape_cast %11 : vector<1x8x128xf32> to vector<8x128xf32>
    %c0_13 = arith.constant 0 : index
    %c0_14 = arith.constant 0 : index
    %c0_15 = arith.constant 0 : index
    %13 = vector.load %arg8[%c0_13, %c0_14, %c0_15] : memref<1x8x128xf32, #tpu.memory_space<vmem>>, vector<1x8x128xf32>
    %14 = vector.shape_cast %13 : vector<1x8x128xf32> to vector<8x128xf32>
    %cst = arith.constant dense<0.000000e+00> : vector<8x128xf32>
    %15 = tpu.matmul %6, %8, %cst {dimension_numbers = #tpu.dot_dimension_numbers<[1], [0], [0], [1], [0, 0, 1, 1], [], []>} : vector<8x32xf32>, vector<32x128xf32>, vector<8x128xf32> -> vector<8x128xf32>
    %cst_16 = arith.constant dense<0.000000e+00> : vector<8x128xf32>
    %16 = tpu.matmul %6, %10, %cst_16 {dimension_numbers = #tpu.dot_dimension_numbers<[1], [0], [0], [1], [0, 0, 1, 1], [], []>} : vector<8x32xf32>, vector<32x128xf32>, vector<8x128xf32> -> vector<8x128xf32>
    %17 = vector.shape_cast %16 : vector<8x128xf32> to vector<8x1x128xf32>
    %18 = vector.shape_cast %15 : vector<8x128xf32> to vector<8x128x1xf32>
    %19 = vector.broadcast %17 : vector<8x1x128xf32> to vector<8x128x128xf32>
    %20 = vector.broadcast %18 : vector<8x128x1xf32> to vector<8x128x128xf32>
    %21 = arith.subf %19, %20 : vector<8x128x128xf32>
    %cst_17 = arith.constant 0.000000e+00 : f32
    %22 = vector.broadcast %cst_17 : f32 to vector<8x128x128xf32>
    %23 = arith.maximumf %21, %22 : vector<8x128x128xf32>
    %24 = math.absf %21 : vector<8x128x128xf32>
    %cst_18 = arith.constant 0.000000e+00 : f32
    %25 = vector.broadcast %cst_18 : f32 to vector<8x128x128xf32>
    %26 = arith.subf %25, %24 : vector<8x128x128xf32>
    %27 = math.exp %26 : vector<8x128x128xf32>
    %28 = math.log1p %27 : vector<8x128x128xf32>
    %29 = arith.addf %23, %28 : vector<8x128x128xf32>
    %30 = vector.shape_cast %14 : vector<8x128xf32> to vector<8x1x128xf32>
    %31 = vector.broadcast %30 : vector<8x1x128xf32> to vector<8x128x128xf32>
    %32 = arith.mulf %29, %31 : vector<8x128x128xf32>
    %cst_19 = arith.constant dense<0.000000e+00> : vector<8x128xf32>
    %33 = vector.multi_reduction <add>, %32, %cst_19 [2] : vector<8x128x128xf32> to vector<8x128xf32>
    %34 = arith.mulf %33, %12 : vector<8x128xf32>
    %35 = vector.shape_cast %34 : vector<8x128xf32> to vector<1x8x128xf32>
    %cst_20 = arith.constant dense<0.000000e+00> : vector<1xf32>
    %36 = vector.multi_reduction <add>, %35, %cst_20 [1, 2] : vector<1x8x128xf32> to vector<1xf32>
    %37 = vector.shape_cast %36 : vector<1xf32> to vector<1x1x1xf32>
    %38 = vector.extract %37[0, 0, 0] : f32 from vector<1x1x1xf32>
    %cst_21 = arith.constant dense<0.000000e+00> : vector<8xf32>
    %39 = vector.multi_reduction <add>, %12, %cst_21 [1] : vector<8x128xf32> to vector<8xf32>
    %40 = vector.shape_cast %39 : vector<8xf32> to vector<8x1xf32>
    %cst_22 = arith.constant dense<0.000000e+00> : vector<8xf32>
    %41 = vector.multi_reduction <add>, %14, %cst_22 [1] : vector<8x128xf32> to vector<8xf32>
    %42 = vector.shape_cast %41 : vector<8xf32> to vector<8x1xf32>
    %43 = arith.mulf %40, %42 : vector<8x1xf32>
    %44 = vector.shape_cast %43 : vector<8x1xf32> to vector<1x8x1xf32>
    %cst_23 = arith.constant dense<0.000000e+00> : vector<1xf32>
    %45 = vector.multi_reduction <add>, %44, %cst_23 [1, 2] : vector<1x8x1xf32> to vector<1xf32>
    %46 = vector.shape_cast %45 : vector<1xf32> to vector<1x1x1xf32>
    %47 = vector.extract %46[0, 0, 0] : f32 from vector<1x1x1xf32>
    %c0_24 = arith.constant 0 : index
    %c0_25 = arith.constant 0 : index
    %48 = vector.load %arg11[%c0_24, %c0_25] : memref<1x1xf32, #tpu.memory_space<vmem>>, vector<1x1xf32>
    %49 = vector.broadcast %38 : f32 to vector<1x1xf32>
    %50 = arith.addf %48, %49 : vector<1x1xf32>
    %c0_26 = arith.constant 0 : index
    %c0_27 = arith.constant 0 : index
    %51 = vector.load %arg11[%c0_26, %c0_27] : memref<1x1xf32, #tpu.memory_space<vmem>>, vector<1x1xf32>
    tpu.vector_store %arg11[%c0_26, %c0_27], %50 {strides = array<i32>} : memref<1x1xf32, #tpu.memory_space<vmem>>, vector<1x1xf32>,
    %c0_28 = arith.constant 0 : index
    %c0_29 = arith.constant 0 : index
    %52 = vector.load %arg12[%c0_28, %c0_29] : memref<1x1xf32, #tpu.memory_space<vmem>>, vector<1x1xf32>
    %53 = vector.broadcast %47 : f32 to vector<1x1xf32>
    %54 = arith.addf %52, %53 : vector<1x1xf32>
    %c0_30 = arith.constant 0 : index
    %c0_31 = arith.constant 0 : index
    %55 = vector.load %arg12[%c0_30, %c0_31] : memref<1x1xf32, #tpu.memory_space<vmem>>, vector<1x1xf32>
    tpu.vector_store %arg12[%c0_30, %c0_31], %54 {strides = array<i32>} : memref<1x1xf32, #tpu.memory_space<vmem>>, vector<1x1xf32>,
    %c0_i32_32 = arith.constant 0 : i32
    %56 = arith.cmpi eq, %arg2, %c0_i32_32 : i32
    %c0_i32_33 = arith.constant 0 : i32
    %57 = arith.cmpi eq, %arg3, %c0_i32_33 : i32
    %58 = arith.andi %56, %57 : i1
    %59 = arith.extui %58 : i1 to i32
    %c0_i32_34 = arith.constant 0 : i32
    %60 = arith.cmpi ne, %59, %c0_i32_34 : i32
    scf.if %60 {
      %c0_35 = arith.constant 0 : index
      %c0_36 = arith.constant 0 : index
      %61 = vector.load %arg11[%c0_35, %c0_36] : memref<1x1xf32, #tpu.memory_space<vmem>>, vector<1x1xf32>
      %62 = vector.extract %61[0, 0] : f32 from vector<1x1xf32>
      %63 = vector.broadcast %62 : f32 to vector<1x1x8x128xf32>
      %c0_37 = arith.constant 0 : index
      %c0_38 = arith.constant 0 : index
      %c0_39 = arith.constant 0 : index
      %c0_40 = arith.constant 0 : index
      %64 = vector.load %arg9[%c0_37, %c0_38, %c0_39, %c0_40] : memref<1x1x8x128xf32, #tpu.memory_space<vmem>>, vector<1x1x8x128xf32>
      tpu.vector_store %arg9[%c0_37, %c0_38, %c0_39, %c0_40], %63 {strides = array<i32>} : memref<1x1x8x128xf32, #tpu.memory_space<vmem>>, vector<1x1x8x128xf32>,
      %c0_41 = arith.constant 0 : index
      %c0_42 = arith.constant 0 : index
      %65 = vector.load %arg12[%c0_41, %c0_42] : memref<1x1xf32, #tpu.memory_space<vmem>>, vector<1x1xf32>
      %66 = vector.extract %65[0, 0] : f32 from vector<1x1xf32>
      %67 = vector.broadcast %66 : f32 to vector<1x1x8x128xf32>
      %c0_43 = arith.constant 0 : index
      %c0_44 = arith.constant 0 : index
      %c0_45 = arith.constant 0 : index
      %c0_46 = arith.constant 0 : index
      %68 = vector.load %arg10[%c0_43, %c0_44, %c0_45, %c0_46] : memref<1x1x8x128xf32, #tpu.memory_space<vmem>>, vector<1x1x8x128xf32>
      tpu.vector_store %arg10[%c0_43, %c0_44, %c0_45, %c0_46], %67 {strides = array<i32>} : memref<1x1x8x128xf32, #tpu.memory_space<vmem>>, vector<1x1x8x128xf32>,
    } else {
    }
    return
  }
  func.func @transform_0(%arg0: i32, %arg1: i32, %arg2: i32, %arg3: i32) -> (i32, i32, i32) {
    %c0_i32 = arith.constant 0 : i32
    %c0_i32_0 = arith.constant 0 : i32
    return %arg0, %arg1, %c0_i32 : i32, i32, i32
  }
  func.func @transform_1(%arg0: i32, %arg1: i32, %arg2: i32, %arg3: i32) -> (i32, i32, i32) {
    %c0_i32 = arith.constant 0 : i32
    %c0_i32_0 = arith.constant 0 : i32
    return %arg0, %c0_i32, %arg2 : i32, i32, i32
  }
  func.func @transform_2(%arg0: i32, %arg1: i32, %arg2: i32, %arg3: i32) -> (i32, i32, i32) {
    %c0_i32 = arith.constant 0 : i32
    %c0_i32_0 = arith.constant 0 : i32
    return %arg0, %c0_i32, %arg3 : i32, i32, i32
  }
  func.func @transform_3(%arg0: i32, %arg1: i32, %arg2: i32, %arg3: i32) -> (i32, i32, i32) {
    %c0_i32 = arith.constant 0 : i32
    return %arg0, %arg1, %arg2 : i32, i32, i32
  }
  func.func @transform_4(%arg0: i32, %arg1: i32, %arg2: i32, %arg3: i32) -> (i32, i32, i32) {
    %c0_i32 = arith.constant 0 : i32
    return %arg0, %arg1, %arg3 : i32, i32, i32
  }
  func.func @transform_5(%arg0: i32, %arg1: i32, %arg2: i32, %arg3: i32) -> (i32, i32, i32, i32) {
    %c0_i32 = arith.constant 0 : i32
    %c0_i32_0 = arith.constant 0 : i32
    %c0_i32_1 = arith.constant 0 : i32
    return %arg0, %arg1, %c0_i32, %c0_i32_0 : i32, i32, i32, i32
  }
  func.func @transform_6(%arg0: i32, %arg1: i32, %arg2: i32, %arg3: i32) -> (i32, i32, i32, i32) {
    %c0_i32 = arith.constant 0 : i32
    %c0_i32_0 = arith.constant 0 : i32
    %c0_i32_1 = arith.constant 0 : i32
    return %arg0, %arg1, %c0_i32, %c0_i32_0 : i32, i32, i32, i32
  }
}

</mosaic_0001>

<bundles_post_ra>
// kernel: sub_independent_loss.1
= control target key start
LH: loop header
LB: loop body
LE: loop exit
PB: predicated region body
PF: predicated region fallthrough
CT: control target
= control target key end

     0   :  { %s6665_s21 = smov 0   ;;  %s6667_s22 = smov 0   ;;  %s11571_s0 = inlined_call_operand.vmem [shape: f32[4,8,32], index: 0, kind: input, shape index: {}]   ;;  %s11572_s1 = inlined_call_operand.vmem [shape: f32[4,32,128], index: 1, kind: input, shape index: {}, may-alias: {1,2}]   ;;  %s11573_s2 = inlined_call_operand.vmem [shape: f32[4,32,128], index: 2, kind: input, shape index: {}, may-alias: {1,2}]   ;;  %s11574_s3 = inlined_call_operand.vmem [shape: f32[4,8,128], index: 3, kind: input, shape index: {}]   ;;  %s11575_s4 = inlined_call_operand.vmem [shape: f32[4,8,128], index: 4, kind: input, shape index: {}]   ;;  %s11576_s5 = inlined_call_operand.vmem [shape: f32[4,1,8,128], index: 5, kind: output, shape index: {0}]   ;;  %s11577_s6 = inlined_call_operand.vmem [shape: f32[4,1,8,128], index: 6, kind: output, shape index: {1}]  }
   0x1   :  { %s6669_s23 = smov 0  }
   0x2 LB: > { %s43_s24 = sadd.s32 1, %s6619_s22  ;;  %p5988_p0 = scmp.ge.s32.totalorder %s6623_s23, 1  ;;  %s6623_s23 = sphi %s6669_s23, %s17_s23   ;;  %s6619_s22 = sphi %s6667_s22, %s12582_s22   ;;  %s6615_s21 = sphi %s6665_s21, %s12581_s21  }
   0x3   : > { %p45_p1 = scmp.ge.s32.totalorder %s43_s24, 4  ;;  %p317_p2 = scmp.lt.s32.totalorder %s6623_s23, 5 }
   0x5   : > { %s12584_s24 = smov (%p45_p1, %s43_s24), 0  ;;  %p318_p3 = pnand %p5988_p0, %p317_p2 }
   0x7   : > { %321 = sbr.rel (%p318_p3) target bundleno = 2020 (0x7e4), region = 40 }
   0xe   : > { %p394_p4 = scmp.lt.s32.totalorder %s6615_s21, 3  ;;  %vm11604_vm0 = vcmask 0   ;;  %v6625_v0 = vmov 0.0|0.0   ;;  %v6626_v1 = vmov 0.0   ;;  %vm6627_vm1 = vmmov 0  }
   0xf   : > { %6036 = vmatprep.subr.bf16.mxu0 %v6625_v0  ;;  %458 = vst.msk [vmem:[#allocation2] sm:$0x1] %vm11604_vm0, %v6626_v1  ;;  %459 = vst.msk [vmem:[#allocation3] sm:$0x1] %vm11604_vm0, %v6626_v1  ;;  %6022 = vmatprep.mubr.msk.f32.mxu0 %vm6627_vm1, %v6626_v1  ;;  %vm471_vm2 = vcmask 261120   ;;  %v11578_v15 = vlaneseq  ;;  %vm5761_vm0 = vcmask 7168  }
  0x10   : > { %s12586_s21 = smov (!%p394_p4, %s6615_s21), 3  ;;  %6042 = vmatprep.subr.bf16.mxu1 %v6625_v0  ;;  %6033 = vmatprep.mubr.msk.f32.mxu1 %vm6627_vm1, %v6626_v1  ;;  %v6628_v51 = vmov 1966171168  }
  0x11   : > { %s6002_s25 = sshll.u32 %s12586_s21, 5  ;;  %s6688_s29 = sshll.u32 %s12586_s21, 3  ;;  %v6698_v16 = vshrl.u32 %v11578_v15, 7  ;;  %v618_v52 = vunpack.c.l.s4 %v6628_v51 }
  0x12   : > { %s408_s28 = scalar_lea.vmem %s11572_s1, %s6002_s25  ;;  %s416_s8 = scalar_lea.vmem %s11573_s2, %s6002_s25 }
  0x13   : > { %v461_v2 = vld [vmem:[%s408_s28] sm:$0xff]  ;;  %v462_v3 = vld [vmem:[%s408_s28 + $0x8] sm:$0xff]  ;;  %v463_v4 = vld [vmem:[%s408_s28 + $0x10] sm:$0xff]  ;;  %s400_s11 = scalar_lea.vmem %s11571_s0, %s6688_s29  ;;  %11605 = vst [vmem:[#allocation4_spill] sm:$0xff] %v6698_v16  ;;  %v6701_v17 = vsub.s32 0, %v6698_v16  ;;  %v11585_v23 = vsub.s32 1, %v6698_v16  ;;  %v619_v56 = vunpack.c.0.s8 %v618_v52  ;;  %s6822_s14 = scalar_lea.vmem %s11575_s4, %s6688_s29 }
  0x14   : > { %v6037_v5 = vpack.c.bf16 %v462_v3, %v461_v2  ;;  %v464_v6 = vld [vmem:[%s408_s28 + $0x18] sm:$0xff]  ;;  %v465_v7 = vld [vmem:[%s416_s8] sm:$0xff]  ;;  %v466_v8 = vld [vmem:[%s416_s8 + $0x8] sm:$0xff]  ;;  %v11584_v25 = vsub.s32 2, %v6698_v16  ;;  %v11583_v27 = vsub.s32 3, %v6698_v16  ;;  %v11582_v29 = vsub.s32 4, %v6698_v16  ;;  %s426_s17 = scalar_lea.vmem %s11574_s3, %s6688_s29  ;;  %s443_s25 = scalar_lea.vmem %s11576_s5, %s6688_s29 }
  0x15   : > { %v6040_v9 = vpack.c.bf16 %v464_v6, %v463_v4  ;;  %v6043_v10 = vpack.c.bf16 %v466_v8, %v465_v7  ;;  %v467_v11 = vld [vmem:[%s416_s8 + $0x10] sm:$0xff]  ;;  %v468_v12 = vld [vmem:[%s416_s8 + $0x18] sm:$0xff]  ;;  %v460_v14 = vld [vmem:[%s400_s11] sm:$0xff]  ;;  %11606 = vst [vmem:[#allocation5_spill] sm:$0xff] %v6701_v17  ;;  %v11581_v31 = vsub.s32 5, %v6698_v16  ;;  %v11580_v39 = vsub.s32 6, %v6698_v16  ;;  %s450_s30 = scalar_lea.vmem %s11577_s6, %s6688_s29 }
  0x16   : > { %6038 = vmatpush3.bf16.msra.mxu0 %v6037_v5  ;;  %v6046_v13 = vpack.c.bf16 %v468_v12, %v467_v11  ;;  %v11579_v55 = vsub.s32 7, %v6698_v16  ;;  %v6778_v60 = vsub.s32 %v619_v56, %v6698_v16 }
  0x17   : > { %6039 = vmatprep.subr.bf16.mxu0 %v6625_v0  ;;  %6044 = vmatpush3.bf16.msra.mxu1 %v6043_v10 }
  0x18   : > { %6045 = vmatprep.subr.bf16.mxu1 %v6625_v0 }
  0x1a   : > { %6041 = vmatpush3.bf16.msra.mxu0 %v6040_v9 }
  0x1b   : > { %6047 = vmatpush3.bf16.msra.mxu1 %v6046_v13 }
  0x1d   : > { %6023 = vmatmul.mubr.msk.f32.vlgmr.msra.gmra.mrb[0].mxu0 %vm471_vm2, %v460_v14 }
  0x1e   : > { %6034 = vmatmul.mubr.msk.f32.vlgmr.msra.gmra.mrb[0].mxu1 %vm471_vm2, %v460_v14 }
  0xf0   : > { %v6703_v18 = vpop.f32.mrb[0].mxu0 }
  0xf1   : > { %v668_v19 = vrot.slane %v6703_v18, %v6701_v17  ;;  %v6024_v20 = vpop.f32.mrb[1].mxu0  ;;  %v6707_v21 = vpop.f32.mrb[0].mxu1  ;;  %v735_v24 = vrot.slane %v6703_v18, %v11585_v23  ;;  %v802_v26 = vrot.slane %v6703_v18, %v11584_v25  ;;  %v869_v28 = vrot.slane %v6703_v18, %v11583_v27 }
  0xf2   : > { %v6035_v22 = vpop.f32.mrb[1].mxu1  ;;  %v936_v30 = vrot.slane %v6703_v18, %v11582_v29  ;;  %v1003_v32 = vrot.slane %v6703_v18, %v11581_v31  ;;  %v1070_v42 = vrot.slane %v6703_v18, %v11580_v39  ;;  %v1137_v57 = vrot.slane %v6703_v18, %v11579_v55 }
  0xf3   : > { %678 = vbcast.lane.b32.xlu1 %v668_v19, 272  ;;  %670 = vbcast.lane.b32.xlu0 %v668_v19, 256  ;;  %v6782_v61 = vrot.slane %v6707_v21, %v6778_v60 }
  0xf5   : > { %v6790_v0 = vrot.slane %v6782_v61, %v6778_v60 }
  0xf7   : > { %682 = vbcast.lane.b32.xlu1 %v668_v19, 280  ;;  %674 = vbcast.lane.b32.xlu0 %v668_v19, 264  ;;  %v6798_v3 = vrot.slane %v6790_v0, %v6701_v17 }
  0xfb   : > { %690 = vbcast.lane.b32.xlu1 %v668_v19, 296  ;;  %686 = vbcast.lane.b32.xlu0 %v668_v19, 288 }
  0xff   : > { %698 = vbcast.lane.b32.xlu1 %v668_v19, 312  ;;  %694 = vbcast.lane.b32.xlu0 %v668_v19, 304 }
 0x103   : > { %706 = vbcast.lane.b32.xlu1 %v668_v19, 328  ;;  %702 = vbcast.lane.b32.xlu0 %v668_v19, 320 }
 0x107   : > { %714 = vbcast.lane.b32.xlu1 %v668_v19, 344  ;;  %710 = vbcast.lane.b32.xlu0 %v668_v19, 336 }
 0x10b   : > { %722 = vbcast.lane.b32.xlu1 %v668_v19, 360  ;;  %718 = vbcast.lane.b32.xlu0 %v668_v19, 352 }
 0x10f   : > { %730 = vbcast.lane.b32.xlu1 %v668_v19, 376  ;;  %726 = vbcast.lane.b32.xlu0 %v668_v19, 368  ;;  %v470_v19 = vld [vmem:[%s6822_s14] sm:$0xff] }
 0x113   : > { %741 = vbcast.lane.b32.xlu1 %v735_v24, 264  ;;  %737 = vbcast.lane.b32.xlu0 %v735_v24, 256 }
 0x117   : > { %749 = vbcast.lane.b32.xlu1 %v735_v24, 280  ;;  %745 = vbcast.lane.b32.xlu0 %v735_v24, 272 }
 0x11b   : > { %757 = vbcast.lane.b32.xlu1 %v735_v24, 296  ;;  %753 = vbcast.lane.b32.xlu0 %v735_v24, 288 }
 0x11f   : > { %765 = vbcast.lane.b32.xlu1 %v735_v24, 312  ;;  %761 = vbcast.lane.b32.xlu0 %v735_v24, 304 }
 0x123   : > { %773 = vbcast.lane.b32.xlu1 %v735_v24, 328  ;;  %769 = vbcast.lane.b32.xlu0 %v735_v24, 320 }
 0x127   : > { %781 = vbcast.lane.b32.xlu1 %v735_v24, 344  ;;  %777 = vbcast.lane.b32.xlu0 %v735_v24, 336 }
 0x12b   : > { %789 = vbcast.lane.b32.xlu1 %v735_v24, 360  ;;  %785 = vbcast.lane.b32.xlu0 %v735_v24, 352 }
 0x12f   : > { %797 = vbcast.lane.b32.xlu1 %v735_v24, 376  ;;  %793 = vbcast.lane.b32.xlu0 %v735_v24, 368 }
 0x133   : > { %808 = vbcast.lane.b32.xlu1 %v802_v26, 264  ;;  %804 = vbcast.lane.b32.xlu0 %v802_v26, 256 }
 0x137   : > { %816 = vbcast.lane.b32.xlu1 %v802_v26, 280  ;;  %812 = vbcast.lane.b32.xlu0 %v802_v26, 272 }
 0x13b   : > { %824 = vbcast.lane.b32.xlu1 %v802_v26, 296  ;;  %820 = vbcast.lane.b32.xlu0 %v802_v26, 288 }
 0x13f   : > { %832 = vbcast.lane.b32.xlu1 %v802_v26, 312  ;;  %828 = vbcast.lane.b32.xlu0 %v802_v26, 304 }
 0x143   : > { %840 = vbcast.lane.b32.xlu1 %v802_v26, 328  ;;  %836 = vbcast.lane.b32.xlu0 %v802_v26, 320 }
 0x147   : > { %848 = vbcast.lane.b32.xlu1 %v802_v26, 344  ;;  %844 = vbcast.lane.b32.xlu0 %v802_v26, 336 }
 0x14b   : > { %856 = vbcast.lane.b32.xlu1 %v802_v26, 360  ;;  %852 = vbcast.lane.b32.xlu0 %v802_v26, 352 }
 0x14f   : > { %864 = vbcast.lane.b32.xlu1 %v802_v26, 376  ;;  %860 = vbcast.lane.b32.xlu0 %v802_v26, 368 }
 0x153   : > { %875 = vbcast.lane.b32.xlu1 %v869_v28, 264  ;;  %871 = vbcast.lane.b32.xlu0 %v869_v28, 256 }
 0x157   : > { %883 = vbcast.lane.b32.xlu1 %v869_v28, 280  ;;  %879 = vbcast.lane.b32.xlu0 %v869_v28, 272 }
 0x15b   : > { %891 = vbcast.lane.b32.xlu1 %v869_v28, 296  ;;  %887 = vbcast.lane.b32.xlu0 %v869_v28, 288 }
 0x15f   : > { %899 = vbcast.lane.b32.xlu1 %v869_v28, 312  ;;  %895 = vbcast.lane.b32.xlu0 %v869_v28, 304 }
 0x163   : > { %907 = vbcast.lane.b32.xlu1 %v869_v28, 328  ;;  %903 = vbcast.lane.b32.xlu0 %v869_v28, 320 }
 0x165   : > { %v6729_v33 = vpop.permute.xlu1 %678  ;;  %v6731_v34 = vpop.permute.xlu0 %670 }
 0x166   : > { %v6802_v4 = vsub.f32 %v6798_v3, %v6729_v33  ;;  %v6810_v7 = vsub.f32 %v6798_v3, %v6731_v34  ;;  %v3297_v33 = vrot.slane %v470_v19, %v6778_v60 }
 0x167   : > { %915 = vbcast.lane.b32.xlu1 %v869_v28, 344  ;;  %911 = vbcast.lane.b32.xlu0 %v869_v28, 336 }
 0x168   : > { %v1499_v8 = vand.u32 2147483647, %v6802_v4  ;;  %v1497_v9 = vand.u32 2147483647, %v6810_v7 }
 0x169   : > { %v6733_v35 = vpop.permute.xlu1 %682  ;;  %v6735_v36 = vpop.permute.xlu0 %674 }
 0x16a   : > { %v1627_v12 = vsub.f32 0.0, %v1499_v8  ;;  %v6826_v13 = vsub.f32 %v6798_v3, %v6733_v35  ;;  %v1625_v14 = vsub.f32 0.0, %v1497_v9  ;;  %v6830_v18 = vsub.f32 %v6798_v3, %v6735_v36 }
 0x16b   : > { %923 = vbcast.lane.b32.xlu1 %v869_v28, 360  ;;  %919 = vbcast.lane.b32.xlu0 %v869_v28, 352  ;;  %v3305_v36 = vcombine.high %v3297_v33, %v3297_v33 }
 0x16c   : > { %v1757_v20 = vmul.f32 1.442695, %v1627_v12  ;;  %v1500_v22 = vand.u32 2147483647, %v6826_v13 }
 0x16d   : > { %v6737_v37 = vpop.permute.xlu1 %690  ;;  %v6739_v38 = vpop.permute.xlu0 %686 }
 0x16e   : > { %v6842_v34 = vsub.f32 %v6798_v3, %v6737_v37  ;;  %v6846_v35 = vsub.f32 %v6798_v3, %v6739_v38  ;;  %6088 = vpow2.f32 %v1757_v20  ;;  %v1628_v51 = vsub.f32 0.0, %v1500_v22 }
 0x16f   : > { %931 = vbcast.lane.b32.xlu1 %v869_v28, 376  ;;  %927 = vbcast.lane.b32.xlu0 %v869_v28, 368  ;;  %v3290_v28 = vcombine.high %v470_v19, %v470_v19  ;;  %v3327_v38 = vrot.slane %v3305_v36, %v6778_v60  ;;  %v631_v36 = vcombine.high %v6782_v61, %v6782_v61 }
 0x170   : > { %v1502_v8 = vand.u32 2147483647, %v6842_v34  ;;  %v1501_v9 = vand.u32 2147483647, %v6846_v35 }
 0x171   : > { %v6742_v40 = vpop.permute.xlu1 %698  ;;  %v6744_v41 = vpop.permute.xlu0 %694  ;;  %v3304_v52 = vrot.slane %v3290_v28, %v6778_v60 }
 0x173   : > { %942 = vbcast.lane.b32.xlu1 %v936_v30, 264  ;;  %938 = vbcast.lane.b32.xlu0 %v936_v30, 256  ;;  %v3306_v37 = vcombine.high %v3304_v52, %v3304_v52 }
 0x175   : > { %v6749_v43 = vpop.permute.xlu1 %706  ;;  %v6751_v44 = vpop.permute.xlu0 %702 }
 0x177   : > { %950 = vbcast.lane.b32.xlu1 %v936_v30, 280  ;;  %946 = vbcast.lane.b32.xlu0 %v936_v30, 272 }
 0x178   : > { %v6880_v61 = vpop.eup %6088 }
 0x179   : > { %v6753_v45 = vpop.permute.xlu1 %714  ;;  %v6755_v46 = vpop.permute.xlu0 %710 }
 0x17b   : > { %958 = vbcast.lane.b32.xlu1 %v936_v30, 296  ;;  %954 = vbcast.lane.b32.xlu0 %v936_v30, 288 }
 0x17d   : > { %v6757_v47 = vpop.permute.xlu1 %722  ;;  %v6759_v48 = vpop.permute.xlu0 %718 }
 0x17f   : > { %966 = vbcast.lane.b32.xlu1 %v936_v30, 312  ;;  %962 = vbcast.lane.b32.xlu0 %v936_v30, 304 }
 0x181   : > { %v6761_v49 = vpop.permute.xlu1 %730  ;;  %v6763_v50 = vpop.permute.xlu0 %726 }
 0x183   : > { %974 = vbcast.lane.b32.xlu1 %v936_v30, 328  ;;  %970 = vbcast.lane.b32.xlu0 %v936_v30, 320 }
 0x185   : > { %v6765_v53 = vpop.permute.xlu1 %741  ;;  %v6767_v54 = vpop.permute.xlu0 %737 }
 0x187   : > { %982 = vbcast.lane.b32.xlu1 %v936_v30, 344  ;;  %978 = vbcast.lane.b32.xlu0 %v936_v30, 336 }
 0x189   : > { %v6773_v58 = vpop.permute.xlu1 %749  ;;  %v6775_v59 = vpop.permute.xlu0 %745 }
 0x18b   : > { %990 = vbcast.lane.b32.xlu1 %v936_v30, 360  ;;  %986 = vbcast.lane.b32.xlu0 %v936_v30, 352 }
 0x18d   : > { %v6784_v62 = vpop.permute.xlu1 %757  ;;  %v6786_v63 = vpop.permute.xlu0 %753 }
 0x18f   : > { %998 = vbcast.lane.b32.xlu1 %v936_v30, 376  ;;  %994 = vbcast.lane.b32.xlu0 %v936_v30, 368  ;;  %v1753_v30 = vmul.f32 1.442695, %v1625_v14  ;;  %v1759_v14 = vmul.f32 1.442695, %v1628_v51  ;;  %v6869_v51 = vsub.f32 %v6798_v3, %v6744_v41 }
 0x191   : > { %v6792_v1 = vpop.permute.xlu1 %765  ;;  %v6794_v2 = vpop.permute.xlu0 %761  ;;  %6090 = vpow2.f32 %v1753_v30  ;;  %v1630_v30 = vsub.f32 0.0, %v1502_v8 }
 0x192   : > { %6092 = vpow2.f32 %v1759_v14  ;;  %v653_v14 = vrot.slane %v631_v36, %v6778_v60 }
 0x193   : > { %1009 = vbcast.lane.b32.xlu1 %v1003_v32, 264  ;;  %1005 = vbcast.lane.b32.xlu0 %v1003_v32, 256  ;;  %v1763_v15 = vmul.f32 1.442695, %v1630_v30  ;;  %v6903_v30 = vsub.f32 %v6798_v3, %v6751_v44  ;;  %v6913_v44 = vsub.f32 %v6798_v3, %v6753_v45 }
 0x194   : > { %v6919_v27 = vrot.slane %v653_v14, %v6701_v17 }
 0x195   : > { %v6804_v5 = vpop.permute.xlu1 %773  ;;  %v6806_v6 = vpop.permute.xlu0 %769 }
 0x197   : > { %1017 = vbcast.lane.b32.xlu1 %v1003_v32, 280  ;;  %1013 = vbcast.lane.b32.xlu0 %v1003_v32, 272 }
 0x199   : > { %v6814_v10 = vpop.permute.xlu1 %781  ;;  %v6816_v11 = vpop.permute.xlu0 %777 }
 0x19b   : > { %1025 = vbcast.lane.b32.xlu1 %v1003_v32, 296  ;;  %1021 = vbcast.lane.b32.xlu0 %v1003_v32, 288 }
 0x19d   : > { %v6834_v24 = vpop.permute.xlu1 %789  ;;  %v6836_v26 = vpop.permute.xlu0 %785 }
 0x19f   : > { %1033 = vbcast.lane.b32.xlu1 %v1003_v32, 312  ;;  %1029 = vbcast.lane.b32.xlu0 %v1003_v32, 304 }
 0x1a3   : > { %1041 = vbcast.lane.b32.xlu1 %v1003_v32, 328  ;;  %1037 = vbcast.lane.b32.xlu0 %v1003_v32, 320 }
 0x1a7   : > { %1049 = vbcast.lane.b32.xlu1 %v1003_v32, 344  ;;  %1045 = vbcast.lane.b32.xlu0 %v1003_v32, 336 }
 0x1ab   : > { %1057 = vbcast.lane.b32.xlu1 %v1003_v32, 360  ;;  %1053 = vbcast.lane.b32.xlu0 %v1003_v32, 352 }
 0x1af   : > { %1065 = vbcast.lane.b32.xlu1 %v1003_v32, 376  ;;  %1061 = vbcast.lane.b32.xlu0 %v1003_v32, 368  ;;  %v1498_v32 = vand.u32 2147483647, %v6830_v18 }
 0x1b1   : > { %v1626_v56 = vsub.f32 0.0, %v1498_v32  ;;  %v6862_v32 = vsub.f32 %v6798_v3, %v6742_v40 }
 0x1b3   : > { %1076 = vbcast.lane.b32.xlu1 %v1070_v42, 264  ;;  %1072 = vbcast.lane.b32.xlu0 %v1070_v42, 256  ;;  %v1755_v20 = vmul.f32 1.442695, %v1626_v56  ;;  %v3337_v56 = vcombine.high %v3327_v38, %v3327_v38  ;;  %v1504_v55 = vand.u32 2147483647, %v6862_v32 }
 0x1b5   : > { %6094 = vpow2.f32 %v1755_v20  ;;  %v6894_v20 = vrot.slane %v3337_v56, %v6701_v17 }
 0x1b6   : > { %6096 = vpow2.f32 %v1763_v15  ;;  %v1505_v15 = vand.u32 2147483647, %v6903_v30 }
 0x1b7   : > { %1084 = vbcast.lane.b32.xlu1 %v1070_v42, 280  ;;  %1080 = vbcast.lane.b32.xlu0 %v1070_v42, 272  ;;  %11611 = vst [vmem:[#allocation10_spill] sm:$0xff] %v6894_v20 }
 0x1bb   : > { %1092 = vbcast.lane.b32.xlu1 %v1070_v42, 296  ;;  %1088 = vbcast.lane.b32.xlu0 %v1070_v42, 288 }
 0x1bf   : > { %1100 = vbcast.lane.b32.xlu1 %v1070_v42, 312  ;;  %1096 = vbcast.lane.b32.xlu0 %v1070_v42, 304 }
 0x1c3   : > { %1108 = vbcast.lane.b32.xlu1 %v1070_v42, 328  ;;  %1104 = vbcast.lane.b32.xlu0 %v1070_v42, 320 }
 0x1c7   : > { %1116 = vbcast.lane.b32.xlu1 %v1070_v42, 344  ;;  %1112 = vbcast.lane.b32.xlu0 %v1070_v42, 336 }
 0x1cb   : > { %1124 = vbcast.lane.b32.xlu1 %v1070_v42, 360  ;;  %1120 = vbcast.lane.b32.xlu0 %v1070_v42, 352 }
 0x1cf   : > { %1132 = vbcast.lane.b32.xlu1 %v1070_v42, 376  ;;  %1128 = vbcast.lane.b32.xlu0 %v1070_v42, 368  ;;  %v616_v42 = vcombine.high %v6707_v21, %v6707_v21  ;;  %v3320_v21 = vrot.slane %v3304_v52, %v6778_v60 }
 0x1d1   : > { %v630_v12 = vrot.slane %v616_v42, %v6778_v60  ;;  %v1629_v42 = vsub.f32 0.0, %v1501_v9  ;;  %v3336_v52 = vcombine.high %v3320_v21, %v3320_v21 }
 0x1d3   : > { %1143 = vbcast.lane.b32.xlu1 %v1137_v57, 264  ;;  %1139 = vbcast.lane.b32.xlu0 %v1137_v57, 256  ;;  %v632_v28 = vcombine.high %v630_v12, %v630_v12  ;;  %v646_v9 = vrot.slane %v630_v12, %v6778_v60  ;;  %v1761_v39 = vmul.f32 1.442695, %v1629_v42  ;;  %v663_v42 = vcombine.high %v653_v14, %v653_v14 }
 0x1d5   : > { %v660_v41 = vrot.slane %v632_v28, %v6778_v60  ;;  %v661_v28 = vcombine.high %v6790_v0, %v6790_v0  ;;  %v662_v36 = vcombine.high %v646_v9, %v646_v9  ;;  %6098 = vpow2.f32 %v1761_v39 }
 0x1d6   : > { %v6926_v39 = vrot.slane %v663_v42, %v6701_v17 }
 0x1d7   : > { %1151 = vbcast.lane.b32.xlu1 %v1137_v57, 280  ;;  %1147 = vbcast.lane.b32.xlu0 %v1137_v57, 272  ;;  %v664_v31 = vcombine.high %v660_v41, %v660_v41  ;;  %v6922_v25 = vrot.slane %v661_v28, %v6701_v17  ;;  %v6932_v45 = vrot.slane %v660_v41, %v6701_v17  ;;  %v1508_v41 = vand.u32 2147483647, %v6913_v44 }
 0x1d8   : > { %11616 = vst [vmem:[#allocation15_spill] sm:$0xff] %v6926_v39  ;;  %v6937_v14 = vrot.slane %v662_v36, %v6701_v17 }
 0x1d9   : > { %11615 = vst [vmem:[#allocation14_spill] sm:$0xff] %v6922_v25  ;;  %11618 = vst [vmem:[#allocation17_spill] sm:$0xff] %v6932_v45 }
 0x1da   : > { %11619 = vst [vmem:[#allocation18_spill] sm:$0xff] %v6937_v14 }
 0x1db   : > { %1159 = vbcast.lane.b32.xlu1 %v1137_v57, 296  ;;  %1155 = vbcast.lane.b32.xlu0 %v1137_v57, 288 }
 0x1df   : > { %1167 = vbcast.lane.b32.xlu1 %v1137_v57, 312  ;;  %1163 = vbcast.lane.b32.xlu0 %v1137_v57, 304 }
 0x1e3   : > { %1175 = vbcast.lane.b32.xlu1 %v1137_v57, 328  ;;  %1171 = vbcast.lane.b32.xlu0 %v1137_v57, 320 }
 0x1e7   : > { %1183 = vbcast.lane.b32.xlu1 %v1137_v57, 344  ;;  %1179 = vbcast.lane.b32.xlu0 %v1137_v57, 336 }
 0x1eb   : > { %1191 = vbcast.lane.b32.xlu1 %v1137_v57, 360  ;;  %1187 = vbcast.lane.b32.xlu0 %v1137_v57, 352 }
 0x1ef   : > { %1199 = vbcast.lane.b32.xlu1 %v1137_v57, 376  ;;  %1195 = vbcast.lane.b32.xlu0 %v1137_v57, 368  ;;  %v3313_v57 = vrot.slane %v3297_v33, %v6778_v60  ;;  %v3334_v33 = vrot.slane %v3306_v37, %v6778_v60  ;;  %v6878_v37 = vrot.slane %v3320_v21, %v6701_v17 }
 0x1f0   : > { %v6891_v21 = vsub.f32 %v6798_v3, %v6749_v43  ;;  %v6906_v60 = vrot.slane %v3336_v52, %v6701_v17  ;;  %v2027_v43 = vadd.f32 1.0, %v6880_v61 }
 0x1f1   : > { %v3335_v19 = vcombine.high %v3313_v57, %v3313_v57  ;;  %v6858_v22 = vrot.slane %v3313_v57, %v6701_v17  ;;  %v6872_v57 = vrot.slane %v3327_v38, %v6701_v17  ;;  %v3338_v8 = vcombine.high %v3334_v33, %v3334_v33  ;;  %11610 = vst [vmem:[#allocation9_spill] sm:$0xff] %v6878_v37  ;;  %v6885_v38 = vpop.eup %6090 }
 0x1f2   : > { %v6897_v12 = vrot.slane %v3334_v33, %v6701_v17  ;;  %11613 = vst [vmem:[#allocation12_spill] sm:$0xff] %v6906_v60  ;;  %v2009_v56 = vadd.f32 1.0, %v6885_v38  ;;  %v1632_v33 = vsub.f32 0.0, %v1504_v55  ;;  %v1506_v0 = vand.u32 2147483647, %v6891_v21 }
 0x1f3   : > { %11607 = vst [vmem:[#allocation6_spill] sm:$0xff] %v6858_v22  ;;  %11608 = vst [vmem:[#allocation7_spill] sm:$0xff] %v6872_v57  ;;  %v6875_v40 = vrot.slane %v3335_v19, %v6701_v17  ;;  %v1503_v19 = vand.u32 2147483647, %v6869_v51  ;;  %v6916_v52 = vrot.slane %v3338_v8, %v6701_v17  ;;  %v6929_v55 = vrot.slane %v646_v9, %v6701_v17  ;;  %v6934_v8 = vpop.eup %6092 }
 0x1f4   : > { %11612 = vst [vmem:[#allocation11_spill] sm:$0xff] %v6897_v12  ;;  %6100 = vlog2.f32 %v2027_v43  ;;  %v1767_v28 = vmul.f32 1.442695, %v1632_v33  ;;  %v6942_v23 = vpop.eup %6094  ;;  %v1634_v16 = vsub.f32 0.0, %v1506_v0  ;;  %v1633_v60 = vsub.f32 0.0, %v1505_v15 }
 0x1f5   : > { %11609 = vst [vmem:[#allocation8_spill] sm:$0xff] %v6875_v40  ;;  %v1631_v29 = vsub.f32 0.0, %v1503_v19  ;;  %11614 = vst [vmem:[#allocation13_spill] sm:$0xff] %v6916_v52  ;;  %v6940_v19 = vrot.slane %v664_v31, %v6701_v17  ;;  %6102 = vlog2.f32 %v2009_v56  ;;  %v2030_v31 = vmul.f32 -0.5, %v6880_v61  ;;  %v6957_v43 = vpop.eup %6096 }
 0x1f6   : > { %11617 = vst [vmem:[#allocation16_spill] sm:$0xff] %v6929_v55  ;;  %v2036_v56 = vadd.f32 1.0, %v6934_v8  ;;  %v2012_v0 = vmul.f32 -0.5, %v6885_v38  ;;  %v2018_v42 = vadd.f32 1.0, %v6942_v23  ;;  %6104 = vpow2.f32 %v1767_v28  ;;  %v6962_v37 = vpop.eup %6098 }
 0x1f7   : > { %11620 = vst [vmem:[#allocation19_spill] sm:$0xff] %v6940_v19  ;;  %v1765_v9 = vmul.f32 1.442695, %v1631_v29  ;;  %v2033_v29 = vand.u32 2147483647, %v6880_v61  ;;  %v1636_v15 = vsub.f32 0.0, %v1508_v41 }
 0x1f8   : > { %v2015_v52 = vand.u32 2147483647, %v6885_v38  ;;  %v1771_v36 = vmul.f32 1.442695, %v1634_v16  ;;  %v2039_v12 = vmul.f32 -0.5, %v6934_v8  ;;  %v2031_v20 = vadd.f32 1.0, %v2030_v31 }
 0x1f9   : > { %6106 = vpow2.f32 %v1765_v9  ;;  %v1769_v19 = vmul.f32 1.442695, %v1633_v60  ;;  %v6967_v9 = vsub.f32 %v6798_v3, %v6755_v46  ;;  %vm6969_vm3 = vcmp.lt.f32.partialorder %v2033_v29, 0.0004427343 }
 0x1fa   : > { %6108 = vlog2.f32 %v2036_v56  ;;  %v2013_v41 = vadd.f32 1.0, %v2012_v0  ;;  %v2021_v33 = vmul.f32 -0.5, %v6942_v23  ;;  %vm6974_vm4 = vcmp.lt.f32.partialorder %v2015_v52, 0.0004427343 }
 0x1fb   : > { %6110 = vlog2.f32 %v2018_v42  ;;  %v2057_v31 = vmul.f32 -0.5, %v6957_v43  ;;  %v1775_v56 = vmul.f32 1.442695, %v1636_v15  ;;  %v2040_v46 = vadd.f32 1.0, %v2039_v12 }
 0x1fc   : > { %6112 = vpow2.f32 %v1771_v36  ;;  %v2054_v29 = vadd.f32 1.0, %v6957_v43  ;;  %v2048_v14 = vmul.f32 -0.5, %v6962_v37  ;;  %v2042_v42 = vand.u32 2147483647, %v6934_v8 }
 0x1fd   : > { %6114 = vpow2.f32 %v1769_v19  ;;  %v2045_v0 = vadd.f32 1.0, %v6962_v37  ;;  %v1507_v40 = vand.u32 2147483647, %v6967_v9  ;;  %v2022_v57 = vadd.f32 1.0, %v2021_v33 }
 0x1fe   : > { %v6101_v17 = vpop.eup %6100  ;;  %v2024_v36 = vand.u32 2147483647, %v6942_v23  ;;  %v6988_v12 = vsub.f32 %v6798_v3, %v6757_v47  ;;  %v2032_v15 = vmul.f32 %v6880_v61, %v2031_v20  ;;  %v2058_v19 = vadd.f32 1.0, %v2057_v31 }
 0x1ff   : > { %v6103_v28 = vpop.eup %6102  ;;  %v2029_v45 = vmul.f32 0.6931472, %v6101_v17  ;;  %6116 = vpow2.f32 %v1775_v56  ;;  %v2014_v39 = vmul.f32 %v6885_v38, %v2013_v41  ;;  %v6995_v52 = vmul.f32 %v6934_v8, %v2040_v46 }
 0x200   : > { %v2011_v55 = vmul.f32 0.6931472, %v6103_v28  ;;  %v6991_v22 = vpop.eup %6104  ;;  %6118 = vlog2.f32 %v2054_v29  ;;  %v2049_v17 = vadd.f32 1.0, %v2048_v14  ;;  %vm6999_vm5 = vcmp.lt.f32.partialorder %v2042_v42, 0.0004427343 }
 0x201   : > { %v2060_v47 = vand.u32 2147483647, %v6957_v43  ;;  %6120 = vlog2.f32 %v2045_v0  ;;  %v1635_v61 = vsub.f32 0.0, %v1507_v40  ;;  %v7006_v20 = vsub.f32 %v6798_v3, %v6759_v48 }
 0x202   : > { %v2035_v38 = vsel %vm6969_vm3, %v2032_v15, %v2029_v45  ;;  %v7011_v8 = vmul.f32 %v6942_v23, %v2022_v57  ;;  %vm7013_vm6 = vcmp.lt.f32.partialorder %v2024_v36, 0.0004427343  ;;  %v2051_v28 = vand.u32 2147483647, %v6962_v37 }
 0x203   : > { %v6997_v33 = vpop.eup %6106  ;;  %v1510_v41 = vand.u32 2147483647, %v6988_v12  ;;  %v2017_v40 = vsel %vm6974_vm4, %v2014_v39, %v2011_v55  ;;  %v7022_v48 = vmul.f32 %v6957_v43, %v2058_v19  ;;  %v2072_v45 = vadd.f32 1.0, %v6991_v22 }
 0x204   : > { %v6109_v31 = vpop.eup %6108  ;;  %v7027_v16 = vmul.f32 %v6962_v37, %v2049_v17  ;;  %v2075_v56 = vmul.f32 -0.5, %v6991_v22  ;;  %v2063_v46 = vadd.f32 1.0, %v6997_v33  ;;  %v7033_v29 = vsub.f32 %v6798_v3, %v6761_v49 }
 0x205   : > { %v6111_v57 = vpop.eup %6110  ;;  %v11629_v55 = vmax.f32 %v6802_v4, 0.0  ;;  %v2078_v60 = vand.u32 2147483647, %v6991_v22  ;;  %v1773_v42 = vmul.f32 1.442695, %v1635_v61  ;;  %v11631_v36 = vmax.f32 %v6810_v7, 0.0 }
 0x206   : > { %v7035_v39 = vpop.eup %6112  ;;  %v1509_v37 = vand.u32 2147483647, %v7006_v20  ;;  %v2038_v19 = vmul.f32 0.6931472, %v6109_v31  ;;  %v1638_v17 = vsub.f32 0.0, %v1510_v41  ;;  %6122 = vlog2.f32 %v2072_v45 }
 0x207   : > { %v7039_v43 = vadd.f32 %v2035_v38, %v11629_v55  ;;  %v7043_v0 = vpop.eup %6114  ;;  %v7047_v15 = vadd.f32 %v2017_v40, %v11631_v36  ;;  %v2020_v23 = vmul.f32 0.6931472, %v6111_v57  ;;  %v2066_v4 = vmul.f32 -0.5, %v6997_v33 }
 0x208   : > { %v7053_v38 = vsub.f32 %v6798_v3, %v6763_v50  ;;  %vm7055_vm7 = vcmp.lt.f32.partialorder %v2060_v47, 0.0004427343  ;;  %6124 = vlog2.f32 %v2063_v46  ;;  %v2090_v7 = vadd.f32 1.0, %v7035_v39 }
 0x209   : > { %11630 = vst [vmem:[#allocation20_spill] sm:$0xff] %v7039_v43  ;;  %11632 = vst [vmem:[#allocation21_spill] sm:$0xff] %v7047_v15  ;;  %v1512_v31 = vand.u32 2147483647, %v7033_v29  ;;  %v7063_v41 = vsub.f32 %v6919_v27, %v6765_v53  ;;  %v7065_v40 = vpop.eup %6116  ;;  %vm7067_vm8 = vcmp.lt.f32.partialorder %v2051_v28, 0.0004427343  ;;  %6126 = vpow2.f32 %v1773_v42 }
 0x20a   : > { %v2081_v50 = vadd.f32 1.0, %v7043_v0  ;;  %v1637_v3 = vsub.f32 0.0, %v1509_v37  ;;  %v7074_v47 = vsub.f32 %v6919_v27, %v6767_v54  ;;  %v6119_v57 = vpop.eup %6118  ;;  %v2044_v53 = vsel %vm6999_vm5, %v6995_v52, %v2038_v19 }
 0x20b   : > { %v2076_v46 = vadd.f32 1.0, %v2075_v56  ;;  %v2069_v55 = vand.u32 2147483647, %v6997_v33  ;;  %v1779_v28 = vmul.f32 1.442695, %v1638_v17  ;;  %v6121_v36 = vpop.eup %6120  ;;  %v2026_v49 = vsel %vm7013_vm6, %v7011_v8, %v2020_v23 }
 0x20c   : > { %v2067_v42 = vadd.f32 1.0, %v2066_v4  ;;  %v1511_v37 = vand.u32 2147483647, %v7053_v38  ;;  %v7086_v54 = vsub.f32 %v6919_v27, %v6773_v58  ;;  %6128 = vlog2.f32 %v2090_v7 }
 0x20d   : > { %v2108_v25 = vadd.f32 1.0, %v7065_v40  ;;  %v1640_v52 = vsub.f32 0.0, %v1512_v31  ;;  %v1514_v56 = vand.u32 2147483647, %v7063_v41  ;;  %v2056_v19 = vmul.f32 0.6931472, %v6119_v57 }
 0x20e   : > { %6130 = vlog2.f32 %v2081_v50  ;;  %v1777_v17 = vmul.f32 1.442695, %v1637_v3  ;;  %v1513_v43 = vand.u32 2147483647, %v7074_v47  ;;  %v2047_v14 = vmul.f32 0.6931472, %v6121_v36 }
 0x20f   : > { %v2093_v8 = vmul.f32 -0.5, %v7035_v39  ;;  %v2084_v23 = vmul.f32 -0.5, %v7043_v0  ;;  %6132 = vpow2.f32 %v1779_v28  ;;  %v11637_v58 = vmax.f32 %v6826_v13, 0.0 }
 0x210   : > { %v2077_v7 = vmul.f32 %v6991_v22, %v2076_v46  ;;  %v1639_v31 = vsub.f32 0.0, %v1511_v37  ;;  %v1516_v15 = vand.u32 2147483647, %v7086_v54  ;;  %v11638_v50 = vmax.f32 %v6830_v18, 0.0  ;;  %v6123_v28 = vpop.eup %6122 }
 0x211   : > { %v7095_v4 = vadd.f32 %v2044_v53, %v11637_v58  ;;  %vm7103_vm9 = vcmp.lt.f32.partialorder %v2078_v60, 0.0004427343  ;;  %vm7107_vm10 = vcmp.lt.f32.partialorder %v2069_v55, 0.0004427343  ;;  %6134 = vlog2.f32 %v2108_v25 }
 0x212   : > { %v7101_v3 = vadd.f32 %v2026_v49, %v11638_v50  ;;  %v1783_v13 = vmul.f32 1.442695, %v1640_v52  ;;  %v1642_v53 = vsub.f32 0.0, %v1514_v56  ;;  %v2062_v22 = vsel %vm7055_vm7, %v7022_v48, %v2056_v19  ;;  %v6125_v60 = vpop.eup %6124 }
 0x213   : > { %v2068_v18 = vmul.f32 %v6997_v33, %v2067_v42  ;;  %6136 = vpow2.f32 %v1777_v17  ;;  %v1641_v49 = vsub.f32 0.0, %v1513_v43  ;;  %v2053_v46 = vsel %vm7067_vm8, %v7027_v16, %v2047_v14  ;;  %v7119_v52 = vpop.eup %6126 }
 0x214   : > { %v2094_v55 = vadd.f32 1.0, %v2093_v8  ;;  %v2096_v37 = vand.u32 2147483647, %v7035_v39  ;;  %v2085_v25 = vadd.f32 1.0, %v2084_v23  ;;  %v2087_v56 = vand.u32 2147483647, %v7043_v0 }
 0x215   : > { %v1382_v61 = vmax.f32 %v6988_v12, 0.0  ;;  %v1781_v48 = vmul.f32 1.442695, %v1639_v31  ;;  %v1644_v19 = vsub.f32 0.0, %v1516_v15  ;;  %v11643_v33 = vmax.f32 %v6842_v34, 0.0 }
 0x216   : > { %v2111_v42 = vmul.f32 -0.5, %v7065_v40  ;;  %6138 = vpow2.f32 %v1783_v13  ;;  %v1787_v16 = vmul.f32 1.442695, %v1642_v53  ;;  %v11644_v45 = vmax.f32 %v6846_v35, 0.0  ;;  %v6129_v58 = vpop.eup %6128 }
 0x217   : > { %v7125_v43 = vadd.f32 %v2062_v22, %v11643_v33  ;;  %v2074_v14 = vmul.f32 0.6931472, %v6123_v28  ;;  %v2065_v8 = vmul.f32 0.6931472, %v6125_v60  ;;  %v1785_v23 = vmul.f32 1.442695, %v1641_v49 }
 0x218   : > { %v7130_v17 = vadd.f32 %v2053_v46, %v11644_v45  ;;  %v2095_v50 = vmul.f32 %v7035_v39, %v2094_v55  ;;  %vm7133_vm11 = vcmp.lt.f32.partialorder %v2096_v37, 0.0004427343  ;;  %v2086_v34 = vmul.f32 %v7043_v0, %v2085_v25  ;;  %v6131_v13 = vpop.eup %6130 }
 0x219   : > { %v2099_v31 = vadd.f32 1.0, %v7119_v52  ;;  %vm7139_vm12 = vcmp.lt.f32.partialorder %v2087_v56, 0.0004427343  ;;  %6140 = vpow2.f32 %v1781_v48  ;;  %v1791_v35 = vmul.f32 1.442695, %v1644_v19  ;;  %v7147_v39 = vpop.eup %6132 }
 0x21a   : > { %v7145_v28 = vsub.f32 %v6919_v27, %v6775_v59  ;;  %v2112_v22 = vadd.f32 1.0, %v2111_v42  ;;  %v2114_v49 = vand.u32 2147483647, %v7065_v40  ;;  %v1381_v0 = vmax.f32 %v7006_v20, 0.0 }
 0x21b   : > { %6142 = vpow2.f32 %v1787_v16  ;;  %v2080_v60 = vsel %vm7103_vm9, %v2077_v7, %v2074_v14  ;;  %v2071_v46 = vsel %vm7107_vm10, %v2068_v18, %v2065_v8  ;;  %v2092_v55 = vmul.f32 0.6931472, %v6129_v58  ;;  %v6135_v37 = vpop.eup %6134 }
 0x21c   : > { %6144 = vpow2.f32 %v1785_v23  ;;  %v2083_v25 = vmul.f32 0.6931472, %v6131_v13  ;;  %v2102_v59 = vmul.f32 -0.5, %v7119_v52  ;;  %v2126_v19 = vadd.f32 1.0, %v7147_v39 }
 0x21d   : > { %6146 = vlog2.f32 %v2099_v31  ;;  %v7157_v48 = vpop.eup %6136  ;;  %v1515_v57 = vand.u32 2147483647, %v7145_v28  ;;  %v7163_v7 = vsub.f32 %v6919_v27, %v6784_v62  ;;  %v11649_v36 = vmax.f32 %v6862_v32, 0.0 }
 0x21e   : > { %6148 = vpow2.f32 %v1791_v35  ;;  %v11650_v33 = vmax.f32 %v6869_v51, 0.0  ;;  %v2113_v16 = vmul.f32 %v7065_v40, %v2112_v22  ;;  %vm7174_vm13 = vcmp.lt.f32.partialorder %v2114_v49, 0.0004427343 }
 0x21f   : > { %v7167_v18 = vadd.f32 %v2080_v60, %v11649_v36  ;;  %v2098_v14 = vsel %vm7133_vm11, %v2095_v50, %v2092_v55  ;;  %v2110_v8 = vmul.f32 0.6931472, %v6135_v37  ;;  %v2089_v51 = vsel %vm7139_vm12, %v2086_v34, %v2083_v25 }
 0x220   : > { %v7171_v42 = vadd.f32 %v2071_v46, %v11650_v33  ;;  %v7182_v23 = vpop.eup %6138  ;;  %v2103_v58 = vadd.f32 1.0, %v2102_v59  ;;  %v2105_v40 = vand.u32 2147483647, %v7119_v52  ;;  %v2117_v31 = vadd.f32 1.0, %v7157_v48 }
 0x221   : > { %6150 = vlog2.f32 %v2126_v19  ;;  %v2129_v13 = vmul.f32 -0.5, %v7147_v39  ;;  %v1643_v15 = vsub.f32 0.0, %v1515_v57  ;;  %v1518_v50 = vand.u32 2147483647, %v7163_v7 }
 0x222   : > { %v11653_v35 = vmax.f32 %v6891_v21, 0.0  ;;  %v7198_v34 = vsub.f32 %v6919_v27, %v6786_v63  ;;  %v11655_v46 = vmax.f32 %v6903_v30, 0.0  ;;  %v2116_v37 = vsel %vm7174_vm13, %v2113_v16, %v2110_v8 }
 0x223   : > { %v7200_v60 = vpop.eup %6140  ;;  %v2144_v21 = vadd.f32 1.0, %v7182_v23  ;;  %v7211_v25 = vsub.f32 %v6919_v27, %v6792_v1  ;;  %v2104_v63 = vmul.f32 %v7119_v52, %v2103_v58  ;;  %vm7216_vm14 = vcmp.lt.f32.partialorder %v2105_v40, 0.0004427343 }
 0x224   : > { %v7192_v22 = vadd.f32 %v2098_v14, %v11653_v35  ;;  %v7204_v55 = vadd.f32 %v2089_v51, %v11655_v46  ;;  %6152 = vlog2.f32 %v2117_v31  ;;  %v2120_v30 = vmul.f32 -0.5, %v7157_v48 }
 0x225   : > { %v7213_v59 = vpop.eup %6142  ;;  %v2130_v36 = vadd.f32 1.0, %v2129_v13  ;;  %v2132_v33 = vand.u32 2147483647, %v7147_v39  ;;  %v1789_v16 = vmul.f32 1.442695, %v1643_v15  ;;  %v1646_v45 = vsub.f32 0.0, %v1518_v50 }
 0x226   : > { %11654 = vst [vmem:[#allocation22_spill] sm:$0xff] %v7192_v22  ;;  %v7221_v57 = vpop.eup %6144  ;;  %v11658_v14 = vmax.f32 %v6913_v44, 0.0  ;;  %v2135_v52 = vadd.f32 1.0, %v7200_v60  ;;  %v1517_v58 = vand.u32 2147483647, %v7198_v34  ;;  %6154 = vlog2.f32 %v2144_v21 }
 0x227   : > { %v6147_v1 = vpop.eup %6146  ;;  %v2162_v31 = vadd.f32 1.0, %v7213_v59  ;;  %v1520_v13 = vand.u32 2147483647, %v7211_v25  ;;  %v7237_v15 = vsub.f32 %v6919_v27, %v6794_v2  ;;  %v2121_v44 = vadd.f32 1.0, %v2120_v30 }
 0x228   : > { %v7226_v8 = vadd.f32 %v2116_v37, %v11658_v14  ;;  %v7231_v40 = vpop.eup %6148  ;;  %v2123_v50 = vand.u32 2147483647, %v7157_v48  ;;  %v2147_v35 = vmul.f32 -0.5, %v7182_v23  ;;  %v2153_v46 = vadd.f32 1.0, %v7221_v57 }
 0x229   : > { %v2101_v37 = vmul.f32 0.6931472, %v6147_v1  ;;  %v2131_v14 = vmul.f32 %v7147_v39, %v2130_v36  ;;  %vm7243_vm15 = vcmp.lt.f32.partialorder %v2132_v33, 0.0004427343  ;;  %6156 = vpow2.f32 %v1789_v16 }
 0x22a   : > { %11659 = vst [vmem:[#allocation23_spill] sm:$0xff] %v7226_v8  ;;  %v1795_v51 = vmul.f32 1.442695, %v1646_v45  ;;  %v2150_v53 = vand.u32 2147483647, %v7182_v23  ;;  %6158 = vlog2.f32 %v2135_v52  ;;  %v2180_v2 = vadd.f32 1.0, %v7231_v40 }
 0x22b   : > { %v1645_v30 = vsub.f32 0.0, %v1517_v58  ;;  %v6151_v49 = vpop.eup %6150  ;;  %6160 = vlog2.f32 %v2162_v31  ;;  %v1648_v32 = vsub.f32 0.0, %v1520_v13  ;;  %v1519_v62 = vand.u32 2147483647, %v7237_v15 }
 0x22c   : > { %v7252_v39 = vsub.f32 %v6919_v27, %v6804_v5  ;;  %v2122_v36 = vmul.f32 %v7157_v48, %v2121_v44  ;;  %vm7255_vm1 = vcmp.lt.f32.partialorder %v2123_v50, 0.0004427343  ;;  %v2148_v16 = vadd.f32 1.0, %v2147_v35 }
 0x22d   : > { %6162 = vlog2.f32 %v2153_v46  ;;  %v2107_v1 = vsel %vm7216_vm14, %v2104_v63, %v2101_v37  ;;  %v2138_v52 = vmul.f32 -0.5, %v7200_v60  ;;  %v2128_v31 = vmul.f32 0.6931472, %v6151_v49 }
 0x22e   : > { %6164 = vpow2.f32 %v1795_v51  ;;  %v6153_v5 = vpop.eup %6152  ;;  %v2165_v48 = vmul.f32 -0.5, %v7213_v59  ;;  %v1793_v13 = vmul.f32 1.442695, %v1645_v30  ;;  %vm7265_vm2 = vcmp.lt.f32.partialorder %v2150_v53, 0.0004427343 }
 0x22f   : > { %6166 = vlog2.f32 %v2180_v2  ;;  %v1799_v50 = vmul.f32 1.442695, %v1648_v32  ;;  %v1647_v35 = vsub.f32 0.0, %v1519_v62  ;;  %v1522_v19 = vand.u32 2147483647, %v7252_v39 }
 0x230   : > { %v7272_v63 = vsub.f32 %v6919_v27, %v6806_v6  ;;  %v11666_v51 = vmax.f32 %v6967_v9, 0.0  ;;  %v2149_v49 = vmul.f32 %v7182_v23, %v2148_v16  ;;  %v2141_v37 = vand.u32 2147483647, %v7200_v60  ;;  %v6155_v2 = vpop.eup %6154 }
 0x231   : > { %v2156_v53 = vmul.f32 -0.5, %v7221_v57  ;;  %v2119_v30 = vmul.f32 0.6931472, %v6153_v5  ;;  %v2139_v32 = vadd.f32 1.0, %v2138_v52  ;;  %v2168_v62 = vand.u32 2147483647, %v7213_v59 }
 0x232   : > { %v7276_v46 = vadd.f32 %v2107_v1, %v11666_v51  ;;  %v7284_v58 = vsub.f32 %v6919_v27, %v6814_v10  ;;  %v2134_v6 = vsel %vm7243_vm15, %v2131_v14, %v2128_v31  ;;  %v2166_v9 = vadd.f32 1.0, %v2165_v48 }
 0x233   : > { %v2159_v1 = vand.u32 2147483647, %v7221_v57  ;;  %6168 = vpow2.f32 %v1793_v13  ;;  %v7289_v23 = vpop.eup %6156  ;;  %v1797_v16 = vmul.f32 1.442695, %v1647_v35  ;;  %v1650_v51 = vsub.f32 0.0, %v1522_v19 }
 0x234   : > { %11667 = vst [vmem:[#allocation24_spill] sm:$0xff] %v7276_v46  ;;  %6170 = vpow2.f32 %v1799_v50  ;;  %v1521_v52 = vand.u32 2147483647, %v7272_v63  ;;  %v6159_v5 = vpop.eup %6158  ;;  %v2146_v45 = vmul.f32 0.6931472, %v6155_v2  ;;  %v2157_v10 = vadd.f32 1.0, %v2156_v53 }
 0x235   : > { %vm7292_vm3 = vcmp.lt.f32.partialorder %v2141_v37, 0.0004427343  ;;  %v2183_v14 = vmul.f32 -0.5, %v7231_v40  ;;  %v6161_v21 = vpop.eup %6160  ;;  %v2125_v31 = vsel %vm7255_vm1, %v2122_v36, %v2119_v30  ;;  %v2140_v48 = vmul.f32 %v7200_v60, %v2139_v32 }
 0x236   : > { %v2186_v13 = vand.u32 2147483647, %v7231_v40  ;;  %v1524_v50 = vand.u32 2147483647, %v7284_v58  ;;  %v7304_v19 = vadd.f32 %v2134_v6, %v1382_v61  ;;  %vm7306_vm4 = vcmp.lt.f32.partialorder %v2168_v62, 0.0004427343 }
 0x237   : > { %v6163_v35 = vpop.eup %6162  ;;  %v2171_v53 = vadd.f32 1.0, %v7289_v23  ;;  %v7313_v36 = vsub.f32 %v6919_v27, %v6816_v11  ;;  %v2167_v33 = vmul.f32 %v7213_v59, %v2166_v9  ;;  %vm7318_vm5 = vcmp.lt.f32.partialorder %v2159_v1, 0.0004427343 }
 0x238   : > { %11670 = vst [vmem:[#allocation25_spill] sm:$0xff] %v7304_v19  ;;  %v7315_v60 = vpop.eup %6164  ;;  %6172 = vpow2.f32 %v1797_v16  ;;  %v1803_v12 = vmul.f32 1.442695, %v1650_v51  ;;  %v1649_v61 = vsub.f32 0.0, %v1521_v52  ;;  %v7324_v32 = vadd.f32 %v2125_v31, %v1381_v0 }
 0x239   : > { %v6167_v30 = vpop.eup %6166  ;;  %v2152_v11 = vsel %vm7265_vm2, %v2149_v49, %v2146_v45  ;;  %v2158_v62 = vmul.f32 %v7221_v57, %v2157_v10  ;;  %v2184_v6 = vadd.f32 1.0, %v2183_v14  ;;  %v2137_v19 = vmul.f32 0.6931472, %v6159_v5  ;;  %v11696_v14 = vld [vmem:[#allocation14_spill] sm:$0xff] }
 0x23a   : > { %11675 = vst [vmem:[#allocation26_spill] sm:$0xff] %v7324_v32  ;;  %vm7329_vm6 = vcmp.lt.f32.partialorder %v2186_v13, 0.0004427343  ;;  %v1652_v1 = vsub.f32 0.0, %v1524_v50  ;;  %6174 = vlog2.f32 %v2171_v53  ;;  %v2198_v16 = vadd.f32 1.0, %v7315_v60 }
 0x23b   : > { %v1523_v20 = vand.u32 2147483647, %v7313_v36  ;;  %v7338_v0 = vsub.f32 %v6919_v27, %v6834_v24  ;;  %v11678_v57 = vmax.f32 %v7033_v29, 0.0  ;;  %v2164_v44 = vmul.f32 0.6931472, %v6161_v21 }
 0x23c   : > { %6176 = vpow2.f32 %v1803_v12  ;;  %v1801_v49 = vmul.f32 1.442695, %v1649_v61  ;;  %v2155_v52 = vmul.f32 0.6931472, %v6163_v35  ;;  %v2182_v5 = vmul.f32 0.6931472, %v6167_v30 }
 0x23d   : > { %v7342_v45 = vadd.f32 %v2152_v11, %v11678_v57  ;;  %v7344_v51 = vpop.eup %6168  ;;  %v2185_v10 = vmul.f32 %v7231_v40, %v2184_v6  ;;  %v2143_v24 = vsel %vm7292_vm3, %v2140_v48, %v2137_v19  ;;  %v2174_v29 = vmul.f32 -0.5, %v7289_v23  ;;  %v794_v48 = vpop.permute.xlu0 %793 }
 0x23e   : > { %v7348_v31 = vpop.eup %6170  ;;  %v1807_v21 = vmul.f32 1.442695, %v1652_v1  ;;  %6178 = vlog2.f32 %v2198_v16  ;;  %v1651_v50 = vsub.f32 0.0, %v1523_v20  ;;  %v1526_v53 = vand.u32 2147483647, %v7338_v0  ;;  %v798_v16 = vpop.permute.xlu1 %797 }
 0x23f   : > { %11679 = vst [vmem:[#allocation27_spill] sm:$0xff] %v7342_v45  ;;  %v7357_v35 = vsub.f32 %v6919_v27, %v6836_v26  ;;  %v2170_v40 = vsel %vm7306_vm4, %v2167_v33, %v2164_v44  ;;  %v2189_v12 = vadd.f32 1.0, %v7344_v51  ;;  %6180 = vpow2.f32 %v1801_v49 }
 0x240   : > { %v2161_v19 = vsel %vm7318_vm5, %v2158_v62, %v2155_v52  ;;  %v2188_v61 = vsel %vm7329_vm6, %v2185_v10, %v2182_v5  ;;  %v2177_v30 = vand.u32 2147483647, %v7289_v23  ;;  %v2216_v26 = vadd.f32 1.0, %v7348_v31 }
 0x241   : > { %v11680_v37 = vmax.f32 %v7053_v38, 0.0  ;;  %v2175_v6 = vadd.f32 1.0, %v2174_v29  ;;  %v2201_v1 = vmul.f32 -0.5, %v7315_v60  ;;  %6182 = vpow2.f32 %v1807_v21 }
 0x242   : > { %v7369_v11 = vpop.eup %6172  ;;  %v11682_v2 = vmax.f32 %v7063_v41, 0.0  ;;  %v1805_v59 = vmul.f32 1.442695, %v1651_v50  ;;  %v1654_v20 = vsub.f32 0.0, %v1526_v53  ;;  %v1525_v57 = vand.u32 2147483647, %v7357_v35 }
 0x243   : > { %v7373_v33 = vadd.f32 %v2143_v24, %v11680_v37  ;;  %v11684_v44 = vmax.f32 %v7074_v47, 0.0  ;;  %v11686_v38 = vmax.f32 %v7086_v54, 0.0  ;;  %6184 = vlog2.f32 %v2189_v12 }
 0x244   : > { %v7378_v62 = vadd.f32 %v2170_v40, %v11682_v2  ;;  %v2192_v5 = vmul.f32 -0.5, %v7344_v51  ;;  %v6175_v10 = vpop.eup %6174  ;;  %vm7390_vm7 = vcmp.lt.f32.partialorder %v2177_v30, 0.0004427343  ;;  %6186 = vlog2.f32 %v2216_v26  ;;  %v805_v40 = vpop.permute.xlu0 %804 }
 0x245   : > { %11681 = vst [vmem:[#allocation28_spill] sm:$0xff] %v7373_v33  ;;  %v7383_v49 = vadd.f32 %v2161_v19, %v11684_v44  ;;  %v7387_v52 = vadd.f32 %v2188_v61, %v11686_v38  ;;  %v2207_v24 = vadd.f32 1.0, %v7369_v11  ;;  %v7396_v29 = vsub.f32 %v6919_v27, %v798_v16 }
 0x246   : > { %11683 = vst [vmem:[#allocation29_spill] sm:$0xff] %v7378_v62  ;;  %v7398_v47 = vpop.eup %6176  ;;  %v2176_v54 = vmul.f32 %v7289_v23, %v2175_v6  ;;  %v2202_v21 = vadd.f32 1.0, %v2201_v1  ;;  %v2204_v50 = vand.u32 2147483647, %v7315_v60  ;;  %v2219_v53 = vmul.f32 -0.5, %v7348_v31  ;;  %v809_v23 = vpop.permute.xlu1 %808 }
 0x247   : > { %11685 = vst [vmem:[#allocation30_spill] sm:$0xff] %v7383_v49  ;;  %11687 = vst [vmem:[#allocation31_spill] sm:$0xff] %v7387_v52  ;;  %6188 = vpow2.f32 %v1805_v59  ;;  %v1811_v12 = vmul.f32 1.442695, %v1654_v20  ;;  %v1653_v19 = vsub.f32 0.0, %v1525_v57  ;;  %v7404_v61 = vsub.f32 %v6919_v27, %v794_v48 }
 0x248   : > { %v2193_v30 = vadd.f32 1.0, %v2192_v5  ;;  %v2195_v26 = vand.u32 2147483647, %v7344_v51  ;;  %v2222_v37 = vand.u32 2147483647, %v7348_v31  ;;  %v6179_v6 = vpop.eup %6178  ;;  %6190 = vlog2.f32 %v2207_v24 }
 0x249   : > { %v2173_v1 = vmul.f32 0.6931472, %v6175_v10  ;;  %v2234_v2 = vadd.f32 1.0, %v7398_v47  ;;  %v1528_v59 = vand.u32 2147483647, %v7396_v29  ;;  %v7411_v20 = vpop.eup %6180  ;;  %v2203_v27 = vmul.f32 %v7315_v60, %v2202_v21 }
 0x24a   : > { %vm7414_vm8 = vcmp.lt.f32.partialorder %v2204_v50, 0.0004427343  ;;  %v2220_v57 = vadd.f32 1.0, %v2219_v53  ;;  %v2210_v44 = vmul.f32 -0.5, %v7369_v11  ;;  %6192 = vpow2.f32 %v1811_v12  ;;  %v813_v53 = vpop.permute.xlu0 %812  ;;  %v817_v9 = vpop.permute.xlu1 %816 }
 0x24b   : > { %v1809_v5 = vmul.f32 1.442695, %v1653_v19  ;;  %v1527_v10 = vand.u32 2147483647, %v7404_v61  ;;  %v7421_v24 = vpop.eup %6182  ;;  %v2200_v16 = vmul.f32 0.6931472, %v6179_v6  ;;  %v7424_v56 = vmul.f32 %v7344_v51, %v2193_v30 }
 0x24c   : > { %vm7426_vm9 = vcmp.lt.f32.partialorder %v2195_v26, 0.0004427343  ;;  %v2213_v21 = vand.u32 2147483647, %v7369_v11  ;;  %v2179_v12 = vsel %vm7390_vm7, %v2176_v54, %v2173_v1  ;;  %vm7434_vm10 = vcmp.lt.f32.partialorder %v2222_v37, 0.0004427343 }
 0x24d   : > { %6194 = vlog2.f32 %v2234_v2  ;;  %v2225_v51 = vadd.f32 1.0, %v7411_v20  ;;  %v1656_v30 = vsub.f32 0.0, %v1528_v59  ;;  %v6185_v26 = vpop.eup %6184  ;;  %v2221_v6 = vmul.f32 %v7348_v31, %v2220_v57 }
 0x24e   : > { %v2211_v38 = vadd.f32 1.0, %v2210_v44  ;;  %v2237_v13 = vmul.f32 -0.5, %v7398_v47  ;;  %v7442_v50 = vsub.f32 %v11696_v14, %v809_v23  ;;  %v6187_v41 = vpop.eup %6186  ;;  %v2252_v54 = vadd.f32 1.0, %v7421_v24 }
 0x24f   : > { %6196 = vpow2.f32 %v1809_v5  ;;  %v1655_v37 = vsub.f32 0.0, %v1527_v10  ;;  %v7446_v1 = vsub.f32 %v11696_v14, %v805_v40  ;;  %v11697_v2 = vmax.f32 %v7145_v28, 0.0 }
 0x250   : > { %v2206_v31 = vsel %vm7414_vm8, %v2203_v27, %v2200_v16  ;;  %v2240_v57 = vand.u32 2147483647, %v7398_v47  ;;  %v2191_v52 = vmul.f32 0.6931472, %v6185_v26  ;;  %6198 = vlog2.f32 %v2225_v51  ;;  %v821_v27 = vpop.permute.xlu0 %820 }
 0x251   : > { %v7450_v59 = vadd.f32 %v2179_v12, %v11697_v2  ;;  %v7456_v44 = vpop.eup %6188  ;;  %v2228_v5 = vmul.f32 -0.5, %v7411_v20  ;;  %v1815_v10 = vmul.f32 1.442695, %v1656_v30  ;;  %v2218_v40 = vmul.f32 0.6931472, %v6187_v41 }
 0x252   : > { %v2212_v62 = vmul.f32 %v7369_v11, %v2211_v38  ;;  %vm7460_vm11 = vcmp.lt.f32.partialorder %v2213_v21, 0.0004427343  ;;  %v2238_v48 = vadd.f32 1.0, %v2237_v13  ;;  %v1530_v16 = vand.u32 2147483647, %v7442_v50  ;;  %v6191_v12 = vpop.eup %6190  ;;  %v825_v21 = vpop.permute.xlu1 %824 }
 0x253   : > { %11698 = vst [vmem:[#allocation14_spill] sm:$0xff] %v7450_v59  ;;  %6200 = vlog2.f32 %v2252_v54  ;;  %v1813_v2 = vmul.f32 1.442695, %v1655_v37  ;;  %v1529_v26 = vand.u32 2147483647, %v7446_v1  ;;  %v7467_v51 = vsub.f32 %v11696_v14, %v817_v9 }
 0x254   : > { %v11701_v30 = vmax.f32 %v7163_v7, 0.0  ;;  %v2231_v11 = vand.u32 2147483647, %v7411_v20  ;;  %v2243_v38 = vadd.f32 1.0, %v7456_v44  ;;  %v7476_v13 = vsub.f32 %v11696_v14, %v813_v53  ;;  %v7478_v23 = vpop.eup %6192 }
 0x255   : > { %v2197_v54 = vsel %vm7426_vm9, %v7424_v56, %v2191_v52  ;;  %vm7483_vm12 = vcmp.lt.f32.partialorder %v2240_v57, 0.0004427343  ;;  %v2229_v7 = vadd.f32 1.0, %v2228_v5  ;;  %v2255_v37 = vmul.f32 -0.5, %v7421_v24 }
 0x256   : > { %v7471_v41 = vadd.f32 %v2206_v31, %v11701_v30  ;;  %6202 = vpow2.f32 %v1815_v10  ;;  %v2224_v31 = vsel %vm7434_vm10, %v2221_v6, %v2218_v40  ;;  %v2209_v53 = vmul.f32 0.6931472, %v6191_v12  ;;  %v7498_v6 = vpop.permute.xlu0 %828 }
 0x257   : > { %v2258_v30 = vand.u32 2147483647, %v7421_v24  ;;  %v6195_v59 = vpop.eup %6194  ;;  %6204 = vpow2.f32 %v1813_v2  ;;  %v1657_v49 = vsub.f32 0.0, %v1529_v26  ;;  %v1532_v56 = vand.u32 2147483647, %v7467_v51 }
 0x258   : > { %11702 = vst [vmem:[#allocation32_spill] sm:$0xff] %v7471_v41  ;;  %v1658_v41 = vsub.f32 0.0, %v1530_v16  ;;  %v7493_v52 = vsub.f32 %v11696_v14, %v825_v21  ;;  %v2239_v60 = vmul.f32 %v7398_v47, %v2238_v48  ;;  %6206 = vlog2.f32 %v2243_v38 }
 0x259   : > { %v2270_v57 = vadd.f32 1.0, %v7478_v23  ;;  %v1531_v19 = vand.u32 2147483647, %v7476_v13  ;;  %v7500_v5 = vpop.eup %6196  ;;  %v11705_v10 = vmax.f32 %v7198_v34, 0.0  ;;  %v2230_v16 = vmul.f32 %v7411_v20, %v2229_v7 }
 0x25a   : > { %vm7507_vm13 = vcmp.lt.f32.partialorder %v2231_v11, 0.0004427343  ;;  %v2256_v47 = vadd.f32 1.0, %v2255_v37  ;;  %v2246_v48 = vmul.f32 -0.5, %v7456_v44  ;;  %v11709_v2 = vmax.f32 %v7211_v25, 0.0  ;;  %v6199_v34 = vpop.eup %6198 }
 0x25b   : > { %v7504_v40 = vadd.f32 %v2197_v54, %v11705_v10  ;;  %v2236_v38 = vmul.f32 0.6931472, %v6195_v59  ;;  %v2249_v21 = vand.u32 2147483647, %v7456_v44  ;;  %v1819_v45 = vmul.f32 1.442695, %v1658_v41 }
 0x25c   : > { %v7514_v26 = vadd.f32 %v2224_v31, %v11709_v2  ;;  %v2215_v54 = vsel %vm7460_vm11, %v2212_v62, %v2209_v53  ;;  %vm7519_vm14 = vcmp.lt.f32.partialorder %v2258_v30, 0.0004427343  ;;  %v1817_v11 = vmul.f32 1.442695, %v1657_v49 }
 0x25d   : > { %11706 = vst [vmem:[#allocation33_spill] sm:$0xff] %v7504_v40  ;;  %v1660_v7 = vsub.f32 0.0, %v1532_v56  ;;  %v1534_v37 = vand.u32 2147483647, %v7493_v52  ;;  %6208 = vlog2.f32 %v2270_v57  ;;  %v2261_v25 = vadd.f32 1.0, %v7500_v5  ;;  %v6201_v41 = vpop.eup %6200 }
 0x25e   : > { %11710 = vst [vmem:[#allocation34_spill] sm:$0xff] %v7514_v26  ;;  %v1659_v31 = vsub.f32 0.0, %v1531_v19  ;;  %v7526_v59 = vsub.f32 %v11696_v14, %v821_v27  ;;  %v2257_v10 = vmul.f32 %v7421_v24, %v2256_v47  ;;  %v2247_v28 = vadd.f32 1.0, %v2246_v48  ;;  %v833_v19 = vpop.permute.xlu1 %832  ;;  %v7537_v27 = vpop.permute.xlu0 %836 }
 0x25f   : > { %v11713_v49 = vmax.f32 %v7237_v15, 0.0  ;;  %v2242_v56 = vsel %vm7483_vm12, %v2239_v60, %v2236_v38  ;;  %v2227_v57 = vmul.f32 0.6931472, %v6199_v34  ;;  %6210 = vpow2.f32 %v1819_v45 }
 0x260   : > { %v7539_v2 = vpop.eup %6202  ;;  %v2273_v24 = vmul.f32 -0.5, %v7478_v23  ;;  %6212 = vpow2.f32 %v1817_v11  ;;  %v1823_v47 = vmul.f32 1.442695, %v1660_v7  ;;  %v1662_v48 = vsub.f32 0.0, %v1534_v37 }
 0x261   : > { %v7533_v30 = vadd.f32 %v2215_v54, %v11713_v49  ;;  %v2254_v53 = vmul.f32 0.6931472, %v6201_v41  ;;  %vm7542_vm15 = vcmp.lt.f32.partialorder %v2249_v21, 0.0004427343  ;;  %6214 = vlog2.f32 %v2261_v25  ;;  %v7547_v45 = vpop.eup %6204 }
 0x262   : > { %v1821_v9 = vmul.f32 1.442695, %v1659_v31  ;;  %v1533_v60 = vand.u32 2147483647, %v7526_v59  ;;  %v11717_v38 = vmax.f32 %v7252_v39, 0.0  ;;  %v2248_v54 = vmul.f32 %v7456_v44, %v2247_v28  ;;  %v6207_v21 = vpop.eup %6206  ;;  %v7567_v12 = vpop.permute.xlu0 %844 }
 0x263   : > { %11714 = vst [vmem:[#allocation35_spill] sm:$0xff] %v7533_v30  ;;  %v7556_v7 = vsub.f32 %v11696_v14, %v833_v19  ;;  %v2233_v37 = vsel %vm7507_vm13, %v2230_v16, %v2227_v57  ;;  %v2276_v25 = vand.u32 2147483647, %v7478_v23  ;;  %v2264_v31 = vmul.f32 -0.5, %v7500_v5 }
 0x264   : > { %v7551_v34 = vadd.f32 %v2242_v56, %v11717_v38  ;;  %v2288_v41 = vadd.f32 1.0, %v7539_v2  ;;  %v2274_v39 = vadd.f32 1.0, %v2273_v24  ;;  %6216 = vpow2.f32 %v1823_v47  ;;  %v841_v47 = vpop.permute.xlu1 %840 }
 0x265   : > { %v1827_v44 = vmul.f32 1.442695, %v1662_v48  ;;  %v2260_v28 = vsel %vm7519_vm14, %v2257_v10, %v2254_v53  ;;  %v2279_v56 = vadd.f32 1.0, %v7547_v45  ;;  %6218 = vpow2.f32 %v1821_v9 }
 0x266   : > { %11718 = vst [vmem:[#allocation36_spill] sm:$0xff] %v7551_v34  ;;  %v1661_v19 = vsub.f32 0.0, %v1533_v60  ;;  %v11719_v16 = vmax.f32 %v7272_v63, 0.0  ;;  %v2245_v38 = vmul.f32 0.6931472, %v6207_v21  ;;  %v2265_v10 = vadd.f32 1.0, %v2264_v31 }
 0x267   : > { %v2267_v24 = vand.u32 2147483647, %v7500_v5  ;;  %v1536_v49 = vand.u32 2147483647, %v7556_v7  ;;  %v6209_v48 = vpop.eup %6208  ;;  %vm7575_vm1 = vcmp.lt.f32.partialorder %v2276_v25, 0.0004427343  ;;  %6220 = vlog2.f32 %v2288_v41 }
 0x268   : > { %v7571_v57 = vadd.f32 %v2233_v37, %v11719_v16  ;;  %v7581_v53 = vsub.f32 %v11696_v14, %v7498_v6  ;;  %v11723_v63 = vmax.f32 %v7284_v58, 0.0  ;;  %v2291_v60 = vmul.f32 -0.5, %v7539_v2 }
 0x269   : > { %6222 = vpow2.f32 %v1827_v44  ;;  %v7589_v37 = vpop.eup %6210  ;;  %v2275_v25 = vmul.f32 %v7478_v23, %v2274_v39  ;;  %v1825_v41 = vmul.f32 1.442695, %v1661_v19  ;;  %v2251_v58 = vsel %vm7542_vm15, %v2248_v54, %v2245_v38  ;;  %v7607_v19 = vpop.permute.xlu0 %852 }
 0x26a   : > { %11720 = vst [vmem:[#allocation37_spill] sm:$0xff] %v7571_v57  ;;  %v7585_v9 = vadd.f32 %v2260_v28, %v11723_v63  ;;  %6224 = vlog2.f32 %v2279_v56  ;;  %v7593_v16 = vpop.eup %6212  ;;  %v2272_v6 = vmul.f32 0.6931472, %v6209_v48  ;;  %vm7597_vm2 = vcmp.lt.f32.partialorder %v2267_v24, 0.0004427343 }
 0x26b   : > { %v1664_v63 = vsub.f32 0.0, %v1536_v49  ;;  %v6215_v44 = vpop.eup %6214  ;;  %v2266_v21 = vmul.f32 %v7500_v5, %v2265_v10  ;;  %v1535_v39 = vand.u32 2147483647, %v7581_v53  ;;  %v7605_v56 = vsub.f32 %v11696_v14, %v841_v47  ;;  %v849_v49 = vpop.permute.xlu1 %848 }
 0x26c   : > { %11724 = vst [vmem:[#allocation38_spill] sm:$0xff] %v7585_v9  ;;  %v2292_v15 = vadd.f32 1.0, %v2291_v60  ;;  %v2294_v54 = vand.u32 2147483647, %v7539_v2  ;;  %v2282_v38 = vmul.f32 -0.5, %v7547_v45  ;;  %v2306_v24 = vadd.f32 1.0, %v7589_v37 }
 0x26d   : > { %v11727_v48 = vmax.f32 %v7313_v36, 0.0  ;;  %v2285_v10 = vand.u32 2147483647, %v7547_v45  ;;  %v2297_v23 = vadd.f32 1.0, %v7593_v16  ;;  %6226 = vpow2.f32 %v1825_v41 }
 0x26e   : > { %v7618_v47 = vpop.eup %6216  ;;  %v2278_v60 = vsel %vm7575_vm1, %v2275_v25, %v2272_v6  ;;  %v2263_v31 = vmul.f32 0.6931472, %v6215_v44  ;;  %v2309_v11 = vmul.f32 -0.5, %v7589_v37  ;;  %v1831_v62 = vmul.f32 1.442695, %v1664_v63 }
 0x26f   : > { %v7614_v5 = vadd.f32 %v2251_v58, %v11727_v48  ;;  %v7623_v9 = vpop.eup %6218  ;;  %v1663_v58 = vsub.f32 0.0, %v1535_v39  ;;  %v1538_v48 = vand.u32 2147483647, %v7605_v56  ;;  %v7632_v41 = vmul.f32 %v7539_v2, %v2292_v15 }
 0x270   : > { %vm7634_vm3 = vcmp.lt.f32.partialorder %v2294_v54, 0.0004427343  ;;  %v2283_v25 = vadd.f32 1.0, %v2282_v38  ;;  %6228 = vlog2.f32 %v2306_v24  ;;  %v7639_v6 = vsub.f32 %v11696_v14, %v849_v49  ;;  %v7651_v54 = vpop.permute.xlu0 %860 }
 0x271   : > { %11728 = vst [vmem:[#allocation39_spill] sm:$0xff] %v7614_v5  ;;  %v7629_v5 = vsub.f32 %v11696_v14, %v7537_v27  ;;  %v6221_v63 = vpop.eup %6220  ;;  %v11731_v44 = vmax.f32 %v7338_v0, 0.0  ;;  %vm7645_vm4 = vcmp.lt.f32.partialorder %v2285_v10, 0.0004427343  ;;  %v2312_v2 = vand.u32 2147483647, %v7589_v37  ;;  %v857_v10 = vpop.permute.xlu1 %856 }
 0x272   : > { %6230 = vlog2.f32 %v2297_v23  ;;  %v2324_v15 = vadd.f32 1.0, %v7618_v47  ;;  %v2269_v24 = vsel %vm7597_vm2, %v2266_v21, %v2263_v31  ;;  %v2310_v49 = vadd.f32 1.0, %v2309_v11 }
 0x273   : > { %v7643_v39 = vadd.f32 %v2278_v60, %v11731_v44  ;;  %v7653_v38 = vpop.eup %6222  ;;  %v2315_v0 = vadd.f32 1.0, %v7623_v9  ;;  %6232 = vpow2.f32 %v1831_v62  ;;  %v2300_v44 = vmul.f32 -0.5, %v7593_v16 }
 0x274   : > { %v6225_v60 = vpop.eup %6224  ;;  %v1829_v36 = vmul.f32 1.442695, %v1663_v58  ;;  %v1537_v23 = vand.u32 2147483647, %v7629_v5  ;;  %v2284_v34 = vmul.f32 %v7547_v45, %v2283_v25  ;;  %v2327_v57 = vmul.f32 -0.5, %v7618_v47  ;;  %v7675_v40 = vpop.permute.xlu0 %871 }
 0x275   : > { %11732 = vst [vmem:[#allocation40_spill] sm:$0xff] %v7643_v39  ;;  %v1666_v39 = vsub.f32 0.0, %v1538_v48  ;;  %v1540_v21 = vand.u32 2147483647, %v7639_v6  ;;  %v2290_v11 = vmul.f32 0.6931472, %v6221_v63  ;;  %6234 = vlog2.f32 %v2324_v15 }
 0x276   : > { %v2303_v31 = vand.u32 2147483647, %v7593_v16  ;;  %v2342_v62 = vadd.f32 1.0, %v7653_v38  ;;  %v11735_v28 = vmax.f32 %v7357_v35, 0.0  ;;  %v2281_v48 = vmul.f32 0.6931472, %v6225_v60 }
 0x277   : > { %v7671_v30 = vmul.f32 %v7589_v37, %v2310_v49  ;;  %6236 = vlog2.f32 %v2315_v0  ;;  %v7673_v45 = vpop.eup %6226  ;;  %v2301_v25 = vadd.f32 1.0, %v2300_v44  ;;  %v1835_v26 = vmul.f32 1.442695, %v1666_v39  ;;  %v865_v49 = vpop.permute.xlu1 %864 }
 0x278   : > { %v7668_v58 = vadd.f32 %v2269_v24, %v11735_v28  ;;  %6238 = vpow2.f32 %v1829_v36  ;;  %v1665_v63 = vsub.f32 0.0, %v1537_v23  ;;  %vm7677_vm5 = vcmp.lt.f32.partialorder %v2312_v2, 0.0004427343 }
 0x279   : > { %v2328_v35 = vadd.f32 1.0, %v2327_v57  ;;  %v2318_v24 = vmul.f32 -0.5, %v7623_v9  ;;  %v1668_v37 = vsub.f32 0.0, %v1540_v21  ;;  %v2296_v0 = vsel %vm7634_vm3, %v7632_v41, %v2290_v11 }
 0x27a   : > { %11736 = vst [vmem:[#allocation41_spill] sm:$0xff] %v7668_v58  ;;  %vm7686_vm6 = vcmp.lt.f32.partialorder %v2303_v31, 0.0004427343  ;;  %v2330_v39 = vand.u32 2147483647, %v7618_v47  ;;  %6240 = vlog2.f32 %v2342_v62  ;;  %v7693_v57 = vsub.f32 %v11696_v14, %v7567_v12  ;;  %v6229_v2 = vpop.eup %6228 }
 0x27b   : > { %v2287_v44 = vsel %vm7645_vm4, %v2284_v34, %v2281_v48  ;;  %v2321_v23 = vand.u32 2147483647, %v7623_v9  ;;  %v2333_v20 = vadd.f32 1.0, %v7673_v45  ;;  %v7700_v41 = vsub.f32 %v11696_v14, %v857_v10 }
 0x27c   : > { %v6231_v21 = vpop.eup %6230  ;;  %v2302_v11 = vmul.f32 %v7593_v16, %v2301_v25  ;;  %6242 = vpow2.f32 %v1835_v26  ;;  %v1833_v31 = vmul.f32 1.442695, %v1665_v63  ;;  %v7705_v12 = vsub.f32 %v11696_v14, %v7607_v19  ;;  %v7726_v63 = vpop.permute.xlu0 %879 }
 0x27d   : > { %v7707_v62 = vpop.eup %6232  ;;  %v11741_v34 = vmax.f32 %v7396_v29, 0.0  ;;  %v7714_v28 = vmul.f32 %v7618_v47, %v2328_v35  ;;  %v2319_v10 = vadd.f32 1.0, %v2318_v24  ;;  %v1839_v48 = vmul.f32 1.442695, %v1668_v37  ;;  %v876_v35 = vpop.permute.xlu1 %875 }
 0x27e   : > { %v11743_v60 = vmax.f32 %v7404_v61, 0.0  ;;  %v2308_v26 = vmul.f32 0.6931472, %v6229_v2  ;;  %vm7720_vm7 = vcmp.lt.f32.partialorder %v2330_v39, 0.0004427343  ;;  %v2345_v19 = vmul.f32 -0.5, %v7653_v38 }
 0x27f   : > { %v7711_v27 = vadd.f32 %v2296_v0, %v11741_v34  ;;  %v1539_v29 = vand.u32 2147483647, %v7693_v57  ;;  %v2299_v0 = vmul.f32 0.6931472, %v6231_v21  ;;  %vm7728_vm8 = vcmp.lt.f32.partialorder %v2321_v23, 0.0004427343  ;;  %v6235_v24 = vpop.eup %6234 }
 0x280   : > { %v7718_v16 = vadd.f32 %v2287_v44, %v11743_v60  ;;  %6244 = vlog2.f32 %v2333_v20  ;;  %v1542_v61 = vand.u32 2147483647, %v7700_v41  ;;  %v2360_v60 = vadd.f32 1.0, %v7707_v62  ;;  %v7751_v46 = vpop.permute.xlu0 %887 }
 0x281   : > { %11742 = vst [vmem:[#allocation42_spill] sm:$0xff] %v7711_v27  ;;  %6246 = vpow2.f32 %v1833_v31  ;;  %v1541_v37 = vand.u32 2147483647, %v7705_v12  ;;  %v7736_v39 = vsub.f32 %v11696_v14, %v865_v49  ;;  %v6237_v2 = vpop.eup %6236  ;;  %v2320_v44 = vmul.f32 %v7623_v9, %v2319_v10 }
 0x282   : > { %11744 = vst [vmem:[#allocation43_spill] sm:$0xff] %v7718_v16  ;;  %v2348_v23 = vand.u32 2147483647, %v7653_v38  ;;  %v2336_v21 = vmul.f32 -0.5, %v7673_v45  ;;  %6248 = vpow2.f32 %v1839_v48  ;;  %v7741_v20 = vpop.eup %6238  ;;  %v2314_v34 = vsel %vm7677_vm5, %v7671_v30, %v2308_v26 }
 0x283   : > { %v2346_v31 = vadd.f32 1.0, %v2345_v19  ;;  %v1667_v16 = vsub.f32 0.0, %v1539_v29  ;;  %v2305_v49 = vsel %vm7686_vm6, %v2302_v11, %v2299_v0  ;;  %v2326_v58 = vmul.f32 0.6931472, %v6235_v24  ;;  %v7762_v19 = vpop.permute.xlu1 %883 }
 0x284   : > { %v2339_v9 = vand.u32 2147483647, %v7673_v45  ;;  %v1670_v10 = vsub.f32 0.0, %v1542_v61  ;;  %v6241_v33 = vpop.eup %6240  ;;  %v2317_v32 = vmul.f32 0.6931472, %v6237_v2  ;;  %6250 = vlog2.f32 %v2360_v60 }
 0x285   : > { %v1669_v48 = vsub.f32 0.0, %v1541_v37  ;;  %v1544_v8 = vand.u32 2147483647, %v7736_v39  ;;  %v11749_v30 = vmax.f32 %v7442_v50, 0.0  ;;  %vm7757_vm9 = vcmp.lt.f32.partialorder %v2348_v23, 0.0004427343 }
 0x286   : > { %v2337_v36 = vadd.f32 1.0, %v2336_v21  ;;  %v2351_v11 = vadd.f32 1.0, %v7741_v20  ;;  %v7764_v29 = vpop.eup %6242  ;;  %v11753_v0 = vmax.f32 %v7446_v1, 0.0  ;;  %v2347_v24 = vmul.f32 %v7653_v38, %v2346_v31 }
 0x287   : > { %v7755_v15 = vadd.f32 %v2314_v34, %v11749_v30  ;;  %v1837_v60 = vmul.f32 1.442695, %v1667_v16  ;;  %v2332_v37 = vsel %vm7720_vm7, %v7714_v28, %v2326_v58  ;;  %v2344_v2 = vmul.f32 0.6931472, %v6241_v33  ;;  %v11757_v28 = vld [vmem:[#allocation15_spill] sm:$0xff] }
 0x288   : > { %v7768_v61 = vadd.f32 %v2305_v49, %v11753_v0  ;;  %vm7775_vm10 = vcmp.lt.f32.partialorder %v2339_v9, 0.0004427343  ;;  %v2363_v21 = vmul.f32 -0.5, %v7707_v62  ;;  %v1843_v34 = vmul.f32 1.442695, %v1670_v10 }
 0x289   : > { %11750 = vst [vmem:[#allocation44_spill] sm:$0xff] %v7755_v15  ;;  %v2323_v1 = vsel %vm7728_vm8, %v2320_v44, %v2317_v32  ;;  %v1841_v49 = vmul.f32 1.442695, %v1669_v48  ;;  %v1672_v38 = vsub.f32 0.0, %v1544_v8  ;;  %v7784_v16 = vsub.f32 %v11696_v14, %v7651_v54  ;;  %v7799_v54 = vpop.permute.xlu0 %895  ;;  %v11778_v15 = vld [vmem:[#allocation21_spill] sm:$0xff] }
 0x28a   : > { %11754 = vst [vmem:[#allocation45_spill] sm:$0xff] %v7768_v61  ;;  %v6245_v31 = vpop.eup %6244  ;;  %v2338_v58 = vmul.f32 %v7673_v45, %v2337_v36  ;;  %6252 = vlog2.f32 %v2351_v11  ;;  %v2378_v33 = vadd.f32 1.0, %v7764_v29  ;;  %v7789_v25 = vsub.f32 %v11757_v28, %v876_v35 }
 0x28b   : > { %v7791_v9 = vpop.eup %6246  ;;  %v11758_v47 = vmax.f32 %v7467_v51, 0.0  ;;  %v2366_v8 = vand.u32 2147483647, %v7707_v62  ;;  %6254 = vpow2.f32 %v1837_v60  ;;  %v11760_v44 = vmax.f32 %v7476_v13, 0.0  ;;  %v7809_v51 = vpop.permute.xlu1 %891 }
 0x28c   : > { %v7801_v45 = vpop.eup %6248  ;;  %v2350_v35 = vsel %vm7757_vm9, %v2347_v24, %v2344_v2  ;;  %v2364_v48 = vadd.f32 1.0, %v2363_v21  ;;  %6256 = vpow2.f32 %v1843_v34  ;;  %v2335_v30 = vmul.f32 0.6931472, %v6245_v31 }
 0x28d   : > { %v7795_v32 = vadd.f32 %v2332_v37, %v11758_v47  ;;  %v7805_v10 = vadd.f32 %v2323_v1, %v11760_v44  ;;  %6258 = vpow2.f32 %v1841_v49  ;;  %v1847_v36 = vmul.f32 1.442695, %v1672_v38  ;;  %v7835_v44 = vpop.permute.xlu0 %903 }
 0x28e   : > { %v1543_v11 = vand.u32 2147483647, %v7784_v16  ;;  %v2354_v0 = vmul.f32 -0.5, %v7741_v20  ;;  %6260 = vlog2.f32 %v2378_v33  ;;  %v2369_v60 = vadd.f32 1.0, %v7791_v9  ;;  %v6251_v37 = vpop.eup %6250 }
 0x28f   : > { %11759 = vst [vmem:[#allocation15_spill] sm:$0xff] %v7795_v32  ;;  %11761 = vst [vmem:[#allocation46_spill] sm:$0xff] %v7805_v10  ;;  %v1546_v13 = vand.u32 2147483647, %v7789_v25  ;;  %vm7815_vm11 = vcmp.lt.f32.partialorder %v2366_v8, 0.0004427343  ;;  %v7823_v21 = vsub.f32 %v11757_v28, %v7675_v40  ;;  %v2341_v33 = vsel %vm7775_vm10, %v2338_v58, %v2335_v30 }
 0x290   : > { %v2396_v24 = vadd.f32 1.0, %v7801_v45  ;;  %v11764_v34 = vmax.f32 %v7493_v52, 0.0  ;;  %v2357_v49 = vand.u32 2147483647, %v7741_v20  ;;  %v2381_v38 = vmul.f32 -0.5, %v7764_v29 }
 0x291   : > { %v2372_v47 = vmul.f32 -0.5, %v7791_v9  ;;  %6262 = vpow2.f32 %v1847_v36  ;;  %v1671_v8 = vsub.f32 0.0, %v1543_v11  ;;  %v2362_v40 = vmul.f32 0.6931472, %v6251_v37 }
 0x292   : > { %v7827_v1 = vadd.f32 %v2350_v35, %v11764_v34  ;;  %v2355_v2 = vadd.f32 1.0, %v2354_v0  ;;  %6264 = vlog2.f32 %v2369_v60  ;;  %v1674_v52 = vsub.f32 0.0, %v1546_v13  ;;  %v7837_v35 = vpop.permute.xlu1 %899 }
 0x293   : > { %v2384_v34 = vand.u32 2147483647, %v7764_v29  ;;  %6266 = vlog2.f32 %v2396_v24  ;;  %v2399_v31 = vmul.f32 -0.5, %v7801_v45  ;;  %v1545_v23 = vand.u32 2147483647, %v7823_v21  ;;  %v11779_v24 = vld [vmem:[#allocation6_spill] sm:$0xff] }
 0x294   : > { %11765 = vst [vmem:[#allocation47_spill] sm:$0xff] %v7827_v1  ;;  %v6253_v58 = vpop.eup %6252  ;;  %v2365_v30 = vmul.f32 %v7707_v62, %v2364_v48  ;;  %v2382_v36 = vadd.f32 1.0, %v2381_v38  ;;  %v11766_v60 = vmax.f32 %v7526_v59, 0.0  ;;  %vm7851_vm12 = vcmp.lt.f32.partialorder %v2357_v49, 0.0004427343 }
 0x295   : > { %v7845_v0 = vpop.eup %6254  ;;  %v2373_v14 = vadd.f32 1.0, %v2372_v47  ;;  %v1845_v50 = vmul.f32 1.442695, %v1671_v8  ;;  %v7860_v48 = vmul.f32 %v7741_v20, %v2355_v2  ;;  %v2375_v38 = vand.u32 2147483647, %v7791_v9 }
 0x296   : > { %v7849_v13 = vadd.f32 %v2341_v33, %v11766_v60  ;;  %v7855_v27 = vpop.eup %6256  ;;  %v2368_v62 = vsel %vm7815_vm11, %v2365_v30, %v2362_v40  ;;  %v1851_v37 = vmul.f32 1.442695, %v1674_v52  ;;  %vm7865_vm13 = vcmp.lt.f32.partialorder %v2384_v34, 0.0004427343  ;;  %v7870_v60 = vpop.permute.xlu0 %911 }
 0x297   : > { %v7863_v59 = vpop.eup %6258  ;;  %v2400_v33 = vadd.f32 1.0, %v2399_v31  ;;  %v2402_v47 = vand.u32 2147483647, %v7801_v45  ;;  %v1673_v8 = vsub.f32 0.0, %v1545_v23  ;;  %v2383_v40 = vmul.f32 %v7764_v29, %v2382_v36  ;;  %v7879_v34 = vpop.permute.xlu1 %907 }
 0x298   : > { %11767 = vst [vmem:[#allocation48_spill] sm:$0xff] %v7849_v13  ;;  %v6261_v26 = vpop.eup %6260  ;;  %v2387_v20 = vadd.f32 1.0, %v7845_v0  ;;  %v7877_v52 = vsub.f32 %v11757_v28, %v7762_v19  ;;  %v11772_v31 = vmax.f32 %v7556_v7, 0.0  ;;  %v7886_v23 = vmul.f32 %v7791_v9, %v2373_v14 }
 0x299   : > { %v2414_v11 = vadd.f32 1.0, %v7855_v27  ;;  %6268 = vpow2.f32 %v1845_v50  ;;  %v2353_v29 = vmul.f32 0.6931472, %v6253_v58  ;;  %vm7889_vm14 = vcmp.lt.f32.partialorder %v2375_v38, 0.0004427343 }
 0x29a   : > { %v7883_v30 = vadd.f32 %v2368_v62, %v11772_v31  ;;  %v2405_v19 = vadd.f32 1.0, %v7863_v59  ;;  %6270 = vpow2.f32 %v1851_v37  ;;  %v2380_v7 = vmul.f32 0.6931472, %v6261_v26 }
 0x29b   : > { %v7895_v1 = vpop.eup %6262  ;;  %v7898_v62 = vmul.f32 %v7801_v45, %v2400_v33  ;;  %vm7900_vm15 = vcmp.lt.f32.partialorder %v2402_v47, 0.0004427343  ;;  %v2390_v50 = vmul.f32 -0.5, %v7845_v0  ;;  %v1849_v14 = vmul.f32 1.442695, %v1673_v8  ;;  %v7917_v8 = vpop.permute.xlu0 %919 }
 0x29c   : > { %11773 = vst [vmem:[#allocation49_spill] sm:$0xff] %v7883_v30  ;;  %v6265_v58 = vpop.eup %6264  ;;  %6272 = vlog2.f32 %v2387_v20  ;;  %v1548_v31 = vand.u32 2147483647, %v7877_v52  ;;  %v7909_v37 = vsub.f32 %v11757_v28, %v7726_v63  ;;  %v2417_v45 = vmul.f32 -0.5, %v7855_v27 }
 0x29d   : > { %v6267_v26 = vpop.eup %6266  ;;  %6274 = vlog2.f32 %v2414_v11  ;;  %v2408_v33 = vmul.f32 -0.5, %v7863_v59  ;;  %v7915_v47 = vsub.f32 %v11757_v28, %v7809_v51  ;;  %v2359_v20 = vsel %vm7851_vm12, %v7860_v48, %v2353_v29  ;;  %v7924_v11 = vpop.permute.xlu1 %915 }
 0x29e   : > { %v2393_v38 = vand.u32 2147483647, %v7845_v0  ;;  %6276 = vlog2.f32 %v2405_v19  ;;  %v2432_v63 = vadd.f32 1.0, %v7895_v1  ;;  %v2386_v2 = vsel %vm7865_vm13, %v2383_v40, %v2380_v7 }
 0x29f   : > { %v2371_v30 = vmul.f32 0.6931472, %v6265_v58  ;;  %v2391_v13 = vadd.f32 1.0, %v2390_v50  ;;  %6278 = vpow2.f32 %v1849_v14  ;;  %v2398_v51 = vmul.f32 0.6931472, %v6267_v26 }
 0x2a0   : > { %v1676_v32 = vsub.f32 0.0, %v1548_v31  ;;  %v1547_v10 = vand.u32 2147483647, %v7909_v37  ;;  %v3379_v48 = vmul.f32 %v11779_v24, %v11778_v15  ;;  %v2418_v29 = vadd.f32 1.0, %v2417_v45  ;;  %v7955_v45 = vpop.permute.xlu0 %927 }
 0x2a1   : > { %v2409_v61 = vadd.f32 1.0, %v2408_v33  ;;  %v1550_v19 = vand.u32 2147483647, %v7915_v47  ;;  %v7934_v22 = vsub.f32 %v11757_v28, %v7751_v46  ;;  %v2420_v49 = vand.u32 2147483647, %v7855_v27 }
 0x2a2   : > { %v2411_v40 = vand.u32 2147483647, %v7863_v59  ;;  %6280 = vlog2.f32 %v2432_v63  ;;  %v2435_v7 = vmul.f32 -0.5, %v7895_v1  ;;  %3507 = vadd.xlane.f32.xlu0 %v3379_v48  ;;  %v11780_v15 = vmax.f32 %v7581_v53, 0.0 }
 0x2a3   : > { %v7939_v50 = vpop.eup %6268  ;;  %v11781_v58 = vmax.f32 %v7605_v56, 0.0  ;;  %v2377_v46 = vsel %vm7889_vm14, %v7886_v23, %v2371_v30  ;;  %v7953_v26 = vmul.f32 %v7845_v0, %v2391_v13  ;;  %v2404_v53 = vsel %vm7900_vm15, %v7898_v62, %v2398_v51  ;;  %v7970_v0 = vpop.permute.xlu1 %923 }
 0x2a4   : > { %v7943_v14 = vadd.f32 %v2359_v20, %v11780_v15  ;;  %v7957_v33 = vpop.eup %6270  ;;  %vm7962_vm1 = vcmp.lt.f32.partialorder %v2393_v38, 0.0004427343  ;;  %v1855_v56 = vmul.f32 1.442695, %v1676_v32  ;;  %v7968_v30 = vsub.f32 %v11757_v28, %v7837_v35 }
 0x2a5   : > { %v7947_v31 = vadd.f32 %v2386_v2, %v11781_v58  ;;  %v1675_v2 = vsub.f32 0.0, %v1547_v10  ;;  %v7973_v13 = vmul.f32 %v7855_v27, %v2418_v29  ;;  %v7976_v23 = vmul.f32 %v7863_v59, %v2409_v61 }
 0x2a6   : > { %v1678_v36 = vsub.f32 0.0, %v1550_v19  ;;  %v1549_v62 = vand.u32 2147483647, %v7934_v22  ;;  %v6273_v9 = vpop.eup %6272  ;;  %vm7979_vm2 = vcmp.lt.f32.partialorder %v2420_v49, 0.0004427343  ;;  %v2436_v10 = vadd.f32 1.0, %v2435_v7 }
 0x2a7   : > { %11782 = vst [vmem:[#allocation21_spill] sm:$0xff] %v7947_v31  ;;  %vm7983_vm3 = vcmp.lt.f32.partialorder %v2411_v40, 0.0004427343  ;;  %v2438_v35 = vand.u32 2147483647, %v7895_v1  ;;  %v2423_v27 = vadd.f32 1.0, %v7939_v50  ;;  %v6275_v63 = vpop.eup %6274  ;;  %6282 = vpow2.f32 %v1855_v56 }
 0x2a8   : > { %v11789_v61 = vmax.f32 %v7629_v5, 0.0  ;;  %v11790_v51 = vmax.f32 %v7639_v6, 0.0  ;;  %v2450_v29 = vadd.f32 1.0, %v7957_v33  ;;  %v6277_v49 = vpop.eup %6276  ;;  %v1853_v40 = vmul.f32 1.442695, %v1675_v2 }
 0x2a9   : > { %v1552_v7 = vand.u32 2147483647, %v7968_v30  ;;  %v8002_v15 = vsub.f32 %v11757_v28, %v7799_v54  ;;  %v8004_v5 = vpop.eup %6278  ;;  %v2389_v58 = vmul.f32 0.6931472, %v6273_v9  ;;  %v1677_v6 = vsub.f32 0.0, %v1549_v62 }
 0x2aa   : > { %v7991_v59 = vadd.f32 %v2377_v46, %v11789_v61  ;;  %v7995_v48 = vadd.f32 %v2404_v53, %v11790_v51  ;;  %v1859_v46 = vmul.f32 1.442695, %v1678_v36  ;;  %v8006_v53 = vpop.permute.xlu0 %938  ;;  %v11792_v61 = vld [vmem:[#allocation20_spill] sm:$0xff]  ;;  %v8011_v19 = vmul.f32 %v7895_v1, %v2436_v10  ;;  %v8022_v36 = vpop.permute.xlu1 %931 }
 0x2ab   : > { %v3381_v51 = vmul.f32 %v11779_v24, %v11792_v61  ;;  %vm8013_vm4 = vcmp.lt.f32.partialorder %v2438_v35, 0.0004427343  ;;  %6284 = vlog2.f32 %v2423_v27  ;;  %v8020_v2 = vsub.f32 %v11757_v28, %v7879_v34 }
 0x2ac   : > { %11791 = vst [vmem:[#allocation6_spill] sm:$0xff] %v7995_v48  ;;  %v2416_v62 = vmul.f32 0.6931472, %v6275_v63  ;;  %v2407_v9 = vmul.f32 0.6931472, %v6277_v49  ;;  %6286 = vlog2.f32 %v2450_v29  ;;  %v3380_v1 = vmul.f32 %v11779_v24, %v7101_v3  ;;  %v6281_v10 = vpop.eup %6280  ;;  %v11823_v48 = vld [vmem:[#allocation22_spill] sm:$0xff] }
 0x2ad   : > { %3511 = vadd.xlane.f32.xlu0 %v3381_v51  ;;  %v2441_v35 = vadd.f32 1.0, %v8004_v5  ;;  %6288 = vpow2.f32 %v1853_v40  ;;  %v1680_v27 = vsub.f32 0.0, %v1552_v7  ;;  %v1551_v61 = vand.u32 2147483647, %v8002_v15 }
 0x2ae   : > { %v2395_v34 = vsel %vm7962_vm1, %v7953_v26, %v2389_v58  ;;  %6290 = vpow2.f32 %v1859_v46  ;;  %v1857_v63 = vmul.f32 1.442695, %v1677_v6  ;;  %3509 = vadd.xlane.f32.xlu1 %v3380_v1  ;;  %v2426_v29 = vmul.f32 -0.5, %v7939_v50  ;;  %v8046_v46 = vpop.permute.xlu0 %946  ;;  %v8049_v49 = vpop.permute.xlu1 %942 }
 0x2af   : > { %v2453_v3 = vmul.f32 -0.5, %v7957_v33  ;;  %v1554_v40 = vand.u32 2147483647, %v8020_v2  ;;  %v2422_v7 = vsel %vm7979_vm2, %v7973_v13, %v2416_v62  ;;  %v2413_v26 = vsel %vm7983_vm3, %v7976_v23, %v2407_v9 }
 0x2b0   : > { %v2434_v20 = vmul.f32 0.6931472, %v6281_v10  ;;  %v8044_v58 = vsub.f32 %v11757_v28, %v7835_v44  ;;  %6292 = vlog2.f32 %v2441_v35  ;;  %v2444_v6 = vmul.f32 -0.5, %v8004_v5 }
 0x2b1   : > { %v1863_v51 = vmul.f32 1.442695, %v1680_v27  ;;  %v1679_v1 = vsub.f32 0.0, %v1551_v61  ;;  %v11795_v13 = vmax.f32 %v7693_v57, 0.0  ;;  %v2429_v23 = vand.u32 2147483647, %v7939_v50  ;;  %v8057_v44 = vpop.eup %6282 }
 0x2b2   : > { %6294 = vpow2.f32 %v1857_v63  ;;  %v11797_v62 = vmax.f32 %v7700_v41, 0.0  ;;  %v2427_v10 = vadd.f32 1.0, %v2426_v29  ;;  %v2454_v35 = vadd.f32 1.0, %v2453_v3 }
 0x2b3   : > { %v8053_v38 = vadd.f32 %v2395_v34, %v11795_v13  ;;  %v1682_v27 = vsub.f32 0.0, %v1554_v40  ;;  %v11799_v61 = vmax.f32 %v7705_v12, 0.0  ;;  %v2440_v57 = vsel %vm8013_vm4, %v8011_v19, %v2434_v20 }
 0x2b4   : > { %v8061_v9 = vadd.f32 %v2422_v7, %v11797_v62  ;;  %v2456_v34 = vand.u32 2147483647, %v7957_v33  ;;  %v1553_v63 = vand.u32 2147483647, %v8044_v58  ;;  %v2445_v32 = vadd.f32 1.0, %v2444_v6  ;;  %v8078_v7 = vpop.permute.xlu0 %954 }
 0x2b5   : > { %11796 = vst [vmem:[#allocation20_spill] sm:$0xff] %v8053_v38  ;;  %v8065_v54 = vadd.f32 %v2413_v26, %v11799_v61  ;;  %v6285_v13 = vpop.eup %6284  ;;  %v2447_v41 = vand.u32 2147483647, %v8004_v5  ;;  %6296 = vpow2.f32 %v1863_v51  ;;  %v1861_v29 = vmul.f32 1.442695, %v1679_v1  ;;  %v11824_v38 = vld [vmem:[#allocation24_spill] sm:$0xff] }
 0x2b6   : > { %11798 = vst [vmem:[#allocation50_spill] sm:$0xff] %v8061_v9  ;;  %v6287_v3 = vpop.eup %6286  ;;  %vm8073_vm5 = vcmp.lt.f32.partialorder %v2429_v23, 0.0004427343  ;;  %v2468_v12 = vadd.f32 1.0, %v8057_v44  ;;  %v3382_v19 = vmul.f32 %v11779_v24, %v7095_v4  ;;  %v3383_v56 = vmul.f32 %v11779_v24, %v7130_v17  ;;  %v8092_v23 = vpop.permute.xlu1 %950 }
 0x2b7   : > { %11800 = vst [vmem:[#allocation51_spill] sm:$0xff] %v8065_v54  ;;  %v8084_v26 = vpop.eup %6288  ;;  %v2428_v20 = vmul.f32 %v7939_v50, %v2427_v10  ;;  %v2455_v6 = vmul.f32 %v7957_v33, %v2454_v35  ;;  %v1867_v51 = vmul.f32 1.442695, %v1682_v27  ;;  %v8090_v1 = vsub.f32 %v11757_v28, %v7924_v11 }
 0x2b8   : > { %v8094_v62 = vpop.eup %6290  ;;  %v11803_v4 = vmax.f32 %v7736_v39, 0.0  ;;  %vm8100_vm6 = vcmp.lt.f32.partialorder %v2456_v34, 0.0004427343  ;;  %v1681_v50 = vsub.f32 0.0, %v1553_v63  ;;  %v8106_v33 = vsub.f32 %v11757_v28, %v7870_v60  ;;  %3513 = vadd.xlane.f32.xlu0 %v3382_v19  ;;  %3515 = vadd.xlane.f32.xlu1 %v3383_v56 }
 0x2b9   : > { %v2425_v11 = vmul.f32 0.6931472, %v6285_v13  ;;  %v2446_v10 = vmul.f32 %v8004_v5, %v2445_v32  ;;  %vm8109_vm7 = vcmp.lt.f32.partialorder %v2447_v41, 0.0004427343  ;;  %6298 = vpow2.f32 %v1861_v29 }
 0x2ba   : > { %v8098_v61 = vadd.f32 %v2440_v57, %v11803_v4  ;;  %v2452_v39 = vmul.f32 0.6931472, %v6287_v3  ;;  %6300 = vlog2.f32 %v2468_v12  ;;  %v2459_v27 = vadd.f32 1.0, %v8084_v26  ;;  %v6293_v34 = vpop.eup %6292  ;;  %v8124_v12 = vpop.permute.xlu0 %962 }
 0x2bb   : > { %v3384_v57 = vmul.f32 %v11779_v24, %v7125_v43  ;;  %v2471_v60 = vmul.f32 -0.5, %v8057_v44  ;;  %v2486_v63 = vadd.f32 1.0, %v8094_v62  ;;  %6302 = vpow2.f32 %v1867_v51  ;;  %v8134_v4 = vpop.permute.xlu1 %958 }
 0x2bc   : > { %11804 = vst [vmem:[#allocation52_spill] sm:$0xff] %v8098_v61  ;;  %v1556_v5 = vand.u32 2147483647, %v8090_v1  ;;  %v8119_v32 = vpop.eup %6294  ;;  %v1865_v29 = vmul.f32 1.442695, %v1681_v50  ;;  %v2431_v43 = vsel %vm8073_vm5, %v2428_v20, %v2425_v11  ;;  %v2462_v19 = vmul.f32 -0.5, %v8084_v26 }
 0x2bd   : > { %v1555_v3 = vand.u32 2147483647, %v8106_v33  ;;  %3517 = vadd.xlane.f32.xlu0 %v3384_v57  ;;  %v8132_v51 = vsub.f32 %v11757_v28, %v7970_v0  ;;  %v2458_v50 = vsel %vm8100_vm6, %v2455_v6, %v2452_v39  ;;  %v2443_v41 = vmul.f32 0.6931472, %v6293_v34 }
 0x2be   : > { %v2474_v13 = vand.u32 2147483647, %v8057_v44  ;;  %6304 = vlog2.f32 %v2459_v27  ;;  %v2472_v40 = vadd.f32 1.0, %v2471_v60  ;;  %v2477_v20 = vadd.f32 1.0, %v8119_v32 }
 0x2bf   : > { %v8139_v57 = vpop.eup %6296  ;;  %6306 = vlog2.f32 %v2486_v63  ;;  %v1684_v11 = vsub.f32 0.0, %v1556_v5  ;;  %v2489_v56 = vmul.f32 -0.5, %v8094_v62  ;;  %v1683_v61 = vsub.f32 0.0, %v1555_v3  ;;  %v8160_v3 = vpop.permute.xlu0 %970 }
 0x2c0   : > { %6308 = vpow2.f32 %v1865_v29  ;;  %v11809_v17 = vmax.f32 %v7784_v16, 0.0  ;;  %v11811_v39 = vmax.f32 %v7789_v25, 0.0  ;;  %v2463_v34 = vadd.f32 1.0, %v2462_v19 }
 0x2c1   : > { %v8154_v60 = vsub.f32 %v11757_v28, %v7917_v8  ;;  %v2449_v63 = vsel %vm8109_vm7, %v2446_v10, %v2443_v41  ;;  %v2504_v5 = vadd.f32 1.0, %v8139_v57  ;;  %v1558_v29 = vand.u32 2147483647, %v8132_v51  ;;  %v8174_v41 = vpop.permute.xlu1 %966  ;;  %v11825_v8 = vld [vmem:[#allocation16_spill] sm:$0xff] }
 0x2c2   : > { %v8146_v6 = vadd.f32 %v2431_v43, %v11809_v17  ;;  %v8150_v27 = vadd.f32 %v2458_v50, %v11811_v39  ;;  %v3385_v16 = vmul.f32 %v11779_v24, %v7171_v42  ;;  %v8167_v43 = vmul.f32 %v8057_v44, %v2472_v40 }
 0x2c3   : > { %v8164_v25 = vpop.eup %6298  ;;  %vm8169_vm8 = vcmp.lt.f32.partialorder %v2474_v13, 0.0004427343  ;;  %v2465_v10 = vand.u32 2147483647, %v8084_v26  ;;  %6310 = vlog2.f32 %v2477_v20  ;;  %v1871_v35 = vmul.f32 1.442695, %v1684_v11 }
 0x2c4   : > { %11810 = vst [vmem:[#allocation53_spill] sm:$0xff] %v8146_v6  ;;  %11812 = vst [vmem:[#allocation54_spill] sm:$0xff] %v8150_v27  ;;  %v6301_v19 = vpop.eup %6300  ;;  %v2490_v50 = vadd.f32 1.0, %v2489_v56  ;;  %v2492_v17 = vand.u32 2147483647, %v8094_v62  ;;  %3519 = vadd.xlane.f32.xlu1 %v3385_v16  ;;  %v3386_v44 = vmul.f32 %v11779_v24, %v7167_v18  ;;  %v11815_v13 = vmax.f32 %v7823_v21, 0.0 }
 0x2c5   : > { %v1869_v42 = vmul.f32 1.442695, %v1683_v61  ;;  %v8179_v40 = vpop.eup %6302  ;;  %v8186_v20 = vmul.f32 %v8084_v26, %v2463_v34  ;;  %v2480_v11 = vmul.f32 -0.5, %v8119_v32  ;;  %v1557_v56 = vand.u32 2147483647, %v8154_v60 }
 0x2c6   : > { %v8183_v39 = vadd.f32 %v2449_v63, %v11815_v13  ;;  %6312 = vlog2.f32 %v2504_v5  ;;  %v2495_v61 = vadd.f32 1.0, %v8164_v25  ;;  %v1686_v16 = vsub.f32 0.0, %v1558_v29  ;;  %3521 = vadd.xlane.f32.xlu0 %v3386_v44  ;;  %v8210_v44 = vpop.permute.xlu0 %978 }
 0x2c7   : > { %v8193_v18 = vsub.f32 %v11757_v28, %v8022_v36  ;;  %vm8195_vm9 = vcmp.lt.f32.partialorder %v2465_v10, 0.0004427343  ;;  %v2483_v26 = vand.u32 2147483647, %v8119_v32  ;;  %v2507_v34 = vmul.f32 -0.5, %v8139_v57 }
 0x2c8   : > { %11816 = vst [vmem:[#allocation55_spill] sm:$0xff] %v8183_v39  ;;  %v2498_v63 = vmul.f32 -0.5, %v8164_v25  ;;  %6314 = vpow2.f32 %v1871_v35  ;;  %v6305_v5 = vpop.eup %6304  ;;  %v2470_v13 = vmul.f32 0.6931472, %v6301_v19  ;;  %v8203_v29 = vmul.f32 %v8094_v62, %v2490_v50  ;;  %v8213_v35 = vpop.permute.xlu1 %974 }
 0x2c9   : > { %vm8205_vm10 = vcmp.lt.f32.partialorder %v2492_v17, 0.0004427343  ;;  %v2522_v10 = vadd.f32 1.0, %v8179_v40  ;;  %6316 = vpow2.f32 %v1869_v42  ;;  %v6307_v0 = vpop.eup %6306  ;;  %v2481_v27 = vadd.f32 1.0, %v2480_v11 }
 0x2ca   : > { %v1685_v6 = vsub.f32 0.0, %v1557_v56  ;;  %v3387_v62 = vmul.f32 %v11779_v24, %v7204_v55  ;;  %v8217_v19 = vpop.eup %6308  ;;  %6318 = vlog2.f32 %v2495_v61  ;;  %v1875_v50 = vmul.f32 1.442695, %v1686_v16 }
 0x2cb   : > { %v1560_v17 = vand.u32 2147483647, %v8193_v18  ;;  %v8222_v42 = vsub.f32 %v11757_v28, %v7955_v45  ;;  %vm8224_vm11 = vcmp.lt.f32.partialorder %v2483_v26, 0.0004427343  ;;  %v2508_v56 = vadd.f32 1.0, %v2507_v34 }
 0x2cc   : > { %v2510_v39 = vand.u32 2147483647, %v8139_v57  ;;  %v2499_v9 = vadd.f32 1.0, %v2498_v63  ;;  %v2501_v55 = vand.u32 2147483647, %v8164_v25  ;;  %3523 = vadd.xlane.f32.xlu1 %v3387_v62  ;;  %v2476_v61 = vsel %vm8169_vm8, %v8167_v43, %v2470_v13 }
 0x2cd   : > { %v2461_v16 = vmul.f32 0.6931472, %v6305_v5  ;;  %v2488_v54 = vmul.f32 0.6931472, %v6307_v0  ;;  %6320 = vlog2.f32 %v2522_v10  ;;  %v6311_v28 = vpop.eup %6310  ;;  %v2513_v45 = vadd.f32 1.0, %v8217_v19  ;;  %v8243_v0 = vpop.permute.xlu0 %986 }
 0x2ce   : > { %v1873_v26 = vmul.f32 1.442695, %v1685_v6  ;;  %v3388_v34 = vmul.f32 %v11779_v24, %v11823_v48  ;;  %v3389_v63 = vmul.f32 %v11779_v24, %v11824_v38  ;;  %6322 = vpow2.f32 %v1875_v50  ;;  %v8251_v38 = vpop.permute.xlu1 %982 }
 0x2cf   : > { %v1688_v31 = vsub.f32 0.0, %v1560_v17  ;;  %v1559_v62 = vand.u32 2147483647, %v8222_v42  ;;  %v8241_v43 = vsub.f32 %v11825_v8, %v8049_v49  ;;  %v2482_v5 = vmul.f32 %v8119_v32, %v2481_v27 }
 0x2d0   : > { %v8247_v6 = vmul.f32 %v8139_v57, %v2508_v56  ;;  %v2525_v48 = vmul.f32 -0.5, %v8179_v40  ;;  %3525 = vadd.xlane.f32.xlu0 %v3388_v34  ;;  %3527 = vadd.xlane.f32.xlu1 %v3389_v63  ;;  %v6313_v10 = vpop.eup %6312  ;;  %v11826_v50 = vmax.f32 %v7877_v52, 0.0  ;;  %v2467_v32 = vsel %vm8195_vm9, %v8186_v20, %v2461_v16 }
 0x2d1   : > { %v2479_v27 = vmul.f32 0.6931472, %v6311_v28  ;;  %vm8260_vm12 = vcmp.lt.f32.partialorder %v2510_v39, 0.0004427343  ;;  %v8265_v17 = vmul.f32 %v8164_v25, %v2499_v9  ;;  %v2494_v52 = vsel %vm8205_vm10, %v8203_v29, %v2488_v54 }
 0x2d2   : > { %v8255_v49 = vadd.f32 %v2476_v61, %v11826_v50  ;;  %v8267_v56 = vpop.eup %6314  ;;  %v2528_v61 = vand.u32 2147483647, %v8179_v40  ;;  %6324 = vpow2.f32 %v1873_v26  ;;  %vm8276_vm13 = vcmp.lt.f32.partialorder %v2501_v55, 0.0004427343 }
 0x2d3   : > { %v8274_v20 = vpop.eup %6316  ;;  %6326 = vlog2.f32 %v2513_v45  ;;  %v1879_v9 = vmul.f32 1.442695, %v1688_v31  ;;  %v1687_v25 = vsub.f32 0.0, %v1559_v62  ;;  %v1562_v21 = vand.u32 2147483647, %v8241_v43  ;;  %v8298_v62 = vpop.permute.xlu0 %994 }
 0x2d4   : > { %11827 = vst [vmem:[#allocation22_spill] sm:$0xff] %v8255_v49  ;;  %v11832_v16 = vmax.f32 %v7909_v37, 0.0  ;;  %v2526_v54 = vadd.f32 1.0, %v2525_v48  ;;  %v8288_v28 = vsub.f32 %v11825_v8, %v8006_v53  ;;  %v6319_v55 = vpop.eup %6318  ;;  %v11834_v26 = vmax.f32 %v7915_v47, 0.0  ;;  %v11836_v47 = vld [vmem:[#allocation23_spill] sm:$0xff] }
 0x2d5   : > { %v2485_v31 = vsel %vm8224_vm11, %v2482_v5, %v2479_v27  ;;  %v2516_v45 = vmul.f32 -0.5, %v8217_v19  ;;  %v2540_v37 = vadd.f32 1.0, %v8267_v56  ;;  %v2506_v48 = vmul.f32 0.6931472, %v6313_v10 }
 0x2d6   : > { %v8283_v36 = vadd.f32 %v2467_v32, %v11832_v16  ;;  %v8292_v63 = vadd.f32 %v2494_v52, %v11834_v26  ;;  %v2531_v50 = vadd.f32 1.0, %v8274_v20  ;;  %v8303_v53 = vsub.f32 %v11825_v8, %v8092_v23  ;;  %v8305_v32 = vpop.permute.xlu1 %990 }
 0x2d7   : > { %v3390_v52 = vmul.f32 %v11779_v24, %v11836_v47  ;;  %v6321_v11 = vpop.eup %6320  ;;  %vm8309_vm14 = vcmp.lt.f32.partialorder %v2528_v61, 0.0004427343  ;;  %v2519_v27 = vand.u32 2147483647, %v8217_v19  ;;  %6328 = vpow2.f32 %v1879_v9 }
 0x2d8   : > { %11833 = vst [vmem:[#allocation24_spill] sm:$0xff] %v8283_v36  ;;  %11835 = vst [vmem:[#allocation16_spill] sm:$0xff] %v8292_v63  ;;  %v1877_v10 = vmul.f32 1.442695, %v1687_v25  ;;  %v1690_v16 = vsub.f32 0.0, %v1562_v21  ;;  %v11839_v26 = vmax.f32 %v7934_v22, 0.0  ;;  %v2527_v34 = vmul.f32 %v8179_v40, %v2526_v54  ;;  %v8320_v47 = vpop.eup %6322 }
 0x2d9   : > { %v2497_v23 = vmul.f32 0.6931472, %v6319_v55  ;;  %v1561_v13 = vand.u32 2147483647, %v8288_v28  ;;  %3529 = vadd.xlane.f32.xlu0 %v3390_v52  ;;  %6330 = vlog2.f32 %v2540_v37  ;;  %v2543_v61 = vmul.f32 -0.5, %v8267_v56  ;;  %v11841_v25 = vld [vmem:[#allocation26_spill] sm:$0xff]  ;;  %v8339_v52 = vpop.permute.xlu0 %1005 }
 0x2da   : > { %v8316_v29 = vadd.f32 %v2485_v31, %v11839_v26  ;;  %v8325_v9 = vsub.f32 %v11825_v8, %v8046_v46  ;;  %v3391_v22 = vmul.f32 %v11779_v24, %v11841_v25  ;;  %v2512_v21 = vsel %vm8260_vm12, %v8247_v6, %v2506_v48 }
 0x2db   : > { %v2517_v40 = vadd.f32 1.0, %v2516_v45  ;;  %6332 = vlog2.f32 %v2531_v50  ;;  %v1564_v54 = vand.u32 2147483647, %v8303_v53  ;;  %vm8333_vm15 = vcmp.lt.f32.partialorder %v2519_v27, 0.0004427343  ;;  %v8347_v50 = vpop.permute.xlu1 %998 }
 0x2dc   : > { %11840 = vst [vmem:[#allocation23_spill] sm:$0xff] %v8316_v29  ;;  %v2546_v31 = vand.u32 2147483647, %v8267_v56  ;;  %v2534_v46 = vmul.f32 -0.5, %v8274_v20  ;;  %6334 = vpow2.f32 %v1877_v10  ;;  %v1883_v37 = vmul.f32 1.442695, %v1690_v16  ;;  %3531 = vadd.xlane.f32.xlu1 %v3391_v22  ;;  %v8341_v26 = vpop.eup %6324 }
 0x2dd   : > { %v2503_v6 = vsel %vm8276_vm13, %v8265_v17, %v2497_v23  ;;  %v2524_v57 = vmul.f32 0.6931472, %v6321_v11  ;;  %v2558_v45 = vadd.f32 1.0, %v8320_v47  ;;  %v1689_v48 = vsub.f32 0.0, %v1561_v13  ;;  %v6327_v27 = vpop.eup %6326  ;;  %v11844_v22 = vld [vmem:[#allocation25_spill] sm:$0xff] }
 0x2de   : > { %v2544_v25 = vadd.f32 1.0, %v2543_v61  ;;  %v1563_v10 = vand.u32 2147483647, %v8325_v9  ;;  %v8352_v16 = vsub.f32 %v11825_v8, %v8134_v4  ;;  %v3392_v63 = vmul.f32 %v11779_v24, %v11844_v22 }
 0x2df   : > { %v11845_v39 = vmax.f32 %v7968_v30, 0.0  ;;  %v2518_v11 = vmul.f32 %v8217_v19, %v2517_v40  ;;  %v2537_v13 = vand.u32 2147483647, %v8274_v20  ;;  %v1692_v23 = vsub.f32 0.0, %v1564_v54 }
 0x2e0   : > { %v11847_v61 = vmax.f32 %v8002_v15, 0.0  ;;  %v2535_v49 = vadd.f32 1.0, %v2534_v46  ;;  %v2549_v4 = vadd.f32 1.0, %v8341_v26  ;;  %6336 = vpow2.f32 %v1883_v37  ;;  %3533 = vadd.xlane.f32.xlu0 %v3392_v63  ;;  %v8391_v37 = vpop.permute.xlu1 %1009 }
 0x2e1   : > { %v8358_v17 = vadd.f32 %v2512_v21, %v11845_v39  ;;  %v2530_v22 = vsel %vm8309_vm14, %v2527_v34, %v2524_v57  ;;  %v2515_v30 = vmul.f32 0.6931472, %v6327_v27  ;;  %6338 = vlog2.f32 %v2558_v45  ;;  %v8369_v39 = vpop.eup %6328  ;;  %v8383_v34 = vpop.permute.xlu0 %1013 }
 0x2e2   : > { %v8364_v29 = vadd.f32 %v2503_v6, %v11847_v61  ;;  %v1881_v21 = vmul.f32 1.442695, %v1689_v48  ;;  %v8372_v19 = vmul.f32 %v8267_v56, %v2544_v25  ;;  %vm8374_vm1 = vcmp.lt.f32.partialorder %v2546_v31, 0.0004427343 }
 0x2e3   : > { %11846 = vst [vmem:[#allocation26_spill] sm:$0xff] %v8358_v17  ;;  %v1691_v40 = vsub.f32 0.0, %v1563_v10  ;;  %v1566_v54 = vand.u32 2147483647, %v8352_v16  ;;  %v8381_v63 = vsub.f32 %v11825_v8, %v8078_v7  ;;  %vm8385_vm2 = vcmp.lt.f32.partialorder %v2537_v13, 0.0004427343  ;;  %v6331_v6 = vpop.eup %6330 }
 0x2e4   : > { %11848 = vst [vmem:[#allocation25_spill] sm:$0xff] %v8364_v29  ;;  %v2561_v56 = vmul.f32 -0.5, %v8320_v47  ;;  %v1887_v46 = vmul.f32 1.442695, %v1692_v23  ;;  %v11853_v57 = vmax.f32 %v8020_v2, 0.0  ;;  %v2536_v7 = vmul.f32 %v8274_v20, %v2535_v49 }
 0x2e5   : > { %6340 = vlog2.f32 %v2549_v4  ;;  %v6333_v27 = vpop.eup %6332  ;;  %v2521_v25 = vsel %vm8333_vm15, %v2518_v11, %v2515_v30  ;;  %v2564_v10 = vand.u32 2147483647, %v8320_v47  ;;  %v2576_v13 = vadd.f32 1.0, %v8369_v39 }
 0x2e6   : > { %v8395_v45 = vadd.f32 %v2530_v22, %v11853_v57  ;;  %6342 = vpow2.f32 %v1881_v21  ;;  %v8403_v23 = vpop.eup %6334  ;;  %v1885_v61 = vmul.f32 1.442695, %v1691_v40  ;;  %v1694_v2 = vsub.f32 0.0, %v1566_v54  ;;  %v11855_v57 = vld [vmem:[#allocation28_spill] sm:$0xff]  ;;  %v8415_v54 = vpop.permute.xlu0 %1021 }
 0x2e7   : > { %v1565_v22 = vand.u32 2147483647, %v8381_v63  ;;  %v3393_v49 = vmul.f32 %v11779_v24, %v11855_v57  ;;  %v2542_v20 = vmul.f32 0.6931472, %v6331_v6  ;;  %v2562_v4 = vadd.f32 1.0, %v2561_v56  ;;  %v11860_v6 = vld [vmem:[#allocation27_spill] sm:$0xff] }
 0x2e8   : > { %11854 = vst [vmem:[#allocation56_spill] sm:$0xff] %v8395_v45  ;;  %v2552_v48 = vmul.f32 -0.5, %v8341_v26  ;;  %6344 = vpow2.f32 %v1887_v46  ;;  %v11856_v55 = vmax.f32 %v8044_v58, 0.0  ;;  %v2533_v30 = vmul.f32 0.6931472, %v6333_v27  ;;  %v8423_v58 = vpop.permute.xlu1 %1017 }
 0x2e9   : > { %v2579_v21 = vmul.f32 -0.5, %v8369_v39  ;;  %3535 = vadd.xlane.f32.xlu1 %v3393_v49  ;;  %vm8417_vm3 = vcmp.lt.f32.partialorder %v2564_v10, 0.0004427343  ;;  %6346 = vlog2.f32 %v2576_v13  ;;  %v2567_v56 = vadd.f32 1.0, %v8403_v23  ;;  %v11861_v49 = vld [vmem:[#allocation30_spill] sm:$0xff]  ;;  %v11862_v10 = vld [vmem:[#allocation7_spill] sm:$0xff] }
 0x2ea   : > { %v8411_v11 = vadd.f32 %v2521_v25, %v11856_v55  ;;  %v3394_v27 = vmul.f32 %v11779_v24, %v11860_v6  ;;  %v8427_v25 = vpop.eup %6336  ;;  %6348 = vpow2.f32 %v1885_v61  ;;  %v1891_v57 = vmul.f32 1.442695, %v1694_v2 }
 0x2eb   : > { %v1693_v55 = vsub.f32 0.0, %v1565_v22  ;;  %v3395_v40 = vmul.f32 %v11862_v10, %v11861_v49  ;;  %v6339_v45 = vpop.eup %6338  ;;  %v2548_v13 = vsel %vm8374_vm1, %v8372_v19, %v2542_v20  ;;  %v2563_v46 = vmul.f32 %v8320_v47, %v2562_v4  ;;  %v8450_v4 = vpop.permute.xlu0 %1029 }
 0x2ec   : > { %11857 = vst [vmem:[#allocation28_spill] sm:$0xff] %v8411_v11  ;;  %v2553_v11 = vadd.f32 1.0, %v2552_v48  ;;  %v2555_v17 = vand.u32 2147483647, %v8341_v26  ;;  %3537 = vadd.xlane.f32.xlu0 %v3394_v27  ;;  %v2539_v24 = vsel %vm8385_vm2, %v2536_v7, %v2533_v30  ;;  %v2580_v61 = vadd.f32 1.0, %v2579_v21 }
 0x2ed   : > { %v2582_v2 = vand.u32 2147483647, %v8369_v39  ;;  %v8441_v22 = vsub.f32 %v11825_v8, %v8174_v41  ;;  %3539 = vadd.xlane.f32.xlu1 %v3395_v40  ;;  %6350 = vlog2.f32 %v2567_v56  ;;  %v2570_v19 = vmul.f32 -0.5, %v8403_v23 }
 0x2ee   : > { %v2594_v47 = vadd.f32 1.0, %v8427_v25  ;;  %v8447_v15 = vsub.f32 %v11825_v8, %v8124_v12  ;;  %v2560_v5 = vmul.f32 0.6931472, %v6339_v45  ;;  %v2597_v7 = vmul.f32 -0.5, %v8427_v25  ;;  %v8464_v45 = vpop.permute.xlu1 %1025 }
 0x2ef   : > { %v6341_v48 = vpop.eup %6340  ;;  %6352 = vpow2.f32 %v1891_v57  ;;  %v1889_v20 = vmul.f32 1.442695, %v1693_v55  ;;  %v11863_v30 = vmax.f32 %v8090_v1, 0.0  ;;  %v2554_v40 = vmul.f32 %v8341_v26, %v2553_v11 }
 0x2f0   : > { %v8452_v41 = vpop.eup %6342  ;;  %vm8459_vm4 = vcmp.lt.f32.partialorder %v2555_v17, 0.0004427343  ;;  %v11867_v6 = vmax.f32 %v8106_v33, 0.0  ;;  %v8471_v57 = vmul.f32 %v8369_v39, %v2580_v61  ;;  %v1568_v1 = vand.u32 2147483647, %v8441_v22 }
 0x2f1   : > { %v8456_v21 = vadd.f32 %v2548_v13, %v11863_v30  ;;  %v8476_v26 = vsub.f32 %v11825_v8, %v8213_v35  ;;  %vm8480_vm5 = vcmp.lt.f32.partialorder %v2582_v2, 0.0004427343  ;;  %v2571_v55 = vadd.f32 1.0, %v2570_v19 }
 0x2f2   : > { %v8468_v27 = vadd.f32 %v2539_v24, %v11867_v6  ;;  %v8478_v17 = vpop.eup %6344  ;;  %v2573_v33 = vand.u32 2147483647, %v8403_v23  ;;  %6354 = vlog2.f32 %v2594_v47  ;;  %v1567_v49 = vand.u32 2147483647, %v8447_v15  ;;  %v11871_v6 = vld [vmem:[#allocation29_spill] sm:$0xff] }
 0x2f3   : > { %11864 = vst [vmem:[#allocation27_spill] sm:$0xff] %v8456_v21  ;;  %v2566_v39 = vsel %vm8417_vm3, %v2563_v46, %v2560_v5  ;;  %v2551_v13 = vmul.f32 0.6931472, %v6341_v48  ;;  %v2598_v24 = vadd.f32 1.0, %v2597_v7  ;;  %6356 = vpow2.f32 %v1889_v20  ;;  %v6347_v35 = vpop.eup %6346  ;;  %v8497_v46 = vpop.permute.xlu0 %1037  ;;  %v11872_v48 = vld [vmem:[#allocation14_spill] sm:$0xff] }
 0x2f4   : > { %11868 = vst [vmem:[#allocation30_spill] sm:$0xff] %v8468_v27  ;;  %v2585_v61 = vadd.f32 1.0, %v8452_v41  ;;  %v3396_v19 = vmul.f32 %v11862_v10, %v11871_v6  ;;  %v8493_v12 = vpop.eup %6348  ;;  %v2612_v47 = vadd.f32 1.0, %v8478_v17  ;;  %v1696_v21 = vsub.f32 0.0, %v1568_v1  ;;  %v8513_v27 = vpop.permute.xlu1 %1033  ;;  %v11887_v6 = vld [vmem:[#allocation32_spill] sm:$0xff] }
 0x2f5   : > { %v1570_v31 = vand.u32 2147483647, %v8476_v26  ;;  %v3397_v5 = vmul.f32 %v11862_v10, %v11872_v48  ;;  %v11873_v7 = vmax.f32 %v8132_v51, 0.0  ;;  %v8506_v30 = vmul.f32 %v8403_v23, %v2571_v55 }
 0x2f6   : > { %vm8508_vm6 = vcmp.lt.f32.partialorder %v2573_v33, 0.0004427343  ;;  %v2600_v1 = vand.u32 2147483647, %v8427_v25  ;;  %v1695_v2 = vsub.f32 0.0, %v1567_v49  ;;  %3541 = vadd.xlane.f32.xlu0 %v3396_v19  ;;  %v2557_v48 = vsel %vm8459_vm4, %v2554_v40, %v2551_v13 }
 0x2f7   : > { %v8503_v20 = vadd.f32 %v2566_v39, %v11873_v7  ;;  %v2578_v29 = vmul.f32 0.6931472, %v6347_v35  ;;  %v8518_v51 = vmul.f32 %v8427_v25, %v2598_v24  ;;  %v2588_v23 = vmul.f32 -0.5, %v8452_v41  ;;  %3543 = vadd.xlane.f32.xlu1 %v3397_v5  ;;  %v6351_v55 = vpop.eup %6350  ;;  %v8547_v5 = vpop.permute.xlu0 %1045 }
 0x2f8   : > { %6358 = vlog2.f32 %v2585_v61  ;;  %v2603_v33 = vadd.f32 1.0, %v8493_v12  ;;  %v1895_v56 = vmul.f32 1.442695, %v1696_v21  ;;  %v1698_v40 = vsub.f32 0.0, %v1570_v31 }
 0x2f9   : > { %11874 = vst [vmem:[#allocation7_spill] sm:$0xff] %v8503_v20  ;;  %v8524_v7 = vpop.eup %6352  ;;  %6360 = vlog2.f32 %v2612_v47  ;;  %v8528_v25 = vsub.f32 %v11825_v8, %v8160_v3  ;;  %v11877_v13 = vmax.f32 %v8154_v60, 0.0  ;;  %vm8534_vm7 = vcmp.lt.f32.partialorder %v2600_v1, 0.0004427343  ;;  %v11881_v47 = vld [vmem:[#allocation31_spill] sm:$0xff]  ;;  %v11882_v1 = vld [vmem:[#allocation33_spill] sm:$0xff] }
 0x2fa   : > { %v1893_v61 = vmul.f32 1.442695, %v1695_v2  ;;  %v8540_v19 = vsub.f32 %v11825_v8, %v8251_v38  ;;  %v3398_v21 = vmul.f32 %v11862_v10, %v11881_v47  ;;  %v2584_v3 = vsel %vm8480_vm5, %v8471_v57, %v2578_v29  ;;  %v8554_v47 = vpop.permute.xlu1 %1041 }
 0x2fb   : > { %v8532_v24 = vadd.f32 %v2557_v48, %v11877_v13  ;;  %v2569_v31 = vmul.f32 0.6931472, %v6351_v55  ;;  %v2589_v60 = vadd.f32 1.0, %v2588_v23  ;;  %v3399_v48 = vmul.f32 %v11862_v10, %v11882_v1 }
 0x2fc   : > { %v6355_v13 = vpop.eup %6354  ;;  %v2591_v2 = vand.u32 2147483647, %v8452_v41  ;;  %v2615_v38 = vmul.f32 -0.5, %v8478_v17  ;;  %6362 = vlog2.f32 %v2603_v33  ;;  %v2630_v49 = vadd.f32 1.0, %v8524_v7  ;;  %3545 = vadd.xlane.f32.xlu0 %v3398_v21 }
 0x2fd   : > { %11878 = vst [vmem:[#allocation29_spill] sm:$0xff] %v8532_v24  ;;  %v8556_v11 = vpop.eup %6356  ;;  %6364 = vpow2.f32 %v1895_v56  ;;  %v1899_v57 = vmul.f32 1.442695, %v1698_v40  ;;  %v1569_v23 = vand.u32 2147483647, %v8528_v25  ;;  %3547 = vadd.xlane.f32.xlu1 %v3399_v48  ;;  %v11883_v55 = vmax.f32 %v8193_v18, 0.0 }
 0x2fe   : > { %v2618_v33 = vand.u32 2147483647, %v8478_v17  ;;  %6366 = vpow2.f32 %v1893_v61  ;;  %v1572_v39 = vand.u32 2147483647, %v8540_v19  ;;  %v2575_v21 = vsel %vm8508_vm6, %v8506_v30, %v2569_v31 }
 0x2ff   : > { %v8562_v1 = vadd.f32 %v2584_v3, %v11883_v55  ;;  %v2596_v56 = vmul.f32 0.6931472, %v6355_v13  ;;  %v8570_v29 = vmul.f32 %v8452_v41, %v2589_v60  ;;  %v2606_v40 = vmul.f32 -0.5, %v8493_v12  ;;  %v8583_v41 = vpop.permute.xlu0 %1053 }
 0x300   : > { %vm8573_vm8 = vcmp.lt.f32.partialorder %v2591_v2, 0.0004427343  ;;  %v2616_v18 = vadd.f32 1.0, %v2615_v38  ;;  %6368 = vlog2.f32 %v2630_v49  ;;  %v2633_v61 = vmul.f32 -0.5, %v8524_v7 }
 0x301   : > { %11884 = vst [vmem:[#allocation14_spill] sm:$0xff] %v8562_v1  ;;  %v2621_v3 = vadd.f32 1.0, %v8556_v11  ;;  %6370 = vpow2.f32 %v1899_v57  ;;  %v1697_v55 = vsub.f32 0.0, %v1569_v23  ;;  %v8581_v30 = vsub.f32 %v11825_v8, %v8210_v44  ;;  %v8595_v57 = vpop.permute.xlu1 %1049  ;;  %v11892_v23 = vld [vmem:[#allocation35_spill] sm:$0xff] }
 0x302   : > { %v3400_v31 = vmul.f32 %v11862_v10, %v11887_v6  ;;  %v6359_v60 = vpop.eup %6358  ;;  %v11888_v13 = vmax.f32 %v8222_v42, 0.0  ;;  %vm8591_vm9 = vcmp.lt.f32.partialorder %v2618_v33, 0.0004427343  ;;  %v1700_v38 = vsub.f32 0.0, %v1572_v39 }
 0x303   : > { %v3401_v44 = vmul.f32 %v11862_v10, %v11892_v23  ;;  %v6361_v1 = vpop.eup %6360  ;;  %v2602_v6 = vsel %vm8534_vm7, %v8518_v51, %v2596_v56  ;;  %v2607_v20 = vadd.f32 1.0, %v2606_v40  ;;  %v2609_v42 = vand.u32 2147483647, %v8493_v12 }
 0x304   : > { %v8589_v2 = vadd.f32 %v2575_v21, %v11888_v13  ;;  %v8605_v33 = vsub.f32 %v11825_v8, %v8305_v32  ;;  %3549 = vadd.xlane.f32.xlu0 %v3400_v31  ;;  %v2634_v21 = vadd.f32 1.0, %v2633_v61  ;;  %v2636_v39 = vand.u32 2147483647, %v8524_v7 }
 0x305   : > { %6372 = vlog2.f32 %v2621_v3  ;;  %v2624_v13 = vmul.f32 -0.5, %v8556_v11  ;;  %3551 = vadd.xlane.f32.xlu1 %v3401_v44  ;;  %v2587_v23 = vmul.f32 0.6931472, %v6359_v60  ;;  %v1897_v35 = vmul.f32 1.442695, %v1697_v55  ;;  %v8640_v44 = vpop.permute.xlu1 %1057 }
 0x306   : > { %11889 = vst [vmem:[#allocation31_spill] sm:$0xff] %v8589_v2  ;;  %v2617_v2 = vmul.f32 %v8478_v17, %v2616_v18  ;;  %v1571_v51 = vand.u32 2147483647, %v8581_v30  ;;  %v6363_v56 = vpop.eup %6362  ;;  %v11893_v40 = vmax.f32 %v8241_v43, 0.0  ;;  %v2614_v32 = vmul.f32 0.6931472, %v6361_v1  ;;  %v8631_v1 = vpop.permute.xlu0 %1061 }
 0x307   : > { %v1903_v31 = vmul.f32 1.442695, %v1700_v38  ;;  %v8617_v61 = vsub.f32 %v11825_v8, %v8243_v0  ;;  %v8619_v3 = vpop.eup %6364  ;;  %v2608_v60 = vmul.f32 %v8493_v12, %v2607_v20  ;;  %vm8622_vm10 = vcmp.lt.f32.partialorder %v2609_v42, 0.0004427343 }
 0x308   : > { %v8613_v24 = vadd.f32 %v2602_v6, %v11893_v40  ;;  %v1574_v18 = vand.u32 2147483647, %v8605_v33  ;;  %v8629_v43 = vsub.f32 %v11825_v8, %v8347_v50  ;;  %v8633_v55 = vpop.eup %6366  ;;  %v8636_v0 = vmul.f32 %v8524_v7, %v2634_v21 }
 0x309   : > { %v2625_v38 = vadd.f32 1.0, %v2624_v13  ;;  %v2627_v12 = vand.u32 2147483647, %v8556_v11  ;;  %v2593_v6 = vsel %vm8573_vm8, %v8570_v29, %v2587_v23  ;;  %v2605_v50 = vmul.f32 0.6931472, %v6363_v56  ;;  %v8683_v48 = vpop.permute.xlu1 %1065 }
 0x30a   : > { %11894 = vst [vmem:[#allocation33_spill] sm:$0xff] %v8613_v24  ;;  %vm8645_vm11 = vcmp.lt.f32.partialorder %v2636_v39, 0.0004427343  ;;  %6374 = vpow2.f32 %v1897_v35  ;;  %v1699_v40 = vsub.f32 0.0, %v1571_v51  ;;  %v6369_v7 = vpop.eup %6368  ;;  %v2620_v21 = vsel %vm8591_vm9, %v2617_v2, %v2614_v32 }
 0x30b   : > { %v2648_v13 = vadd.f32 1.0, %v8619_v3  ;;  %6376 = vpow2.f32 %v1903_v31  ;;  %v1573_v20 = vand.u32 2147483647, %v8617_v61  ;;  %v8653_v24 = vpop.eup %6370  ;;  %v2639_v29 = vadd.f32 1.0, %v8633_v55 }
 0x30c   : > { %v1702_v39 = vsub.f32 0.0, %v1574_v18  ;;  %v1576_v23 = vand.u32 2147483647, %v8629_v43  ;;  %v11899_v35 = vmax.f32 %v8288_v28, 0.0  ;;  %v8663_v2 = vmul.f32 %v8556_v11, %v2625_v38  ;;  %v8680_v38 = vpop.permute.xlu0 %1072 }
 0x30d   : > { %vm8665_vm12 = vcmp.lt.f32.partialorder %v2627_v12, 0.0004427343  ;;  %v8672_v32 = vsub.f32 %v11825_v8, %v8298_v62  ;;  %v11903_v31 = vmax.f32 %v8303_v53, 0.0  ;;  %v2611_v28 = vsel %vm8622_vm10, %v2608_v60, %v2605_v50  ;;  %v11905_v8 = vld [vmem:[#allocation34_spill] sm:$0xff] }
 0x30e   : > { %v8660_v51 = vadd.f32 %v2593_v6, %v11899_v35  ;;  %v2632_v6 = vmul.f32 0.6931472, %v6369_v7  ;;  %v1901_v11 = vmul.f32 1.442695, %v1699_v40  ;;  %6378 = vlog2.f32 %v2648_v13  ;;  %v11907_v7 = vld [vmem:[#allocation17_spill] sm:$0xff] }
 0x30f   : > { %v8676_v18 = vadd.f32 %v2620_v21, %v11903_v31  ;;  %v6373_v12 = vpop.eup %6372  ;;  %v2666_v35 = vadd.f32 1.0, %v8653_v24  ;;  %v1701_v56 = vsub.f32 0.0, %v1573_v20  ;;  %v3402_v62 = vmul.f32 %v11862_v10, %v11905_v8  ;;  %v11906_v31 = vld [vmem:[#allocation37_spill] sm:$0xff] }
 0x310   : > { %11900 = vst [vmem:[#allocation32_spill] sm:$0xff] %v8660_v51  ;;  %6380 = vlog2.f32 %v2639_v29  ;;  %v1907_v53 = vmul.f32 1.442695, %v1702_v39  ;;  %v1704_v21 = vsub.f32 0.0, %v1576_v23  ;;  %v3403_v60 = vmul.f32 %v11862_v10, %v11906_v31  ;;  %v11911_v31 = vld [vmem:[#allocation36_spill] sm:$0xff] }
 0x311   : > { %11904 = vst [vmem:[#allocation35_spill] sm:$0xff] %v8676_v18  ;;  %v2651_v17 = vmul.f32 -0.5, %v8619_v3  ;;  %v1575_v40 = vand.u32 2147483647, %v8672_v32  ;;  %v8694_v20 = vsub.f32 %v11907_v7, %v8391_v37  ;;  %3553 = vadd.xlane.f32.xlu0 %v3402_v62  ;;  %v11908_v13 = vmax.f32 %v8325_v9, 0.0  ;;  %v11912_v18 = vld [vmem:[#allocation39_spill] sm:$0xff] }
 0x312   : > { %v2623_v29 = vmul.f32 0.6931472, %v6373_v12  ;;  %v2642_v39 = vmul.f32 -0.5, %v8633_v55  ;;  %6382 = vpow2.f32 %v1901_v11  ;;  %3555 = vadd.xlane.f32.xlu1 %v3403_v60  ;;  %v2638_v23 = vsel %vm8645_vm11, %v8636_v0, %v2632_v6  ;;  %v8709_v12 = vpop.permute.xlu0 %1080 }
 0x313   : > { %v8698_v8 = vadd.f32 %v2611_v28, %v11908_v13  ;;  %6384 = vlog2.f32 %v2666_v35  ;;  %v1905_v50 = vmul.f32 1.442695, %v1701_v56  ;;  %v2654_v62 = vand.u32 2147483647, %v8619_v3  ;;  %11910 = vst [vmem:[#allocation37_spill] sm:$0xff] %v8709_v12  ;;  %v8715_v35 = vpop.permute.xlu1 %1076 }
 0x314   : > { %v8705_v37 = vpop.eup %6374  ;;  %v2669_v9 = vmul.f32 -0.5, %v8653_v24  ;;  %6386 = vpow2.f32 %v1907_v53  ;;  %v1911_v28 = vmul.f32 1.442695, %v1704_v21  ;;  %v2652_v60 = vadd.f32 1.0, %v2651_v17 }
 0x315   : > { %11909 = vst [vmem:[#allocation34_spill] sm:$0xff] %v8698_v8  ;;  %v8711_v11 = vpop.eup %6376  ;;  %v2645_v42 = vand.u32 2147483647, %v8633_v55  ;;  %v1703_v0 = vsub.f32 0.0, %v1575_v40  ;;  %v1578_v6 = vand.u32 2147483647, %v8694_v20  ;;  %v2629_v56 = vsel %vm8665_vm12, %v8663_v2, %v2623_v29 }
 0x316   : > { %v2643_v13 = vadd.f32 1.0, %v2642_v39  ;;  %v2672_v53 = vand.u32 2147483647, %v8653_v24  ;;  %v8723_v21 = vsub.f32 %v11907_v7, %v8339_v52  ;;  %v2657_v17 = vadd.f32 1.0, %v8705_v37 }
 0x317   : > { %6388 = vpow2.f32 %v1905_v50  ;;  %v3404_v40 = vmul.f32 %v11862_v10, %v11911_v31  ;;  %v3405_v8 = vmul.f32 %v11862_v10, %v11912_v18  ;;  %vm8730_vm13 = vcmp.lt.f32.partialorder %v2654_v62, 0.0004427343 }
 0x318   : > { %v2670_v2 = vadd.f32 1.0, %v2669_v9  ;;  %v2660_v49 = vmul.f32 -0.5, %v8705_v37  ;;  %v2684_v29 = vadd.f32 1.0, %v8711_v11  ;;  %6390 = vpow2.f32 %v1911_v28  ;;  %v6379_v52 = vpop.eup %6378 }
 0x319   : > { %v11915_v39 = vmax.f32 %v8352_v16, 0.0  ;;  %vm8740_vm14 = vcmp.lt.f32.partialorder %v2645_v42, 0.0004427343  ;;  %v1909_v18 = vmul.f32 1.442695, %v1703_v0  ;;  %v1706_v62 = vsub.f32 0.0, %v1578_v6  ;;  %3557 = vadd.xlane.f32.xlu0 %v3404_v40  ;;  %3559 = vadd.xlane.f32.xlu1 %v3405_v8 }
 0x31a   : > { %v6381_v36 = vpop.eup %6380  ;;  %v2653_v9 = vmul.f32 %v8619_v3, %v2652_v60  ;;  %v2644_v12 = vmul.f32 %v8633_v55, %v2643_v13  ;;  %v1577_v28 = vand.u32 2147483647, %v8723_v21  ;;  %v8749_v16 = vsub.f32 %v11907_v7, %v8423_v58  ;;  %v8762_v55 = vpop.permute.xlu1 %1084  ;;  %v11924_v3 = vld [vmem:[#allocation38_spill] sm:$0xff] }
 0x31b   : > { %v8738_v50 = vadd.f32 %v2638_v23, %v11915_v39  ;;  %v8751_v23 = vpop.permute.xlu0 %1088  ;;  %v11920_v42 = vmax.f32 %v8381_v63, 0.0  ;;  %vm8757_vm15 = vcmp.lt.f32.partialorder %v2672_v53, 0.0004427343  ;;  %6392 = vlog2.f32 %v2657_v17 }
 0x31c   : > { %11919 = vst [vmem:[#allocation36_spill] sm:$0xff] %v8751_v23  ;;  %v8764_v8 = vpop.eup %6382  ;;  %v2671_v58 = vmul.f32 %v8653_v24, %v2670_v2  ;;  %v2661_v60 = vadd.f32 1.0, %v2660_v49  ;;  %6394 = vlog2.f32 %v2684_v29  ;;  %v2687_v6 = vmul.f32 -0.5, %v8711_v11 }
 0x31d   : > { %11916 = vst [vmem:[#allocation17_spill] sm:$0xff] %v8738_v50  ;;  %v8755_v39 = vadd.f32 %v2629_v56, %v11920_v42  ;;  %v6385_v63 = vpop.eup %6384  ;;  %v2650_v56 = vmul.f32 0.6931472, %v6379_v52  ;;  %v2641_v13 = vmul.f32 0.6931472, %v6381_v36  ;;  %6396 = vpow2.f32 %v1909_v18 }
 0x31e   : > { %v1915_v53 = vmul.f32 1.442695, %v1706_v62  ;;  %v8768_v40 = vpop.eup %6386  ;;  %v1705_v17 = vsub.f32 0.0, %v1577_v28  ;;  %v1580_v42 = vand.u32 2147483647, %v8749_v16  ;;  %v3406_v50 = vmul.f32 %v11862_v10, %v11924_v3 }
 0x31f   : > { %11921 = vst [vmem:[#allocation39_spill] sm:$0xff] %v8755_v39  ;;  %v11925_v39 = vld [vmem:[#allocation41_spill] sm:$0xff]  ;;  %v2663_v2 = vand.u32 2147483647, %v8705_v37  ;;  %v2675_v49 = vadd.f32 1.0, %v8764_v8  ;;  %v8780_v36 = vsub.f32 %v11907_v7, %v8383_v34  ;;  %v8783_v18 = vmul.f32 %v8705_v37, %v2661_v60  ;;  %v8786_v3 = vpop.permute.xlu0 %1096 }
 0x320   : > { %v3407_v24 = vmul.f32 %v11862_v10, %v11925_v39  ;;  %v2668_v52 = vmul.f32 0.6931472, %v6385_v63  ;;  %v2688_v62 = vadd.f32 1.0, %v2687_v6  ;;  %v2690_v28 = vand.u32 2147483647, %v8711_v11  ;;  %11926 = vst [vmem:[#allocation38_spill] sm:$0xff] %v8786_v3  ;;  %3561 = vadd.xlane.f32.xlu0 %v3406_v50  ;;  %v8794_v63 = vpop.permute.xlu1 %1092 }
 0x321   : > { %v8788_v39 = vpop.eup %6388  ;;  %v2656_v29 = vsel %vm8730_vm13, %v2653_v9, %v2650_v56  ;;  %v2702_v23 = vadd.f32 1.0, %v8768_v40  ;;  %6398 = vpow2.f32 %v1915_v53  ;;  %v2647_v60 = vsel %vm8740_vm14, %v2644_v12, %v2641_v13  ;;  %v11929_v56 = vld [vmem:[#allocation40_spill] sm:$0xff] }
 0x322   : > { %3563 = vadd.xlane.f32.xlu1 %v3407_v24  ;;  %v8796_v37 = vpop.eup %6390  ;;  %v2678_v50 = vmul.f32 -0.5, %v8764_v8  ;;  %v1913_v6 = vmul.f32 1.442695, %v1705_v17  ;;  %v1708_v24 = vsub.f32 0.0, %v1580_v42  ;;  %vm8801_vm1 = vcmp.lt.f32.partialorder %v2663_v2, 0.0004427343 }
 0x323   : > { %6400 = vlog2.f32 %v2675_v49  ;;  %v1579_v51 = vand.u32 2147483647, %v8780_v36  ;;  %v8808_v9 = vsub.f32 %v11907_v7, %v8464_v45  ;;  %v3408_v53 = vmul.f32 %v11862_v10, %v11929_v56  ;;  %v11947_v42 = vld [vmem:[#allocation45_spill] sm:$0xff] }
 0x324   : > { %v11930_v12 = vmax.f32 %v8441_v22, 0.0  ;;  %v2674_v13 = vsel %vm8757_vm15, %v2671_v58, %v2668_v52  ;;  %v8819_v17 = vmul.f32 %v8711_v11, %v2688_v62  ;;  %vm8821_vm2 = vcmp.lt.f32.partialorder %v2690_v28, 0.0004427343  ;;  %v8832_v52 = vpop.permute.xlu0 %1104  ;;  %v11937_v62 = vld [vmem:[#allocation43_spill] sm:$0xff]  ;;  %v8844_v34 = vpop.permute.xlu1 %1100 }
 0x325   : > { %v2693_v45 = vadd.f32 1.0, %v8788_v39  ;;  %v6393_v2 = vpop.eup %6392  ;;  %v11934_v49 = vmax.f32 %v8447_v15, 0.0  ;;  %6402 = vlog2.f32 %v2702_v23  ;;  %v2705_v22 = vmul.f32 -0.5, %v8768_v40  ;;  %3565 = vadd.xlane.f32.xlu0 %v3408_v53  ;;  %11936 = vst [vmem:[#allocation57_spill] sm:$0xff] %v8832_v52 }
 0x326   : > { %v8814_v31 = vadd.f32 %v2656_v29, %v11930_v12  ;;  %v2720_v0 = vadd.f32 1.0, %v8796_v37  ;;  %v6395_v58 = vpop.eup %6394  ;;  %v2679_v11 = vadd.f32 1.0, %v2678_v50  ;;  %6404 = vpow2.f32 %v1913_v6 }
 0x327   : > { %v8828_v56 = vadd.f32 %v2647_v60, %v11934_v49  ;;  %v1919_v29 = vmul.f32 1.442695, %v1708_v24  ;;  %v3409_v28 = vmul.f32 %v11862_v10, %v11937_v62  ;;  %v8836_v12 = vpop.eup %6396  ;;  %v11938_v15 = vmax.f32 %v8476_v26, 0.0 }
 0x328   : > { %11931 = vst [vmem:[#allocation41_spill] sm:$0xff] %v8814_v31  ;;  %v2681_v23 = vand.u32 2147483647, %v8764_v8  ;;  %v1707_v49 = vsub.f32 0.0, %v1579_v51  ;;  %v1582_v53 = vand.u32 2147483647, %v8808_v9  ;;  %6406 = vlog2.f32 %v2693_v45 }
 0x329   : > { %11935 = vst [vmem:[#allocation40_spill] sm:$0xff] %v8828_v56  ;;  %v8840_v60 = vadd.f32 %v2674_v13, %v11938_v15  ;;  %v2659_v50 = vmul.f32 0.6931472, %v6393_v2  ;;  %v2708_v6 = vand.u32 2147483647, %v8768_v40  ;;  %v8849_v24 = vsub.f32 %v11907_v7, %v8415_v54  ;;  %3567 = vadd.xlane.f32.xlu1 %v3409_v28 }
 0x32a   : > { %v2686_v62 = vmul.f32 0.6931472, %v6395_v58  ;;  %v2706_v26 = vadd.f32 1.0, %v2705_v22  ;;  %v2696_v13 = vmul.f32 -0.5, %v8788_v39  ;;  %6408 = vlog2.f32 %v2720_v0 }
 0x32b   : > { %11939 = vst [vmem:[#allocation43_spill] sm:$0xff] %v8840_v60  ;;  %v8853_v51 = vmul.f32 %v8764_v8, %v2679_v11  ;;  %v2711_v15 = vadd.f32 1.0, %v8836_v12  ;;  %6410 = vpow2.f32 %v1919_v29  ;;  %v8858_v2 = vsub.f32 %v11907_v7, %v8513_v27  ;;  %v8860_v45 = vpop.eup %6398  ;;  %v11942_v8 = vld [vmem:[#allocation42_spill] sm:$0xff]  ;;  %v8878_v60 = vpop.permute.xlu0 %1112 }
 0x32c   : > { %vm8862_vm3 = vcmp.lt.f32.partialorder %v2681_v23, 0.0004427343  ;;  %v1917_v22 = vmul.f32 1.442695, %v1707_v49  ;;  %v1710_v58 = vsub.f32 0.0, %v1582_v53  ;;  %v8868_v0 = vsub.f32 %v11907_v7, %v8450_v4  ;;  %11943 = vst [vmem:[#allocation42_spill] sm:$0xff] %v8878_v60 }
 0x32d   : > { %v3410_v11 = vmul.f32 %v11862_v10, %v11942_v8  ;;  %v2665_v27 = vsel %vm8801_vm1, %v8783_v18, %v2659_v50  ;;  %v2699_v29 = vand.u32 2147483647, %v8788_v39  ;;  %v1581_v23 = vand.u32 2147483647, %v8849_v24  ;;  %v6401_v49 = vpop.eup %6400  ;;  %v8891_v50 = vpop.permute.xlu1 %1108 }
 0x32e   : > { %v2692_v4 = vsel %vm8821_vm2, %v8819_v17, %v2686_v62  ;;  %v8884_v53 = vmul.f32 %v8768_v40, %v2706_v26  ;;  %vm8886_vm4 = vcmp.lt.f32.partialorder %v2708_v6, 0.0004427343  ;;  %v2697_v18 = vadd.f32 1.0, %v2696_v13  ;;  %11946 = vst [vmem:[#allocation58_spill] sm:$0xff] %v8891_v50  ;;  %v11948_v17 = vld [vmem:[#allocation8_spill] sm:$0xff] }
 0x32f   : > { %v2723_v3 = vmul.f32 -0.5, %v8796_v37  ;;  %3569 = vadd.xlane.f32.xlu0 %v3410_v11  ;;  %6412 = vlog2.f32 %v2711_v15  ;;  %v2738_v8 = vadd.f32 1.0, %v8860_v45  ;;  %v1584_v28 = vand.u32 2147483647, %v8858_v2  ;;  %v6403_v40 = vpop.eup %6402 }
 0x330   : > { %v3411_v62 = vmul.f32 %v11948_v17, %v11947_v42  ;;  %v11949_v6 = vmax.f32 %v8528_v25, 0.0  ;;  %6414 = vpow2.f32 %v1917_v22  ;;  %v1923_v13 = vmul.f32 1.442695, %v1710_v58  ;;  %v8902_v56 = vpop.eup %6404  ;;  %v11965_v22 = vld [vmem:[#allocation46_spill] sm:$0xff] }
 0x331   : > { %v1583_v31 = vand.u32 2147483647, %v8868_v0  ;;  %v2677_v11 = vmul.f32 0.6931472, %v6401_v49  ;;  %v2726_v15 = vand.u32 2147483647, %v8796_v37  ;;  %v2698_v25 = vmul.f32 %v8788_v39, %v2697_v18  ;;  %v8923_v18 = vpop.permute.xlu1 %1116 }
 0x332   : > { %v8899_v26 = vadd.f32 %v2665_v27, %v11949_v6  ;;  %v2714_v60 = vmul.f32 -0.5, %v8836_v12  ;;  %v1709_v52 = vsub.f32 0.0, %v1581_v23  ;;  %3571 = vadd.xlane.f32.xlu1 %v3411_v62  ;;  %v11951_v42 = vmax.f32 %v8540_v19, 0.0  ;;  %v6407_v27 = vpop.eup %6406  ;;  %v8919_v23 = vpop.permute.xlu0 %1120 }
 0x333   : > { %vm8911_vm5 = vcmp.lt.f32.partialorder %v2699_v29, 0.0004427343  ;;  %v2724_v58 = vadd.f32 1.0, %v2723_v3  ;;  %v2704_v6 = vmul.f32 0.6931472, %v6403_v40  ;;  %6416 = vlog2.f32 %v2738_v8 }
 0x334   : > { %11950 = vst [vmem:[#allocation45_spill] sm:$0xff] %v8899_v26  ;;  %v8908_v50 = vadd.f32 %v2692_v4, %v11951_v42  ;;  %v1712_v49 = vsub.f32 0.0, %v1584_v28  ;;  %v8917_v26 = vsub.f32 %v11907_v7, %v8554_v47  ;;  %v6409_v19 = vpop.eup %6408  ;;  %v2717_v4 = vand.u32 2147483647, %v8836_v12 }
 0x335   : > { %v2729_v39 = vadd.f32 1.0, %v8902_v56  ;;  %6418 = vpow2.f32 %v1923_v13  ;;  %v1711_v29 = vsub.f32 0.0, %v1583_v31  ;;  %v8925_v3 = vpop.eup %6410  ;;  %v2683_v28 = vsel %vm8862_vm3, %v8853_v51, %v2677_v11 }
 0x336   : > { %11952 = vst [vmem:[#allocation8_spill] sm:$0xff] %v8908_v50  ;;  %vm8930_vm6 = vcmp.lt.f32.partialorder %v2726_v15, 0.0004427343  ;;  %v2715_v8 = vadd.f32 1.0, %v2714_v60  ;;  %v1921_v62 = vmul.f32 1.442695, %v1709_v52  ;;  %v2725_v42 = vmul.f32 %v8796_v37, %v2724_v58 }
 0x337   : > { %v2695_v40 = vmul.f32 0.6931472, %v6407_v27  ;;  %v2710_v50 = vsel %vm8886_vm4, %v8884_v53, %v2704_v6  ;;  %v2741_v54 = vmul.f32 -0.5, %v8860_v45  ;;  %v1927_v51 = vmul.f32 1.442695, %v1712_v49  ;;  %v8953_v49 = vpop.permute.xlu0 %1128 }
 0x338   : > { %v1586_v11 = vand.u32 2147483647, %v8917_v26  ;;  %v11957_v15 = vmax.f32 %v8581_v30, 0.0  ;;  %v2722_v52 = vmul.f32 0.6931472, %v6409_v19  ;;  %6420 = vlog2.f32 %v2729_v39  ;;  %11961 = vst [vmem:[#allocation60_spill] sm:$0xff] %v8953_v49 }
 0x339   : > { %vm8946_vm7 = vcmp.lt.f32.partialorder %v2717_v4, 0.0004427343  ;;  %v1925_v58 = vmul.f32 1.442695, %v1711_v29  ;;  %v6413_v27 = vpop.eup %6412  ;;  %v2716_v10 = vmul.f32 %v8836_v12, %v2715_v8  ;;  %v2756_v53 = vadd.f32 1.0, %v8925_v3 }
 0x33a   : > { %v8944_v60 = vadd.f32 %v2683_v28, %v11957_v15  ;;  %6422 = vpow2.f32 %v1921_v62  ;;  %v8955_v30 = vpop.eup %6414  ;;  %v11962_v19 = vmax.f32 %v8605_v33, 0.0  ;;  %v2701_v39 = vsel %vm8911_vm5, %v2698_v25, %v2695_v40  ;;  %v8965_v28 = vpop.permute.xlu1 %1124 }
 0x33b   : > { %v2744_v29 = vand.u32 2147483647, %v8860_v45  ;;  %v2742_v8 = vadd.f32 1.0, %v2741_v54  ;;  %6424 = vpow2.f32 %v1927_v51  ;;  %v1714_v62 = vsub.f32 0.0, %v1586_v11 }
 0x33c   : > { %11958 = vst [vmem:[#allocation59_spill] sm:$0xff] %v8944_v60  ;;  %v8959_v4 = vadd.f32 %v2710_v50, %v11962_v19  ;;  %v8969_v15 = vsub.f32 %v11907_v7, %v8497_v46  ;;  %v2728_v33 = vsel %vm8930_vm6, %v2725_v42, %v2722_v52  ;;  %6426 = vpow2.f32 %v1925_v58  ;;  %v11964_v50 = vld [vmem:[#allocation44_spill] sm:$0xff]  ;;  %v11968_v58 = vld [vmem:[#allocation15_spill] sm:$0xff] }
 0x33d   : > { %v3412_v25 = vmul.f32 %v11948_v17, %v11964_v50  ;;  %v3413_v40 = vmul.f32 %v11948_v17, %v11965_v22  ;;  %v6417_v19 = vpop.eup %6416  ;;  %v2713_v12 = vmul.f32 0.6931472, %v6413_v27  ;;  %v2732_v54 = vmul.f32 -0.5, %v8902_v56 }
 0x33e   : > { %11963 = vst [vmem:[#allocation61_spill] sm:$0xff] %v8959_v4  ;;  %6428 = vlog2.f32 %v2756_v53  ;;  %v2747_v51 = vadd.f32 1.0, %v8955_v30  ;;  %v11966_v46 = vmax.f32 %v8617_v61, 0.0  ;;  %v2735_v42 = vand.u32 2147483647, %v8902_v56  ;;  %v8995_v61 = vpop.permute.xlu0 %1139  ;;  %v12051_v4 = vld [vmem:[#allocation31_spill] sm:$0xff] }
 0x33f   : > { %v8979_v11 = vpop.eup %6418  ;;  %3573 = vadd.xlane.f32.xlu0 %v3412_v25  ;;  %3575 = vadd.xlane.f32.xlu1 %v3413_v40  ;;  %v3414_v27 = vmul.f32 %v11948_v17, %v11968_v58  ;;  %v2759_v50 = vmul.f32 -0.5, %v8925_v3  ;;  %v1931_v53 = vmul.f32 1.442695, %v1714_v62  ;;  %v1585_v22 = vand.u32 2147483647, %v8969_v15  ;;  %11969 = vst [vmem:[#allocation46_spill] sm:$0xff] %v8995_v61  ;;  %v9006_v62 = vpop.permute.xlu1 %1132 }
 0x340   : > { %v8983_v47 = vadd.f32 %v2701_v39, %v11966_v46  ;;  %v8993_v6 = vsub.f32 %v11907_v7, %v8595_v57  ;;  %v11970_v39 = vmax.f32 %v8629_v43, 0.0  ;;  %v2740_v25 = vmul.f32 0.6931472, %v6417_v19  ;;  %v12052_v61 = vld [vmem:[#allocation14_spill] sm:$0xff] }
 0x341   : > { %v2743_v40 = vmul.f32 %v8860_v45, %v2742_v8  ;;  %vm9002_vm8 = vcmp.lt.f32.partialorder %v2744_v29, 0.0004427343  ;;  %v2719_v52 = vsel %vm8946_vm7, %v2716_v10, %v2713_v12  ;;  %v2733_v57 = vadd.f32 1.0, %v2732_v54  ;;  %v11976_v8 = vld [vmem:[#allocation48_spill] sm:$0xff] }
 0x342   : > { %11967 = vst [vmem:[#allocation44_spill] sm:$0xff] %v8983_v47  ;;  %v8999_v46 = vadd.f32 %v2728_v33, %v11970_v39  ;;  %6430 = vlog2.f32 %v2747_v51  ;;  %v2774_v31 = vadd.f32 1.0, %v8979_v11  ;;  %v6421_v13 = vpop.eup %6420  ;;  %vm9011_vm9 = vcmp.lt.f32.partialorder %v2735_v42, 0.0004427343 }
 0x343   : > { %v2762_v45 = vand.u32 2147483647, %v8925_v3  ;;  %3577 = vadd.xlane.f32.xlu0 %v3414_v27  ;;  %v3415_v33 = vmul.f32 %v11948_v17, %v11976_v8  ;;  %v2760_v37 = vadd.f32 1.0, %v2759_v50  ;;  %6432 = vpow2.f32 %v1931_v53 }
 0x344   : > { %11971 = vst [vmem:[#allocation15_spill] sm:$0xff] %v8999_v46  ;;  %v9019_v19 = vpop.eup %6422  ;;  %v1713_v10 = vsub.f32 0.0, %v1585_v22  ;;  %v1588_v12 = vand.u32 2147483647, %v8993_v6  ;;  %v11977_v54 = vmax.f32 %v8672_v32, 0.0  ;;  %v2746_v42 = vsel %vm9002_vm8, %v2743_v40, %v2740_v25  ;;  %v9037_v32 = vpop.permute.xlu0 %1147 }
 0x345   : > { %v2750_v39 = vmul.f32 -0.5, %v8955_v30  ;;  %v2753_v27 = vand.u32 2147483647, %v8955_v30  ;;  %3579 = vadd.xlane.f32.xlu1 %v3415_v33  ;;  %v9030_v8 = vpop.eup %6424  ;;  %v2731_v29 = vmul.f32 0.6931472, %v6421_v13  ;;  %6434 = vlog2.f32 %v2774_v31  ;;  %11979 = vst [vmem:[#allocation62_spill] sm:$0xff] %v9037_v32  ;;  %v9045_v13 = vpop.permute.xlu1 %1143 }
 0x346   : > { %v9024_v51 = vadd.f32 %v2719_v52, %v11977_v54  ;;  %v2777_v50 = vmul.f32 -0.5, %v8979_v11  ;;  %v9035_v53 = vsub.f32 %v11907_v7, %v8547_v5  ;;  %v9039_v52 = vpop.eup %6426  ;;  %v2734_v22 = vmul.f32 %v8902_v56, %v2733_v57  ;;  %11980 = vst [vmem:[#allocation63_spill] sm:$0xff] %v9045_v13 }
 0x347   : > { %v2765_v25 = vadd.f32 1.0, %v9019_v19  ;;  %v2761_v33 = vmul.f32 %v8925_v3, %v2760_v37  ;;  %vm9048_vm10 = vcmp.lt.f32.partialorder %v2762_v45, 0.0004427343  ;;  %v1929_v54 = vmul.f32 1.442695, %v1713_v10 }
 0x348   : > { %11978 = vst [vmem:[#allocation48_spill] sm:$0xff] %v9024_v51  ;;  %v6429_v31 = vpop.eup %6428  ;;  %v1716_v32 = vsub.f32 0.0, %v1588_v12  ;;  %v11983_v46 = vmax.f32 %v8694_v20, 0.0  ;;  %v2751_v57 = vadd.f32 1.0, %v2750_v39  ;;  %v2780_v40 = vand.u32 2147483647, %v8979_v11 }
 0x349   : > { %v2792_v58 = vadd.f32 1.0, %v9030_v8  ;;  %v2737_v51 = vsel %vm9011_vm9, %v2734_v22, %v2731_v29  ;;  %vm9060_vm11 = vcmp.lt.f32.partialorder %v2753_v27, 0.0004427343  ;;  %v2778_v45 = vadd.f32 1.0, %v2777_v50  ;;  %v11987_v12 = vld [vmem:[#allocation47_spill] sm:$0xff]  ;;  %v9073_v27 = vpop.permute.xlu0 %1155 }
 0x34a   : > { %v9054_v56 = vadd.f32 %v2746_v42, %v11983_v46  ;;  %v2783_v37 = vadd.f32 1.0, %v9039_v52  ;;  %v1587_v10 = vand.u32 2147483647, %v9035_v53  ;;  %v2758_v20 = vmul.f32 0.6931472, %v6429_v31  ;;  %11988 = vst [vmem:[#allocation47_spill] sm:$0xff] %v9073_v27 }
 0x34b   : > { %6436 = vlog2.f32 %v2765_v25  ;;  %v2768_v46 = vmul.f32 -0.5, %v9019_v19  ;;  %v3416_v42 = vmul.f32 %v11948_v17, %v11987_v12  ;;  %v1935_v43 = vmul.f32 1.442695, %v1716_v32 }
 0x34c   : > { %11984 = vst [vmem:[#allocation64_spill] sm:$0xff] %v9054_v56  ;;  %v6431_v39 = vpop.eup %6430  ;;  %6438 = vpow2.f32 %v1929_v54  ;;  %v9071_v29 = vsub.f32 %v11907_v7, %v8640_v44  ;;  %v3417_v50 = vmul.f32 %v11948_v17, %v7943_v14  ;;  %v2752_v22 = vmul.f32 %v8955_v30, %v2751_v57  ;;  %v9083_v54 = vpop.permute.xlu1 %1151 }
 0x34d   : > { %6440 = vlog2.f32 %v2792_v58  ;;  %v2795_v25 = vmul.f32 -0.5, %v9030_v8  ;;  %v9081_v31 = vsub.f32 %v11907_v7, %v8583_v41  ;;  %11989 = vst [vmem:[#allocation65_spill] sm:$0xff] %v9083_v54  ;;  %3581 = vadd.xlane.f32.xlu0 %v3416_v42  ;;  %v9085_v32 = vpop.eup %6432  ;;  %v11990_v44 = vmax.f32 %v8723_v21, 0.0  ;;  %v9113_v5 = vpop.permute.xlu0 %1163 }
 0x34e   : > { %v9092_v14 = vmul.f32 %v8979_v11, %v2778_v45  ;;  %vm9094_vm12 = vcmp.lt.f32.partialorder %v2780_v40, 0.0004427343  ;;  %6442 = vlog2.f32 %v2783_v37  ;;  %v1715_v58 = vsub.f32 0.0, %v1587_v10  ;;  %3583 = vadd.xlane.f32.xlu1 %v3417_v50  ;;  %11994 = vst [vmem:[#allocation67_spill] sm:$0xff] %v9113_v5 }
 0x34f   : > { %v9089_v12 = vadd.f32 %v2737_v51, %v11990_v44  ;;  %v2749_v41 = vmul.f32 0.6931472, %v6431_v39  ;;  %v2769_v57 = vadd.f32 1.0, %v2768_v46  ;;  %v2771_v42 = vand.u32 2147483647, %v9019_v19  ;;  %v6435_v56 = vpop.eup %6434 }
 0x350   : > { %v2764_v21 = vsel %vm9048_vm10, %v2761_v33, %v2758_v20  ;;  %v2798_v11 = vand.u32 2147483647, %v9030_v8  ;;  %6444 = vpow2.f32 %v1935_v43  ;;  %v1590_v51 = vand.u32 2147483647, %v9071_v29  ;;  %v9122_v27 = vpop.permute.xlu1 %1159 }
 0x351   : > { %11991 = vst [vmem:[#allocation66_spill] sm:$0xff] %v9089_v12  ;;  %v2796_v40 = vadd.f32 1.0, %v2795_v25  ;;  %v2786_v45 = vmul.f32 -0.5, %v9039_v52  ;;  %v2810_v37 = vadd.f32 1.0, %v9085_v32  ;;  %v1589_v10 = vand.u32 2147483647, %v9081_v31 }
 0x352   : > { %v2789_v46 = vand.u32 2147483647, %v9039_v52  ;;  %v1933_v50 = vmul.f32 1.442695, %v1715_v58  ;;  %v9111_v33 = vsub.f32 %v11907_v7, %v8683_v48  ;;  %v2755_v20 = vsel %vm9060_vm11, %v2752_v22, %v2749_v41  ;;  %11995 = vst [vmem:[#allocation68_spill] sm:$0xff] %v9122_v27 }
 0x353   : > { %v2776_v43 = vmul.f32 0.6931472, %v6435_v56  ;;  %v2813_v25 = vmul.f32 -0.5, %v9085_v32  ;;  %v9120_v44 = vsub.f32 %v11907_v7, %v8631_v1  ;;  %v11996_v58 = vmax.f32 %v8749_v16, 0.0 }
 0x354   : > { %v9129_v48 = vmul.f32 %v9019_v19, %v2769_v57  ;;  %vm9131_vm13 = vcmp.lt.f32.partialorder %v2771_v42, 0.0004427343  ;;  %v1718_v56 = vsub.f32 0.0, %v1590_v51  ;;  %v9136_v22 = vmul.f32 %v9030_v8, %v2796_v40 }
 0x355   : > { %v9126_v39 = vadd.f32 %v2764_v21, %v11996_v58  ;;  %v6437_v3 = vpop.eup %6436  ;;  %vm9138_vm14 = vcmp.lt.f32.partialorder %v2798_v11, 0.0004427343  ;;  %v2787_v7 = vadd.f32 1.0, %v2786_v45  ;;  %6446 = vlog2.f32 %v2810_v37  ;;  %v12006_v45 = vld [vmem:[#allocation49_spill] sm:$0xff] }
 0x356   : > { %v1717_v16 = vsub.f32 0.0, %v1589_v10  ;;  %v9142_v41 = vpop.eup %6438  ;;  %v12002_v19 = vmax.f32 %v8780_v36, 0.0  ;;  %vm9148_vm15 = vcmp.lt.f32.partialorder %v2789_v46, 0.0004427343  ;;  %6448 = vpow2.f32 %v1933_v50  ;;  %v9163_v50 = vpop.permute.xlu0 %1171 }
 0x357   : > { %11997 = vst [vmem:[#allocation69_spill] sm:$0xff] %v9126_v39  ;;  %v1592_v8 = vand.u32 2147483647, %v9111_v33  ;;  %v6441_v21 = vpop.eup %6440  ;;  %v2782_v11 = vsel %vm9094_vm12, %v9092_v14, %v2776_v43  ;;  %v2814_v51 = vadd.f32 1.0, %v2813_v25  ;;  %v1591_v40 = vand.u32 2147483647, %v9120_v44  ;;  %v9168_v43 = vpop.permute.xlu1 %1167 }
 0x358   : > { %v9146_v57 = vadd.f32 %v2755_v20, %v12002_v19  ;;  %v3418_v36 = vmul.f32 %v11948_v17, %v12006_v45  ;;  %v6443_v37 = vpop.eup %6442  ;;  %v2767_v10 = vmul.f32 0.6931472, %v6437_v3  ;;  %v1939_v46 = vmul.f32 1.442695, %v1718_v56  ;;  %v12007_v20 = vld [vmem:[#allocation18_spill] sm:$0xff]  ;;  %12008 = vst [vmem:[#allocation49_spill] sm:$0xff] %v9163_v50 }
 0x359   : > { %v9161_v58 = vsub.f32 %v12007_v20, %v8715_v35  ;;  %v3419_v19 = vmul.f32 %v11948_v17, %v7991_v59  ;;  %v2804_v14 = vmul.f32 -0.5, %v9142_v41  ;;  %v1937_v30 = vmul.f32 1.442695, %v1717_v16  ;;  %12009 = vst [vmem:[#allocation18_spill] sm:$0xff] %v9168_v43  ;;  %v12010_v25 = vld [vmem:[#allocation21_spill] sm:$0xff]  ;;  %v12011_v3 = vld [vmem:[#allocation20_spill] sm:$0xff] }
 0x35a   : > { %12003 = vst [vmem:[#allocation70_spill] sm:$0xff] %v9146_v57  ;;  %3585 = vadd.xlane.f32.xlu0 %v3418_v36  ;;  %v3420_v45 = vmul.f32 %v11948_v17, %v12010_v25  ;;  %v3421_v56 = vmul.f32 %v11948_v17, %v12011_v3  ;;  %v9174_v27 = vpop.eup %6444  ;;  %v2794_v35 = vmul.f32 0.6931472, %v6441_v21  ;;  %v2788_v50 = vmul.f32 %v9039_v52, %v2787_v7 }
 0x35b   : > { %v2816_v39 = vand.u32 2147483647, %v9085_v32  ;;  %v1720_v59 = vsub.f32 0.0, %v1592_v8  ;;  %3587 = vadd.xlane.f32.xlu1 %v3419_v19  ;;  %v12012_v16 = vmax.f32 %v8808_v9, 0.0  ;;  %v2785_v36 = vmul.f32 0.6931472, %v6443_v37  ;;  %v9210_v1 = vpop.permute.xlu1 %1175 }
 0x35c   : > { %v2801_v43 = vadd.f32 1.0, %v9142_v41  ;;  %v1719_v25 = vsub.f32 0.0, %v1591_v40  ;;  %v2773_v3 = vsel %vm9131_vm13, %v9129_v48, %v2767_v10  ;;  %v9187_v21 = vmul.f32 %v9085_v32, %v2814_v51  ;;  %v9203_v51 = vpop.permute.xlu0 %1179  ;;  %v12017_v40 = vld [vmem:[#allocation6_spill] sm:$0xff] }
 0x35d   : > { %v9180_v57 = vadd.f32 %v2782_v11, %v12012_v16  ;;  %6450 = vpow2.f32 %v1939_v46  ;;  %v1594_v52 = vand.u32 2147483647, %v9161_v58  ;;  %v2805_v7 = vadd.f32 1.0, %v2804_v14  ;;  %12016 = vst [vmem:[#allocation20_spill] sm:$0xff] %v9203_v51  ;;  %12018 = vst [vmem:[#allocation6_spill] sm:$0xff] %v9210_v1  ;;  %v12038_v16 = vld [vmem:[#allocation22_spill] sm:$0xff] }
 0x35e   : > { %v2828_v8 = vadd.f32 1.0, %v9174_v27  ;;  %6452 = vpow2.f32 %v1937_v30  ;;  %v9193_v9 = vsub.f32 %v12007_v20, %v8680_v38  ;;  %3589 = vadd.xlane.f32.xlu0 %v3420_v45  ;;  %v2800_v5 = vsel %vm9138_vm14, %v9136_v22, %v2794_v35  ;;  %v12039_v30 = vld [vmem:[#allocation23_spill] sm:$0xff] }
 0x35f   : > { %12013 = vst [vmem:[#allocation21_spill] sm:$0xff] %v9180_v57  ;;  %vm9198_vm1 = vcmp.lt.f32.partialorder %v2816_v39, 0.0004427343  ;;  %v1943_v11 = vmul.f32 1.442695, %v1720_v59  ;;  %3591 = vadd.xlane.f32.xlu1 %v3421_v56  ;;  %v3422_v37 = vmul.f32 %v11948_v17, %v12017_v40  ;;  %v6447_v38 = vpop.eup %6446  ;;  %v2791_v10 = vsel %vm9148_vm15, %v2788_v50, %v2785_v36 }
 0x360   : > { %6454 = vlog2.f32 %v2801_v43  ;;  %v2807_v22 = vand.u32 2147483647, %v9142_v41  ;;  %v1941_v39 = vmul.f32 1.442695, %v1719_v25  ;;  %v9212_v46 = vpop.eup %6448  ;;  %v12019_v19 = vmax.f32 %v8849_v24, 0.0 }
 0x361   : > { %v1722_v45 = vsub.f32 0.0, %v1594_v52  ;;  %v9221_v56 = vsub.f32 %v12007_v20, %v8762_v55  ;;  %v12021_v42 = vmax.f32 %v8858_v2, 0.0  ;;  %v9228_v43 = vmul.f32 %v9142_v41, %v2805_v7  ;;  %v12025_v41 = vld [vmem:[#allocation51_spill] sm:$0xff]  ;;  %v9243_v7 = vpop.permute.xlu0 %1187 }
 0x362   : > { %v9216_v14 = vadd.f32 %v2773_v3, %v12019_v19  ;;  %6456 = vlog2.f32 %v2828_v8  ;;  %v1593_v35 = vand.u32 2147483647, %v9193_v9  ;;  %3593 = vadd.xlane.f32.xlu0 %v3422_v37  ;;  %v12023_v24 = vmax.f32 %v8868_v0, 0.0  ;;  %12026 = vst [vmem:[#allocation51_spill] sm:$0xff] %v9243_v7  ;;  %v12027_v0 = vld [vmem:[#allocation50_spill] sm:$0xff]  ;;  %v9249_v37 = vpop.permute.xlu1 %1183  ;;  %v12040_v7 = vld [vmem:[#allocation16_spill] sm:$0xff] }
 0x363   : > { %v9225_v50 = vadd.f32 %v2800_v5, %v12021_v42  ;;  %6458 = vpow2.f32 %v1943_v11  ;;  %v9237_v36 = vmul.f32 0.6931472, %v6447_v38  ;;  %v2819_v2 = vadd.f32 1.0, %v9212_v46  ;;  %v12028_v5 = vld [vmem:[#allocation53_spill] sm:$0xff]  ;;  %12029 = vst [vmem:[#allocation50_spill] sm:$0xff] %v9249_v37  ;;  %v12030_v38 = vld [vmem:[#allocation52_spill] sm:$0xff] }
 0x364   : > { %12020 = vst [vmem:[#allocation71_spill] sm:$0xff] %v9216_v14  ;;  %v9233_v59 = vadd.f32 %v2791_v10, %v12023_v24  ;;  %6460 = vpow2.f32 %v1941_v39  ;;  %v3423_v25 = vmul.f32 %v11948_v17, %v12025_v41  ;;  %v1947_v3 = vmul.f32 1.442695, %v1722_v45  ;;  %v12031_v39 = vld [vmem:[#allocation55_spill] sm:$0xff]  ;;  %v12032_v19 = vld [vmem:[#allocation10_spill] sm:$0xff]  ;;  %v12049_v14 = vld [vmem:[#allocation29_spill] sm:$0xff] }
 0x365   : > { %12022 = vst [vmem:[#allocation72_spill] sm:$0xff] %v9225_v50  ;;  %v1596_v52 = vand.u32 2147483647, %v9221_v56  ;;  %v3424_v8 = vmul.f32 %v11948_v17, %v12027_v0  ;;  %v3425_v11 = vmul.f32 %v11948_v17, %v12028_v5  ;;  %v1721_v40 = vsub.f32 0.0, %v1593_v35  ;;  %v12033_v42 = vld [vmem:[#allocation54_spill] sm:$0xff]  ;;  %v12034_v5 = vld [vmem:[#allocation37_spill] sm:$0xff] }
 0x366   : > { %12024 = vst [vmem:[#allocation73_spill] sm:$0xff] %v9233_v59  ;;  %3595 = vadd.xlane.f32.xlu1 %v3423_v25  ;;  %v3426_v10 = vmul.f32 %v11948_v17, %v12030_v38  ;;  %v3427_v45 = vmul.f32 %v12032_v19, %v12031_v39  ;;  %v3428_v24 = vmul.f32 %v12032_v19, %v12033_v42  ;;  %v2831_v0 = vmul.f32 -0.5, %v9174_v27  ;;  %v12035_v25 = vld [vmem:[#allocation24_spill] sm:$0xff]  ;;  %v12047_v50 = vld [vmem:[#allocation30_spill] sm:$0xff]  ;;  %v12048_v59 = vld [vmem:[#allocation27_spill] sm:$0xff] }
 0x367   : > { %v9257_v41 = vpop.eup %6450  ;;  %v2834_v55 = vand.u32 2147483647, %v9174_v27  ;;  %v9263_v35 = vsub.f32 %v12007_v20, %v12034_v5  ;;  %3597 = vadd.xlane.f32.xlu0 %v3424_v8  ;;  %v3429_v17 = vmul.f32 %v12032_v19, %v12035_v25  ;;  %v2818_v39 = vsel %vm9198_vm1, %v9187_v21, %v9237_v36  ;;  %v12041_v36 = vld [vmem:[#allocation25_spill] sm:$0xff] }
 0x368   : > { %v9267_v38 = vpop.eup %6452  ;;  %vm9273_vm2 = vcmp.lt.f32.partialorder %v2807_v22, 0.0004427343  ;;  %6462 = vlog2.f32 %v2819_v2  ;;  %v3430_v5 = vmul.f32 %v12032_v19, %v12038_v16  ;;  %v9281_v8 = vmul.f32 %v12032_v19, %v12039_v30  ;;  %v12042_v16 = vld [vmem:[#allocation26_spill] sm:$0xff]  ;;  %v12043_v30 = vld [vmem:[#allocation28_spill] sm:$0xff] }
 0x369   : > { %v2822_v25 = vmul.f32 -0.5, %v9212_v46  ;;  %6464 = vpow2.f32 %v1947_v3  ;;  %v1724_v32 = vsub.f32 0.0, %v1596_v52  ;;  %v9286_v48 = vmul.f32 %v12032_v19, %v12040_v7 }
 0x36a   : > { %v6455_v21 = vpop.eup %6454  ;;  %v1945_v22 = vmul.f32 1.442695, %v1721_v40  ;;  %3599 = vadd.xlane.f32.xlu1 %v3425_v11  ;;  %v9290_v2 = vmul.f32 %v12032_v19, %v12041_v36  ;;  %v9294_v51 = vmul.f32 %v12032_v19, %v12042_v16  ;;  %v9298_v37 = vmul.f32 %v12032_v19, %v12043_v30  ;;  %v9303_v40 = vpop.permute.xlu0 %1195  ;;  %v12045_v11 = vld [vmem:[#allocation56_spill] sm:$0xff] }
 0x36b   : > { %v2846_v3 = vadd.f32 1.0, %v9257_v41  ;;  %v2837_v52 = vadd.f32 1.0, %v9267_v38  ;;  %v1595_v7 = vand.u32 2147483647, %v9263_v35  ;;  %12044 = vst [vmem:[#allocation53_spill] sm:$0xff] %v9303_v40  ;;  %3601 = vadd.xlane.f32.xlu0 %v3426_v10  ;;  %v9307_v36 = vmul.f32 %v12032_v19, %v12045_v11  ;;  %v9309_v16 = vpop.permute.xlu1 %1191  ;;  %v12050_v10 = vld [vmem:[#allocation7_spill] sm:$0xff] }
 0x36c   : > { %v6457_v1 = vpop.eup %6456  ;;  %12046 = vst [vmem:[#allocation52_spill] sm:$0xff] %v9309_v16  ;;  %v9313_v30 = vmul.f32 %v12032_v19, %v12047_v50  ;;  %v9317_v57 = vmul.f32 %v12032_v19, %v12048_v59  ;;  %v9321_v54 = vmul.f32 %v12032_v19, %v12049_v14  ;;  %v9325_v40 = vmul.f32 %v12032_v19, %v12050_v10 }
 0x36d   : > { %v9327_v11 = vpop.eup %6458  ;;  %v2803_v12 = vmul.f32 0.6931472, %v6455_v21  ;;  %v1951_v16 = vmul.f32 1.442695, %v1724_v32  ;;  %v9331_v50 = vmul.f32 %v12032_v19, %v12051_v4  ;;  %v9335_v59 = vmul.f32 %v12032_v19, %v12052_v61 }
 0x36e   : > { %v9337_v47 = vpop.eup %6460  ;;  %v2825_v14 = vand.u32 2147483647, %v9212_v46  ;;  %v2849_v13 = vmul.f32 -0.5, %v9257_v41  ;;  %6466 = vpow2.f32 %v1945_v22  ;;  %3603 = vadd.xlane.f32.xlu1 %v3427_v45  ;;  %v2832_v21 = vadd.f32 1.0, %v2831_v0  ;;  %v9346_v61 = vpop.xlane.xlu0 %3507  ;;  %v12056_v0 = vld [vmem:[#allocation36_spill] sm:$0xff] }
 0x36f   : > { %vm9342_vm3 = vcmp.lt.f32.partialorder %v2834_v55, 0.0004427343  ;;  %v2823_v4 = vadd.f32 1.0, %v2822_v25  ;;  %6468 = vlog2.f32 %v2846_v3  ;;  %3605 = vadd.xlane.f32.xlu0 %v3428_v24  ;;  %12055 = vst [vmem:[#allocation55_spill] sm:$0xff] %v9346_v61  ;;  %v2840_v19 = vmul.f32 -0.5, %v9267_v38 }
 0x370   : > { %6470 = vlog2.f32 %v2837_v52  ;;  %v1723_v60 = vsub.f32 0.0, %v1595_v7  ;;  %v9351_v49 = vsub.f32 %v12007_v20, %v8794_v63  ;;  %v2809_v55 = vsel %vm9273_vm2, %v9228_v43, %v2803_v12  ;;  %v9370_v12 = vpop.permute.xlu1 %1199 }
 0x371   : > { %v2864_v45 = vadd.f32 1.0, %v9327_v11  ;;  %6472 = vpow2.f32 %v1951_v16  ;;  %v9359_v24 = vsub.f32 %v12007_v20, %v12056_v0  ;;  %v12057_v22 = vmax.f32 %v8917_v26, 0.0 }
 0x372   : > { %v6463_v25 = vpop.eup %6462  ;;  %vm9365_vm4 = vcmp.lt.f32.partialorder %v2825_v14, 0.0004427343  ;;  %v2850_v63 = vadd.f32 1.0, %v2849_v13  ;;  %v2852_v42 = vand.u32 2147483647, %v9257_v41  ;;  %3607 = vadd.xlane.f32.xlu1 %v3429_v17  ;;  %v2833_v16 = vmul.f32 %v9174_v27, %v2832_v21  ;;  %v9388_v21 = vpop.xlane.xlu0 %3511 }
 0x373   : > { %v9363_v3 = vadd.f32 %v2818_v39, %v12057_v22  ;;  %v9372_v43 = vpop.eup %6464  ;;  %v2830_v7 = vmul.f32 0.6931472, %v6457_v1  ;;  %v2843_v0 = vand.u32 2147483647, %v9267_v38  ;;  %v2855_v26 = vadd.f32 1.0, %v9337_v47  ;;  %3609 = vadd.xlane.f32.xlu0 %v3430_v5  ;;  %12061 = vst [vmem:[#allocation10_spill] sm:$0xff] %v9388_v21 }
 0x374   : > { %v12060_v39 = vmax.f32 %v8969_v15, 0.0  ;;  %v2841_v13 = vadd.f32 1.0, %v2840_v19  ;;  %v1949_v22 = vmul.f32 1.442695, %v1723_v60  ;;  %v1598_v10 = vand.u32 2147483647, %v9351_v49 }
 0x375   : > { %v2824_v17 = vmul.f32 %v9212_v46, %v2823_v4  ;;  %6474 = vlog2.f32 %v2864_v45  ;;  %v1597_v1 = vand.u32 2147483647, %v9359_v24  ;;  %v9386_v27 = vsub.f32 %v12007_v20, %v8844_v34  ;;  %v9397_v46 = vpop.xlane.xlu1 %3509  ;;  %v12068_v60 = vld [vmem:[#allocation38_spill] sm:$0xff] }
 0x376   : > { %v9379_v14 = vadd.f32 %v2809_v55, %v12060_v39  ;;  %v9391_v5 = vmul.f32 %v9257_v41, %v2850_v63  ;;  %v2867_v15 = vmul.f32 -0.5, %v9327_v11  ;;  %3611 = vadd.xlane.f32.xlu1 %v9281_v8  ;;  %12062 = vst [vmem:[#allocation54_spill] sm:$0xff] %v9397_v46  ;;  %v2836_v4 = vsel %vm9342_vm3, %v2833_v16, %v2830_v7 }
 0x377   : > { %v2821_v34 = vmul.f32 0.6931472, %v6463_v25  ;;  %vm9401_vm5 = vcmp.lt.f32.partialorder %v2852_v42, 0.0004427343  ;;  %6476 = vlog2.f32 %v2855_v26  ;;  %v2882_v41 = vadd.f32 1.0, %v9372_v43  ;;  %3613 = vadd.xlane.f32.xlu0 %v9286_v48 }
 0x378   : > { %v9407_v45 = vpop.eup %6466  ;;  %v9410_v63 = vmul.f32 %v9267_v38, %v2841_v13  ;;  %vm9412_vm6 = vcmp.lt.f32.partialorder %v2843_v0, 0.0004427343  ;;  %v2858_v32 = vmul.f32 -0.5, %v9337_v47  ;;  %6478 = vpow2.f32 %v1949_v22 }
 0x379   : > { %v1726_v25 = vsub.f32 0.0, %v1598_v10  ;;  %v6469_v42 = vpop.eup %6468  ;;  %v2870_v7 = vand.u32 2147483647, %v9327_v11  ;;  %v1725_v26 = vsub.f32 0.0, %v1597_v1  ;;  %v1600_v48 = vand.u32 2147483647, %v9386_v27  ;;  %v9443_v46 = vpop.xlane.xlu1 %3515 }
 0x37a   : > { %v6471_v39 = vpop.eup %6470  ;;  %v12067_v38 = vmax.f32 %v8993_v6, 0.0  ;;  %v2868_v0 = vadd.f32 1.0, %v2867_v15  ;;  %v2861_v19 = vand.u32 2147483647, %v9337_v47  ;;  %v9427_v22 = vsub.f32 %v12007_v20, %v12068_v60  ;;  %3615 = vadd.xlane.f32.xlu1 %v9290_v2  ;;  %v12069_v6 = vld [vmem:[#allocation58_spill] sm:$0xff]  ;;  %v9440_v15 = vpop.xlane.xlu0 %3513  ;;  %12070 = vst [vmem:[#allocation37_spill] sm:$0xff] %v9443_v46 }
 0x37b   : > { %v9430_v10 = vpop.eup %6472  ;;  %v2827_v1 = vsel %vm9365_vm4, %v2824_v17, %v2821_v34  ;;  %6480 = vlog2.f32 %v2882_v41  ;;  %v2873_v16 = vadd.f32 1.0, %v9407_v45  ;;  %3617 = vadd.xlane.f32.xlu0 %v9294_v51  ;;  %v2848_v60 = vmul.f32 0.6931472, %v6469_v42 }
 0x37c   : > { %v9422_v13 = vadd.f32 %v2836_v4, %v12067_v38  ;;  %v9437_v4 = vsub.f32 %v12007_v20, %v12069_v6  ;;  %v2859_v38 = vadd.f32 1.0, %v2858_v32  ;;  %v2885_v2 = vmul.f32 -0.5, %v9372_v43  ;;  %v12073_v6 = vld [vmem:[#allocation57_spill] sm:$0xff] }
 0x37d   : > { %v1955_v21 = vmul.f32 1.442695, %v1726_v25  ;;  %v2839_v52 = vmul.f32 0.6931472, %v6471_v39  ;;  %vm9445_vm7 = vcmp.lt.f32.partialorder %v2870_v7, 0.0004427343  ;;  %v9451_v61 = vsub.f32 %v12007_v20, %v12073_v6 }
 0x37e   : > { %v1953_v34 = vmul.f32 1.442695, %v1725_v26  ;;  %v1728_v41 = vsub.f32 0.0, %v1600_v48  ;;  %v12074_v51 = vmax.f32 %v9035_v53, 0.0  ;;  %v2869_v32 = vmul.f32 %v9327_v11, %v2868_v0  ;;  %3619 = vadd.xlane.f32.xlu1 %v9298_v37 }
 0x37f   : > { %v2900_v25 = vadd.f32 1.0, %v9430_v10  ;;  %v1599_v39 = vand.u32 2147483647, %v9427_v22  ;;  %v6475_v7 = vpop.eup %6474  ;;  %vm9461_vm8 = vcmp.lt.f32.partialorder %v2861_v19, 0.0004427343  ;;  %6482 = vlog2.f32 %v2873_v16  ;;  %3621 = vadd.xlane.f32.xlu0 %v9307_v36 }
 0x380   : > { %v9455_v42 = vadd.f32 %v2827_v1, %v12074_v51  ;;  %v2888_v48 = vand.u32 2147483647, %v9372_v43  ;;  %v1602_v53 = vand.u32 2147483647, %v9437_v4  ;;  %v9469_v1 = vsub.f32 %v12007_v20, %v8923_v18  ;;  %v9480_v51 = vpop.xlane.xlu0 %3517 }
 0x381   : > { %v2854_v37 = vsel %vm9401_vm5, %v9391_v5, %v2848_v60  ;;  %v2860_v11 = vmul.f32 %v9337_v47, %v2859_v38  ;;  %v2886_v19 = vadd.f32 1.0, %v2885_v2  ;;  %6484 = vpow2.f32 %v1955_v21  ;;  %v6477_v0 = vpop.eup %6476  ;;  %12077 = vst [vmem:[#allocation24_spill] sm:$0xff] %v9480_v51  ;;  %v9486_v21 = vpop.xlane.xlu1 %3519 }
 0x382   : > { %v2845_v16 = vsel %vm9412_vm6, %v9410_v63, %v2839_v52  ;;  %6486 = vpow2.f32 %v1953_v34  ;;  %v1959_v6 = vmul.f32 1.442695, %v1728_v41  ;;  %v1601_v18 = vand.u32 2147483647, %v9451_v61  ;;  %v9482_v36 = vpop.eup %6478  ;;  %3623 = vadd.xlane.f32.xlu1 %v9313_v30  ;;  %12078 = vst [vmem:[#allocation22_spill] sm:$0xff] %v9486_v21 }
 0x383   : > { %v2866_v46 = vmul.f32 0.6931472, %v6475_v7  ;;  %v2876_v5 = vmul.f32 -0.5, %v9407_v45  ;;  %6488 = vlog2.f32 %v2900_v25  ;;  %v1727_v47 = vsub.f32 0.0, %v1599_v39  ;;  %3625 = vadd.xlane.f32.xlu0 %v9317_v57 }
 0x384   : > { %v12079_v55 = vmax.f32 %v9071_v29, 0.0  ;;  %vm9492_vm9 = vcmp.lt.f32.partialorder %v2888_v48, 0.0004427343  ;;  %v1730_v38 = vsub.f32 0.0, %v1602_v53  ;;  %v1604_v2 = vand.u32 2147483647, %v9469_v1 }
 0x385   : > { %v2857_v52 = vmul.f32 0.6931472, %v6477_v0  ;;  %v9500_v30 = vmul.f32 %v9372_v43, %v2886_v19  ;;  %v2879_v34 = vand.u32 2147483647, %v9407_v45  ;;  %v2903_v29 = vmul.f32 -0.5, %v9430_v10  ;;  %v6481_v41 = vpop.eup %6480 }
 0x386   : > { %v9490_v63 = vadd.f32 %v2854_v37, %v12079_v55  ;;  %v12082_v25 = vmax.f32 %v9081_v31, 0.0  ;;  %v2891_v7 = vadd.f32 1.0, %v9482_v36  ;;  %6490 = vpow2.f32 %v1959_v6  ;;  %3627 = vadd.xlane.f32.xlu1 %v9321_v54  ;;  %v12083_v31 = vld [vmem:[#allocation42_spill] sm:$0xff]  ;;  %v9519_v6 = vpop.xlane.xlu0 %3521 }
 0x387   : > { %v1729_v48 = vsub.f32 0.0, %v1601_v18  ;;  %v2872_v57 = vsel %vm9445_vm7, %v2869_v32, %v2866_v46  ;;  %v2877_v53 = vadd.f32 1.0, %v2876_v5  ;;  %v2906_v43 = vand.u32 2147483647, %v9430_v10  ;;  %3629 = vadd.xlane.f32.xlu0 %v9325_v40  ;;  %12084 = vst [vmem:[#allocation23_spill] sm:$0xff] %v9519_v6  ;;  %v9527_v18 = vpop.xlane.xlu1 %3523  ;;  %v12109_v40 = vld [vmem:[#allocation41_spill] sm:$0xff] }
 0x388   : > { %v9506_v39 = vadd.f32 %v2845_v16, %v12082_v25  ;;  %v1957_v37 = vmul.f32 1.442695, %v1727_v47  ;;  %v1963_v0 = vmul.f32 1.442695, %v1730_v38  ;;  %v1732_v55 = vsub.f32 0.0, %v1604_v2  ;;  %12087 = vst [vmem:[#allocation16_spill] sm:$0xff] %v9527_v18 }
 0x389   : > { %v9516_v16 = vsub.f32 %v12007_v20, %v12083_v31  ;;  %v2863_v46 = vsel %vm9461_vm8, %v2860_v11, %v2857_v52  ;;  %v2884_v17 = vmul.f32 0.6931472, %v6481_v41  ;;  %vm9523_vm10 = vcmp.lt.f32.partialorder %v2879_v34, 0.0004427343  ;;  %v6483_v5 = vpop.eup %6482  ;;  %v12173_v6 = vld [vmem:[#allocation18_spill] sm:$0xff] }
 0x38a   : > { %v2904_v54 = vadd.f32 1.0, %v2903_v29  ;;  %v12088_v47 = vmax.f32 %v9111_v33, 0.0  ;;  %6492 = vlog2.f32 %v2891_v7  ;;  %v1961_v2 = vmul.f32 1.442695, %v1729_v48  ;;  %3631 = vadd.xlane.f32.xlu1 %v9331_v50  ;;  %v9564_v31 = vpop.xlane.xlu0 %3525 }
 0x38b   : > { %v9534_v25 = vpop.eup %6484  ;;  %v2878_v26 = vmul.f32 %v9407_v45, %v2877_v53  ;;  %vm9537_vm11 = vcmp.lt.f32.partialorder %v2906_v43, 0.0004427343  ;;  %v2894_v52 = vmul.f32 -0.5, %v9482_v36  ;;  %6494 = vpow2.f32 %v1957_v37  ;;  %3633 = vadd.xlane.f32.xlu0 %v9335_v59  ;;  %v12092_v53 = vld [vmem:[#allocation32_spill] sm:$0xff]  ;;  %v12093_v43 = vld [vmem:[#allocation9_spill] sm:$0xff]  ;;  %12095 = vst [vmem:[#allocation25_spill] sm:$0xff] %v9564_v31 }
 0x38c   : > { %v9531_v38 = vadd.f32 %v2872_v57, %v12088_v47  ;;  %v9543_v33 = vpop.eup %6486  ;;  %v12091_v34 = vmax.f32 %v9120_v44, 0.0  ;;  %6496 = vpow2.f32 %v1963_v0  ;;  %v1967_v41 = vmul.f32 1.442695, %v1732_v55  ;;  %v12094_v55 = vld [vmem:[#allocation33_spill] sm:$0xff] }
 0x38d   : > { %v1603_v7 = vand.u32 2147483647, %v9516_v16  ;;  %v6489_v45 = vpop.eup %6488  ;;  %v2890_v48 = vsel %vm9492_vm9, %v9500_v30, %v2884_v17  ;;  %v2875_v57 = vmul.f32 0.6931472, %v6483_v5  ;;  %v2905_v50 = vmul.f32 %v9430_v10, %v2904_v54  ;;  %v9569_v17 = vpop.xlane.xlu1 %3527 }
 0x38e   : > { %v9547_v29 = vadd.f32 %v2863_v46, %v12091_v34  ;;  %v3443_v37 = vmul.f32 %v12093_v43, %v12092_v53  ;;  %v2918_v44 = vadd.f32 1.0, %v9534_v25  ;;  %6498 = vpow2.f32 %v1961_v2  ;;  %12096 = vst [vmem:[#allocation26_spill] sm:$0xff] %v9569_v17 }
 0x38f   : > { %v9560_v0 = vsub.f32 %v12007_v20, %v8965_v28  ;;  %v3444_v59 = vmul.f32 %v12093_v43, %v12094_v55  ;;  %v2895_v8 = vadd.f32 1.0, %v2894_v52  ;;  %v2897_v30 = vand.u32 2147483647, %v9482_v36  ;;  %v12098_v55 = vld [vmem:[#allocation34_spill] sm:$0xff] }
 0x390   : > { %v2909_v10 = vadd.f32 1.0, %v9543_v33  ;;  %3635 = vadd.xlane.f32.xlu1 %v3443_v37  ;;  %v9571_v54 = vpop.eup %6490  ;;  %v2902_v5 = vmul.f32 0.6931472, %v6489_v45  ;;  %v2921_v28 = vmul.f32 -0.5, %v9534_v25  ;;  %6500 = vpow2.f32 %v1967_v41  ;;  %v12099_v41 = vld [vmem:[#allocation35_spill] sm:$0xff] }
 0x391   : > { %v1731_v47 = vsub.f32 0.0, %v1603_v7  ;;  %3637 = vadd.xlane.f32.xlu0 %v3444_v59  ;;  %v12097_v2 = vmax.f32 %v9161_v58, 0.0  ;;  %v2912_v34 = vmul.f32 -0.5, %v9543_v33  ;;  %v3445_v37 = vmul.f32 %v12093_v43, %v12098_v55  ;;  %v9598_v55 = vpop.xlane.xlu0 %3529 }
 0x392   : > { %v2881_v46 = vsel %vm9523_vm10, %v2878_v26, %v2875_v57  ;;  %6502 = vlog2.f32 %v2918_v44  ;;  %v1606_v45 = vand.u32 2147483647, %v9560_v0  ;;  %v3446_v7 = vmul.f32 %v12093_v43, %v12099_v41  ;;  %12102 = vst [vmem:[#allocation28_spill] sm:$0xff] %v9598_v55  ;;  %v12104_v41 = vld [vmem:[#allocation39_spill] sm:$0xff] }
 0x393   : > { %v9576_v52 = vadd.f32 %v2890_v48, %v12097_v2  ;;  %v9588_v58 = vmul.f32 %v9482_v36, %v2895_v8  ;;  %vm9590_vm12 = vcmp.lt.f32.partialorder %v2897_v30, 0.0004427343  ;;  %6504 = vlog2.f32 %v2909_v10 }
 0x394   : > { %v2936_v59 = vadd.f32 1.0, %v9571_v54  ;;  %3639 = vadd.xlane.f32.xlu1 %v3445_v37  ;;  %v6493_v2 = vpop.eup %6492  ;;  %v2908_v32 = vsel %vm9537_vm11, %v2905_v50, %v2902_v5  ;;  %v2922_v26 = vadd.f32 1.0, %v2921_v28  ;;  %v1965_v44 = vmul.f32 1.442695, %v1731_v47  ;;  %v9609_v50 = vpop.xlane.xlu1 %3531 }
 0x395   : > { %3641 = vadd.xlane.f32.xlu0 %v3446_v7  ;;  %v9600_v36 = vpop.eup %6494  ;;  %v12103_v8 = vmax.f32 %v9193_v9, 0.0  ;;  %v2924_v10 = vand.u32 2147483647, %v9534_v25  ;;  %v2913_v37 = vadd.f32 1.0, %v2912_v34  ;;  %v3447_v11 = vmul.f32 %v12093_v43, %v12104_v41  ;;  %12105 = vst [vmem:[#allocation56_spill] sm:$0xff] %v9609_v50  ;;  %v12106_v9 = vld [vmem:[#allocation17_spill] sm:$0xff] }
 0x396   : > { %v9611_v5 = vpop.eup %6496  ;;  %v1734_v47 = vsub.f32 0.0, %v1606_v45  ;;  %v9616_v7 = vsub.f32 %v12007_v20, %v8919_v23  ;;  %v2893_v57 = vmul.f32 0.6931472, %v6493_v2  ;;  %v2915_v41 = vand.u32 2147483647, %v9543_v33 }
 0x397   : > { %v9604_v30 = vadd.f32 %v2881_v46, %v12103_v8  ;;  %v3448_v46 = vmul.f32 %v12093_v43, %v12106_v9  ;;  %v12107_v8 = vmax.f32 %v9221_v56, 0.0  ;;  %6506 = vlog2.f32 %v2936_v59  ;;  %v12108_v59 = vld [vmem:[#allocation40_spill] sm:$0xff] }
 0x398   : > { %3643 = vadd.xlane.f32.xlu1 %v3447_v11  ;;  %v9625_v53 = vpop.eup %6498  ;;  %v9628_v45 = vmul.f32 %v9534_v25, %v2922_v26  ;;  %v2939_v23 = vmul.f32 -0.5, %v9571_v54  ;;  %v2927_v28 = vadd.f32 1.0, %v9600_v36  ;;  %6508 = vpow2.f32 %v1965_v44  ;;  %v9664_v19 = vpop.xlane.xlu1 %3535 }
 0x399   : > { %v9622_v34 = vadd.f32 %v2908_v32, %v12107_v8  ;;  %3645 = vadd.xlane.f32.xlu0 %v3448_v46  ;;  %v9633_v56 = vmul.f32 %v9543_v33, %v2913_v37  ;;  %v2954_v2 = vadd.f32 1.0, %v9611_v5  ;;  %v3449_v11 = vmul.f32 %v12093_v43, %v12108_v59  ;;  %v9645_v46 = vpop.xlane.xlu0 %3533  ;;  %12115 = vst [vmem:[#allocation27_spill] sm:$0xff] %v9664_v19  ;;  %v12117_v19 = vld [vmem:[#allocation60_spill] sm:$0xff]  ;;  %v12129_v37 = vld [vmem:[#allocation19_spill] sm:$0xff] }
 0x39a   : > { %v9639_v9 = vpop.eup %6500  ;;  %v2942_v25 = vand.u32 2147483647, %v9571_v54  ;;  %v1971_v26 = vmul.f32 1.442695, %v1734_v47  ;;  %v1605_v8 = vand.u32 2147483647, %v9616_v7  ;;  %v3450_v44 = vmul.f32 %v12093_v43, %v12109_v40 }
 0x39b   : > { %12110 = vst [vmem:[#allocation30_spill] sm:$0xff] %v9645_v46  ;;  %v2899_v33 = vsel %vm9590_vm12, %v9588_v58, %v2893_v57  ;;  %vm9650_vm13 = vcmp.lt.f32.partialorder %v2924_v10, 0.0004427343  ;;  %vm9654_vm14 = vcmp.lt.f32.partialorder %v2915_v41, 0.0004427343  ;;  %v2930_v47 = vmul.f32 -0.5, %v9600_v36 }
 0x39c   : > { %v2945_v32 = vadd.f32 1.0, %v9625_v53  ;;  %v9662_v40 = vsub.f32 %v12007_v20, %v9006_v62  ;;  %3647 = vadd.xlane.f32.xlu1 %v3449_v11  ;;  %v6503_v58 = vpop.eup %6502  ;;  %v2940_v48 = vadd.f32 1.0, %v2939_v23  ;;  %6510 = vlog2.f32 %v2927_v28  ;;  %v12116_v46 = vld [vmem:[#allocation45_spill] sm:$0xff]  ;;  %v12118_v28 = vld [vmem:[#allocation43_spill] sm:$0xff] }
 0x39d   : > { %v2957_v57 = vmul.f32 -0.5, %v9611_v5  ;;  %3649 = vadd.xlane.f32.xlu0 %v3450_v44  ;;  %v6505_v41 = vpop.eup %6504  ;;  %v2933_v60 = vand.u32 2147483647, %v9600_v36  ;;  %6512 = vlog2.f32 %v2954_v2  ;;  %v2972_v50 = vadd.f32 1.0, %v9639_v9 }
 0x39e   : > { %v3451_v62 = vmul.f32 %v12093_v43, %v12116_v46  ;;  %6514 = vpow2.f32 %v1971_v26  ;;  %v1733_v11 = vsub.f32 0.0, %v1605_v8  ;;  %v9674_v23 = vsub.f32 %v12007_v20, %v12117_v19  ;;  %v9684_v20 = vpop.xlane.xlu0 %3537 }
 0x39f   : > { %v3452_v17 = vmul.f32 %v12093_v43, %v12118_v28  ;;  %v2931_v10 = vadd.f32 1.0, %v2930_v47  ;;  %6516 = vlog2.f32 %v2945_v32  ;;  %v2948_v44 = vmul.f32 -0.5, %v9625_v53  ;;  %12120 = vst [vmem:[#allocation29_spill] sm:$0xff] %v9684_v20 }
 0x3a0   : > { %v1608_v2 = vand.u32 2147483647, %v9662_v40  ;;  %3651 = vadd.xlane.f32.xlu1 %v3451_v62  ;;  %v12119_v55 = vmax.f32 %v9263_v35, 0.0  ;;  %v2920_v26 = vmul.f32 0.6931472, %v6503_v58  ;;  %v2958_v46 = vadd.f32 1.0, %v2957_v57 }
 0x3a1   : > { %v2911_v8 = vmul.f32 0.6931472, %v6505_v41  ;;  %3653 = vadd.xlane.f32.xlu0 %v3452_v17  ;;  %v6507_v19 = vpop.eup %6506  ;;  %v2941_v28 = vmul.f32 %v9571_v54, %v2940_v48  ;;  %vm9687_vm15 = vcmp.lt.f32.partialorder %v2942_v25, 0.0004427343  ;;  %v2960_v47 = vand.u32 2147483647, %v9611_v5 }
 0x3a2   : > { %v9682_v18 = vadd.f32 %v2899_v33, %v12119_v55  ;;  %v12123_v62 = vld [vmem:[#allocation59_spill] sm:$0xff]  ;;  %v9694_v55 = vpop.xlane.xlu1 %3539  ;;  %v9696_v33 = vpop.eup %6508  ;;  %6518 = vlog2.f32 %v2972_v50  ;;  %v1969_v17 = vmul.f32 1.442695, %v1733_v11  ;;  %v1607_v58 = vand.u32 2147483647, %v9674_v23  ;;  %v12125_v57 = vld [vmem:[#allocation8_spill] sm:$0xff] }
 0x3a3   : > { %v3453_v35 = vmul.f32 %v12093_v43, %v12123_v62  ;;  %12124 = vst [vmem:[#allocation7_spill] sm:$0xff] %v9694_v55  ;;  %v3454_v54 = vmul.f32 %v12093_v43, %v12125_v57  ;;  %v9702_v25 = vmul.f32 %v9600_v36, %v2931_v10  ;;  %v2949_v48 = vadd.f32 1.0, %v2948_v44 }
 0x3a4   : > { %v2951_v41 = vand.u32 2147483647, %v9625_v53  ;;  %v1736_v20 = vsub.f32 0.0, %v1608_v2  ;;  %v2926_v62 = vsel %vm9650_vm13, %v9628_v45, %v2920_v26  ;;  %v2917_v50 = vsel %vm9654_vm14, %v9633_v56, %v2911_v8  ;;  %v12130_v26 = vld [vmem:[#allocation44_spill] sm:$0xff]  ;;  %v12133_v8 = vld [vmem:[#allocation46_spill] sm:$0xff] }
 0x3a5   : > { %3655 = vadd.xlane.f32.xlu1 %v3453_v35  ;;  %vm9711_vm1 = vcmp.lt.f32.partialorder %v2933_v60, 0.0004427343  ;;  %v9716_v36 = vmul.f32 %v9611_v5, %v2958_v46  ;;  %v2975_v10 = vmul.f32 -0.5, %v9639_v9  ;;  %3657 = vadd.xlane.f32.xlu0 %v3454_v54  ;;  %v2938_v44 = vmul.f32 0.6931472, %v6507_v19  ;;  %v12128_v35 = vld [vmem:[#allocation63_spill] sm:$0xff]  ;;  %v9736_v54 = vpop.xlane.xlu0 %3541 }
 0x3a6   : > { %v2963_v2 = vadd.f32 1.0, %v9696_v33  ;;  %v9722_v45 = vsub.f32 %v12129_v37, %v12128_v35  ;;  %v3455_v56 = vmul.f32 %v12093_v43, %v12130_v26  ;;  %v6511_v60 = vpop.eup %6510  ;;  %vm9726_vm2 = vcmp.lt.f32.partialorder %v2960_v47, 0.0004427343  ;;  %v12134_v19 = vld [vmem:[#allocation61_spill] sm:$0xff]  ;;  %12135 = vst [vmem:[#allocation31_spill] sm:$0xff] %v9736_v54 }
 0x3a7   : > { %6520 = vpow2.f32 %v1969_v17  ;;  %v1735_v5 = vsub.f32 0.0, %v1607_v58  ;;  %v9732_v46 = vsub.f32 %v12129_v37, %v12133_v8  ;;  %v3456_v57 = vmul.f32 %v12093_v43, %v12134_v19  ;;  %v6513_v35 = vpop.eup %6512  ;;  %v9747_v58 = vpop.xlane.xlu1 %3543 }
 0x3a8   : > { %v12136_v55 = vmax.f32 %v9351_v49, 0.0  ;;  %v2950_v47 = vmul.f32 %v9625_v53, %v2949_v48  ;;  %vm9743_vm3 = vcmp.lt.f32.partialorder %v2951_v41, 0.0004427343  ;;  %v1975_v17 = vmul.f32 1.442695, %v1736_v20  ;;  %12139 = vst [vmem:[#allocation14_spill] sm:$0xff] %v9747_v58  ;;  %v9749_v8 = vpop.eup %6514 }
 0x3a9   : > { %3659 = vadd.xlane.f32.xlu1 %v3455_v56  ;;  %v12140_v19 = vmax.f32 %v9359_v24, 0.0  ;;  %v2976_v21 = vadd.f32 1.0, %v2975_v10  ;;  %v2978_v49 = vand.u32 2147483647, %v9639_v9  ;;  %3661 = vadd.xlane.f32.xlu0 %v3456_v57  ;;  %v6517_v53 = vpop.eup %6516  ;;  %v2944_v48 = vsel %vm9687_vm15, %v2941_v28, %v2938_v44  ;;  %v12142_v10 = vld [vmem:[#allocation15_spill] sm:$0xff] }
 0x3aa   : > { %v9740_v26 = vadd.f32 %v2926_v62, %v12136_v55  ;;  %v2929_v20 = vmul.f32 0.6931472, %v6511_v60  ;;  %v1610_v41 = vand.u32 2147483647, %v9722_v45  ;;  %v12141_v62 = vld [vmem:[#allocation48_spill] sm:$0xff]  ;;  %6522 = vlog2.f32 %v2963_v2 }
 0x3ab   : > { %v9753_v54 = vadd.f32 %v2917_v50, %v12140_v19  ;;  %v3457_v56 = vmul.f32 %v12093_v43, %v12141_v62  ;;  %v1973_v24 = vmul.f32 1.442695, %v1735_v5  ;;  %v1609_v50 = vand.u32 2147483647, %v9732_v46 }
 0x3ac   : > { %v3458_v19 = vmul.f32 %v12093_v43, %v12142_v10  ;;  %v2956_v58 = vmul.f32 0.6931472, %v6513_v35  ;;  %v2990_v57 = vadd.f32 1.0, %v9749_v8  ;;  %6524 = vpow2.f32 %v1975_v17  ;;  %v6519_v28 = vpop.eup %6518  ;;  %v9776_v43 = vpop.xlane.xlu0 %3545  ;;  %v12150_v10 = vld [vmem:[#allocation65_spill] sm:$0xff] }
 0x3ad   : > { %3663 = vadd.xlane.f32.xlu1 %v3457_v56  ;;  %v12143_v32 = vmax.f32 %v9386_v27, 0.0  ;;  %v2947_v60 = vmul.f32 0.6931472, %v6517_v53  ;;  %vm9771_vm4 = vcmp.lt.f32.partialorder %v2978_v49, 0.0004427343  ;;  %v2966_v5 = vmul.f32 -0.5, %v9696_v33  ;;  %v9784_v53 = vpop.xlane.xlu1 %3547 }
 0x3ae   : > { %3665 = vadd.xlane.f32.xlu0 %v3458_v19  ;;  %12146 = vst [vmem:[#allocation36_spill] sm:$0xff] %v9776_v43  ;;  %v2935_v35 = vsel %vm9711_vm1, %v9702_v25, %v2929_v20  ;;  %v2977_v17 = vmul.f32 %v9639_v9, %v2976_v21  ;;  %v1738_v62 = vsub.f32 0.0, %v1610_v41  ;;  %v12147_v27 = vld [vmem:[#allocation66_spill] sm:$0xff]  ;;  %12149 = vst [vmem:[#allocation38_spill] sm:$0xff] %v9784_v53  ;;  %6526 = vpow2.f32 %v1973_v24  ;;  %v12151_v19 = vld [vmem:[#allocation64_spill] sm:$0xff] }
 0x3af   : > { %v9769_v44 = vadd.f32 %v2944_v48, %v12143_v32  ;;  %v12148_v48 = vld [vmem:[#allocation11_spill] sm:$0xff]  ;;  %v1737_v49 = vsub.f32 0.0, %v1609_v50  ;;  %v9788_v32 = vsub.f32 %v12129_v37, %v12150_v10  ;;  %v2962_v25 = vsel %vm9726_vm2, %v9716_v36, %v2956_v58  ;;  %v12152_v50 = vld [vmem:[#allocation62_spill] sm:$0xff]  ;;  %v12156_v10 = vld [vmem:[#allocation69_spill] sm:$0xff] }
 0x3b0   : > { %v3459_v56 = vmul.f32 %v12148_v48, %v12147_v27  ;;  %v3460_v55 = vmul.f32 %v12148_v48, %v12151_v19  ;;  %v2974_v21 = vmul.f32 0.6931472, %v6519_v28  ;;  %v2969_v9 = vand.u32 2147483647, %v9696_v33  ;;  %v12154_v28 = vld [vmem:[#allocation70_spill] sm:$0xff]  ;;  %v9819_v19 = vpop.xlane.xlu0 %3549 }
 0x3b1   : > { %6528 = vlog2.f32 %v2990_v57  ;;  %v9796_v11 = vpop.eup %6520  ;;  %v2953_v20 = vsel %vm9743_vm3, %v2950_v47, %v2947_v60  ;;  %v2967_v41 = vadd.f32 1.0, %v2966_v5  ;;  %v9803_v27 = vsub.f32 %v12129_v37, %v12152_v50  ;;  %12157 = vst [vmem:[#allocation58_spill] sm:$0xff] %v9819_v19 }
 0x3b2   : > { %3667 = vadd.xlane.f32.xlu1 %v3459_v56  ;;  %3669 = vadd.xlane.f32.xlu0 %v3460_v55  ;;  %v12153_v36 = vmax.f32 %v9427_v22, 0.0  ;;  %v2993_v58 = vmul.f32 -0.5, %v9749_v8  ;;  %v1979_v57 = vmul.f32 1.442695, %v1738_v62  ;;  %v3461_v56 = vmul.f32 %v12148_v48, %v12154_v28 }
 0x3b3   : > { %v12155_v31 = vmax.f32 %v9437_v4, 0.0  ;;  %v1977_v60 = vmul.f32 1.442695, %v1737_v49  ;;  %v1612_v5 = vand.u32 2147483647, %v9788_v32  ;;  %v3462_v55 = vmul.f32 %v12148_v48, %v12156_v10 }
 0x3b4   : > { %v9807_v59 = vadd.f32 %v2935_v35, %v12153_v36  ;;  %v12158_v22 = vmax.f32 %v9451_v61, 0.0  ;;  %v2980_v62 = vsel %vm9771_vm4, %v2977_v17, %v2974_v21  ;;  %vm9827_vm5 = vcmp.lt.f32.partialorder %v2969_v9, 0.0004427343  ;;  %v6523_v36 = vpop.eup %6522  ;;  %v12162_v9 = vld [vmem:[#allocation68_spill] sm:$0xff] }
 0x3b5   : > { %v9814_v47 = vadd.f32 %v2962_v25, %v12155_v31  ;;  %v2996_v4 = vand.u32 2147483647, %v9749_v8  ;;  %v2981_v49 = vadd.f32 1.0, %v9796_v11  ;;  %v9833_v25 = vpop.xlane.xlu1 %3551  ;;  %v2968_v28 = vmul.f32 %v9696_v33, %v2967_v41 }
 0x3b6   : > { %v9823_v35 = vadd.f32 %v2953_v20, %v12158_v22  ;;  %3671 = vadd.xlane.f32.xlu1 %v3461_v56  ;;  %12161 = vst [vmem:[#allocation57_spill] sm:$0xff] %v9833_v25  ;;  %v1611_v2 = vand.u32 2147483647, %v9803_v27  ;;  %3673 = vadd.xlane.f32.xlu0 %v3462_v55  ;;  %v9839_v17 = vpop.eup %6524  ;;  %v2994_v21 = vadd.f32 1.0, %v2993_v58  ;;  %6530 = vpow2.f32 %v1979_v57  ;;  %v12163_v56 = vld [vmem:[#allocation71_spill] sm:$0xff]  ;;  %v12165_v20 = vld [vmem:[#allocation21_spill] sm:$0xff] }
 0x3b7   : > { %v9843_v31 = vsub.f32 %v12129_v37, %v12162_v9  ;;  %v3463_v10 = vmul.f32 %v12148_v48, %v12163_v56  ;;  %v12164_v33 = vmax.f32 %v9469_v1, 0.0  ;;  %6532 = vpow2.f32 %v1977_v60  ;;  %v12169_v57 = vld [vmem:[#allocation73_spill] sm:$0xff]  ;;  %v12171_v60 = vld [vmem:[#allocation47_spill] sm:$0xff] }
 0x3b8   : > { %v1740_v22 = vsub.f32 0.0, %v1612_v5  ;;  %v3464_v55 = vmul.f32 %v12148_v48, %v12165_v20  ;;  %vm9853_vm6 = vcmp.lt.f32.partialorder %v2996_v4, 0.0004427343  ;;  %6534 = vlog2.f32 %v2981_v49  ;;  %v9859_v9 = vpop.eup %6526  ;;  %v9863_v20 = vpop.xlane.xlu0 %3553 }
 0x3b9   : > { %v9849_v41 = vadd.f32 %v2980_v62, %v12164_v33  ;;  %v2984_v58 = vmul.f32 -0.5, %v9796_v11  ;;  %v2965_v1 = vmul.f32 0.6931472, %v6523_v36  ;;  %v3011_v62 = vmul.f32 -0.5, %v9839_v17  ;;  %12168 = vst [vmem:[#allocation42_spill] sm:$0xff] %v9863_v20  ;;  %v9870_v24 = vpop.xlane.xlu1 %3555 }
 0x3ba   : > { %3675 = vadd.xlane.f32.xlu1 %v3463_v10  ;;  %v1739_v5 = vsub.f32 0.0, %v1611_v2  ;;  %3677 = vadd.xlane.f32.xlu0 %v3464_v55  ;;  %v2995_v56 = vmul.f32 %v9749_v8, %v2994_v21  ;;  %v3008_v49 = vadd.f32 1.0, %v9839_v17  ;;  %v1614_v33 = vand.u32 2147483647, %v9843_v31  ;;  %12170 = vst [vmem:[#allocation32_spill] sm:$0xff] %v9870_v24  ;;  %v12172_v55 = vld [vmem:[#allocation72_spill] sm:$0xff] }
 0x3bb   : > { %v6529_v4 = vpop.eup %6528  ;;  %v3465_v10 = vmul.f32 %v12148_v48, %v12169_v57  ;;  %v2987_v36 = vand.u32 2147483647, %v9796_v11  ;;  %v1983_v25 = vmul.f32 1.442695, %v1740_v22  ;;  %v9875_v2 = vsub.f32 %v12129_v37, %v12171_v60 }
 0x3bc   : > { %v3466_v20 = vmul.f32 %v12148_v48, %v12172_v55  ;;  %v2985_v8 = vadd.f32 1.0, %v2984_v58  ;;  %v3014_v21 = vand.u32 2147483647, %v9839_v17  ;;  %v2999_v53 = vadd.f32 1.0, %v9859_v9 }
 0x3bd   : > { %v3002_v19 = vmul.f32 -0.5, %v9859_v9  ;;  %v2971_v57 = vsel %vm9827_vm5, %v2968_v28, %v2965_v1  ;;  %v2992_v24 = vmul.f32 0.6931472, %v6529_v4  ;;  %v3012_v22 = vadd.f32 1.0, %v3011_v62  ;;  %v9897_v1 = vpop.xlane.xlu0 %3557 }
 0x3be   : > { %3679 = vadd.xlane.f32.xlu1 %v3465_v10  ;;  %v1981_v43 = vmul.f32 1.442695, %v1739_v5  ;;  %3681 = vadd.xlane.f32.xlu0 %v3466_v20  ;;  %6536 = vlog2.f32 %v3008_v49  ;;  %v1742_v60 = vsub.f32 0.0, %v1614_v33  ;;  %v9886_v55 = vsub.f32 %v12129_v37, %v12173_v6  ;;  %v12174_v10 = vld [vmem:[#allocation67_spill] sm:$0xff]  ;;  %12175 = vst [vmem:[#allocation9_spill] sm:$0xff] %v9897_v1  ;;  %v9908_v20 = vpop.xlane.xlu1 %3559 }
 0x3bf   : > { %v3467_v58 = vmul.f32 %v12148_v48, %v9379_v14  ;;  %6538 = vpow2.f32 %v1983_v25  ;;  %v1613_v51 = vand.u32 2147483647, %v9875_v2  ;;  %v9893_v50 = vsub.f32 %v12129_v37, %v12174_v10  ;;  %12177 = vst [vmem:[#allocation33_spill] sm:$0xff] %v9908_v20 }
 0x3c0   : > { %v3468_v28 = vmul.f32 %v12148_v48, %v9363_v3  ;;  %v9899_v62 = vpop.eup %6530  ;;  %v12176_v6 = vmax.f32 %v9516_v16, 0.0  ;;  %v9906_v14 = vmul.f32 %v9796_v11, %v2985_v8  ;;  %6540 = vlog2.f32 %v2999_v53  ;;  %v12187_v11 = vld [vmem:[#allocation50_spill] sm:$0xff] }
 0x3c1   : > { %v3003_v25 = vadd.f32 1.0, %v3002_v19  ;;  %v9910_v4 = vpop.eup %6532  ;;  %v2998_v3 = vsel %vm9853_vm6, %v2995_v56, %v2992_v24  ;;  %vm9914_vm7 = vcmp.lt.f32.partialorder %v2987_v36, 0.0004427343  ;;  %v9919_v16 = vmul.f32 %v9839_v17, %v3012_v22 }
 0x3c2   : > { %v9903_v5 = vadd.f32 %v2971_v57, %v12176_v6  ;;  %3683 = vadd.xlane.f32.xlu1 %v3467_v58  ;;  %6542 = vpow2.f32 %v1981_v43  ;;  %3685 = vadd.xlane.f32.xlu0 %v3468_v28  ;;  %v6535_v53 = vpop.eup %6534  ;;  %v1987_v33 = vmul.f32 1.442695, %v1742_v60  ;;  %v1616_v8 = vand.u32 2147483647, %v9886_v55  ;;  %v12181_v28 = vld [vmem:[#allocation49_spill] sm:$0xff] }
 0x3c3   : > { %v3469_v24 = vmul.f32 %v12148_v48, %v9455_v42  ;;  %v3029_v61 = vmul.f32 -0.5, %v9899_v62  ;;  %v1741_v56 = vsub.f32 0.0, %v1613_v51  ;;  %v1615_v36 = vand.u32 2147483647, %v9893_v50 }
 0x3c4   : > { %v3470_v17 = vmul.f32 %v12148_v48, %v9422_v13  ;;  %v12180_v43 = vmax.f32 %v9560_v0, 0.0  ;;  %v9935_v22 = vmul.f32 %v9859_v9, %v3003_v25  ;;  %v3026_v60 = vadd.f32 1.0, %v9899_v62  ;;  %v9945_v0 = vpop.xlane.xlu0 %3561  ;;  %v12183_v25 = vld [vmem:[#allocation6_spill] sm:$0xff] }
 0x3c5   : > { %v2983_v42 = vmul.f32 0.6931472, %v6535_v53  ;;  %v3017_v51 = vadd.f32 1.0, %v9910_v4  ;;  %v3020_v10 = vmul.f32 -0.5, %v9910_v4  ;;  %v9943_v13 = vsub.f32 %v12129_v37, %v12181_v28  ;;  %12182 = vst [vmem:[#allocation34_spill] sm:$0xff] %v9945_v0 }
 0x3c6   : > { %v9932_v57 = vadd.f32 %v2998_v3, %v12180_v43  ;;  %3687 = vadd.xlane.f32.xlu1 %v3469_v24  ;;  %3689 = vadd.xlane.f32.xlu0 %v3470_v17  ;;  %6544 = vpow2.f32 %v1987_v33  ;;  %v1744_v6 = vsub.f32 0.0, %v1616_v8  ;;  %v9949_v3 = vsub.f32 %v12129_v37, %v12183_v25  ;;  %v9953_v24 = vpop.xlane.xlu1 %3563 }
 0x3c7   : > { %v3471_v53 = vmul.f32 %v12148_v48, %v9506_v39  ;;  %12184 = vst [vmem:[#allocation35_spill] sm:$0xff] %v9953_v24  ;;  %vm9955_vm8 = vcmp.lt.f32.partialorder %v3014_v21, 0.0004427343  ;;  %v3030_v28 = vadd.f32 1.0, %v3029_v61  ;;  %v1985_v58 = vmul.f32 1.442695, %v1741_v56 }
 0x3c8   : > { %v1743_v17 = vsub.f32 0.0, %v1615_v36  ;;  %v3472_v33 = vmul.f32 %v12148_v48, %v9490_v63  ;;  %v6537_v8 = vpop.eup %6536  ;;  %6546 = vlog2.f32 %v3026_v60  ;;  %v9965_v39 = vsub.f32 %v12129_v37, %v12187_v11  ;;  %v12188_v36 = vld [vmem:[#allocation20_spill] sm:$0xff]  ;;  %v9987_v24 = vpop.xlane.xlu0 %3565 }
 0x3c9   : > { %v9967_v21 = vpop.eup %6538  ;;  %6548 = vlog2.f32 %v3017_v51  ;;  %v3021_v61 = vadd.f32 1.0, %v3020_v10  ;;  %v1617_v56 = vand.u32 2147483647, %v9943_v13  ;;  %v9972_v63 = vsub.f32 %v12129_v37, %v12188_v36  ;;  %12189 = vst [vmem:[#allocation39_spill] sm:$0xff] %v9987_v24  ;;  %v12198_v24 = vld [vmem:[#allocation53_spill] sm:$0xff] }
 0x3ca   : > { %3691 = vadd.xlane.f32.xlu1 %v3471_v53  ;;  %3693 = vadd.xlane.f32.xlu0 %v3472_v33  ;;  %v6541_v60 = vpop.eup %6540  ;;  %v2989_v19 = vsel %vm9914_vm7, %v9906_v14, %v2983_v42  ;;  %v1991_v25 = vmul.f32 1.442695, %v1744_v6  ;;  %v1618_v11 = vand.u32 2147483647, %v9949_v3  ;;  %v3473_v53 = vmul.f32 %v12148_v48, %v9547_v29  ;;  %v9992_v29 = vpop.xlane.xlu1 %3567 }
 0x3cb   : > { %v9983_v10 = vmul.f32 %v9899_v62, %v3030_v28  ;;  %6550 = vpow2.f32 %v1985_v58  ;;  %v1989_v36 = vmul.f32 1.442695, %v1743_v17  ;;  %v3474_v33 = vmul.f32 %v12148_v48, %v9531_v38  ;;  %12190 = vst [vmem:[#allocation17_spill] sm:$0xff] %v9992_v29  ;;  %v12192_v38 = vld [vmem:[#allocation51_spill] sm:$0xff]  ;;  %v12196_v29 = vld [vmem:[#allocation52_spill] sm:$0xff] }
 0x3cc   : > { %v9980_v51 = vpop.eup %6542  ;;  %v3010_v49 = vmul.f32 0.6931472, %v6537_v8  ;;  %v3044_v14 = vadd.f32 1.0, %v9967_v21  ;;  %v1620_v6 = vand.u32 2147483647, %v9965_v39  ;;  %v12191_v28 = vmax.f32 %v9616_v7, 0.0 }
 0x3cd   : > { %v1745_v58 = vsub.f32 0.0, %v1617_v56  ;;  %v1619_v17 = vand.u32 2147483647, %v9972_v63  ;;  %v10001_v48 = vsub.f32 %v12129_v37, %v12192_v38  ;;  %v12193_v8 = vand.u32 2147483647, %v9859_v9 }
 0x3ce   : > { %3695 = vadd.xlane.f32.xlu1 %v3473_v53  ;;  %v9996_v20 = vadd.f32 %v2989_v19, %v12191_v28  ;;  %3697 = vadd.xlane.f32.xlu0 %v3474_v33  ;;  %6552 = vpow2.f32 %v1991_v25  ;;  %v1746_v53 = vsub.f32 0.0, %v1618_v11  ;;  %v10011_v7 = vsub.f32 %v12129_v37, %v12196_v29  ;;  %v12197_v19 = vld [vmem:[#allocation12_spill] sm:$0xff] }
 0x3cf   : > { %vm10005_vm9 = vcmp.lt.f32.partialorder %v12193_v8, 0.0004427343  ;;  %v3475_v56 = vmul.f32 %v12197_v19, %v9604_v30  ;;  %v10016_v28 = vmul.f32 %v9910_v4, %v3021_v61  ;;  %v3047_v33 = vmul.f32 -0.5, %v9967_v21 }
 0x3d0   : > { %6554 = vpow2.f32 %v1989_v36  ;;  %v3476_v9 = vmul.f32 %v12197_v19, %v9576_v52  ;;  %v10021_v38 = vpop.eup %6544  ;;  %v3016_v25 = vsel %vm9955_vm8, %v9919_v16, %v3010_v49  ;;  %v3035_v11 = vadd.f32 1.0, %v9980_v51  ;;  %v10032_v52 = vpop.xlane.xlu0 %3569 }
 0x3d1   : > { %6556 = vlog2.f32 %v3044_v14  ;;  %v1748_v29 = vsub.f32 0.0, %v1620_v6  ;;  %v1993_v30 = vmul.f32 1.442695, %v1745_v58  ;;  %v1747_v61 = vsub.f32 0.0, %v1619_v17  ;;  %12199 = vst [vmem:[#allocation40_spill] sm:$0xff] %v10032_v52  ;;  %v10041_v14 = vpop.xlane.xlu1 %3571 }
 0x3d2   : > { %3699 = vadd.xlane.f32.xlu1 %v3475_v56  ;;  %v1621_v8 = vand.u32 2147483647, %v10001_v48  ;;  %v10030_v36 = vsub.f32 %v12129_v37, %v12198_v24  ;;  %3701 = vadd.xlane.f32.xlu0 %v3476_v9  ;;  %v6547_v0 = vpop.eup %6546  ;;  %v1995_v1 = vmul.f32 1.442695, %v1746_v53  ;;  %v1622_v16 = vand.u32 2147483647, %v10011_v7 }
 0x3d3   : > { %v10037_v43 = vsub.f32 %v12129_v37, %v9370_v12  ;;  %v3477_v49 = vmul.f32 %v12197_v19, %v9682_v18  ;;  %12200 = vst [vmem:[#allocation41_spill] sm:$0xff] %v10041_v14  ;;  %v6549_v6 = vpop.eup %6548  ;;  %v3001_v58 = vmul.f32 0.6931472, %v6541_v60  ;;  %v3050_v24 = vand.u32 2147483647, %v9967_v21 }
 0x3d4   : > { %v3062_v17 = vadd.f32 1.0, %v10021_v38  ;;  %v3478_v53 = vmul.f32 %v12197_v19, %v9622_v34  ;;  %v12201_v56 = vmax.f32 %v9662_v40, 0.0  ;;  %v12202_v12 = vand.u32 2147483647, %v9899_v62 }
 0x3d5   : > { %6558 = vlog2.f32 %v3035_v11  ;;  %v3038_v18 = vmul.f32 -0.5, %v9980_v51  ;;  %v1999_v60 = vmul.f32 1.442695, %v1748_v29  ;;  %v10058_v14 = vpop.eup %6550  ;;  %v1997_v52 = vmul.f32 1.442695, %v1747_v61  ;;  %v10069_v61 = vpop.xlane.xlu0 %3573 }
 0x3d6   : > { %v10049_v9 = vadd.f32 %v3016_v25, %v12201_v56  ;;  %vm10053_vm10 = vcmp.lt.f32.partialorder %v12202_v12, 0.0004427343  ;;  %3703 = vadd.xlane.f32.xlu1 %v3477_v49  ;;  %6560 = vpow2.f32 %v1993_v30  ;;  %v1749_v34 = vsub.f32 0.0, %v1621_v8  ;;  %3705 = vadd.xlane.f32.xlu0 %v3478_v53  ;;  %v10081_v42 = vpop.xlane.xlu1 %3575 }
 0x3d7   : > { %v1623_v40 = vand.u32 2147483647, %v10030_v36  ;;  %6562 = vpow2.f32 %v1995_v1  ;;  %v1750_v25 = vsub.f32 0.0, %v1622_v16  ;;  %v1624_v62 = vand.u32 2147483647, %v10037_v43  ;;  %12208 = vst [vmem:[#allocation45_spill] sm:$0xff] %v10081_v42 }
 0x3d8   : > { %v3479_v56 = vmul.f32 %v12197_v19, %v9753_v54  ;;  %v3007_v11 = vsel %vm10005_vm9, %v9935_v22, %v3001_v58  ;;  %v3048_v29 = vadd.f32 1.0, %v3047_v33  ;;  %6564 = vlog2.f32 %v3062_v17  ;;  %v10071_v8 = vpop.eup %6552 }
 0x3d9   : > { %v3480_v30 = vmul.f32 %v12197_v19, %v9740_v26  ;;  %v12205_v1 = vand.u32 2147483647, %v9910_v4  ;;  %v3039_v54 = vadd.f32 1.0, %v3038_v18  ;;  %v3041_v49 = vand.u32 2147483647, %v9980_v51 }
 0x3da   : > { %v3053_v22 = vadd.f32 1.0, %v10058_v14  ;;  %6566 = vpow2.f32 %v1999_v60  ;;  %3707 = vadd.xlane.f32.xlu1 %v3479_v56  ;;  %v10083_v26 = vpop.eup %6554  ;;  %v3028_v33 = vmul.f32 0.6931472, %v6547_v0  ;;  %vm10085_vm12 = vcmp.lt.f32.partialorder %v3050_v24, 0.0004427343 }
 0x3db   : > { %vm10075_vm11 = vcmp.lt.f32.partialorder %v12205_v1, 0.0004427343  ;;  %6568 = vpow2.f32 %v1997_v52  ;;  %v2001_v4 = vmul.f32 1.442695, %v1749_v34  ;;  %v1751_v17 = vsub.f32 0.0, %v1623_v40  ;;  %3709 = vadd.xlane.f32.xlu0 %v3480_v30  ;;  %v6557_v53 = vpop.eup %6556 }
 0x3dc   : > { %v12211_v12 = vmax.f32 %v9674_v23, 0.0  ;;  %v2003_v60 = vmul.f32 1.442695, %v1750_v25  ;;  %v1752_v56 = vsub.f32 0.0, %v1624_v62  ;;  %v3481_v1 = vmul.f32 %v12197_v19, %v9807_v59 }
 0x3dd   : > { %v3049_v0 = vmul.f32 %v9967_v21, %v3048_v29  ;;  %v3080_v24 = vadd.f32 1.0, %v10071_v8  ;;  %v1487_v42 = vmax.f32 %v9893_v50, 0.0  ;;  %v3482_v52 = vmul.f32 %v12197_v19, %v9769_v44 }
 0x3de   : > { %v10091_v18 = vadd.f32 %v3007_v11, %v12211_v12  ;;  %v10101_v34 = vmul.f32 %v9980_v51, %v3039_v54  ;;  %vm10103_vm13 = vcmp.lt.f32.partialorder %v3041_v49, 0.0004427343  ;;  %v3065_v40 = vmul.f32 -0.5, %v10021_v38  ;;  %3711 = vadd.xlane.f32.xlu1 %v3481_v1  ;;  %v10112_v51 = vpop.xlane.xlu0 %3577  ;;  %v10116_v54 = vpop.xlane.xlu1 %3579 }
 0x3df   : > { %6570 = vlog2.f32 %v3053_v22  ;;  %v3071_v59 = vadd.f32 1.0, %v10083_v26  ;;  %v3034_v21 = vsel %vm10053_vm10, %v9983_v10, %v3028_v33  ;;  %v3019_v25 = vmul.f32 0.6931472, %v6549_v6  ;;  %3713 = vadd.xlane.f32.xlu0 %v3482_v52  ;;  %v6559_v62 = vpop.eup %6558 }
 0x3e0   : > { %6572 = vpow2.f32 %v2001_v4  ;;  %v2005_v44 = vmul.f32 1.442695, %v1751_v17  ;;  %v3046_v11 = vmul.f32 0.6931472, %v6557_v53  ;;  %v2007_v29 = vmul.f32 1.442695, %v1752_v56  ;;  %v10118_v49 = vpop.eup %6560 }
 0x3e1   : > { %6574 = vpow2.f32 %v2003_v60  ;;  %v3483_v30 = vmul.f32 %v12197_v19, %v9823_v35  ;;  %v1490_v10 = vmax.f32 %v9949_v3, 0.0  ;;  %v1489_v6 = vmax.f32 %v9943_v13, 0.0  ;;  %v10124_v22 = vpop.eup %6562 }
 0x3e2   : > { %6576 = vlog2.f32 %v3080_v24  ;;  %v3484_v37 = vmul.f32 %v12197_v19, %v9814_v47  ;;  %v12214_v33 = vmax.f32 %v9722_v45, 0.0  ;;  %v3066_v17 = vadd.f32 1.0, %v3065_v40  ;;  %v6565_v53 = vpop.eup %6564 }
 0x3e3   : > { %v3068_v35 = vand.u32 2147483647, %v10021_v38  ;;  %6578 = vlog2.f32 %v3071_v59  ;;  %3715 = vadd.xlane.f32.xlu1 %v3483_v30  ;;  %v3025_v12 = vsel %vm10075_vm11, %v10016_v28, %v3019_v25  ;;  %v3037_v60 = vmul.f32 0.6931472, %v6559_v62  ;;  %v10158_v62 = vpop.xlane.xlu1 %3583 }
 0x3e4   : > { %v10128_v4 = vadd.f32 %v3034_v21, %v12214_v33  ;;  %v3056_v56 = vmul.f32 -0.5, %v10058_v14  ;;  %6580 = vpow2.f32 %v2005_v44  ;;  %3717 = vadd.xlane.f32.xlu0 %v3484_v37  ;;  %v10135_v47 = vpop.eup %6566  ;;  %v3052_v45 = vsel %vm10085_vm12, %v3049_v0, %v3046_v11  ;;  %v10149_v21 = vpop.xlane.xlu0 %3581 }
 0x3e5   : > { %v3089_v1 = vadd.f32 1.0, %v10118_v49  ;;  %6582 = vpow2.f32 %v2007_v29  ;;  %v3485_v24 = vmul.f32 %v12197_v19, %v9903_v5  ;;  %v10142_v52 = vpop.eup %6568  ;;  %v3059_v28 = vand.u32 2147483647, %v10058_v14 }
 0x3e6   : > { %v3083_v16 = vmul.f32 -0.5, %v10071_v8  ;;  %v3098_v40 = vadd.f32 1.0, %v10124_v22  ;;  %v3486_v59 = vmul.f32 %v12197_v19, %v9849_v41  ;;  %v12215_v58 = vmax.f32 %v9732_v46, 0.0 }
 0x3e7   : > { %v3064_v25 = vmul.f32 0.6931472, %v6565_v53  ;;  %v3067_v44 = vmul.f32 %v10021_v38, %v3066_v17  ;;  %vm10154_vm14 = vcmp.lt.f32.partialorder %v3068_v35, 0.0004427343  ;;  %3719 = vadd.xlane.f32.xlu1 %v3485_v24  ;;  %v12218_v11 = vmax.f32 %v9788_v32, 0.0 }
 0x3e8   : > { %v3273_v0 = vadd.f32 %v3025_v12, %v12215_v58  ;;  %v3043_v41 = vsel %vm10103_vm13, %v10101_v34, %v3037_v60  ;;  %v3057_v46 = vadd.f32 1.0, %v3056_v56  ;;  %v3116_v30 = vadd.f32 1.0, %v10135_v47  ;;  %3721 = vadd.xlane.f32.xlu0 %v3486_v59 }
 0x3e9   : > { %v10162_v29 = vadd.f32 %v3052_v45, %v12218_v11  ;;  %v6571_v38 = vpop.eup %6570  ;;  %v3086_v37 = vand.u32 2147483647, %v10071_v8  ;;  %6584 = vlog2.f32 %v3089_v1  ;;  %v3107_v33 = vadd.f32 1.0, %v10142_v52 }
 0x3ea   : > { %v3487_v17 = vmul.f32 %v12197_v19, %v9996_v20  ;;  %v10172_v32 = vpop.eup %6572  ;;  %vm10174_vm15 = vcmp.lt.f32.partialorder %v3059_v28, 0.0004427343  ;;  %v3084_v34 = vadd.f32 1.0, %v3083_v16  ;;  %6586 = vlog2.f32 %v3098_v40 }
 0x3eb   : > { %v3488_v23 = vmul.f32 %v12197_v19, %v9932_v57  ;;  %v10180_v53 = vpop.eup %6574  ;;  %v3070_v12 = vsel %vm10154_vm14, %v3067_v44, %v3064_v25  ;;  %v3074_v60 = vmul.f32 -0.5, %v10083_v26  ;;  %v3077_v20 = vand.u32 2147483647, %v10083_v26  ;;  %v10190_v57 = vpop.xlane.xlu0 %3585 }
 0x3ec   : > { %3723 = vadd.xlane.f32.xlu1 %v3487_v17  ;;  %v6577_v45 = vpop.eup %6576  ;;  %v12221_v1 = vmax.f32 %v9803_v27, 0.0  ;;  %v3055_v28 = vmul.f32 0.6931472, %v6571_v38  ;;  %v3058_v16 = vmul.f32 %v10058_v14, %v3057_v46  ;;  %6588 = vlog2.f32 %v3116_v30  ;;  %v10199_v27 = vpop.xlane.xlu1 %3587 }
 0x3ed   : > { %3725 = vadd.xlane.f32.xlu0 %v3488_v23  ;;  %v6579_v40 = vpop.eup %6578  ;;  %vm10192_vm1 = vcmp.lt.f32.partialorder %v3086_v37, 0.0004427343  ;;  %6590 = vlog2.f32 %v3107_v33  ;;  %v3125_v58 = vadd.f32 1.0, %v10172_v32  ;;  %v3489_v25 = vmul.f32 %v12197_v19, %v10091_v18 }
 0x3ee   : > { %v3275_v24 = vadd.f32 %v3043_v41, %v12221_v1  ;;  %v10201_v44 = vpop.eup %6580  ;;  %v12224_v14 = vmax.f32 %v9843_v31, 0.0  ;;  %v3085_v11 = vmul.f32 %v10071_v8, %v3084_v34  ;;  %v3134_v41 = vadd.f32 1.0, %v10180_v53 }
 0x3ef   : > { %v3490_v46 = vmul.f32 %v12197_v19, %v10049_v9  ;;  %v10211_v30 = vpop.eup %6582  ;;  %v3075_v38 = vadd.f32 1.0, %v3074_v60  ;;  %vm10213_vm2 = vcmp.lt.f32.partialorder %v3077_v20, 0.0004427343  ;;  %v3101_v37 = vmul.f32 -0.5, %v10124_v22  ;;  %v10223_v9 = vpop.xlane.xlu0 %3589 }
 0x3f0   : > { %v10205_v5 = vadd.f32 %v3070_v12, %v12224_v14  ;;  %v3104_v31 = vand.u32 2147483647, %v10124_v22  ;;  %3727 = vadd.xlane.f32.xlu1 %v3489_v25  ;;  %v3061_v8 = vsel %vm10174_vm15, %v3058_v16, %v3055_v28  ;;  %v3082_v33 = vmul.f32 0.6931472, %v6577_v45  ;;  %v12227_v12 = vld [vmem:[#allocation13_spill] sm:$0xff]  ;;  %v10229_v1 = vpop.xlane.xlu1 %3591 }
 0x3f1   : > { %v3092_v17 = vmul.f32 -0.5, %v10118_v49  ;;  %v3095_v19 = vand.u32 2147483647, %v10118_v49  ;;  %3729 = vadd.xlane.f32.xlu0 %v3490_v46  ;;  %v3119_v34 = vmul.f32 -0.5, %v10135_v47  ;;  %6592 = vlog2.f32 %v3125_v58  ;;  %12228 = vst [vmem:[#allocation60_spill] sm:$0xff] %v10229_v1 }
 0x3f2   : > { %v3143_v23 = vadd.f32 1.0, %v10201_v44  ;;  %v3491_v60 = vmul.f32 %v12227_v12, %v3273_v0  ;;  %v3073_v20 = vmul.f32 0.6931472, %v6579_v40  ;;  %6594 = vlog2.f32 %v3134_v41 }
 0x3f3   : > { %v3152_v35 = vadd.f32 1.0, %v10211_v30  ;;  %v3492_v45 = vmul.f32 %v12227_v12, %v10128_v4  ;;  %v6585_v28 = vpop.eup %6584  ;;  %v12229_v16 = vmax.f32 %v9875_v2, 0.0  ;;  %v3076_v14 = vmul.f32 %v10083_v26, %v3075_v38  ;;  %v10247_v4 = vpop.xlane.xlu0 %3593 }
 0x3f4   : > { %v3102_v58 = vadd.f32 1.0, %v3101_v37  ;;  %vm10236_vm3 = vcmp.lt.f32.partialorder %v3104_v31, 0.0004427343  ;;  %3731 = vadd.xlane.f32.xlu1 %v3491_v60  ;;  %v6587_v0 = vpop.eup %6586  ;;  %v3088_v40 = vsel %vm10192_vm1, %v3085_v11, %v3082_v33  ;;  %v3093_v41 = vadd.f32 1.0, %v3092_v17 }
 0x3f5   : > { %v3277_v25 = vadd.f32 %v3061_v8, %v12229_v16  ;;  %vm10242_vm4 = vcmp.lt.f32.partialorder %v3095_v19, 0.0004427343  ;;  %v3110_v2 = vmul.f32 -0.5, %v10142_v52  ;;  %3733 = vadd.xlane.f32.xlu0 %v3492_v45  ;;  %v3120_v26 = vadd.f32 1.0, %v3119_v34  ;;  %v10262_v45 = vpop.xlane.xlu1 %3595 }
 0x3f6   : > { %v3122_v38 = vand.u32 2147483647, %v10135_v47  ;;  %6596 = vlog2.f32 %v3143_v23  ;;  %v3493_v37 = vmul.f32 %v12227_v12, %v3275_v24  ;;  %v6589_v31 = vpop.eup %6588  ;;  %v3079_v59 = vsel %vm10213_vm2, %v3076_v14, %v3073_v20  ;;  %12235 = vst [vmem:[#allocation43_spill] sm:$0xff] %v10262_v45 }
 0x3f7   : > { %v3091_v11 = vmul.f32 0.6931472, %v6585_v28  ;;  %6598 = vlog2.f32 %v3152_v35  ;;  %v3494_v8 = vmul.f32 %v12227_v12, %v10162_v29  ;;  %v6591_v33 = vpop.eup %6590  ;;  %v3100_v17 = vmul.f32 0.6931472, %v6587_v0 }
 0x3f8   : > { %v3103_v19 = vmul.f32 %v10124_v22, %v3102_v58  ;;  %v3113_v34 = vand.u32 2147483647, %v10142_v52  ;;  %v3137_v60 = vmul.f32 -0.5, %v10180_v53  ;;  %3735 = vadd.xlane.f32.xlu1 %v3493_v37  ;;  %v12234_v24 = vmax.f32 %v9886_v55, 0.0  ;;  %v10271_v55 = vpop.xlane.xlu0 %3597 }
 0x3f9   : > { %v3094_v18 = vmul.f32 %v10118_v49, %v3093_v41  ;;  %v3111_v20 = vadd.f32 1.0, %v3110_v2  ;;  %v3128_v35 = vmul.f32 -0.5, %v10172_v32  ;;  %3737 = vadd.xlane.f32.xlu0 %v3494_v8  ;;  %v3279_v29 = vadd.f32 %v3079_v59, %v1487_v42  ;;  %12238 = vst [vmem:[#allocation59_spill] sm:$0xff] %v10271_v55 }
 0x3fa   : > { %v3280_v23 = vadd.f32 %v3088_v40, %v12234_v24  ;;  %v3118_v22 = vmul.f32 0.6931472, %v6589_v31  ;;  %vm10266_vm5 = vcmp.lt.f32.partialorder %v3122_v38, 0.0004427343  ;;  %v3495_v16 = vmul.f32 %v12227_v12, %v3277_v25  ;;  %v10288_v38 = vpop.xlane.xlu1 %3599 }
 0x3fb   : > { %v3097_v49 = vsel %vm10242_vm4, %v3094_v18, %v3091_v11  ;;  %v3121_v14 = vmul.f32 %v10135_v47, %v3120_v26  ;;  %v3109_v58 = vmul.f32 0.6931472, %v6591_v33  ;;  %v3496_v0 = vmul.f32 %v12227_v12, %v10205_v5  ;;  %v6593_v50 = vpop.eup %6592  ;;  %12241 = vst [vmem:[#allocation8_spill] sm:$0xff] %v10288_v38 }
 0x3fc   : > { %v3106_v42 = vsel %vm10236_vm3, %v3103_v19, %v3100_v17  ;;  %vm10280_vm6 = vcmp.lt.f32.partialorder %v3113_v34, 0.0004427343  ;;  %v3138_v25 = vadd.f32 1.0, %v3137_v60  ;;  %v3140_v41 = vand.u32 2147483647, %v10180_v53  ;;  %3739 = vadd.xlane.f32.xlu1 %v3495_v16  ;;  %v6595_v56 = vpop.eup %6594  ;;  %v10296_v11 = vpop.xlane.xlu0 %3601  ;;  %v10366_v60 = vld [vmem:[%s426_s17] sm:$0xff] }
 0x3fd   : > { %v3112_v2 = vmul.f32 %v10142_v52, %v3111_v20  ;;  %v3129_v47 = vadd.f32 1.0, %v3128_v35  ;;  %v3131_v26 = vand.u32 2147483647, %v10172_v32  ;;  %v3146_v5 = vmul.f32 -0.5, %v10201_v44  ;;  %3741 = vadd.xlane.f32.xlu0 %v3496_v0  ;;  %12242 = vst [vmem:[#allocation63_spill] sm:$0xff] %v10296_v11 }
 0x3fe   : > { %v3281_v46 = vadd.f32 %v3097_v49, %v1489_v6  ;;  %v3124_v37 = vsel %vm10266_vm5, %v3121_v14, %v3118_v22  ;;  %v3155_v31 = vmul.f32 -0.5, %v10211_v30  ;;  %v3497_v59 = vmul.f32 %v12227_v12, %v3279_v29 }
 0x3ff   : > { %v3282_v52 = vadd.f32 %v3106_v42, %v1490_v10  ;;  %v3115_v8 = vsel %vm10280_vm6, %v3112_v2, %v3109_v58  ;;  %v3127_v33 = vmul.f32 0.6931472, %v6593_v50  ;;  %v3498_v17 = vmul.f32 %v12227_v12, %v3280_v23 }
 0x400   : > { %v6597_v13 = vpop.eup %6596  ;;  %v1491_v6 = vmax.f32 %v9972_v63, 0.0  ;;  %v3136_v19 = vmul.f32 0.6931472, %v6595_v56  ;;  %v3139_v34 = vmul.f32 %v10180_v53, %v3138_v25  ;;  %vm10305_vm7 = vcmp.lt.f32.partialorder %v3140_v41, 0.0004427343  ;;  %3743 = vadd.xlane.f32.xlu1 %v3497_v59  ;;  %v10316_v63 = vpop.xlane.xlu1 %3603 }
 0x401   : > { %v6599_v24 = vpop.eup %6598  ;;  %v12245_v3 = vmax.f32 %v9965_v39, 0.0  ;;  %v3130_v18 = vmul.f32 %v10172_v32, %v3129_v47  ;;  %vm10312_vm8 = vcmp.lt.f32.partialorder %v3131_v26, 0.0004427343  ;;  %v3147_v23 = vadd.f32 1.0, %v3146_v5  ;;  %12248 = vst [vmem:[#allocation19_spill] sm:$0xff] %v10316_v63  ;;  %3745 = vadd.xlane.f32.xlu0 %v3498_v17  ;;  %v10320_v28 = vpop.xlane.xlu0 %3605 }
 0x402   : > { %v3283_v53 = vadd.f32 %v3115_v8, %v1491_v6  ;;  %v3156_v35 = vadd.f32 1.0, %v3155_v31  ;;  %v3149_v29 = vand.u32 2147483647, %v10201_v44  ;;  %v3499_v22 = vmul.f32 %v12227_v12, %v3281_v46  ;;  %12249 = vst [vmem:[#allocation44_spill] sm:$0xff] %v10320_v28 }
 0x403   : > { %v3284_v10 = vadd.f32 %v3124_v37, %v12245_v3  ;;  %v3133_v39 = vsel %vm10312_vm8, %v3130_v18, %v3127_v33  ;;  %v3158_v32 = vand.u32 2147483647, %v10211_v30  ;;  %v3145_v16 = vmul.f32 0.6931472, %v6597_v13 }
 0x404   : > { %v3500_v49 = vmul.f32 %v12227_v12, %v3282_v52  ;;  %v3142_v14 = vsel %vm10305_vm7, %v3139_v34, %v3136_v19  ;;  %v1493_v58 = vmax.f32 %v10001_v48, 0.0  ;;  %v3154_v0 = vmul.f32 0.6931472, %v6599_v24  ;;  %3747 = vadd.xlane.f32.xlu1 %v3499_v22  ;;  %v10331_v40 = vpop.xlane.xlu1 %3607 }
 0x405   : > { %v1494_v50 = vmax.f32 %v10011_v7, 0.0  ;;  %v3148_v42 = vmul.f32 %v10201_v44, %v3147_v23  ;;  %12250 = vst [vmem:[#allocation46_spill] sm:$0xff] %v10331_v40  ;;  %v3157_v41 = vmul.f32 %v10211_v30, %v3156_v35  ;;  %vm3150_vm9 = vcmp.lt.f32.partialorder %v3149_v29, 0.0004427343  ;;  %v10335_v2 = vpop.xlane.xlu0 %3609 }
 0x406   : > { %3749 = vadd.xlane.f32.xlu0 %v3500_v49  ;;  %v3285_v25 = vadd.f32 %v3133_v39, %v1493_v58  ;;  %v3501_v56 = vmul.f32 %v12227_v12, %v3283_v53  ;;  %12251 = vst [vmem:[#allocation61_spill] sm:$0xff] %v10335_v2  ;;  %vm3159_vm10 = vcmp.lt.f32.partialorder %v3158_v32, 0.0004427343  ;;  %v3502_v26 = vmul.f32 %v12227_v12, %v3284_v10 }
 0x407   : > { %v3286_v47 = vadd.f32 %v3142_v14, %v1494_v50  ;;  %v3151_v48 = vsel %vm3150_vm9, %v3148_v42, %v3145_v16  ;;  %v3160_v5 = vsel %vm3159_vm10, %v3157_v41, %v3154_v0  ;;  %v1495_v7 = vmax.f32 %v10030_v36, 0.0  ;;  %v12281_v41 = vld [vmem:[#allocation4_spill] sm:$0xff] }
 0x408   : > { %3751 = vadd.xlane.f32.xlu1 %v3501_v56  ;;  %v1496_v44 = vmax.f32 %v10037_v43, 0.0  ;;  %v10340_v46 = vpop.xlane.xlu1 %3611  ;;  %v3503_v37 = vmul.f32 %v12227_v12, %v3285_v25  ;;  %v12282_v56 = vsub.s32 1, %v12281_v41  ;;  %v12342_v45 = vsub.s32 7, %v12281_v41 }
 0x409   : > { %12252 = vst [vmem:[#allocation48_spill] sm:$0xff] %v10340_v46  ;;  %v3287_v30 = vadd.f32 %v3151_v48, %v1495_v7  ;;  %v10343_v31 = vpop.xlane.xlu0 %3613  ;;  %v3504_v52 = vmul.f32 %v12227_v12, %v3286_v47  ;;  %vm5079_vm11 = vcmask 130112   ;;  %vm5086_vm12 = vcmask 195712  }
 0x40a   : > { %3753 = vadd.xlane.f32.xlu0 %v3502_v26  ;;  %12253 = vst [vmem:[#allocation15_spill] sm:$0xff] %v10343_v31  ;;  %v3288_v59 = vadd.f32 %v3160_v5, %v1496_v44  ;;  %v3834_v47 = vrot.slane %v10366_v60, %v12282_v56  ;;  %v4236_v55 = vrot.slane %v10366_v60, %v12342_v45  ;;  %vm5093_vm13 = vcmask 261312  }
 0x40b   : > { %v3505_v36 = vmul.f32 %v12227_v12, %v3287_v30  ;;  %vm5100_vm14 = vcmask 326912   ;;  %vm5107_vm15 = vcmask 392512   ;;  %vm5114_vm1 = vcmask 458112  }
 0x40c   : > { %3755 = vadd.xlane.f32.xlu1 %v3503_v37  ;;  %v10346_v8 = vpop.xlane.xlu1 %3615  ;;  %v3506_v43 = vmul.f32 %v12227_v12, %v3288_v59  ;;  %v12262_v12 = vld [vmem:[#allocation5_spill] sm:$0xff]  ;;  %vm5121_vm2 = vcmask 523712   ;;  %vm5128_vm3 = vcmask 589312   ;;  %vm5135_vm4 = vcmask 654912  }
 0x40d   : > { %12254 = vst [vmem:[#allocation66_spill] sm:$0xff] %v10346_v8  ;;  %v10349_v33 = vpop.xlane.xlu0 %3617  ;;  %v3767_v3 = vrot.slane %v10366_v60, %v12262_v12  ;;  %vm5142_vm5 = vcmask 720512   ;;  %vm5149_vm6 = vcmask 786112   ;;  %vm5156_vm7 = vcmask 851712  }
 0x40e   : > { %3757 = vadd.xlane.f32.xlu0 %v3504_v52  ;;  %12255 = vst [vmem:[#allocation11_spill] sm:$0xff] %v10349_v33  ;;  %vm5163_vm8 = vcmask 917312   ;;  %vm5170_vm9 = vcmask 982912   ;;  %vm5177_vm10 = vcmask 1048512  }
 0x410   : > { %3759 = vadd.xlane.f32.xlu1 %v3505_v36  ;;  %v10352_v17 = vpop.xlane.xlu1 %3619 }
 0x411   : > { %12256 = vst [vmem:[#allocation65_spill] sm:$0xff] %v10352_v17  ;;  %v10354_v13 = vpop.xlane.xlu0 %3621 }
 0x412   : > { %3761 = vadd.xlane.f32.xlu0 %v3506_v43  ;;  %12257 = vst [vmem:[#allocation64_spill] sm:$0xff] %v10354_v13 }
 0x414   : > { %v10356_v6 = vpop.xlane.xlu1 %3623 }
 0x415   : > { %12258 = vst [vmem:[#allocation62_spill] sm:$0xff] %v10356_v6  ;;  %v10358_v19 = vpop.xlane.xlu0 %3625 }
 0x416   : > { %12259 = vst [vmem:[#allocation70_spill] sm:$0xff] %v10358_v19 }
 0x418   : > { %v10364_v34 = vpop.xlane.xlu1 %3627 }
 0x419   : > { %12260 = vst [vmem:[#allocation69_spill] sm:$0xff] %v10364_v34  ;;  %v10368_v24 = vpop.xlane.xlu0 %3629 }
 0x41a   : > { %12261 = vst [vmem:[#allocation68_spill] sm:$0xff] %v10368_v24  ;;  %v12335_v24 = vsub.s32 6, %v12281_v41 }
 0x41c   : > { %v10372_v10 = vpop.xlane.xlu1 %3631 }
 0x41d   : > { %12263 = vst [vmem:[#allocation71_spill] sm:$0xff] %v10372_v10  ;;  %v10374_v18 = vpop.xlane.xlu0 %3633 }
 0x41e   : > { %12264 = vst [vmem:[#allocation21_spill] sm:$0xff] %v10374_v18  ;;  %v12299_v18 = vsub.s32 2, %v12281_v41 }
 0x420   : > { %v10376_v20 = vpop.xlane.xlu1 %3635 }
 0x421   : > { %12265 = vst [vmem:[#allocation73_spill] sm:$0xff] %v10376_v20  ;;  %3769 = vbcast.lane.b32.xlu1 %v3767_v3, 256  ;;  %v10378_v23 = vpop.xlane.xlu0 %3637 }
 0x422   : > { %12266 = vst [vmem:[#allocation47_spill] sm:$0xff] %v10378_v23 }
 0x424   : > { %v10380_v53 = vpop.xlane.xlu1 %3639 }
 0x425   : > { %12267 = vst [vmem:[#allocation72_spill] sm:$0xff] %v10380_v53  ;;  %3777 = vbcast.lane.b32.xlu1 %v3767_v3, 272  ;;  %v10382_v35 = vpop.xlane.xlu0 %3641 }
 0x426   : > { %12268 = vst [vmem:[#allocation18_spill] sm:$0xff] %v10382_v35 }
 0x428   : > { %3773 = vbcast.lane.b32.xlu0 %v3767_v3, 264  ;;  %v10384_v29 = vpop.xlane.xlu1 %3643 }
 0x429   : > { %12269 = vst [vmem:[#allocation67_spill] sm:$0xff] %v10384_v29  ;;  %3781 = vbcast.lane.b32.xlu1 %v3767_v3, 280  ;;  %v10386_v22 = vpop.xlane.xlu0 %3645 }
 0x42a   : > { %12270 = vst [vmem:[#allocation49_spill] sm:$0xff] %v10386_v22 }
 0x42c   : > { %3785 = vbcast.lane.b32.xlu0 %v3767_v3, 288  ;;  %v10388_v39 = vpop.xlane.xlu1 %3647 }
 0x42d   : > { %12271 = vst [vmem:[#allocation6_spill] sm:$0xff] %v10388_v39  ;;  %3789 = vbcast.lane.b32.xlu1 %v3767_v3, 296  ;;  %v10390_v32 = vpop.xlane.xlu0 %3649 }
 0x42e   : > { %12272 = vst [vmem:[#allocation50_spill] sm:$0xff] %v10390_v32 }
 0x430   : > { %3793 = vbcast.lane.b32.xlu0 %v3767_v3, 304  ;;  %v10392_v16 = vpop.xlane.xlu1 %3651 }
 0x431   : > { %12273 = vst [vmem:[#allocation20_spill] sm:$0xff] %v10392_v16  ;;  %3797 = vbcast.lane.b32.xlu1 %v3767_v3, 312  ;;  %v10394_v49 = vpop.xlane.xlu0 %3653 }
 0x432   : > { %12274 = vst [vmem:[#allocation51_spill] sm:$0xff] %v10394_v49 }
 0x434   : > { %3801 = vbcast.lane.b32.xlu0 %v3767_v3, 320  ;;  %v10396_v14 = vpop.xlane.xlu1 %3655 }
 0x435   : > { %12275 = vst [vmem:[#allocation52_spill] sm:$0xff] %v10396_v14  ;;  %3805 = vbcast.lane.b32.xlu1 %v3767_v3, 328  ;;  %v10398_v58 = vpop.xlane.xlu0 %3657 }
 0x436   : > { %12276 = vst [vmem:[#allocation12_spill] sm:$0xff] %v10398_v58 }
 0x438   : > { %3809 = vbcast.lane.b32.xlu0 %v3767_v3, 336  ;;  %v10400_v0 = vpop.xlane.xlu1 %3659 }
 0x439   : > { %12277 = vst [vmem:[#allocation53_spill] sm:$0xff] %v10400_v0  ;;  %3813 = vbcast.lane.b32.xlu1 %v3767_v3, 344  ;;  %v10402_v50 = vpop.xlane.xlu0 %3661 }
 0x43a   : > { %12278 = vst [vmem:[#allocation13_spill] sm:$0xff] %v10402_v50  ;;  %v3901_v50 = vrot.slane %v10366_v60, %v12299_v18 }
 0x43c   : > { %3817 = vbcast.lane.b32.xlu0 %v3767_v3, 352  ;;  %v10404_v42 = vpop.xlane.xlu1 %3663 }
 0x43d   : > { %12279 = vst [vmem:[#allocation5_spill] sm:$0xff] %v10404_v42  ;;  %3821 = vbcast.lane.b32.xlu1 %v3767_v3, 360  ;;  %v10406_v25 = vpop.xlane.xlu0 %3665 }
 0x43e   : > { %12280 = vst [vmem:[#allocation74_spill] sm:$0xff] %v10406_v25 }
 0x440   : > { %3825 = vbcast.lane.b32.xlu0 %v3767_v3, 368  ;;  %v10411_v48 = vpop.xlane.xlu1 %3667 }
 0x441   : > { %12283 = vst [vmem:[#allocation75_spill] sm:$0xff] %v10411_v48  ;;  %3829 = vbcast.lane.b32.xlu1 %v3767_v3, 376  ;;  %v10413_v26 = vpop.xlane.xlu0 %3669  ;;  %v6629_v48 = vmov 0  }
 0x442   : > { %12284 = vst [vmem:[#allocation76_spill] sm:$0xff] %v10413_v26  ;;  %6086 = vset.pattern.permute.xlu1 %v6629_v48  ;;  %6085 = vset.pattern.permute.xlu0 %v6629_v48  ;;  %v4169_v48 = vrot.slane %v10366_v60, %v12335_v24 }
 0x444   : > { %3836 = vbcast.lane.b32.xlu0 %v3834_v47, 256  ;;  %v10415_v5 = vpop.xlane.xlu1 %3671 }
 0x445   : > { %12285 = vst [vmem:[#allocation77_spill] sm:$0xff] %v10415_v5  ;;  %3840 = vbcast.lane.b32.xlu1 %v3834_v47, 264  ;;  %v10417_v7 = vpop.xlane.xlu0 %3673 }
 0x446   : > { %12286 = vst [vmem:[#allocation78_spill] sm:$0xff] %v10417_v7 }
 0x448   : > { %3844 = vbcast.lane.b32.xlu0 %v3834_v47, 272  ;;  %v10419_v44 = vpop.xlane.xlu1 %3675 }
 0x449   : > { %12287 = vst [vmem:[#allocation79_spill] sm:$0xff] %v10419_v44  ;;  %3848 = vbcast.lane.b32.xlu1 %v3834_v47, 280  ;;  %v10421_v30 = vpop.xlane.xlu0 %3677 }
 0x44a   : > { %12288 = vst [vmem:[#allocation80_spill] sm:$0xff] %v10421_v30 }
 0x44c   : > { %3852 = vbcast.lane.b32.xlu0 %v3834_v47, 288  ;;  %v10423_v37 = vpop.xlane.xlu1 %3679 }
 0x44d   : > { %12289 = vst [vmem:[#allocation81_spill] sm:$0xff] %v10423_v37  ;;  %3856 = vbcast.lane.b32.xlu1 %v3834_v47, 296  ;;  %v10425_v59 = vpop.xlane.xlu0 %3681 }
 0x44e   : > { %12290 = vst [vmem:[#allocation82_spill] sm:$0xff] %v10425_v59 }
 0x450   : > { %3860 = vbcast.lane.b32.xlu0 %v3834_v47, 304  ;;  %v10427_v52 = vpop.xlane.xlu1 %3683 }
 0x451   : > { %12291 = vst [vmem:[#allocation83_spill] sm:$0xff] %v10427_v52  ;;  %3864 = vbcast.lane.b32.xlu1 %v3834_v47, 312  ;;  %v10429_v36 = vpop.xlane.xlu0 %3685 }
 0x452   : > { %12292 = vst [vmem:[#allocation84_spill] sm:$0xff] %v10429_v36 }
 0x454   : > { %3868 = vbcast.lane.b32.xlu0 %v3834_v47, 320  ;;  %v10431_v43 = vpop.xlane.xlu1 %3687 }
 0x455   : > { %12293 = vst [vmem:[#allocation85_spill] sm:$0xff] %v10431_v43  ;;  %3872 = vbcast.lane.b32.xlu1 %v3834_v47, 328  ;;  %v10433_v12 = vpop.xlane.xlu0 %3689 }
 0x456   : > { %12294 = vst [vmem:[#allocation86_spill] sm:$0xff] %v10433_v12 }
 0x458   : > { %3876 = vbcast.lane.b32.xlu0 %v3834_v47, 336  ;;  %v10435_v3 = vpop.xlane.xlu1 %3691 }
 0x459   : > { %12295 = vst [vmem:[#allocation87_spill] sm:$0xff] %v10435_v3  ;;  %3880 = vbcast.lane.b32.xlu1 %v3834_v47, 344  ;;  %v10437_v56 = vpop.xlane.xlu0 %3693 }
 0x45a   : > { %12296 = vst [vmem:[#allocation88_spill] sm:$0xff] %v10437_v56 }
 0x45c   : > { %3884 = vbcast.lane.b32.xlu0 %v3834_v47, 352  ;;  %v10439_v25 = vpop.xlane.xlu1 %3695 }
 0x45d   : > { %12297 = vst [vmem:[#allocation89_spill] sm:$0xff] %v10439_v25  ;;  %3888 = vbcast.lane.b32.xlu1 %v3834_v47, 360  ;;  %v10441_v42 = vpop.xlane.xlu0 %3697 }
 0x45e   : > { %12298 = vst [vmem:[#allocation90_spill] sm:$0xff] %v10441_v42 }
 0x460   : > { %3892 = vbcast.lane.b32.xlu0 %v3834_v47, 368  ;;  %v10446_v0 = vpop.xlane.xlu1 %3699 }
 0x461   : > { %12300 = vst [vmem:[#allocation91_spill] sm:$0xff] %v10446_v0  ;;  %3896 = vbcast.lane.b32.xlu1 %v3834_v47, 376  ;;  %v10448_v12 = vpop.xlane.xlu0 %3701 }
 0x462   : > { %12301 = vst [vmem:[#allocation92_spill] sm:$0xff] %v10448_v12 }
 0x464   : > { %3903 = vbcast.lane.b32.xlu0 %v3901_v50, 256  ;;  %v10450_v3 = vpop.xlane.xlu1 %3703 }
 0x465   : > { %12302 = vst [vmem:[#allocation93_spill] sm:$0xff] %v10450_v3  ;;  %3907 = vbcast.lane.b32.xlu1 %v3901_v50, 264  ;;  %v10452_v56 = vpop.xlane.xlu0 %3705 }
 0x466   : > { %12303 = vst [vmem:[#allocation94_spill] sm:$0xff] %v10452_v56 }
 0x468   : > { %3911 = vbcast.lane.b32.xlu0 %v3901_v50, 272  ;;  %v10454_v25 = vpop.xlane.xlu1 %3707 }
 0x469   : > { %12304 = vst [vmem:[#allocation95_spill] sm:$0xff] %v10454_v25  ;;  %3915 = vbcast.lane.b32.xlu1 %v3901_v50, 280  ;;  %v10456_v42 = vpop.xlane.xlu0 %3709 }
 0x46a   : > { %12305 = vst [vmem:[#allocation96_spill] sm:$0xff] %v10456_v42 }
 0x46c   : > { %3919 = vbcast.lane.b32.xlu0 %v3901_v50, 288  ;;  %v10458_v18 = vpop.xlane.xlu1 %3711 }
 0x46d   : > { %12306 = vst [vmem:[#allocation97_spill] sm:$0xff] %v10458_v18  ;;  %3923 = vbcast.lane.b32.xlu1 %v3901_v50, 296  ;;  %v10460_v43 = vpop.xlane.xlu0 %3713 }
 0x46e   : > { %12307 = vst [vmem:[#allocation98_spill] sm:$0xff] %v10460_v43 }
 0x470   : > { %3927 = vbcast.lane.b32.xlu0 %v3901_v50, 304  ;;  %v10462_v47 = vpop.xlane.xlu1 %3715 }
 0x471   : > { %12308 = vst [vmem:[#allocation99_spill] sm:$0xff] %v10462_v47  ;;  %3931 = vbcast.lane.b32.xlu1 %v3901_v50, 312  ;;  %v10464_v58 = vpop.xlane.xlu0 %3717 }
 0x472   : > { %12309 = vst [vmem:[#allocation100_spill] sm:$0xff] %v10464_v58  ;;  %v12316_v58 = vsub.s32 3, %v12281_v41 }
 0x474   : > { %3935 = vbcast.lane.b32.xlu0 %v3901_v50, 320  ;;  %v10466_v36 = vpop.xlane.xlu1 %3719  ;;  %v3968_v59 = vrot.slane %v10366_v60, %v12316_v58 }
 0x475   : > { %12310 = vst [vmem:[#allocation101_spill] sm:$0xff] %v10466_v36  ;;  %3939 = vbcast.lane.b32.xlu1 %v3901_v50, 328  ;;  %v10468_v14 = vpop.xlane.xlu0 %3721 }
 0x476   : > { %12311 = vst [vmem:[#allocation102_spill] sm:$0xff] %v10468_v14 }
 0x478   : > { %3943 = vbcast.lane.b32.xlu0 %v3901_v50, 336 }
 0x479   : > { %v10470_v52 = vpop.xlane.xlu1 %3723  ;;  %3947 = vbcast.lane.b32.xlu1 %v3901_v50, 344 }
 0x47a   : > { %12312 = vst [vmem:[#allocation103_spill] sm:$0xff] %v10470_v52  ;;  %v10472_v49 = vpop.xlane.xlu0 %3725 }
 0x47b   : > { %12313 = vst [vmem:[#allocation104_spill] sm:$0xff] %v10472_v49 }
 0x47c   : > { %3951 = vbcast.lane.b32.xlu0 %v3901_v50, 352 }
 0x47d   : > { %v10474_v43 = vpop.xlane.xlu1 %3727  ;;  %3955 = vbcast.lane.b32.xlu1 %v3901_v50, 360 }
 0x47e   : > { %12314 = vst [vmem:[#allocation105_spill] sm:$0xff] %v10474_v43  ;;  %v10476_v47 = vpop.xlane.xlu0 %3729 }
 0x47f   : > { %12315 = vst [vmem:[#allocation106_spill] sm:$0xff] %v10476_v47 }
 0x480   : > { %3959 = vbcast.lane.b32.xlu0 %v3901_v50, 368 }
 0x481   : > { %v10481_v36 = vpop.xlane.xlu1 %3731  ;;  %3963 = vbcast.lane.b32.xlu1 %v3901_v50, 376 }
 0x482   : > { %12317 = vst [vmem:[#allocation107_spill] sm:$0xff] %v10481_v36  ;;  %v10483_v14 = vpop.xlane.xlu0 %3733 }
 0x483   : > { %12318 = vst [vmem:[#allocation108_spill] sm:$0xff] %v10483_v14  ;;  %v12334_v14 = vsub.s32 5, %v12281_v41 }
 0x484   : > { %3970 = vbcast.lane.b32.xlu0 %v3968_v59, 256 }
 0x485   : > { %v10485_v52 = vpop.xlane.xlu1 %3735  ;;  %3974 = vbcast.lane.b32.xlu1 %v3968_v59, 264  ;;  %v4102_v22 = vrot.slane %v10366_v60, %v12334_v14 }
 0x486   : > { %12319 = vst [vmem:[#allocation109_spill] sm:$0xff] %v10485_v52  ;;  %v10487_v49 = vpop.xlane.xlu0 %3737 }
 0x487   : > { %12320 = vst [vmem:[#allocation110_spill] sm:$0xff] %v10487_v49 }
 0x488   : > { %3978 = vbcast.lane.b32.xlu0 %v3968_v59, 272 }
 0x489   : > { %v10489_v43 = vpop.xlane.xlu1 %3739  ;;  %3982 = vbcast.lane.b32.xlu1 %v3968_v59, 280 }
 0x48a   : > { %12321 = vst [vmem:[#allocation111_spill] sm:$0xff] %v10489_v43  ;;  %v10491_v47 = vpop.xlane.xlu0 %3741 }
 0x48b   : > { %12322 = vst [vmem:[#allocation112_spill] sm:$0xff] %v10491_v47 }
 0x48c   : > { %3986 = vbcast.lane.b32.xlu0 %v3968_v59, 288 }
 0x48d   : > { %v10493_v58 = vpop.xlane.xlu1 %3743  ;;  %3990 = vbcast.lane.b32.xlu1 %v3968_v59, 296 }
 0x48e   : > { %12323 = vst [vmem:[#allocation113_spill] sm:$0xff] %v10493_v58  ;;  %v10495_v18 = vpop.xlane.xlu0 %3745 }
 0x48f   : > { %12324 = vst [vmem:[#allocation114_spill] sm:$0xff] %v10495_v18 }
 0x490   : > { %3994 = vbcast.lane.b32.xlu0 %v3968_v59, 304 }
 0x491   : > { %v10497_v50 = vpop.xlane.xlu1 %3747  ;;  %3998 = vbcast.lane.b32.xlu1 %v3968_v59, 312 }
 0x492   : > { %12325 = vst [vmem:[#allocation115_spill] sm:$0xff] %v10497_v50 }
 0x493   : > { %v10499_v16 = vpop.xlane.xlu0 %3749 }
 0x494   : > { %12326 = vst [vmem:[#allocation116_spill] sm:$0xff] %v10499_v16  ;;  %4002 = vbcast.lane.b32.xlu0 %v3968_v59, 320  ;;  %v12333_v16 = vsub.s32 4, %v12281_v41 }
 0x495   : > { %v10501_v37 = vpop.xlane.xlu1 %3751  ;;  %4006 = vbcast.lane.b32.xlu1 %v3968_v59, 328 }
 0x496   : > { %12327 = vst [vmem:[#allocation117_spill] sm:$0xff] %v10501_v37  ;;  %v4035_v42 = vrot.slane %v10366_v60, %v12333_v16 }
 0x497   : > { %v10503_v43 = vpop.xlane.xlu0 %3753 }
 0x498   : > { %12328 = vst [vmem:[#allocation118_spill] sm:$0xff] %v10503_v43  ;;  %4010 = vbcast.lane.b32.xlu0 %v3968_v59, 336 }
 0x499   : > { %v10505_v47 = vpop.xlane.xlu1 %3755  ;;  %4014 = vbcast.lane.b32.xlu1 %v3968_v59, 344 }
 0x49a   : > { %12329 = vst [vmem:[#allocation119_spill] sm:$0xff] %v10505_v47 }
 0x49b   : > { %v10507_v58 = vpop.xlane.xlu0 %3757 }
 0x49c   : > { %12330 = vst [vmem:[#allocation120_spill] sm:$0xff] %v10507_v58  ;;  %4018 = vbcast.lane.b32.xlu0 %v3968_v59, 352 }
 0x49d   : > { %4022 = vbcast.lane.b32.xlu1 %v3968_v59, 360  ;;  %v10509_v18 = vpop.xlane.xlu1 %3759 }
 0x49e   : > { %12331 = vst [vmem:[#allocation121_spill] sm:$0xff] %v10509_v18 }
 0x49f   : > { %v10511_v50 = vpop.xlane.xlu0 %3761 }
 0x4a0   : > { %12332 = vst [vmem:[#allocation122_spill] sm:$0xff] %v10511_v50  ;;  %4026 = vbcast.lane.b32.xlu0 %v3968_v59, 368 }
 0x4a1   : > { %4030 = vbcast.lane.b32.xlu1 %v3968_v59, 376  ;;  %v10516_v37 = vpop.permute.xlu1 %3769 }
 0x4a3   : > { %v10518_v43 = vpop.permute.xlu0 %3773 }
 0x4a4   : > { %4037 = vbcast.lane.b32.xlu0 %v4035_v42, 256 }
 0x4a5   : > { %4041 = vbcast.lane.b32.xlu1 %v4035_v42, 264  ;;  %v10520_v47 = vpop.permute.xlu1 %3777 }
 0x4a7   : > { %v10522_v58 = vpop.permute.xlu0 %3785 }
 0x4a8   : > { %4045 = vbcast.lane.b32.xlu0 %v4035_v42, 272 }
 0x4a9   : > { %4049 = vbcast.lane.b32.xlu1 %v4035_v42, 280  ;;  %v10524_v18 = vpop.permute.xlu1 %3781 }
 0x4ab   : > { %v10526_v50 = vpop.permute.xlu0 %3793 }
 0x4ac   : > { %4053 = vbcast.lane.b32.xlu0 %v4035_v42, 288 }
 0x4ad   : > { %4057 = vbcast.lane.b32.xlu1 %v4035_v42, 296  ;;  %v10528_v16 = vpop.permute.xlu1 %3789 }
 0x4af   : > { %v10530_v59 = vpop.permute.xlu0 %3801 }
 0x4b0   : > { %4061 = vbcast.lane.b32.xlu0 %v4035_v42, 304 }
 0x4b1   : > { %4065 = vbcast.lane.b32.xlu1 %v4035_v42, 312  ;;  %v10532_v49 = vpop.permute.xlu1 %3797 }
 0x4b3   : > { %v10534_v32 = vpop.permute.xlu0 %3809 }
 0x4b4   : > { %4069 = vbcast.lane.b32.xlu0 %v4035_v42, 320 }
 0x4b5   : > { %4073 = vbcast.lane.b32.xlu1 %v4035_v42, 328  ;;  %v10536_v30 = vpop.permute.xlu1 %3805 }
 0x4b7   : > { %v10538_v25 = vpop.permute.xlu0 %3817 }
 0x4b8   : > { %4077 = vbcast.lane.b32.xlu0 %v4035_v42, 336 }
 0x4b9   : > { %4081 = vbcast.lane.b32.xlu1 %v4035_v42, 344  ;;  %v10540_v52 = vpop.permute.xlu1 %3813 }
 0x4bb   : > { %v10542_v39 = vpop.permute.xlu0 %3825 }
 0x4bc   : > { %4085 = vbcast.lane.b32.xlu0 %v4035_v42, 352 }
 0x4bd   : > { %4089 = vbcast.lane.b32.xlu1 %v4035_v42, 360  ;;  %v10544_v44 = vpop.permute.xlu1 %3821 }
 0x4bf   : > { %v10546_v56 = vpop.permute.xlu0 %3836 }
 0x4c0   : > { %4093 = vbcast.lane.b32.xlu0 %v4035_v42, 368 }
 0x4c1   : > { %4097 = vbcast.lane.b32.xlu1 %v4035_v42, 376  ;;  %v10551_v3 = vpop.permute.xlu1 %3829 }
 0x4c3   : > { %v10553_v36 = vpop.permute.xlu0 %3844 }
 0x4c4   : > { %4104 = vbcast.lane.b32.xlu0 %v4102_v22, 256 }
 0x4c5   : > { %4108 = vbcast.lane.b32.xlu1 %v4102_v22, 264  ;;  %v10555_v29 = vpop.permute.xlu1 %3840 }
 0x4c7   : > { %v10557_v7 = vpop.permute.xlu0 %3852 }
 0x4c8   : > { %4112 = vbcast.lane.b32.xlu0 %v4102_v22, 272 }
 0x4c9   : > { %4116 = vbcast.lane.b32.xlu1 %v4102_v22, 280  ;;  %v10559_v0 = vpop.permute.xlu1 %3848 }
 0x4cb   : > { %v10561_v12 = vpop.permute.xlu0 %3860 }
 0x4cc   : > { %4120 = vbcast.lane.b32.xlu0 %v4102_v22, 288 }
 0x4cd   : > { %4124 = vbcast.lane.b32.xlu1 %v4102_v22, 296  ;;  %v10563_v14 = vpop.permute.xlu1 %3856 }
 0x4cf   : > { %v10565_v42 = vpop.permute.xlu0 %3868 }
 0x4d0   : > { %4128 = vbcast.lane.b32.xlu0 %v4102_v22, 304 }
 0x4d1   : > { %4132 = vbcast.lane.b32.xlu1 %v4102_v22, 312  ;;  %v10567_v35 = vpop.permute.xlu1 %3864 }
 0x4d3   : > { %v10569_v5 = vpop.permute.xlu0 %3876 }
 0x4d4   : > { %4136 = vbcast.lane.b32.xlu0 %v4102_v22, 320 }
 0x4d5   : > { %4140 = vbcast.lane.b32.xlu1 %v4102_v22, 328  ;;  %v10571_v26 = vpop.permute.xlu1 %3872 }
 0x4d7   : > { %v10573_v23 = vpop.permute.xlu0 %3884 }
 0x4d8   : > { %4144 = vbcast.lane.b32.xlu0 %v4102_v22, 336 }
 0x4d9   : > { %4148 = vbcast.lane.b32.xlu1 %v4102_v22, 344  ;;  %v10575_v53 = vpop.permute.xlu1 %3880 }
 0x4db   : > { %v10577_v10 = vpop.permute.xlu0 %3892 }
 0x4dc   : > { %4152 = vbcast.lane.b32.xlu0 %v4102_v22, 352 }
 0x4dd   : > { %4156 = vbcast.lane.b32.xlu1 %v4102_v22, 360  ;;  %v10579_v20 = vpop.permute.xlu1 %3888 }
 0x4df   : > { %v10581_v34 = vpop.permute.xlu0 %3903 }
 0x4e0   : > { %4160 = vbcast.lane.b32.xlu0 %v4102_v22, 368 }
 0x4e1   : > { %4164 = vbcast.lane.b32.xlu1 %v4102_v22, 376  ;;  %v10586_v6 = vpop.permute.xlu1 %3896 }
 0x4e3   : > { %v10588_v19 = vpop.permute.xlu0 %3911 }
 0x4e4   : > { %4171 = vbcast.lane.b32.xlu0 %v4169_v48, 256 }
 0x4e5   : > { %4175 = vbcast.lane.b32.xlu1 %v4169_v48, 264  ;;  %v10590_v17 = vpop.permute.xlu1 %3907 }
 0x4e7   : > { %v10592_v13 = vpop.permute.xlu0 %3919 }
 0x4e8   : > { %4179 = vbcast.lane.b32.xlu0 %v4169_v48, 272 }
 0x4e9   : > { %4183 = vbcast.lane.b32.xlu1 %v4169_v48, 280  ;;  %v10594_v8 = vpop.permute.xlu1 %3915 }
 0x4eb   : > { %v10596_v33 = vpop.permute.xlu0 %3927 }
 0x4ec   : > { %4187 = vbcast.lane.b32.xlu0 %v4169_v48, 288 }
 0x4ed   : > { %4191 = vbcast.lane.b32.xlu1 %v4169_v48, 296  ;;  %v10598_v24 = vpop.permute.xlu1 %3923 }
 0x4ef   : > { %v10600_v22 = vpop.permute.xlu0 %3935 }
 0x4f0   : > { %4195 = vbcast.lane.b32.xlu0 %v4169_v48, 304 }
 0x4f1   : > { %4199 = vbcast.lane.b32.xlu1 %v4169_v48, 312  ;;  %v10602_v46 = vpop.permute.xlu1 %3931 }
 0x4f3   : > { %v10604_v31 = vpop.permute.xlu0 %3943 }
 0x4f4   : > { %12336 = vst [vmem:[#allocation123_spill] sm:$0xff] %v10604_v31  ;;  %4203 = vbcast.lane.b32.xlu0 %v4169_v48, 320 }
 0x4f5   : > { %4207 = vbcast.lane.b32.xlu1 %v4169_v48, 328  ;;  %v10606_v40 = vpop.permute.xlu1 %3939 }
 0x4f7   : > { %v10608_v2 = vpop.permute.xlu0 %3951 }
 0x4f8   : > { %12337 = vst [vmem:[#allocation124_spill] sm:$0xff] %v10608_v2  ;;  %4211 = vbcast.lane.b32.xlu0 %v4169_v48, 336 }
 0x4f9   : > { %4215 = vbcast.lane.b32.xlu1 %v4169_v48, 344  ;;  %v10610_v63 = vpop.permute.xlu1 %3947 }
 0x4fa   : > { %12338 = vst [vmem:[#allocation125_spill] sm:$0xff] %v10610_v63 }
 0x4fb   : > { %v10612_v28 = vpop.permute.xlu0 %3959 }
 0x4fc   : > { %12339 = vst [vmem:[#allocation126_spill] sm:$0xff] %v10612_v28  ;;  %4219 = vbcast.lane.b32.xlu0 %v4169_v48, 352 }
 0x4fd   : > { %4223 = vbcast.lane.b32.xlu1 %v4169_v48, 360  ;;  %v10614_v38 = vpop.permute.xlu1 %3955 }
 0x4fe   : > { %12340 = vst [vmem:[#allocation127_spill] sm:$0xff] %v10614_v38 }
 0x4ff   : > { %v10616_v11 = vpop.permute.xlu0 %3970 }
 0x500   : > { %12341 = vst [vmem:[#allocation128_spill] sm:$0xff] %v10616_v11  ;;  %4227 = vbcast.lane.b32.xlu0 %v4169_v48, 368 }
 0x501   : > { %4231 = vbcast.lane.b32.xlu1 %v4169_v48, 376  ;;  %v10621_v31 = vpop.permute.xlu1 %3963 }
 0x502   : > { %12343 = vst [vmem:[#allocation129_spill] sm:$0xff] %v10621_v31 }
 0x503   : > { %v10623_v2 = vpop.permute.xlu0 %3978 }
 0x504   : > { %12344 = vst [vmem:[#allocation130_spill] sm:$0xff] %v10623_v2  ;;  %4238 = vbcast.lane.b32.xlu0 %v4236_v55, 256 }
 0x505   : > { %4242 = vbcast.lane.b32.xlu1 %v4236_v55, 264  ;;  %v10625_v1 = vpop.permute.xlu1 %3974 }
 0x506   : > { %12345 = vst [vmem:[#allocation131_spill] sm:$0xff] %v10625_v1 }
 0x507   : > { %v10627_v28 = vpop.permute.xlu0 %3986 }
 0x508   : > { %12346 = vst [vmem:[#allocation132_spill] sm:$0xff] %v10627_v28  ;;  %4246 = vbcast.lane.b32.xlu0 %v4236_v55, 272 }
 0x509   : > { %4250 = vbcast.lane.b32.xlu1 %v4236_v55, 280  ;;  %v10629_v38 = vpop.permute.xlu1 %3982 }
 0x50a   : > { %12347 = vst [vmem:[#allocation133_spill] sm:$0xff] %v10629_v38 }
 0x50b   : > { %v10631_v11 = vpop.permute.xlu0 %3994 }
 0x50c   : > { %12348 = vst [vmem:[#allocation134_spill] sm:$0xff] %v10631_v11  ;;  %4254 = vbcast.lane.b32.xlu0 %v4236_v55, 288 }
 0x50d   : > { %4258 = vbcast.lane.b32.xlu1 %v4236_v55, 296  ;;  %v10633_v45 = vpop.permute.xlu1 %3990 }
 0x50e   : > { %12349 = vst [vmem:[#allocation135_spill] sm:$0xff] %v10633_v45 }
 0x50f   : > { %v10635_v48 = vpop.permute.xlu0 %4002 }
 0x510   : > { %12350 = vst [vmem:[#allocation136_spill] sm:$0xff] %v10635_v48  ;;  %4262 = vbcast.lane.b32.xlu0 %v4236_v55, 304 }
 0x511   : > { %4266 = vbcast.lane.b32.xlu1 %v4236_v55, 312  ;;  %v10637_v41 = vpop.permute.xlu1 %3998 }
 0x512   : > { %12351 = vst [vmem:[#allocation137_spill] sm:$0xff] %v10637_v41 }
 0x513   : > { %v10639_v2 = vpop.permute.xlu0 %4010 }
 0x514   : > { %12352 = vst [vmem:[#allocation138_spill] sm:$0xff] %v10639_v2  ;;  %4270 = vbcast.lane.b32.xlu0 %v4236_v55, 320 }
 0x515   : > { %4274 = vbcast.lane.b32.xlu1 %v4236_v55, 328  ;;  %v10641_v28 = vpop.permute.xlu1 %4006 }
 0x516   : > { %12353 = vst [vmem:[#allocation139_spill] sm:$0xff] %v10641_v28 }
 0x517   : > { %v10643_v1 = vpop.permute.xlu0 %4018 }
 0x518   : > { %12354 = vst [vmem:[#allocation140_spill] sm:$0xff] %v10643_v1  ;;  %4278 = vbcast.lane.b32.xlu0 %v4236_v55, 336 }
 0x519   : > { %4282 = vbcast.lane.b32.xlu1 %v4236_v55, 344  ;;  %v10645_v11 = vpop.permute.xlu1 %4014 }
 0x51a   : > { %12355 = vst [vmem:[#allocation141_spill] sm:$0xff] %v10645_v11 }
 0x51b   : > { %v10647_v38 = vpop.permute.xlu0 %4026 }
 0x51c   : > { %12356 = vst [vmem:[#allocation142_spill] sm:$0xff] %v10647_v38  ;;  %4286 = vbcast.lane.b32.xlu0 %v4236_v55, 352 }
 0x51d   : > { %4290 = vbcast.lane.b32.xlu1 %v4236_v55, 360  ;;  %v10649_v48 = vpop.permute.xlu1 %4022 }
 0x51e   : > { %12357 = vst [vmem:[#allocation143_spill] sm:$0xff] %v10649_v48 }
 0x51f   : > { %v10651_v45 = vpop.permute.xlu0 %4037 }
 0x520   : > { %12358 = vst [vmem:[#allocation144_spill] sm:$0xff] %v10651_v45  ;;  %4294 = vbcast.lane.b32.xlu0 %v4236_v55, 368 }
 0x521   : > { %4298 = vbcast.lane.b32.xlu1 %v4236_v55, 376  ;;  %v10653_v2 = vpop.permute.xlu1 %4030 }
 0x522   : > { %12359 = vst [vmem:[#allocation145_spill] sm:$0xff] %v10653_v2 }
 0x523   : > { %v10655_v41 = vpop.permute.xlu0 %4045 }
 0x524   : > { %12360 = vst [vmem:[#allocation146_spill] sm:$0xff] %v10655_v41 }
 0x525   : > { %v10657_v28 = vpop.permute.xlu1 %4041 }
 0x526   : > { %12361 = vst [vmem:[#allocation147_spill] sm:$0xff] %v10657_v28 }
 0x527   : > { %v10659_v1 = vpop.permute.xlu0 %4053 }
 0x528   : > { %12362 = vst [vmem:[#allocation148_spill] sm:$0xff] %v10659_v1 }
 0x529   : > { %v10661_v11 = vpop.permute.xlu1 %4049 }
 0x52a   : > { %12363 = vst [vmem:[#allocation149_spill] sm:$0xff] %v10661_v11  ;;  %v12381_v11 = vld [vmem:[#allocation54_spill] sm:$0xff] }
 0x52b   : > { %v10663_v38 = vpop.permute.xlu0 %4061 }
 0x52c   : > { %12364 = vst [vmem:[#allocation150_spill] sm:$0xff] %v10663_v38 }
 0x52d   : > { %v10665_v31 = vpop.permute.xlu1 %4057 }
 0x52e   : > { %12365 = vst [vmem:[#allocation151_spill] sm:$0xff] %v10665_v31 }
 0x52f   : > { %v10667_v48 = vpop.permute.xlu0 %4069 }
 0x530   : > { %12366 = vst [vmem:[#allocation152_spill] sm:$0xff] %v10667_v48  ;;  %v6600_v48 = vld [vmem:[%s6822_s14] sm:$0xff] }
 0x531   : > { %v10669_v45 = vpop.permute.xlu1 %4065 }
 0x532   : > { %12367 = vst [vmem:[#allocation153_spill] sm:$0xff] %v10669_v45 }
 0x533   : > { %v10671_v55 = vpop.permute.xlu0 %4077 }
 0x534   : > { %12368 = vst [vmem:[#allocation154_spill] sm:$0xff] %v10671_v55 }
 0x535   : > { %v10673_v2 = vpop.permute.xlu1 %4073 }
 0x536   : > { %12369 = vst [vmem:[#allocation155_spill] sm:$0xff] %v10673_v2 }
 0x537   : > { %v10675_v41 = vpop.permute.xlu0 %4085 }
 0x538   : > { %12370 = vst [vmem:[#allocation156_spill] sm:$0xff] %v10675_v41 }
 0x539   : > { %v10677_v28 = vpop.permute.xlu1 %4081 }
 0x53a   : > { %12371 = vst [vmem:[#allocation157_spill] sm:$0xff] %v10677_v28 }
 0x53b   : > { %v10679_v63 = vpop.permute.xlu0 %4093 }
 0x53c   : > { %12372 = vst [vmem:[#allocation158_spill] sm:$0xff] %v10679_v63  ;;  %v12380_v63 = vld [vmem:[#allocation55_spill] sm:$0xff] }
 0x53d   : > { %v10681_v1 = vpop.permute.xlu1 %4089 }
 0x53e   : > { %12373 = vst [vmem:[#allocation159_spill] sm:$0xff] %v10681_v1  ;;  %v4428_v1 = vmul.f32 %v10516_v37, %v12380_v63  ;;  %v12384_v37 = vld [vmem:[#allocation37_spill] sm:$0xff] }
 0x53f   : > { %5756 = vadd.xlane.f32.xlu0 %v10366_v60  ;;  %v10684_v38 = vpop.permute.xlu0 %4104 }
 0x540   : > { %12374 = vst [vmem:[#allocation160_spill] sm:$0xff] %v10684_v38 }
 0x541   : > { %v10686_v31 = vpop.permute.xlu1 %4097 }
 0x542   : > { %12375 = vst [vmem:[#allocation161_spill] sm:$0xff] %v10686_v31  ;;  %v4429_v31 = vmul.f32 %v10518_v43, %v12381_v11  ;;  %v4432_v11 = vmul.f32 %v10522_v58, %v12384_v37  ;;  %v12388_v58 = vld [vmem:[#allocation16_spill] sm:$0xff]  ;;  %v12390_v37 = vld [vmem:[#allocation26_spill] sm:$0xff] }
 0x543   : > { %v10691_v55 = vpop.permute.xlu0 %4112 }
 0x544   : > { %12376 = vst [vmem:[#allocation162_spill] sm:$0xff] %v10691_v55  ;;  %v12383_v55 = vld [vmem:[#allocation24_spill] sm:$0xff] }
 0x545   : > { %5758 = vadd.xlane.f32.xlu1 %v6600_v48  ;;  %v10689_v45 = vpop.permute.xlu1 %4108  ;;  %v4431_v48 = vmul.f32 %v10524_v18, %v9440_v15  ;;  %v4433_v63 = vmul.f32 %v10528_v16, %v12383_v55  ;;  %v12385_v15 = vld [vmem:[#allocation23_spill] sm:$0xff]  ;;  %v4436_v55 = vmul.f32 %v10530_v59, %v12388_v58  ;;  %v12392_v59 = vld [vmem:[#allocation56_spill] sm:$0xff] }
 0x546   : > { %v4435_v43 = vmul.f32 %v10532_v49, %v12385_v15  ;;  %v12389_v49 = vld [vmem:[#allocation28_spill] sm:$0xff] }
 0x547   : > { %v10695_v41 = vpop.permute.xlu0 %4120 }
 0x548   : > { %12378 = vst [vmem:[#allocation164_spill] sm:$0xff] %v10695_v41 }
 0x549   : > { %v10693_v2 = vpop.permute.xlu1 %4116 }
 0x54a   : > { %12377 = vst [vmem:[#allocation163_spill] sm:$0xff] %v10693_v2  ;;  %v12382_v2 = vld [vmem:[#allocation10_spill] sm:$0xff] }
 0x54b   : > { %v10701_v60 = vpop.permute.xlu0 %4128  ;;  %v4430_v41 = vmul.f32 %v10520_v47, %v12382_v2  ;;  %v12386_v2 = vld [vmem:[#allocation22_spill] sm:$0xff]  ;;  %v12387_v47 = vld [vmem:[#allocation25_spill] sm:$0xff] }
 0x54c   : > { %v4434_v18 = vmul.f32 %v10526_v50, %v12386_v2  ;;  %v4437_v16 = vmul.f32 %v10536_v30, %v12387_v47  ;;  %v4438_v50 = vmul.f32 %v10534_v32, %v12390_v37  ;;  %v12391_v30 = vld [vmem:[#allocation30_spill] sm:$0xff]  ;;  %v4440_v2 = vmul.f32 %v10538_v25, %v12392_v59  ;;  %v12394_v32 = vld [vmem:[#allocation27_spill] sm:$0xff] }
 0x54d   : > { %v10697_v28 = vpop.permute.xlu1 %4124  ;;  %v4441_v15 = vmul.f32 %v10544_v44, %v12391_v30  ;;  %v12395_v44 = vld [vmem:[#allocation31_spill] sm:$0xff] }
 0x54e   : > { %12379 = vst [vmem:[#allocation165_spill] sm:$0xff] %v10697_v28 }
 0x54f   : > { %v10711_v28 = vpop.permute.xlu0 %4136 }
 0x551   : > { %v10707_v38 = vpop.permute.xlu1 %4132 }
 0x555   : > { %4685 = vperm.xlu0 %6085, %v4428_v1   ;;  %v10717_v1 = vpop.permute.xlu1 %4140 }
 0x556   : > { %4688 = vperm.xlu1 %6086, %v4429_v31   ;;  %v10721_v31 = vpop.permute.xlu0 %4144 }
 0x559   : > { %4694 = vperm.xlu0 %6085, %v4431_v48  }
 0x55a   : > { %4691 = vperm.xlu1 %6086, %v4430_v41   ;;  %v10727_v41 = vpop.permute.xlu1 %4148  ;;  %v10731_v48 = vpop.permute.xlu0 %4152 }
 0x55d   : > { %4700 = vperm.xlu0 %6085, %v4433_v63   ;;  %v4439_v63 = vmul.f32 %v10540_v52, %v12389_v49  ;;  %v12396_v49 = vld [vmem:[#allocation7_spill] sm:$0xff] }
 0x55e   : > { %4697 = vperm.xlu1 %6086, %v4432_v11   ;;  %v10737_v11 = vpop.permute.xlu1 %4156  ;;  %v4444_v25 = vmul.f32 %v10546_v56, %v12396_v49  ;;  %v12400_v56 = vld [vmem:[#allocation38_spill] sm:$0xff] }
 0x561   : > { %4706 = vperm.xlu0 %6085, %v4435_v43   ;;  %v10741_v43 = vpop.permute.xlu0 %4160 }
 0x562   : > { %4703 = vperm.xlu1 %6086, %v4434_v18   ;;  %v12393_v18 = vld [vmem:[#allocation29_spill] sm:$0xff]  ;;  %v10747_v47 = vpop.permute.xlu1 %4164 }
 0x563   : > { %v4443_v52 = vmul.f32 %v10551_v3, %v12393_v18  ;;  %v12397_v3 = vld [vmem:[#allocation36_spill] sm:$0xff] }
 0x564   : > { %v4447_v37 = vmul.f32 %v10559_v0, %v12397_v3  ;;  %v12401_v0 = vld [vmem:[#allocation42_spill] sm:$0xff] }
 0x565   : > { %4712 = vperm.xlu0 %6085, %v4437_v16   ;;  %v4442_v16 = vmul.f32 %v10542_v39, %v12394_v32  ;;  %v10751_v58 = vpop.permute.xlu0 %4171  ;;  %v12398_v39 = vld [vmem:[#allocation14_spill] sm:$0xff]  ;;  %v12402_v32 = vld [vmem:[#allocation57_spill] sm:$0xff] }
 0x566   : > { %4709 = vperm.xlu1 %6086, %v4436_v55   ;;  %v4445_v55 = vmul.f32 %v10555_v29, %v12395_v44  ;;  %v4446_v30 = vmul.f32 %v10553_v36, %v12398_v39  ;;  %v4450_v36 = vmul.f32 %v10561_v12, %v12402_v32  ;;  %v12406_v12 = vld [vmem:[#allocation33_spill] sm:$0xff] }
 0x569   : > { %4718 = vperm.xlu0 %6085, %v4439_v63   ;;  %v10757_v63 = vpop.permute.xlu1 %4175 }
 0x56a   : > { %4715 = vperm.xlu1 %6086, %v4438_v50   ;;  %v10761_v50 = vpop.permute.xlu0 %4179 }
 0x56d   : > { %4724 = vperm.xlu0 %6085, %v4441_v15   ;;  %v12399_v15 = vld [vmem:[#allocation58_spill] sm:$0xff]  ;;  %v10767_v59 = vpop.permute.xlu1 %4183 }
 0x56e   : > { %4721 = vperm.xlu1 %6086, %v4440_v2   ;;  %v4449_v29 = vmul.f32 %v10563_v14, %v12399_v15  ;;  %v4448_v2 = vmul.f32 %v10557_v7, %v12400_v56  ;;  %v10771_v18 = vpop.permute.xlu0 %4187  ;;  %v12403_v14 = vld [vmem:[#allocation9_spill] sm:$0xff]  ;;  %v12404_v7 = vld [vmem:[#allocation32_spill] sm:$0xff]  ;;  %v12408_v15 = vld [vmem:[#allocation35_spill] sm:$0xff] }
 0x56f   : > { %v4453_v44 = vmul.f32 %v10571_v26, %v12403_v14  ;;  %v4452_v49 = vmul.f32 %v10565_v42, %v12404_v7  ;;  %v12407_v26 = vld [vmem:[#allocation39_spill] sm:$0xff]  ;;  %v4456_v42 = vmul.f32 %v10573_v23, %v12408_v15  ;;  %v12411_v23 = vld [vmem:[#allocation41_spill] sm:$0xff]  ;;  %v12422_v15 = vld [vmem:[#allocation8_spill] sm:$0xff] }
 0x570   : > { %v4460_v32 = vmul.f32 %v10581_v34, %v12411_v23  ;;  %v12412_v14 = vld [vmem:[#allocation45_spill] sm:$0xff]  ;;  %v4464_v34 = vmul.f32 %v10592_v13, %v10116_v54  ;;  %v4468_v54 = vmul.f32 %v10600_v22, %v10199_v27  ;;  %v12418_v27 = vld [vmem:[#allocation43_spill] sm:$0xff]  ;;  %v12419_v22 = vld [vmem:[#allocation124_spill] sm:$0xff] }
 0x571   : > { %4730 = vperm.xlu0 %6085, %v4443_v52   ;;  %v4451_v52 = vmul.f32 %v10567_v35, %v12401_v0 }
 0x572   : > { %4727 = vperm.xlu1 %6086, %v4442_v16   ;;  %v10777_v16 = vpop.permute.xlu1 %4191 }
 0x575   : > { %4736 = vperm.xlu0 %6085, %v4445_v55   ;;  %v10781_v55 = vpop.permute.xlu0 %4195 }
 0x576   : > { %4733 = vperm.xlu1 %6086, %v4444_v25   ;;  %v12405_v25 = vld [vmem:[#allocation34_spill] sm:$0xff]  ;;  %v10787_v3 = vpop.permute.xlu1 %4199 }
 0x577   : > { %v4455_v35 = vmul.f32 %v10575_v53, %v12405_v25  ;;  %v12409_v53 = vld [vmem:[#allocation40_spill] sm:$0xff]  ;;  %v12416_v25 = vld [vmem:[#allocation59_spill] sm:$0xff] }
 0x578   : > { %v4459_v56 = vmul.f32 %v10586_v6, %v12409_v53  ;;  %v4463_v6 = vmul.f32 %v10594_v8, %v10112_v51  ;;  %v4467_v51 = vmul.f32 %v10602_v46, %v10190_v57  ;;  %v12413_v57 = vld [vmem:[#allocation125_spill] sm:$0xff] }
 0x579   : > { %4742 = vperm.xlu0 %6085, %v4447_v37   ;;  %v4454_v37 = vmul.f32 %v10569_v5, %v12406_v12  ;;  %v10791_v39 = vpop.permute.xlu0 %4203  ;;  %v12410_v5 = vld [vmem:[#allocation17_spill] sm:$0xff]  ;;  %v4471_v46 = vmul.f32 %v12413_v57, %v10247_v4  ;;  %v4472_v12 = vmul.f32 %v12419_v22, %v12418_v27  ;;  %v12420_v4 = vld [vmem:[#allocation63_spill] sm:$0xff] }
 0x57a   : > { %4739 = vperm.xlu1 %6086, %v4446_v30   ;;  %v4457_v30 = vmul.f32 %v10579_v20, %v12407_v26  ;;  %v4458_v0 = vmul.f32 %v10577_v10, %v12410_v5  ;;  %v4461_v20 = vmul.f32 %v10590_v17, %v10069_v61  ;;  %v4462_v10 = vmul.f32 %v10588_v19, %v12412_v14  ;;  %v12421_v26 = vld [vmem:[#allocation129_spill] sm:$0xff]  ;;  %v12424_v5 = vld [vmem:[#allocation44_spill] sm:$0xff]  ;;  %v12436_v27 = vld [vmem:[#allocation11_spill] sm:$0xff] }
 0x57b   : > { %v4465_v61 = vmul.f32 %v10598_v24, %v10149_v21  ;;  %v4466_v19 = vmul.f32 %v10596_v33, %v10158_v62  ;;  %v4469_v21 = vmul.f32 %v10606_v40, %v10223_v9  ;;  %v12414_v62 = vld [vmem:[#allocation60_spill] sm:$0xff]  ;;  %v12415_v33 = vld [vmem:[#allocation123_spill] sm:$0xff]  ;;  %v12437_v22 = vld [vmem:[#allocation137_spill] sm:$0xff] }
 0x57d   : > { %4748 = vperm.xlu0 %6085, %v4449_v29   ;;  %v10797_v29 = vpop.permute.xlu1 %4207 }
 0x57e   : > { %4745 = vperm.xlu1 %6086, %v4448_v2   ;;  %v10801_v2 = vpop.permute.xlu0 %4211 }
 0x581   : > { %4754 = vperm.xlu0 %6085, %v4451_v52   ;;  %v10807_v52 = vpop.permute.xlu1 %4215 }
 0x582   : > { %4751 = vperm.xlu1 %6086, %v4450_v36   ;;  %v10811_v36 = vpop.permute.xlu0 %4219 }
 0x585   : > { %4760 = vperm.xlu0 %6085, %v4453_v44   ;;  %v10817_v44 = vpop.permute.xlu1 %4223 }
 0x586   : > { %4757 = vperm.xlu1 %6086, %v4452_v49   ;;  %v10821_v17 = vpop.permute.xlu0 %4227  ;;  %v4470_v49 = vmul.f32 %v12415_v33, %v12414_v62  ;;  %v12433_v62 = vld [vmem:[#allocation135_spill] sm:$0xff] }
 0x589   : > { %4766 = vperm.xlu0 %6085, %v4455_v35   ;;  %v10827_v8 = vpop.permute.xlu1 %4231  ;;  %v12417_v35 = vld [vmem:[#allocation127_spill] sm:$0xff] }
 0x58a   : > { %4763 = vperm.xlu1 %6086, %v4454_v37   ;;  %v10831_v7 = vpop.permute.xlu0 %4238  ;;  %v4473_v9 = vmul.f32 %v12417_v35, %v12416_v25  ;;  %v12435_v25 = vld [vmem:[#allocation132_spill] sm:$0xff] }
 0x58d   : > { %4772 = vperm.xlu0 %6085, %v4457_v30   ;;  %v10837_v13 = vpop.permute.xlu1 %4242  ;;  %v4475_v30 = vmul.f32 %v12421_v26, %v12420_v4  ;;  %v12438_v26 = vld [vmem:[#allocation66_spill] sm:$0xff] }
 0x58e   : > { %4769 = vperm.xlu1 %6086, %v4456_v42   ;;  %v10841_v24 = vpop.permute.xlu0 %4246  ;;  %v12423_v42 = vld [vmem:[#allocation126_spill] sm:$0xff] }
 0x58f   : > { %v4474_v53 = vmul.f32 %v12423_v42, %v12422_v15  ;;  %v12440_v42 = vld [vmem:[#allocation64_spill] sm:$0xff] }
 0x591   : > { %4778 = vperm.xlu0 %6085, %v4459_v56   ;;  %v10847_v40 = vpop.permute.xlu1 %4250 }
 0x592   : > { %4775 = vperm.xlu1 %6086, %v4458_v0   ;;  %v10851_v37 = vpop.permute.xlu0 %4254  ;;  %v12425_v0 = vld [vmem:[#allocation131_spill] sm:$0xff] }
 0x595   : > { %4784 = vperm.xlu0 %6085, %v4461_v20   ;;  %v10857_v56 = vpop.permute.xlu1 %4258  ;;  %v4477_v20 = vmul.f32 %v12425_v0, %v12424_v5 }
 0x596   : > { %4781 = vperm.xlu1 %6086, %v4460_v32   ;;  %v10861_v23 = vpop.permute.xlu0 %4262  ;;  %v12426_v32 = vld [vmem:[#allocation19_spill] sm:$0xff] }
 0x599   : > { %4790 = vperm.xlu0 %6085, %v4463_v6   ;;  %v12427_v6 = vld [vmem:[#allocation128_spill] sm:$0xff] }
 0x59a   : > { %4787 = vperm.xlu1 %6086, %v4462_v10   ;;  %v4476_v14 = vmul.f32 %v12427_v6, %v12426_v32  ;;  %v12428_v10 = vld [vmem:[#allocation61_spill] sm:$0xff]  ;;  %v10871_v57 = vpop.permute.xlu0 %4270  ;;  %v12443_v32 = vld [vmem:[#allocation136_spill] sm:$0xff] }
 0x59d   : > { %4796 = vperm.xlu0 %6085, %v4465_v61   ;;  %v12429_v61 = vld [vmem:[#allocation133_spill] sm:$0xff] }
 0x59e   : > { %4793 = vperm.xlu1 %6086, %v4464_v34   ;;  %v4479_v34 = vmul.f32 %v12429_v61, %v12428_v10  ;;  %v10881_v4 = vpop.permute.xlu0 %4278  ;;  %v12444_v10 = vld [vmem:[#allocation70_spill] sm:$0xff]  ;;  %v12445_v61 = vld [vmem:[#allocation141_spill] sm:$0xff] }
 0x5a1   : > { %4802 = vperm.xlu0 %6085, %v4467_v51   ;;  %v10867_v51 = vpop.permute.xlu1 %4266 }
 0x5a2   : > { %4799 = vperm.xlu1 %6086, %v4466_v19   ;;  %v12430_v19 = vld [vmem:[#allocation46_spill] sm:$0xff] }
 0x5a5   : > { %4808 = vperm.xlu0 %6085, %v4469_v21   ;;  %v12431_v21 = vld [vmem:[#allocation130_spill] sm:$0xff] }
 0x5a6   : > { %4805 = vperm.xlu1 %6086, %v4468_v54   ;;  %v4478_v54 = vmul.f32 %v12431_v21, %v12430_v19  ;;  %v12446_v19 = vld [vmem:[#allocation62_spill] sm:$0xff] }
 0x5a7   : > { %v12447_v21 = vld [vmem:[#allocation138_spill] sm:$0xff] }
 0x5a9   : > { %4814 = vperm.xlu0 %6085, %v4471_v46   ;;  %v12432_v46 = vld [vmem:[#allocation15_spill] sm:$0xff] }
 0x5aa   : > { %4811 = vperm.xlu1 %6086, %v4470_v49   ;;  %v4481_v33 = vmul.f32 %v12433_v62, %v12432_v46  ;;  %v12434_v49 = vld [vmem:[#allocation48_spill] sm:$0xff] }
 0x5ab   : > { %v4480_v35 = vmul.f32 %v12435_v25, %v12434_v49  ;;  %v12448_v62 = vld [vmem:[#allocation68_spill] sm:$0xff] }
 0x5ad   : > { %4820 = vperm.xlu0 %6085, %v4473_v9   ;;  %v10877_v9 = vpop.permute.xlu1 %4274 }
 0x5ae   : > { %4817 = vperm.xlu1 %6086, %v4472_v12   ;;  %v4483_v12 = vmul.f32 %v12437_v22, %v12436_v27  ;;  %v12451_v27 = vld [vmem:[#allocation140_spill] sm:$0xff] }
 0x5b1   : > { %4826 = vperm.xlu0 %6085, %v4475_v30   ;;  %v12439_v30 = vld [vmem:[#allocation134_spill] sm:$0xff]  ;;  %v10887_v0 = vpop.permute.xlu1 %4282 }
 0x5b2   : > { %4823 = vperm.xlu1 %6086, %v4474_v53   ;;  %v4482_v15 = vmul.f32 %v12439_v30, %v12438_v26  ;;  %v12441_v53 = vld [vmem:[#allocation139_spill] sm:$0xff]  ;;  %v12453_v26 = vld [vmem:[#allocation144_spill] sm:$0xff] }
 0x5b3   : > { %v4485_v5 = vmul.f32 %v12441_v53, %v12440_v42  ;;  %v12454_v53 = vld [vmem:[#allocation71_spill] sm:$0xff] }
 0x5b5   : > { %4832 = vperm.xlu0 %6085, %v4477_v20   ;;  %v12442_v20 = vld [vmem:[#allocation65_spill] sm:$0xff]  ;;  %v10897_v46 = vpop.permute.xlu1 %4290 }
 0x5b6   : > { %4829 = vperm.xlu1 %6086, %v4476_v14   ;;  %v4484_v6 = vmul.f32 %v12443_v32, %v12442_v20  ;;  %v10891_v14 = vpop.permute.xlu0 %4286  ;;  %v12456_v32 = vld [vmem:[#allocation72_spill] sm:$0xff] }
 0x5b9   : > { %4838 = vperm.xlu0 %6085, %v4479_v34   ;;  %v4487_v34 = vmul.f32 %v12445_v61, %v12444_v10 }
 0x5ba   : > { %4835 = vperm.xlu1 %6086, %v4478_v54   ;;  %v4486_v54 = vmul.f32 %v12447_v21, %v12446_v19  ;;  %v10901_v25 = vpop.permute.xlu0 %4294  ;;  %v12458_v19 = vld [vmem:[#allocation47_spill] sm:$0xff] }
 0x5bb   : > { %v12459_v21 = vld [vmem:[#allocation147_spill] sm:$0xff] }
 0x5bd   : > { %4844 = vperm.xlu0 %6085, %v4481_v33   ;;  %v12449_v33 = vld [vmem:[#allocation143_spill] sm:$0xff] }
 0x5be   : > { %4841 = vperm.xlu1 %6086, %v4480_v35   ;;  %v4489_v49 = vmul.f32 %v12449_v33, %v12448_v62  ;;  %v12450_v35 = vld [vmem:[#allocation69_spill] sm:$0xff]  ;;  %v12460_v62 = vld [vmem:[#allocation76_spill] sm:$0xff] }
 0x5bf   : > { %v4488_v22 = vmul.f32 %v12451_v27, %v12450_v35  ;;  %v4509_v33 = vmul.f32 %v10689_v45, %v12460_v62  ;;  %v12461_v27 = vld [vmem:[#allocation75_spill] sm:$0xff] }
 0x5c0   : > { %v12469_v62 = vld [vmem:[#allocation91_spill] sm:$0xff] }
 0x5c1   : > { %4850 = vperm.xlu0 %6085, %v4483_v12   ;;  %v12452_v12 = vld [vmem:[#allocation73_spill] sm:$0xff] }
 0x5c2   : > { %4847 = vperm.xlu1 %6086, %v4482_v15   ;;  %v4492_v30 = vmul.f32 %v12453_v26, %v12452_v12  ;;  %v10907_v15 = vpop.permute.xlu1 %4298  ;;  %v12463_v26 = vld [vmem:[#allocation77_spill] sm:$0xff] }
 0x5c5   : > { %4856 = vperm.xlu0 %6085, %v4485_v5   ;;  %v12455_v5 = vld [vmem:[#allocation142_spill] sm:$0xff] }
 0x5c6   : > { %4853 = vperm.xlu1 %6086, %v4484_v6   ;;  %v4490_v20 = vmul.f32 %v12455_v5, %v12454_v53  ;;  %v12457_v6 = vld [vmem:[#allocation146_spill] sm:$0xff] }
 0x5c7   : > { %v4494_v10 = vmul.f32 %v12457_v6, %v12456_v32  ;;  %v12465_v32 = vld [vmem:[#allocation18_spill] sm:$0xff]  ;;  %v12466_v6 = vld [vmem:[#allocation149_spill] sm:$0xff] }
 0x5c8   : > { %v4495_v45 = vmul.f32 %v12466_v6, %v12465_v32  ;;  %v12474_v32 = vld [vmem:[#allocation148_spill] sm:$0xff]  ;;  %v12475_v6 = vld [vmem:[#allocation107_spill] sm:$0xff] }
 0x5c9   : > { %4862 = vperm.xlu0 %6085, %v4487_v34  }
 0x5ca   : > { %4859 = vperm.xlu1 %6086, %v4486_v54   ;;  %v4493_v54 = vmul.f32 %v12459_v21, %v12458_v19 }
 0x5cc   : > { %v10909_v42 = vpop.xlane.xlu0 %5756 }
 0x5cd   : > { %4868 = vperm.xlu0 %6085, %v4489_v49  }
 0x5ce   : > { %4865 = vperm.xlu1 %6086, %v4488_v22   ;;  %v12462_v22 = vld [vmem:[#allocation160_spill] sm:$0xff] }
 0x5cf   : > { %v4508_v12 = vmul.f32 %v12462_v22, %v12461_v27  ;;  %v12470_v27 = vld [vmem:[#allocation78_spill] sm:$0xff]  ;;  %v12471_v22 = vld [vmem:[#allocation163_spill] sm:$0xff] }
 0x5d1   : > { %4877 = vperm.xlu0 %6085, %v4492_v30   ;;  %v12464_v30 = vld [vmem:[#allocation162_spill] sm:$0xff] }
 0x5d2   : > { %v10915_v61 = vpop.xlane.xlu1 %5758  ;;  %4871 = vperm.xlu1 %6086, %v4490_v20   ;;  %v4510_v53 = vmul.f32 %v12464_v30, %v12463_v26 }
 0x5d4   : > { %v10917_v34 = vpop.permute.xlu0 %4685 }
 0x5d5   : > { %4883 = vperm.xlu0 %6085, %v4494_v10   ;;  %v12467_v10 = vld [vmem:[#allocation92_spill] sm:$0xff] }
 0x5d6   : > { %v10923_v49 = vpop.permute.xlu1 %4688  ;;  %4880 = vperm.xlu1 %6086, %v4493_v54   ;;  %v4525_v19 = vmul.f32 %v10757_v63, %v12467_v10 }
 0x5d8   : > { %v10925_v35 = vpop.permute.xlu0 %4694 }
 0x5d9   : > { %4928 = vperm.xlu0 %6085, %v4509_v33   ;;  %v4524_v33 = vmul.f32 %v10751_v58, %v12469_v62 }
 0x5da   : > { %v10931_v5 = vpop.permute.xlu1 %4691  ;;  %4925 = vperm.xlu1 %6086, %v4508_v12   ;;  %v4511_v12 = vmul.f32 %v12471_v22, %v12470_v27  ;;  %v12479_v27 = vld [vmem:[#allocation49_spill] sm:$0xff] }
 0x5dc   : > { %v10933_v20 = vpop.permute.xlu0 %4700 }
 0x5dd   : > { %4931 = vperm.xlu0 %6085, %v4510_v53   ;;  %v12473_v53 = vld [vmem:[#allocation67_spill] sm:$0xff] }
 0x5de   : > { %v10939_v21 = vpop.permute.xlu1 %4697  ;;  %4886 = vperm.xlu1 %6086, %v4495_v45   ;;  %v4496_v63 = vmul.f32 %v12474_v32, %v12473_v53  ;;  %v4540_v45 = vmul.f32 %v10831_v7, %v12475_v6  ;;  %v12484_v32 = vld [vmem:[#allocation94_spill] sm:$0xff] }
 0x5e0   : > { %v10941_v54 = vpop.permute.xlu0 %4706 }
 0x5e1   : > { %12468 = vst [vmem:[#allocation55_spill] sm:$0xff] %v10941_v54  ;;  %4976 = vperm.xlu0 %6085, %v4525_v19   ;;  %v12478_v19 = vld [vmem:[#allocation93_spill] sm:$0xff] }
 0x5e2   : > { %v10947_v26 = vpop.permute.xlu1 %4703  ;;  %4973 = vperm.xlu1 %6086, %v4524_v33   ;;  %v4526_v62 = vmul.f32 %v10761_v50, %v12478_v19  ;;  %v12480_v33 = vld [vmem:[#allocation151_spill] sm:$0xff]  ;;  %v12488_v19 = vld [vmem:[#allocation164_spill] sm:$0xff] }
 0x5e3   : > { %v4497_v22 = vmul.f32 %v12480_v33, %v12479_v27  ;;  %v12489_v33 = vld [vmem:[#allocation6_spill] sm:$0xff] }
 0x5e4   : > { %v10949_v30 = vpop.permute.xlu0 %4712 }
 0x5e5   : > { %12472 = vst [vmem:[#allocation54_spill] sm:$0xff] %v10949_v30  ;;  %4934 = vperm.xlu0 %6085, %v4511_v12   ;;  %v12483_v12 = vld [vmem:[#allocation108_spill] sm:$0xff] }
 0x5e6   : > { %v10955_v10 = vpop.permute.xlu1 %4709  ;;  %4889 = vperm.xlu1 %6086, %v4496_v63   ;;  %v4541_v7 = vmul.f32 %v10837_v13, %v12483_v12  ;;  %v4527_v63 = vmul.f32 %v10767_v59, %v12484_v32  ;;  %v12493_v12 = vld [vmem:[#allocation95_spill] sm:$0xff] }
 0x5e7   : > { %12476 = vst [vmem:[#allocation10_spill] sm:$0xff] %v10955_v10 }
 0x5e8   : > { %v10957_v58 = vpop.permute.xlu0 %4718 }
 0x5e9   : > { %12477 = vst [vmem:[#allocation24_spill] sm:$0xff] %v10957_v58  ;;  %5021 = vperm.xlu0 %6085, %v4540_v45   ;;  %v12487_v45 = vld [vmem:[#allocation79_spill] sm:$0xff] }
 0x5ea   : > { %v10963_v30 = vpop.permute.xlu1 %4715  ;;  %4979 = vperm.xlu1 %6086, %v4526_v62   ;;  %v4512_v27 = vmul.f32 %v12488_v19, %v12487_v45  ;;  %v12490_v62 = vld [vmem:[#allocation150_spill] sm:$0xff]  ;;  %v12495_v19 = vld [vmem:[#allocation165_spill] sm:$0xff] }
 0x5eb   : > { %12481 = vst [vmem:[#allocation37_spill] sm:$0xff] %v10963_v30  ;;  %v4498_v58 = vmul.f32 %v12490_v62, %v12489_v33  ;;  %v12496_v62 = vld [vmem:[#allocation50_spill] sm:$0xff] }
 0x5ec   : > { %v10965_v53 = vpop.permute.xlu0 %4724 }
 0x5ed   : > { %12482 = vst [vmem:[#allocation23_spill] sm:$0xff] %v10965_v53  ;;  %4892 = vperm.xlu0 %6085, %v4497_v22   ;;  %v12492_v22 = vld [vmem:[#allocation109_spill] sm:$0xff] }
 0x5ee   : > { %v10971_v6 = vpop.permute.xlu1 %4721  ;;  %5024 = vperm.xlu1 %6086, %v4541_v7   ;;  %v4542_v59 = vmul.f32 %v10841_v24, %v12492_v22  ;;  %v4528_v7 = vmul.f32 %v10771_v18, %v12493_v12  ;;  %v12499_v22 = vld [vmem:[#allocation96_spill] sm:$0xff] }
 0x5ef   : > { %12485 = vst [vmem:[#allocation22_spill] sm:$0xff] %v10971_v6 }
 0x5f0   : > { %v10973_v50 = vpop.permute.xlu0 %4730 }
 0x5f1   : > { %12486 = vst [vmem:[#allocation25_spill] sm:$0xff] %v10973_v50  ;;  %4982 = vperm.xlu0 %6085, %v4527_v63   ;;  %v12494_v63 = vld [vmem:[#allocation80_spill] sm:$0xff] }
 0x5f2   : > { %v10979_v53 = vpop.permute.xlu1 %4727  ;;  %4937 = vperm.xlu1 %6086, %v4512_v27   ;;  %v4513_v33 = vmul.f32 %v12495_v19, %v12494_v63  ;;  %v12497_v27 = vld [vmem:[#allocation153_spill] sm:$0xff] }
 0x5f3   : > { %12491 = vst [vmem:[#allocation16_spill] sm:$0xff] %v10979_v53  ;;  %v4499_v50 = vmul.f32 %v12497_v27, %v12496_v62  ;;  %v12502_v62 = vld [vmem:[#allocation20_spill] sm:$0xff] }
 0x5f4   : > { %v10981_v13 = vpop.permute.xlu0 %4736 }
 0x5f5   : > { %4895 = vperm.xlu0 %6085, %v4498_v58   ;;  %v12498_v58 = vld [vmem:[#allocation110_spill] sm:$0xff] }
 0x5f6   : > { %v10987_v32 = vpop.permute.xlu1 %4733  ;;  %5027 = vperm.xlu1 %6086, %v4542_v59   ;;  %v4543_v18 = vmul.f32 %v10847_v40, %v12498_v58  ;;  %v4529_v59 = vmul.f32 %v10777_v16, %v12499_v22  ;;  %v12506_v58 = vld [vmem:[#allocation97_spill] sm:$0xff] }
 0x5f8   : > { %v10989_v45 = vpop.permute.xlu0 %4742 }
 0x5f9   : > { %4985 = vperm.xlu0 %6085, %v4528_v7   ;;  %v12501_v7 = vld [vmem:[#allocation81_spill] sm:$0xff] }
 0x5fa   : > { %v10995_v53 = vpop.permute.xlu1 %4739  ;;  %4940 = vperm.xlu1 %6086, %v4513_v33   ;;  %v4514_v19 = vmul.f32 %v10701_v60, %v12501_v7  ;;  %v12503_v33 = vld [vmem:[#allocation152_spill] sm:$0xff] }
 0x5fb   : > { %v4500_v27 = vmul.f32 %v12503_v33, %v12502_v62  ;;  %v12510_v62 = vld [vmem:[#allocation51_spill] sm:$0xff] }
 0x5fc   : > { %v10997_v24 = vpop.permute.xlu0 %4748 }
 0x5fd   : > { %4898 = vperm.xlu0 %6085, %v4499_v50   ;;  %v12505_v50 = vld [vmem:[#allocation111_spill] sm:$0xff] }
 0x5fe   : > { %v11003_v12 = vpop.permute.xlu1 %4745  ;;  %5030 = vperm.xlu1 %6086, %v4543_v18   ;;  %v4544_v16 = vmul.f32 %v10851_v37, %v12505_v50  ;;  %v4530_v18 = vmul.f32 %v10781_v55, %v12506_v58  ;;  %v12513_v37 = vlaneseq  ;;  %v12515_v55 = vld [vmem:[#allocation112_spill] sm:$0xff]  ;;  %v12516_v58 = vld [vmem:[#allocation98_spill] sm:$0xff] }
 0x600   : > { %v11005_v63 = vpop.permute.xlu0 %4754 }
 0x601   : > { %12500 = vst [vmem:[#allocation28_spill] sm:$0xff] %v11005_v63  ;;  %4988 = vperm.xlu0 %6085, %v4529_v59   ;;  %v12509_v59 = vld [vmem:[#allocation82_spill] sm:$0xff] }
 0x602   : > { %v11011_v6 = vpop.permute.xlu1 %4751  ;;  %4943 = vperm.xlu1 %6086, %v4514_v19   ;;  %v4515_v7 = vmul.f32 %v10707_v38, %v12509_v59  ;;  %v12511_v19 = vld [vmem:[#allocation155_spill] sm:$0xff] }
 0x603   : > { %v4501_v33 = vmul.f32 %v12511_v19, %v12510_v62  ;;  %v12520_v19 = vld [vmem:[#allocation52_spill] sm:$0xff] }
 0x604   : > { %v11013_v40 = vpop.permute.xlu0 %4760 }
 0x605   : > { %12504 = vst [vmem:[#allocation26_spill] sm:$0xff] %v11013_v40  ;;  %4901 = vperm.xlu0 %6085, %v4500_v27   ;;  %v11030_v27 = vand.u32 127, %v12513_v37  ;;  %v12521_v37 = vld [vmem:[#allocation154_spill] sm:$0xff] }
 0x606   : > { %v11019_v22 = vpop.permute.xlu1 %4757  ;;  %5033 = vperm.xlu1 %6086, %v4544_v16   ;;  %v4545_v16 = vmul.f32 %v10857_v56, %v12515_v55  ;;  %v12523_v56 = vld [vmem:[#allocation4_spill] sm:$0xff]  ;;  %v12524_v55 = vld [vmem:[#allocation113_spill] sm:$0xff] }
 0x607   : > { %12507 = vst [vmem:[#allocation30_spill] sm:$0xff] %v11019_v22 }
 0x608   : > { %v11021_v60 = vpop.permute.xlu0 %4766 }
 0x609   : > { %12508 = vst [vmem:[#allocation56_spill] sm:$0xff] %v11021_v60  ;;  %4991 = vperm.xlu0 %6085, %v4530_v18   ;;  %v4531_v60 = vmul.f32 %v10787_v3, %v12516_v58  ;;  %v5074_v18 = vadd.s32 4294967288, %v11030_v27  ;;  %v11056_v58 = vsub.s32 %v11030_v27, %v12523_v56 }
 0x60a   : > { %v11027_v30 = vpop.permute.xlu1 %4763  ;;  %4946 = vperm.xlu1 %6086, %v4515_v7   ;;  %v12519_v7 = vld [vmem:[#allocation83_spill] sm:$0xff] }
 0x60b   : > { %12512 = vst [vmem:[#allocation29_spill] sm:$0xff] %v11027_v30  ;;  %v4516_v62 = vmul.f32 %v10711_v28, %v12519_v7  ;;  %v5081_v28 = vadd.s32 4294967280, %v11030_v27  ;;  %v12525_v7 = vld [vmem:[#allocation99_spill] sm:$0xff] }
 0x60c   : > { %v11032_v50 = vpop.permute.xlu0 %4772 }
 0x60d   : > { %12514 = vst [vmem:[#allocation27_spill] sm:$0xff] %v11032_v50  ;;  %4904 = vperm.xlu0 %6085, %v4501_v33   ;;  %v4502_v50 = vmul.f32 %v12521_v37, %v12520_v19  ;;  %v11050_v33 = vsub.s32 %v5074_v18, %v12523_v56  ;;  %v4532_v19 = vmul.f32 %v10791_v39, %v12525_v7  ;;  %v12527_v39 = vld [vmem:[#allocation12_spill] sm:$0xff]  ;;  %v12528_v7 = vld [vmem:[#allocation157_spill] sm:$0xff] }
 0x60e   : > { %v11038_v38 = vpop.permute.xlu1 %4769  ;;  %5036 = vperm.xlu1 %6086, %v4545_v16   ;;  %v4546_v16 = vmul.f32 %v10861_v23, %v12524_v55  ;;  %v12526_v23 = vld [vmem:[#allocation84_spill] sm:$0xff]  ;;  %v11067_v55 = vsub.s32 %v5081_v28, %v12523_v56 }
 0x60f   : > { %12517 = vst [vmem:[#allocation31_spill] sm:$0xff] %v11038_v38  ;;  %v4503_v38 = vmul.f32 %v12528_v7, %v12527_v39  ;;  %v12530_v39 = vld [vmem:[#allocation100_spill] sm:$0xff] }
 0x610   : > { %v11041_v59 = vpop.permute.xlu0 %4778 }
 0x611   : > { %12518 = vst [vmem:[#allocation7_spill] sm:$0xff] %v11041_v59  ;;  %4994 = vperm.xlu0 %6085, %v4531_v60  }
 0x612   : > { %v11047_v40 = vpop.permute.xlu1 %4775  ;;  %4949 = vperm.xlu1 %6086, %v4516_v62   ;;  %v5088_v62 = vadd.s32 4294967272, %v11030_v27 }
 0x613   : > { %12522 = vst [vmem:[#allocation36_spill] sm:$0xff] %v11047_v40 }
 0x614   : > { %v4785_v3 = vpop.permute.xlu0 %4784 }
 0x615   : > { %4907 = vperm.xlu0 %6085, %v4502_v50   ;;  %v5265_v60 = vrot.slane %v4785_v3, %v11050_v33  ;;  %v4517_v50 = vmul.f32 %v10717_v1, %v12526_v23  ;;  %v5095_v3 = vadd.s32 4294967264, %v11030_v27  ;;  %v12529_v23 = vld [vmem:[#allocation114_spill] sm:$0xff] }
 0x616   : > { %v4782_v18 = vpop.permute.xlu1 %4781  ;;  %5039 = vperm.xlu1 %6086, %v4546_v16   ;;  %v11074_v16 = vsub.s32 %v5088_v62, %v12523_v56  ;;  %v4547_v28 = vmul.f32 %v10867_v51, %v12529_v23  ;;  %v5109_v62 = vadd.s32 4294967248, %v11030_v27  ;;  %v5116_v51 = vadd.s32 4294967240, %v11030_v27  ;;  %v12531_v23 = vld [vmem:[#allocation85_spill] sm:$0xff] }
 0x617   : > { %v5261_v37 = vrot.slane %v4782_v18, %v11056_v58  ;;  %v5102_v18 = vadd.s32 4294967256, %v11030_v27  ;;  %v4518_v10 = vmul.f32 %v10721_v31, %v12531_v23  ;;  %v5130_v31 = vadd.s32 4294967224, %v11030_v27  ;;  %v12534_v23 = vld [vmem:[#allocation115_spill] sm:$0xff] }
 0x618   : > { %v4791_v59 = vpop.permute.xlu0 %4790  ;;  %v4548_v63 = vmul.f32 %v10871_v57, %v12534_v23  ;;  %v5144_v57 = vadd.s32 4294967208, %v11030_v27 }
 0x619   : > { %4997 = vperm.xlu0 %6085, %v4532_v19   ;;  %v5266_v40 = vsel %vm5079_vm11, %v5265_v60, %v5261_v37  ;;  %v5275_v54 = vrot.slane %v4791_v59, %v11074_v16  ;;  %v11082_v60 = vsub.s32 %v5095_v3, %v12523_v56 }
 0x61a   : > { %v4788_v30 = vpop.permute.xlu1 %4787  ;;  %4952 = vperm.xlu1 %6086, %v4517_v50   ;;  %v4533_v50 = vmul.f32 %v10797_v29, %v12530_v39  ;;  %v11098_v29 = vsub.s32 %v5109_v62, %v12523_v56  ;;  %v11105_v39 = vsub.s32 %v5116_v51, %v12523_v56 }
 0x61b   : > { %v5270_v1 = vrot.slane %v4788_v30, %v11067_v55  ;;  %v11089_v30 = vsub.s32 %v5102_v18, %v12523_v56  ;;  %v5123_v18 = vadd.s32 4294967232, %v11030_v27 }
 0x61c   : > { %v4797_v19 = vpop.permute.xlu0 %4796 }
 0x61d   : > { %4910 = vperm.xlu0 %6085, %v4503_v38   ;;  %v5271_v37 = vsel %vm5086_vm12, %v5270_v1, %v5266_v40  ;;  %v5285_v40 = vrot.slane %v4797_v19, %v11089_v30  ;;  %v11114_v51 = vsub.s32 %v5123_v18, %v12523_v56 }
 0x61e   : > { %v4794_v7 = vpop.permute.xlu1 %4793  ;;  %v5276_v59 = vsel %vm5093_vm13, %v5275_v54, %v5271_v37  ;;  %5042 = vperm.xlu1 %6086, %v4547_v28   ;;  %v12532_v54 = vld [vmem:[#allocation53_spill] sm:$0xff]  ;;  %v12533_v28 = vld [vmem:[#allocation156_spill] sm:$0xff] }
 0x61f   : > { %v5280_v38 = vrot.slane %v4794_v7, %v11082_v60  ;;  %v4504_v37 = vmul.f32 %v12533_v28, %v12532_v54 }
 0x620   : > { %v4803_v3 = vpop.permute.xlu0 %4802 }
 0x621   : > { %5000 = vperm.xlu0 %6085, %v4533_v50   ;;  %v5281_v1 = vsel %vm5100_vm14, %v5280_v38, %v5276_v59  ;;  %v5295_v59 = vrot.slane %v4803_v3, %v11105_v39  ;;  %v5137_v38 = vadd.s32 4294967216, %v11030_v27 }
 0x622   : > { %v4800_v7 = vpop.permute.xlu1 %4799  ;;  %v5286_v19 = vsel %vm5107_vm15, %v5285_v40, %v5281_v1  ;;  %4955 = vperm.xlu1 %6086, %v4518_v10   ;;  %v12535_v40 = vld [vmem:[#allocation101_spill] sm:$0xff]  ;;  %v11121_v1 = vsub.s32 %v5130_v31, %v12523_v56  ;;  %v5151_v31 = vadd.s32 4294967200, %v11030_v27 }
 0x623   : > { %v5290_v50 = vrot.slane %v4800_v7, %v11098_v29  ;;  %v4534_v10 = vmul.f32 %v10801_v2, %v12535_v40  ;;  %v12536_v7 = vld [vmem:[#allocation86_spill] sm:$0xff]  ;;  %v11130_v2 = vsub.s32 %v5137_v38, %v12523_v56  ;;  %v11137_v40 = vsub.s32 %v5144_v57, %v12523_v56 }
 0x624   : > { %v4809_v62 = vpop.permute.xlu0 %4808  ;;  %v4519_v23 = vmul.f32 %v10727_v41, %v12536_v7  ;;  %v5158_v41 = vadd.s32 4294967192, %v11030_v27  ;;  %v12539_v7 = vld [vmem:[#allocation116_spill] sm:$0xff]  ;;  %v11146_v57 = vsub.s32 %v5151_v31, %v12523_v56 }
 0x625   : > { %4913 = vperm.xlu0 %6085, %v4504_v37   ;;  %v5291_v54 = vsel %vm5114_vm1, %v5290_v50, %v5286_v19  ;;  %v5305_v19 = vrot.slane %v4809_v62, %v11121_v1  ;;  %v4549_v22 = vmul.f32 %v10877_v9, %v12539_v7  ;;  %v5172_v9 = vadd.s32 4294967176, %v11030_v27 }
 0x626   : > { %v4806_v28 = vpop.permute.xlu1 %4805  ;;  %v5296_v3 = vsel %vm5121_vm2, %v5295_v59, %v5291_v54  ;;  %5045 = vperm.xlu1 %6086, %v4548_v63   ;;  %v12537_v59 = vld [vmem:[#allocation13_spill] sm:$0xff]  ;;  %v12538_v63 = vld [vmem:[#allocation159_spill] sm:$0xff] }
 0x627   : > { %v5300_v37 = vrot.slane %v4806_v28, %v11114_v51  ;;  %v4505_v54 = vmul.f32 %v12538_v63, %v12537_v59 }
 0x628   : > { %v4815_v18 = vpop.permute.xlu0 %4814 }
 0x629   : > { %5003 = vperm.xlu0 %6085, %v4534_v10   ;;  %v5301_v50 = vsel %vm5128_vm3, %v5300_v37, %v5296_v3  ;;  %v5315_v3 = vrot.slane %v4815_v18, %v11137_v40  ;;  %v5165_v37 = vadd.s32 4294967184, %v11030_v27 }
 0x62a   : > { %v4812_v28 = vpop.permute.xlu1 %4811  ;;  %v5306_v62 = vsel %vm5135_vm4, %v5305_v19, %v5301_v50  ;;  %4958 = vperm.xlu1 %6086, %v4519_v23   ;;  %v12540_v19 = vld [vmem:[#allocation102_spill] sm:$0xff]  ;;  %v11153_v50 = vsub.s32 %v5158_v41, %v12523_v56  ;;  %v12542_v41 = vld [vmem:[#allocation21_spill] sm:$0xff] }
 0x62b   : > { %v5310_v10 = vrot.slane %v4812_v28, %v11130_v2  ;;  %v4535_v23 = vmul.f32 %v10807_v52, %v12540_v19  ;;  %v12541_v28 = vld [vmem:[#allocation87_spill] sm:$0xff]  ;;  %v11162_v52 = vsub.s32 %v5165_v37, %v12523_v56 }
 0x62c   : > { %v4821_v38 = vpop.permute.xlu0 %4820  ;;  %v4520_v7 = vmul.f32 %v10731_v48, %v12541_v28 }
 0x62d   : > { %4916 = vperm.xlu0 %6085, %v4505_v54   ;;  %v5311_v59 = vsel %vm5142_vm5, %v5310_v10, %v5306_v62  ;;  %v5325_v62 = vrot.slane %v4821_v38, %v11153_v50  ;;  %v12543_v10 = vld [vmem:[#allocation145_spill] sm:$0xff] }
 0x62e   : > { %v4818_v63 = vpop.permute.xlu1 %4817  ;;  %v5316_v18 = vsel %vm5149_vm6, %v5315_v3, %v5311_v59  ;;  %5048 = vperm.xlu1 %6086, %v4549_v22   ;;  %v4491_v3 = vmul.f32 %v12543_v10, %v12542_v41  ;;  %v11168_v22 = vsub.s32 %v5172_v9, %v12523_v56  ;;  %v12545_v9 = vld [vmem:[#allocation88_spill] sm:$0xff]  ;;  %v12547_v41 = vld [vmem:[#allocation158_spill] sm:$0xff] }
 0x62f   : > { %v5320_v54 = vrot.slane %v4818_v63, %v11146_v57 }
 0x630   : > { %v4827_v31 = vpop.permute.xlu0 %4826 }
 0x631   : > { %5006 = vperm.xlu0 %6085, %v4535_v23   ;;  %v5321_v27 = vsel %vm5156_vm7, %v5320_v54, %v5316_v18  ;;  %v12544_v23 = vld [vmem:[#allocation117_spill] sm:$0xff]  ;;  %v5335_v37 = vrot.slane %v4827_v31, %v11168_v22  ;;  %v4521_v54 = vmul.f32 %v10737_v11, %v12545_v9 }
 0x632   : > { %v4824_v59 = vpop.permute.xlu1 %4823  ;;  %v5326_v19 = vsel %vm5163_vm8, %v5325_v62, %v5321_v27  ;;  %4961 = vperm.xlu1 %6086, %v4520_v7   ;;  %v4550_v63 = vmul.f32 %v10881_v4, %v12544_v23  ;;  %v12546_v27 = vld [vmem:[#allocation5_spill] sm:$0xff] }
 0x633   : > { %v5330_v48 = vrot.slane %v4824_v59, %v11162_v52  ;;  %v4506_v31 = vmul.f32 %v12547_v41, %v12546_v27  ;;  %v12552_v27 = vld [vmem:[#allocation161_spill] sm:$0xff] }
 0x634   : > { %v4833_v38 = vpop.permute.xlu0 %4832 }
 0x635   : > { %4874 = vperm.xlu0 %6085, %v4491_v3   ;;  %v5331_v18 = vsel %vm5170_vm9, %v5330_v48, %v5326_v19  ;;  %v5344_v56 = vrot.slane %v4833_v38, %v11050_v33  ;;  %v12548_v3 = vld [vmem:[#allocation118_spill] sm:$0xff]  ;;  %v12549_v38 = vld [vmem:[#allocation103_spill] sm:$0xff] }
 0x636   : > { %v11180_v28 = vsel %vm5177_vm10, %v5335_v37, %v5331_v18  ;;  %v4830_v7 = vpop.permute.xlu1 %4829  ;;  %5051 = vperm.xlu1 %6086, %v4550_v63   ;;  %v4551_v59 = vmul.f32 %v10887_v0, %v12548_v3  ;;  %v4536_v23 = vmul.f32 %v10811_v36, %v12549_v38  ;;  %v12550_v18 = vld [vmem:[#allocation89_spill] sm:$0xff] }
 0x637   : > { %v5340_v62 = vrot.slane %v4830_v7, %v11056_v58  ;;  %v4522_v9 = vmul.f32 %v10741_v43, %v12550_v18 }
 0x638   : > { %v4839_v4 = vpop.permute.xlu0 %4838 }
 0x639   : > { %4964 = vperm.xlu0 %6085, %v4521_v54   ;;  %v5345_v10 = vsel %vm5079_vm11, %v5344_v56, %v5340_v62  ;;  %v5354_v63 = vrot.slane %v4839_v4, %v11074_v16  ;;  %v12551_v62 = vld [vmem:[#allocation74_spill] sm:$0xff] }
 0x63a   : > { %v4836_v19 = vpop.permute.xlu1 %4835  ;;  %4919 = vperm.xlu1 %6086, %v4506_v31   ;;  %v4507_v41 = vmul.f32 %v12552_v27, %v12551_v62  ;;  %v12553_v31 = vld [vmem:[#allocation119_spill] sm:$0xff]  ;;  %v12557_v62 = vld [vmem:[#allocation106_spill] sm:$0xff] }
 0x63b   : > { %v5349_v11 = vrot.slane %v4836_v19, %v11067_v55  ;;  %v4539_v27 = vmul.f32 %v10827_v8, %v12557_v62 }
 0x63c   : > { %v4845_v48 = vpop.permute.xlu0 %4844 }
 0x63d   : > { %5054 = vperm.xlu0 %6085, %v4551_v59   ;;  %v5350_v37 = vsel %vm5086_vm12, %v5349_v11, %v5345_v10  ;;  %v5364_v36 = vrot.slane %v4845_v48, %v11089_v30  ;;  %v4552_v10 = vmul.f32 %v10891_v14, %v12553_v31  ;;  %v12554_v11 = vld [vmem:[#allocation104_spill] sm:$0xff] }
 0x63e   : > { %v4842_v56 = vpop.permute.xlu1 %4841  ;;  %v5355_v54 = vsel %vm5093_vm13, %v5354_v63, %v5350_v37  ;;  %5009 = vperm.xlu1 %6086, %v4536_v23   ;;  %v4537_v38 = vmul.f32 %v10817_v44, %v12554_v11  ;;  %v12555_v63 = vld [vmem:[#allocation105_spill] sm:$0xff]  ;;  %v12558_v31 = vld [vmem:[#allocation120_spill] sm:$0xff] }
 0x63f   : > { %v5359_v0 = vrot.slane %v4842_v56, %v11082_v60  ;;  %v4538_v37 = vmul.f32 %v10821_v17, %v12555_v63 }
 0x640   : > { %v4851_v7 = vpop.permute.xlu0 %4850 }
 0x641   : > { %4967 = vperm.xlu0 %6085, %v4522_v9   ;;  %v5360_v4 = vsel %vm5100_vm14, %v5359_v0, %v5355_v54  ;;  %v5374_v23 = vrot.slane %v4851_v7, %v11105_v39  ;;  %v12556_v54 = vld [vmem:[#allocation90_spill] sm:$0xff] }
 0x642   : > { %v4848_v3 = vpop.permute.xlu1 %4847  ;;  %v5365_v43 = vsel %vm5107_vm15, %v5364_v36, %v5360_v4  ;;  %4922 = vperm.xlu1 %6086, %v4507_v41   ;;  %v4523_v0 = vmul.f32 %v10747_v47, %v12556_v54 }
 0x643   : > { %v5369_v59 = vrot.slane %v4848_v3, %v11098_v29 }
 0x644   : > { %v4857_v19 = vpop.permute.xlu0 %4856 }
 0x645   : > { %5057 = vperm.xlu0 %6085, %v4552_v10   ;;  %v5370_v48 = vsel %vm5114_vm1, %v5369_v59, %v5365_v43  ;;  %v5384_v44 = vrot.slane %v4857_v19, %v11121_v1  ;;  %v4553_v10 = vmul.f32 %v10897_v46, %v12558_v31  ;;  %v12559_v43 = vld [vmem:[#allocation122_spill] sm:$0xff] }
 0x646   : > { %v4854_v18 = vpop.permute.xlu1 %4853  ;;  %v5375_v14 = vsel %vm5121_vm2, %v5374_v23, %v5370_v48  ;;  %5012 = vperm.xlu1 %6086, %v4537_v38   ;;  %v4555_v59 = vmul.f32 %v10907_v15, %v12559_v43  ;;  %v12560_v23 = vld [vmem:[#allocation121_spill] sm:$0xff] }
 0x647   : > { %v5379_v9 = vrot.slane %v4854_v18, %v11114_v51  ;;  %v4554_v48 = vmul.f32 %v10901_v25, %v12560_v23 }
 0x648   : > { %v4863_v56 = vpop.permute.xlu0 %4862 }
 0x649   : > { %5015 = vperm.xlu0 %6085, %v4538_v37   ;;  %v5380_v7 = vsel %vm5128_vm3, %v5379_v9, %v5375_v14  ;;  %v5394_v47 = vrot.slane %v4863_v56, %v11137_v40 }
 0x64a   : > { %v4860_v41 = vpop.permute.xlu1 %4859  ;;  %v5385_v17 = vsel %vm5135_vm4, %v5384_v44, %v5380_v7  ;;  %4970 = vperm.xlu1 %6086, %v4523_v0  }
 0x64b   : > { %v5389_v36 = vrot.slane %v4860_v41, %v11130_v2 }
 0x64c   : > { %v4869_v4 = vpop.permute.xlu0 %4868 }
 0x64d   : > { %5018 = vperm.xlu0 %6085, %v4539_v27   ;;  %v5390_v3 = vsel %vm5142_vm5, %v5389_v36, %v5385_v17  ;;  %v5404_v46 = vrot.slane %v4869_v4, %v11153_v50 }
 0x64e   : > { %v4866_v19 = vpop.permute.xlu1 %4865  ;;  %v5395_v8 = vsel %vm5149_vm6, %v5394_v47, %v5390_v3  ;;  %5060 = vperm.xlu1 %6086, %v4553_v10  }
 0x64f   : > { %v5399_v11 = vrot.slane %v4866_v19, %v11146_v57 }
 0x650   : > { %v4878_v38 = vpop.permute.xlu0 %4877 }
 0x651   : > { %5066 = vperm.xlu0 %6085, %v4555_v59   ;;  %v5400_v63 = vsel %vm5156_vm7, %v5399_v11, %v5395_v8  ;;  %v5419_v54 = vrot.slane %v4878_v38, %v11056_v58 }
 0x652   : > { %v4872_v37 = vpop.permute.xlu1 %4871  ;;  %v5405_v18 = vsel %vm5163_vm8, %v5404_v46, %v5400_v63  ;;  %5063 = vperm.xlu1 %6086, %v4554_v48  }
 0x653   : > { %v5409_v15 = vrot.slane %v4872_v37, %v11162_v52 }
 0x654   : > { %v4884_v14 = vpop.permute.xlu0 %4883 }
 0x655   : > { %v11236_v9 = vsel %vm5170_vm9, %v5409_v15, %v5405_v18  ;;  %v5428_v44 = vrot.slane %v4884_v14, %v11067_v55  ;;  %v5760_v14 = vmul.f32 %v10915_v61, %v10909_v42 }
 0x656   : > { %v4881_v56 = vpop.permute.xlu1 %4880 }
 0x657   : > { %v5423_v25 = vrot.slane %v4881_v56, %v11050_v33 }
 0x658   : > { %v4929_v0 = vpop.permute.xlu0 %4928 }
 0x659   : > { %v5424_v7 = vsel %vm5079_vm11, %v5423_v25, %v5419_v54  ;;  %v5502_v62 = vrot.slane %v4929_v0, %v11050_v33 }
 0x65a   : > { %v4926_v27 = vpop.permute.xlu1 %4925  ;;  %v5429_v41 = vsel %vm5086_vm12, %v5428_v44, %v5424_v7 }
 0x65b   : > { %v5498_v17 = vrot.slane %v4926_v27, %v11056_v58  ;;  %v5762_v27 = vsel %vm5761_vm0, %v5760_v14, 0.0  ;;  %vm5732_vm0 = vcmask 1041409  }
 0x65c   : > { %v4932_v36 = vpop.permute.xlu0 %4931 }
 0x65d   : > { %v5507_v4 = vrot.slane %v4932_v36, %v11067_v55  ;;  %v5503_v31 = vsel %vm5079_vm11, %v5502_v62, %v5498_v17 }
 0x65e   : > { %v4887_v47 = vpop.permute.xlu1 %4886 }
 0x65f   : > { %v5508_v10 = vsel %vm5086_vm12, %v5507_v4, %v5503_v31  ;;  %v5433_v3 = vrot.slane %v4887_v47, %v11074_v16 }
 0x660   : > { %v4977_v43 = vpop.permute.xlu0 %4976 }
 0x661   : > { %v5434_v59 = vsel %vm5093_vm13, %v5433_v3, %v5429_v41  ;;  %v5581_v19 = vrot.slane %v4977_v43, %v11050_v33 }
 0x662   : > { %v4974_v8 = vpop.permute.xlu1 %4973 }
 0x663   : > { %v5577_v11 = vrot.slane %v4974_v8, %v11056_v58 }
 0x664   : > { %v4935_v38 = vpop.permute.xlu0 %4934 }
 0x665   : > { %v5512_v23 = vrot.slane %v4935_v38, %v11074_v16  ;;  %v5582_v48 = vsel %vm5079_vm11, %v5581_v19, %v5577_v11 }
 0x666   : > { %v4890_v63 = vpop.permute.xlu1 %4889 }
 0x667   : > { %v5513_v46 = vsel %vm5093_vm13, %v5512_v23, %v5508_v10  ;;  %v5438_v37 = vrot.slane %v4890_v63, %v11082_v60 }
 0x668   : > { %v5022_v18 = vpop.permute.xlu0 %5021 }
 0x669   : > { %v5439_v15 = vsel %vm5100_vm14, %v5438_v37, %v5434_v59  ;;  %v5656_v41 = vrot.slane %v5022_v18, %v11056_v58 }
 0x66a   : > { %v4980_v56 = vpop.permute.xlu1 %4979 }
 0x66b   : > { %v5586_v54 = vrot.slane %v4980_v56, %v11067_v55 }
 0x66c   : > { %v4893_v25 = vpop.permute.xlu0 %4892 }
 0x66d   : > { %v5443_v0 = vrot.slane %v4893_v25, %v11089_v30  ;;  %v5587_v44 = vsel %vm5086_vm12, %v5586_v54, %v5582_v48 }
 0x66e   : > { %v5025_v62 = vpop.permute.xlu1 %5024 }
 0x66f   : > { %v5444_v7 = vsel %vm5107_vm15, %v5443_v0, %v5439_v15  ;;  %v5660_v17 = vrot.slane %v5025_v62, %v11050_v33 }
 0x670   : > { %5763 = vadd.xlane.f32.xlu0 %v5762_v27  ;;  %v4983_v36 = vpop.permute.xlu0 %4982 }
 0x671   : > { %v5591_v42 = vrot.slane %v4983_v36, %v11074_v16  ;;  %v5661_v61 = vsel %vm5079_vm11, %v5660_v17, %v5656_v41 }
 0x672   : > { %v4938_v31 = vpop.permute.xlu1 %4937 }
 0x673   : > { %v5592_v4 = vsel %vm5093_vm13, %v5591_v42, %v5587_v44  ;;  %v5517_v10 = vrot.slane %v4938_v31, %v11082_v60 }
 0x674   : > { %v4896_v47 = vpop.permute.xlu0 %4895 }
 0x675   : > { %v5448_v3 = vrot.slane %v4896_v47, %v11098_v29  ;;  %v5518_v43 = vsel %vm5100_vm14, %v5517_v10, %v5513_v46 }
 0x676   : > { %v5028_v19 = vpop.permute.xlu1 %5027 }
 0x677   : > { %v5449_v59 = vsel %vm5114_vm1, %v5448_v3, %v5444_v7  ;;  %v5665_v8 = vrot.slane %v5028_v19, %v11067_v55  ;;  %v5186_v19 = vrot.slane %v10981_v13, %v11050_v33 }
 0x678   : > { %v4986_v11 = vpop.permute.xlu0 %4985 }
 0x679   : > { %v5596_v38 = vrot.slane %v4986_v11, %v11082_v60  ;;  %v5666_v23 = vsel %vm5086_vm12, %v5665_v8, %v5661_v61  ;;  %v5182_v8 = vrot.slane %v10987_v32, %v11056_v58 }
 0x67a   : > { %v4941_v63 = vpop.permute.xlu1 %4940 }
 0x67b   : > { %v5597_v48 = vsel %vm5100_vm14, %v5596_v38, %v5592_v4  ;;  %v5522_v37 = vrot.slane %v4941_v63, %v11089_v30  ;;  %v5191_v38 = vrot.slane %v10995_v53, %v11067_v55  ;;  %v5078_v63 = vrot.slane %v10923_v49, %v11050_v33 }
 0x67c   : > { %v4899_v18 = vpop.permute.xlu0 %4898  ;;  %v5187_v13 = vsel %vm5079_vm11, %v5186_v19, %v5182_v8  ;;  %v5201_v53 = vrot.slane %v11003_v12, %v11082_v60  ;;  %v5092_v33 = vrot.slane %v10925_v35, %v11074_v16  ;;  %v5113_v35 = vrot.slane %v10947_v26, %v11098_v29 }
 0x67d   : > { %v5453_v15 = vrot.slane %v4899_v18, %v11105_v39  ;;  %v5523_v46 = vsel %vm5107_vm15, %v5522_v37, %v5518_v43  ;;  %v5085_v37 = vrot.slane %v10931_v5, %v11067_v55  ;;  %v5192_v32 = vsel %vm5086_vm12, %v5191_v38, %v5187_v13 }
 0x67e   : > { %v5031_v56 = vpop.permute.xlu1 %5030  ;;  %v5099_v5 = vrot.slane %v10939_v21, %v11082_v60 }
 0x67f   : > { %v5454_v14 = vsel %vm5121_vm2, %v5453_v15, %v5449_v59  ;;  %v5670_v54 = vrot.slane %v5031_v56, %v11074_v16 }
 0x680   : > { %v4989_v25 = vpop.permute.xlu0 %4988 }
 0x681   : > { %v5601_v0 = vrot.slane %v4989_v25, %v11089_v30  ;;  %v5671_v44 = vsel %vm5093_vm13, %v5670_v54, %v5666_v23  ;;  %v5206_v54 = vrot.slane %v10997_v24, %v11089_v30 }
 0x682   : > { %v4944_v62 = vpop.permute.xlu1 %4943 }
 0x683   : > { %v11284_v7 = vsel %vm5107_vm15, %v5601_v0, %v5597_v48  ;;  %v5527_v27 = vrot.slane %v4944_v62, %v11098_v29  ;;  %v5073_v48 = vrot.slane %v10917_v34, %v11056_v58  ;;  %v5196_v34 = vrot.slane %v10989_v45, %v11074_v16  ;;  %v12561_v0 = vld [vmem:[#allocation30_spill] sm:$0xff] }
 0x684   : > { %v4902_v41 = vpop.permute.xlu0 %4901  ;;  %v5106_v16 = vrot.slane %v10933_v20, %v11089_v30  ;;  %v12563_v20 = vld [vmem:[#allocation10_spill] sm:$0xff] }
 0x685   : > { %v5458_v17 = vrot.slane %v4902_v41, %v11114_v51  ;;  %v11289_v36 = vsel %vm5114_vm1, %v5527_v27, %v5523_v46  ;;  %v5080_v46 = vsel %vm5079_vm11, %v5078_v63, %v5073_v48  ;;  %v5197_v58 = vsel %vm5093_vm13, %v5196_v34, %v5192_v32  ;;  %v12562_v27 = vld [vmem:[#allocation28_spill] sm:$0xff]  ;;  %v12565_v48 = vld [vmem:[#allocation29_spill] sm:$0xff]  ;;  %v12566_v32 = vld [vmem:[#allocation26_spill] sm:$0xff] }
 0x686   : > { %v5034_v61 = vpop.permute.xlu1 %5033  ;;  %v5087_v49 = vsel %vm5086_vm12, %v5085_v37, %v5080_v46  ;;  %v5202_v12 = vsel %vm5100_vm14, %v5201_v53, %v5197_v58  ;;  %v5216_v41 = vrot.slane %v12562_v27, %v11105_v39  ;;  %v5231_v63 = vrot.slane %v12565_v48, %v11130_v2  ;;  %v12567_v34 = vld [vmem:[#allocation37_spill] sm:$0xff] }
 0x687   : > { %v11292_v42 = vsel %vm5128_vm3, %v5458_v17, %v5454_v14  ;;  %v5675_v4 = vrot.slane %v5034_v61, %v11082_v60  ;;  %v5211_v14 = vrot.slane %v11011_v6, %v11098_v29  ;;  %v5094_v45 = vsel %vm5093_vm13, %v5092_v33, %v5087_v49  ;;  %v12564_v61 = vld [vmem:[#allocation55_spill] sm:$0xff] }
 0x688   : > { %v11295_v31 = vpop.permute.xlu0 %4991  ;;  %v5101_v21 = vsel %vm5100_vm14, %v5099_v5, %v5094_v45  ;;  %v5207_v60 = vsel %vm5107_vm15, %v5206_v54, %v5202_v12  ;;  %v5127_v17 = vrot.slane %v12563_v20, %v11114_v51  ;;  %v5226_v53 = vrot.slane %v12566_v32, %v11121_v1  ;;  %v12568_v5 = vld [vmem:[#allocation54_spill] sm:$0xff]  ;;  %v12569_v45 = vld [vmem:[#allocation31_spill] sm:$0xff] }
 0x689   : > { %v11298_v10 = vsel %vm5100_vm14, %v5675_v4, %v5671_v44  ;;  %v5212_v6 = vsel %vm5114_vm1, %v5211_v14, %v5207_v60  ;;  %v5221_v44 = vrot.slane %v12561_v0, %v11114_v51  ;;  %v5108_v24 = vsel %vm5107_vm15, %v5106_v16, %v5101_v21  ;;  %v12570_v16 = vld [vmem:[#allocation56_spill] sm:$0xff]  ;;  %v12571_v0 = vld [vmem:[#allocation22_spill] sm:$0xff] }
 0x68a   : > { %v11300_v47 = vpop.permute.xlu1 %4946  ;;  %v5115_v26 = vsel %vm5114_vm1, %v5113_v35, %v5108_v24  ;;  %v5120_v4 = vrot.slane %v12564_v61, %v11105_v39  ;;  %v5217_v19 = vsel %vm5121_vm2, %v5216_v41, %v5212_v6  ;;  %v5141_v49 = vrot.slane %v12567_v34, %v11130_v2  ;;  %v12572_v24 = vld [vmem:[#allocation24_spill] sm:$0xff] }
 0x68b   : > { %v5222_v38 = vsel %vm5128_vm3, %v5221_v44, %v5217_v19  ;;  %v5134_v33 = vrot.slane %v12568_v5, %v11121_v1  ;;  %v5241_v54 = vrot.slane %v12569_v45, %v11146_v57  ;;  %v5236_v60 = vrot.slane %v12570_v16, %v11137_v40 }
 0x68c   : > { %v11302_v3 = vpop.permute.xlu0 %4904  ;;  %v5122_v13 = vsel %vm5121_vm2, %v5120_v4, %v5115_v26  ;;  %v5227_v58 = vsel %vm5135_vm4, %v5226_v53, %v5222_v38  ;;  %v5155_v44 = vrot.slane %v12571_v0, %v11146_v57  ;;  %v5148_v27 = vrot.slane %v12572_v24, %v11137_v40  ;;  %v12574_v38 = vld [vmem:[#allocation27_spill] sm:$0xff] }
 0x68d   : > { %v5129_v46 = vsel %vm5128_vm3, %v5127_v17, %v5122_v13  ;;  %v5232_v14 = vsel %vm5142_vm5, %v5231_v63, %v5227_v58  ;;  %v12573_v17 = vld [vmem:[#allocation36_spill] sm:$0xff]  ;;  %v5246_v48 = vrot.slane %v12574_v38, %v11153_v50  ;;  %v12576_v53 = vld [vmem:[#allocation23_spill] sm:$0xff]  ;;  %vm5734_vm11 = vcmask 1042434  }
 0x68e   : > { %v11304_v43 = vpop.permute.xlu1 %5036  ;;  %v5136_v35 = vsel %vm5135_vm4, %v5134_v33, %v5129_v46  ;;  %v5237_v41 = vsel %vm5149_vm6, %v5236_v60, %v5232_v14  ;;  %v5251_v61 = vrot.slane %v12573_v17, %v11162_v52  ;;  %v12575_v13 = vld [vmem:[#allocation16_spill] sm:$0xff]  ;;  %v5162_v46 = vrot.slane %v12576_v53, %v11153_v50  ;;  %v12577_v14 = vld [vmem:[#allocation7_spill] sm:$0xff] }
 0x68f   : > { %v5143_v6 = vsel %vm5142_vm5, %v5141_v49, %v5136_v35  ;;  %v5242_v20 = vsel %vm5156_vm7, %v5241_v54, %v5237_v41  ;;  %v5169_v32 = vrot.slane %v12575_v13, %v11162_v52  ;;  %v5256_v45 = vrot.slane %v12577_v14, %v11168_v22  ;;  %v12578_v35 = vld [vmem:[#allocation25_spill] sm:$0xff] }
 0x690   : > { %v11306_v59 = vpop.permute.xlu0 %4994  ;;  %v5150_v19 = vsel %vm5149_vm6, %v5148_v27, %v5143_v6  ;;  %v5247_v34 = vsel %vm5163_vm8, %v5246_v48, %v5242_v20  ;;  %v5176_v16 = vrot.slane %v12578_v35, %v11168_v22  ;;  %vm5736_vm12 = vcmask 1043459  }
 0x691   : > { %v5157_v63 = vsel %vm5156_vm7, %v5155_v44, %v5150_v19  ;;  %v5252_v5 = vsel %vm5170_vm9, %v5251_v61, %v5247_v34  ;;  %v5463_v48 = vrot.slane %v11302_v3, %v11121_v1  ;;  %vm5738_vm13 = vcmask 1044484  }
 0x692   : > { %v11312_v11 = vpop.permute.xlu1 %4949  ;;  %v5164_v58 = vsel %vm5163_vm8, %v5162_v46, %v5157_v63  ;;  %v5257_v60 = vsel %vm5177_vm10, %v5256_v45, %v5252_v5  ;;  %vm5740_vm14 = vcmask 1045509  }
 0x693   : > { %v5171_v54 = vsel %vm5170_vm9, %v5169_v32, %v5164_v58  ;;  %v5532_v32 = vrot.slane %v11300_v47, %v11105_v39  ;;  %v5464_v3 = vsel %vm5135_vm4, %v5463_v48, %v11292_v42  ;;  %v5537_v42 = vrot.slane %v11312_v11, %v11114_v51 }
 0x694   : > { %v11316_v23 = vpop.permute.xlu0 %4907  ;;  %v5178_v44 = vsel %vm5177_vm10, %v5176_v16, %v5171_v54 }
 0x695   : > { %v5733_v27 = vsel %vm5732_vm0, %v5257_v60, %v5178_v44  ;;  %v5468_v13 = vrot.slane %v11316_v23, %v11130_v2  ;;  %vm5742_vm0 = vcmask 1046534  }
 0x696   : > { %v11325_v18 = vpop.permute.xlu1 %5039  ;;  %v5735_v41 = vsel %vm5734_vm11, %v11180_v28, %v5733_v27 }
 0x697   : > { %v5469_v23 = vsel %vm5142_vm5, %v5468_v13, %v5464_v3 }
 0x698   : > { %v11330_v15 = vpop.permute.xlu0 %4997 }
 0x699   : > { %v5616_v45 = vrot.slane %v11330_v15, %v11114_v51 }
 0x69a   : > { %v11341_v55 = vpop.permute.xlu1 %4952 }
 0x69c   : > { %v11346_v56 = vpop.permute.xlu0 %4910 }
 0x69d   : > { %v5473_v28 = vrot.slane %v11346_v56, %v11137_v40 }
 0x69e   : > { %v11357_v25 = vpop.permute.xlu1 %5042 }
 0x69f   : > { %v5474_v58 = vsel %vm5149_vm6, %v5473_v28, %v5469_v23 }
 0x6a0   : > { %v11362_v62 = vpop.permute.xlu0 %5000 }
 0x6a1   : > { %v5621_v11 = vrot.slane %v11362_v62, %v11121_v1 }
 0x6a2   : > { %v11373_v8 = vpop.permute.xlu1 %4955 }
 0x6a3   : > { %v5547_v16 = vrot.slane %v11373_v8, %v11130_v2 }
 0x6a4   : > { %v11378_v37 = vpop.permute.xlu0 %4913 }
 0x6a5   : > { %v5478_v53 = vrot.slane %v11378_v37, %v11146_v57  ;;  %v5533_v37 = vsel %vm5121_vm2, %v5532_v32, %v11289_v36  ;;  %v5680_v36 = vrot.slane %v11304_v43, %v11089_v30  ;;  %v5690_v32 = vrot.slane %v11357_v25, %v11105_v39 }
 0x6a6   : > { %v11389_v12 = vpop.permute.xlu1 %5045  ;;  %v5538_v30 = vsel %vm5128_vm3, %v5537_v42, %v5533_v37 }
 0x6a8   : > { %v11394_v21 = vpop.permute.xlu0 %5003 }
 0x6a9   : > { %v5626_v60 = vrot.slane %v11394_v21, %v11130_v2 }
 0x6aa   : > { %v11405_v26 = vpop.permute.xlu1 %4958 }
 0x6ac   : > { %v4917_v4 = vpop.permute.xlu0 %4916 }
 0x6ad   : > { %v5483_v34 = vrot.slane %v4917_v4, %v11153_v50  ;;  %v5479_v4 = vsel %vm5156_vm7, %v5478_v53, %v5474_v58 }
 0x6ae   : > { %v11419_v49 = vpop.permute.xlu1 %5048 }
 0x6af   : > { %v5484_v54 = vsel %vm5163_vm8, %v5483_v34, %v5479_v4 }
 0x6b0   : > { %v11422_v33 = vpop.permute.xlu0 %5006 }
 0x6b1   : > { %v5631_v43 = vrot.slane %v11422_v33, %v11137_v40 }
 0x6b2   : > { %v11431_v6 = vpop.permute.xlu1 %4961 }
 0x6b3   : > { %v5557_v62 = vrot.slane %v11431_v6, %v11146_v57 }
 0x6b4   : > { %v4875_v0 = vpop.permute.xlu0 %4874 }
 0x6b5   : > { %v5414_v24 = vrot.slane %v4875_v0, %v11168_v22  ;;  %v5552_v0 = vrot.slane %v11405_v26, %v11137_v40 }
 0x6b6   : > { %v11438_v17 = vpop.permute.xlu1 %5051 }
 0x6b7   : > { %v5415_v20 = vsel %vm5177_vm10, %v5414_v24, %v11236_v9  ;;  %v5606_v9 = vrot.slane %v11295_v31, %v11098_v29  ;;  %v5611_v31 = vrot.slane %v11306_v59, %v11105_v39  ;;  %v5542_v59 = vrot.slane %v11341_v55, %v11121_v1 }
 0x6b8   : > { %v5737_v61 = vsel %vm5736_vm12, %v5415_v20, %v5735_v41  ;;  %v11440_v19 = vpop.permute.xlu0 %4964 }
 0x6b9   : > { %v5607_v47 = vsel %vm5114_vm1, %v5606_v9, %v11284_v7  ;;  %v5543_v21 = vsel %vm5135_vm4, %v5542_v59, %v5538_v30  ;;  %v5562_v26 = vrot.slane %v11440_v19, %v11153_v50  ;;  %v5681_v9 = vsel %vm5107_vm15, %v5680_v36, %v11298_v10 }
 0x6ba   : > { %v4920_v38 = vpop.permute.xlu1 %4919  ;;  %v5612_v55 = vsel %vm5121_vm2, %v5611_v31, %v5607_v47  ;;  %v5548_v33 = vsel %vm5142_vm5, %v5547_v16, %v5543_v21  ;;  %v5700_v10 = vrot.slane %v11419_v49, %v11121_v1  ;;  %vm5744_vm15 = vcmask 1047559  }
 0x6bb   : > { %v5488_v56 = vrot.slane %v4920_v38, %v11162_v52  ;;  %v5617_v27 = vsel %vm5128_vm3, %v5616_v45, %v5612_v55  ;;  %v5553_v28 = vsel %vm5149_vm6, %v5552_v0, %v5548_v33 }
 0x6bc   : > { %v11444_v63 = vpop.permute.xlu0 %5054  ;;  %v5622_v38 = vsel %vm5135_vm4, %v5621_v11, %v5617_v27 }
 0x6bd   : > { %v5489_v15 = vsel %vm5170_vm9, %v5488_v56, %v5484_v54  ;;  %v5627_v13 = vsel %vm5142_vm5, %v5626_v60, %v5622_v38  ;;  %v5710_v1 = vrot.slane %v11444_v63, %v11137_v40 }
 0x6be   : > { %v5010_v46 = vpop.permute.xlu1 %5009  ;;  %v5632_v53 = vsel %vm5149_vm6, %v5631_v43, %v5627_v13 }
 0x6bf   : > { %v5636_v41 = vrot.slane %v5010_v46, %v11146_v57  ;;  %v5558_v46 = vsel %vm5156_vm7, %v5557_v62, %v5553_v28 }
 0x6c0   : > { %v4968_v5 = vpop.permute.xlu0 %4967 }
 0x6c1   : > { %v5567_v48 = vrot.slane %v4968_v5, %v11162_v52  ;;  %v5637_v34 = vsel %vm5156_vm7, %v5636_v41, %v5632_v53  ;;  %v5777_v41 = vld [vmem:[#allocation3] sm:$0x1] }
 0x6c2   : > { %v4923_v14 = vpop.permute.xlu1 %4922 }
 0x6c3   : > { %v5493_v35 = vrot.slane %v4923_v14, %v11168_v22 }
 0x6c4   : > { %v11477_v7 = vpop.permute.xlu0 %5057 }
 0x6c5   : > { %v5494_v44 = vsel %vm5177_vm10, %v5493_v35, %v5489_v15  ;;  %v5715_v14 = vrot.slane %v11477_v7, %v11146_v57 }
 0x6c6   : > { %v5739_v8 = vsel %vm5738_vm13, %v5494_v44, %v5737_v61  ;;  %v5013_v24 = vpop.permute.xlu1 %5012  ;;  %v5685_v61 = vrot.slane %v11325_v18, %v11098_v29  ;;  %v5695_v29 = vrot.slane %v11389_v12, %v11114_v51  ;;  %v5563_v18 = vsel %vm5163_vm8, %v5562_v26, %v5558_v46  ;;  %v5772_v26 = vld [vmem:[#allocation2] sm:$0x1] }
 0x6c7   : > { %v5641_v6 = vrot.slane %v5013_v24, %v11153_v50  ;;  %v5568_v39 = vsel %vm5170_vm9, %v5567_v48, %v5563_v18  ;;  %v5705_v51 = vrot.slane %v11438_v17, %v11130_v2 }
 0x6c8   : > { %v5016_v20 = vpop.permute.xlu0 %5015  ;;  %v5686_v31 = vsel %vm5114_vm1, %v5685_v61, %v5681_v9  ;;  %vm12579_vm1 = vcmask 0  }
 0x6c9   : > { %v5646_v19 = vrot.slane %v5016_v20, %v11162_v52  ;;  %v5642_v25 = vsel %vm5163_vm8, %v5641_v6, %v5637_v34  ;;  %v5691_v47 = vsel %vm5121_vm2, %v5690_v32, %v5686_v31  ;;  %vm12580_vm2 = vmmov %vm12579_vm1 }
 0x6ca   : > { %v4971_v3 = vpop.permute.xlu1 %4970  ;;  %v5696_v4 = vsel %vm5128_vm3, %v5695_v29, %v5691_v47 }
 0x6cb   : > { %v5572_v5 = vrot.slane %v4971_v3, %v11168_v22  ;;  %v5647_v12 = vsel %vm5170_vm9, %v5646_v19, %v5642_v25  ;;  %v5701_v17 = vsel %vm5135_vm4, %v5700_v10, %v5696_v4 }
 0x6cc   : > { %v5019_v23 = vpop.permute.xlu0 %5018  ;;  %v5706_v59 = vsel %vm5142_vm5, %v5705_v51, %v5701_v17 }
 0x6cd   : > { %v5651_v56 = vrot.slane %v5019_v23, %v11168_v22  ;;  %v5573_v58 = vsel %vm5177_vm10, %v5572_v5, %v5568_v39  ;;  %v5711_v40 = vsel %vm5149_vm6, %v5710_v1, %v5706_v59 }
 0x6ce   : > { %v5061_v37 = vpop.permute.xlu1 %5060  ;;  %v5741_v42 = vsel %vm5740_vm14, %v5573_v58, %v5739_v8  ;;  %v5716_v35 = vsel %vm5156_vm7, %v5715_v14, %v5711_v40 }
 0x6cf   : > { %v5652_v49 = vsel %vm5177_vm10, %v5651_v56, %v5647_v12  ;;  %v5720_v45 = vrot.slane %v5061_v37, %v11153_v50 }
 0x6d0   : > { %v5743_v2 = vsel %vm5742_vm0, %v5652_v49, %v5741_v42  ;;  %v5067_v54 = vpop.permute.xlu0 %5066 }
 0x6d1   : > { %v5721_v11 = vsel %vm5163_vm8, %v5720_v45, %v5716_v35  ;;  %v5730_v57 = vrot.slane %v5067_v54, %v11168_v22 }
 0x6d2   : > { %v5064_v63 = vpop.permute.xlu1 %5063 }
 0x6d3   : > { %v5725_v36 = vrot.slane %v5064_v63, %v11162_v52 }
 0x6d5   : > { %v5726_v7 = vsel %vm5170_vm9, %v5725_v36, %v5721_v11 }
 0x6d6   : > { %v5731_v16 = vsel %vm5177_vm10, %v5730_v57, %v5726_v7 }
 0x6d7   : > { %v5745_v50 = vsel %vm5744_vm15, %v5731_v16, %v5743_v2 }
 0x6d8   : > { %5747 = vadd.xlane.f32.xlu1 %v5745_v50 }
 0x6fd   : > { %v5764_v15 = vpop.xlane.xlu0 %5763 }
 0x6fe   : > { %v5765_v55 = vrot.slane %v5764_v15, 4 }
 0x700   : > { %v5766_v60 = vadd.f32 %v5765_v55, %v5764_v15 }
 0x702   : > { %v5767_v0 = vrot.slane %v5766_v60, 2 }
 0x704   : > { %v5768_v62 = vadd.f32 %v5767_v0, %v5766_v60 }
 0x706   : > { %v5769_v24 = vrot.slane %v5768_v62, 1 }
 0x708   : > { %v5770_v21 = vadd.f32 %v5769_v24, %v5768_v62 }
 0x765   : > { %v5748_v44 = vpop.xlane.xlu1 %5747 }
 0x766   : > { %v5749_v30 = vrot.slane %v5748_v44, 4 }
 0x768   : > { %v5750_v43 = vadd.f32 %v5749_v30, %v5748_v44 }
 0x76a   : > { %v5751_v52 = vrot.slane %v5750_v43, 2 }
 0x76c   : > { %v5752_v8 = vadd.f32 %v5751_v52, %v5750_v43 }
 0x76e   : > { %v5753_v27 = vrot.slane %v5752_v8, 1 }
 0x770   : > { %v5754_v22 = vadd.f32 %v5753_v27, %v5752_v8 }
 0x772   : > { %6048 = vpush %v5754_v22 }
 0x773   : > { %6050 = vpush %v5770_v21 }
 0x7a3   : > { %s6049_s18 = spop %6048 }
 0x7a4   : > { %v5773_v20 = vstv %s6049_s18  ;;  %s6051_s19 = spop %6050 }
 0x7a5   : > { %v5774_v38 = vadd.f32 %v5773_v20, %v5772_v26  ;;  %v5778_v33 = vstv %s6051_s19 }
 0x7a6   : > { %v5779_v48 = vadd.f32 %v5778_v33, %v5777_v41 }
 0x7a7   : > { %5776 = vst.msk [vmem:[#allocation2] sm:$0x1] %vm12579_vm1, %v5774_v38 }
 0x7a8   : > { %5780 = vst.msk [vmem:[#allocation3] sm:$0x1] %vm12580_vm2, %v5779_v48 }
 0x7ae   : > { %v5783_v6 = vld [vmem:[#allocation2] sm:$0x1] }
 0x7af   : > { %6052 = vpush %v5783_v6  ;;  %v5787_v61 = vld [vmem:[#allocation3] sm:$0x1] }
 0x7b0   : > { %6054 = vpush %v5787_v61 }
 0x7e0   : > { %s6053_s26 = spop %6052 }
 0x7e1   : > { %v5785_v13 = vstv %s6053_s26  ;;  %s6055_s7 = spop %6054 }
 0x7e2   : > { %5786 = vst [vmem:[%s443_s25] sm:$0xff] %v5785_v13  ;;  %v5789_v28 = vstv %s6055_s7 }
 0x7e3   : > { %5790 = vst [vmem:[%s450_s30] sm:$0xff] %v5789_v28 }
 0x7e4 PF: > { %s17_s23 = sadd.s32 1, %s6623_s23   ;;  %s12581_s21 = smov %s6619_s22 }
 0x7e5   : > { %p14_p5 = scmp.ge.s32.totalorder %s17_s23, 6   ;;  %s12582_s22 = smov %s12584_s24 }
 0x7e7   :  { %16 = sbr.rel (!%p14_p5) target bundleno = 2 (0x2), region = 102 }

</bundles_post_ra>
